<compile_context>
chip_gen: v5e
topology: v5e:2x2
jax: 0.10.0
libtpu: 0.0.40
codegen_flags: <defaults>
</compile_context>

<pallas_src>
import functools

import jax
import jax.numpy as jnp
import numpy as np
from jax.experimental import pallas as pl
from jax.experimental.pallas import tpu as pltpu

EPS = 1e-5  # torch BatchNorm default eps


# --------------------------------------------------------------------------- #
# Hardware-aware knobs
# --------------------------------------------------------------------------- #

@functools.lru_cache(maxsize=None)
def _vmem_capacity_bytes():
    try:
        cap = int(getattr(pltpu.get_tpu_info(), "vmem_capacity_bytes", 0))
    except Exception:
        cap = 0
    return cap if cap > 0 else 64 * 1024 * 1024


def _vmem_limit_bytes():
    # 3/4 of physical VMEM: ~48 MiB on v7x (64 MiB/core), capped at 96 MiB on v5e/v6e.
    return max(32 * 1024 * 1024,
               min((_vmem_capacity_bytes() * 3) // 4, 96 * 1024 * 1024))


def _pick_fc2_tile(f2):
    """Largest 128-multiple tile <= 512 dividing f2 with >=2 (preferably even) steps."""
    cands = [tn for tn in range(128, min(f2, 512) + 1, 128)
             if f2 % tn == 0 and f2 // tn >= 2]
    if not cands:
        return f2
    even = [tn for tn in cands if (f2 // tn) % 2 == 0]
    return max(even) if even else max(cands)


# --------------------------------------------------------------------------- #
# Kernels
# --------------------------------------------------------------------------- #

def _fc_kernel(x_ref, w1_ref, b1_ref, g1_ref, be1_ref,
               w2_ref, b2_ref, g2_ref, be2_ref, out_ref):
    """Fused fc stage, one (B, TN) feature-column tile per grid step.

    fc1 (Linear Din->1024 + BN1d + ReLU) is tiny and is recomputed identically
    on every step (its inputs are resident, same block index each step), which
    removes a separate launch and the hidden-activation HBM round trip.  fc2's
    (1024, TN) weight tile is the streamed/double-buffered tensor.
    BN1d statistics are per-feature over batch, so column tiles are independent.
    """
    w1 = w1_ref[...]
    x = x_ref[...].astype(w1.dtype)
    h = jnp.dot(x, w1, preferred_element_type=jnp.float32) + b1_ref[...]
    mu = jnp.mean(h, axis=0, keepdims=True)
    var = jnp.mean((h - mu) ** 2, axis=0, keepdims=True)        # biased (train mode)
    h = (h - mu) * jax.lax.rsqrt(var + EPS) * g1_ref[...] + be1_ref[...]
    w2 = w2_ref[...]
    h = jnp.maximum(h, 0.0).astype(w2.dtype)                    # bf16 -> MXU directly
    y = jnp.dot(h, w2, preferred_element_type=jnp.float32) + b2_ref[...]
    mu2 = jnp.mean(y, axis=0, keepdims=True)
    var2 = jnp.mean((y - mu2) ** 2, axis=0, keepdims=True)
    y = (y - mu2) * jax.lax.rsqrt(var2 + EPS) * g2_ref[...] + be2_ref[...]
    out_ref[...] = jnp.maximum(y, 0.0).astype(out_ref.dtype)


def _deconv_parity_matmul(x_ref, w_ref, bias, nrows, cout, wp, ry, rx):
    """ConvT(k4,s2,p1) output for one sub-pixel parity (ry, rx).

    x_ref: (ntot, Cin) zero-padded NHWC input, flattened row-major.
    w_ref: (4, 4, Cin, Cout) per-parity / per-tap weights (no zero blocks).
    Output anchor (b, m, n) reads padded pixels (m+ry+da, n+rx+db), da,db in {0,1}.
    """
    p = 2 * ry + rx
    acc = jnp.zeros((nrows, cout), jnp.float32)
    for da in range(2):
        for db in range(2):
            xs = x_ref[pl.ds((ry + da) * wp + (rx + db), nrows), :]
            acc = acc + jnp.dot(xs, w_ref[p, 2 * da + db],
                                preferred_element_type=jnp.float32)
    return acc + bias


def _deconv1_bn_relu_kernel(x_ref, w_ref, b_ref, g_ref, be_ref, maskt_ref, out_ref,
                            *, wp, n_valid):
    """ConvT(128->64) -> BN2d(train stats) -> ReLU; parity-packed (N, 4*64) output.

    BN2d stats are per channel over batch x 2H x 2W, i.e. pooled over the four
    parities' valid rows; the reductions go through the MXU (mask^T @ y).
    """
    nrows, lanes = out_ref.shape
    cout = lanes // 4
    maskt = maskt_ref[...]                                       # (1, nrows), 1.0 valid
    bias = b_ref[...]                                            # (1, cout) f32
    ys = []
    s1 = jnp.zeros((1, cout), jnp.float32)
    s2 = jnp.zeros((1, cout), jnp.float32)
    for ry in range(2):
        for rx in range(2):
            y = _deconv_parity_matmul(x_ref, w_ref, bias, nrows, cout, wp, ry, rx)
            s1 = s1 + jnp.dot(maskt, y, preferred_element_type=jnp.float32)
            s2 = s2 + jnp.dot(maskt, y * y, preferred_element_type=jnp.float32)
            ys.append(y)
    cnt = jnp.float32(4 * n_valid)                               # = B * 2H * 2W
    mean = s1 / cnt
    var = jnp.maximum(s2 / cnt - mean * mean, 0.0)               # biased variance
    scale = jax.lax.rsqrt(var + EPS) * g_ref[...]
    shift = be_ref[...] - mean * scale
    outs = [jnp.maximum(y * scale + shift, 0.0) for y in ys]
    out_ref[...] = jnp.concatenate(outs, axis=-1).astype(out_ref.dtype)


def _deconv2_tanh_kernel(x_ref, w_ref, b_ref, out_ref, *, wp):
    """ConvT(64->nc) -> Tanh for one batch element; parity-packed (N, 4*nc) output."""
    nrows, lanes = out_ref.shape
    cout = lanes // 4
    bias = b_ref[...]
    outs = []
    for ry in range(2):
        for rx in range(2):
            y = _deconv_parity_matmul(x_ref, w_ref, bias, nrows, cout, wp, ry, rx)
            outs.append(jnp.tanh(y))
    out_ref[...] = jnp.concatenate(outs, axis=-1).astype(out_ref.dtype)


def _vmem_call(kernel, out_shape, out_dtype, *args):
    """Single-program pallas_call with whole arrays resident in VMEM."""
    return pl.pallas_call(
        kernel,
        out_shape=jax.ShapeDtypeStruct(out_shape, out_dtype),
        in_specs=[pl.BlockSpec(memory_space=pltpu.MemorySpace.VMEM)] * len(args),
        out_specs=pl.BlockSpec(memory_space=pltpu.MemorySpace.VMEM),
        compiler_params=pltpu.CompilerParams(vmem_limit_bytes=_vmem_limit_bytes()),
    )(*args)


# --------------------------------------------------------------------------- #
# JAX-side glue (cheap, 1x-activation reshapes/pads only)
# --------------------------------------------------------------------------- #

def _valid_row_mask_t(b, h, w, nrows):
    hp, wp = h + 2, w + 2
    r = np.arange(nrows)
    valid = ((r % wp) < w) & (((r // wp) % hp) < h)
    return jnp.asarray(valid.astype(np.float32)[None, :])          # (1, nrows)


def _assemble_parity(y, b, h, w, cout):
    """(nrows, 4*Cout) parity-packed rows -> (B, 2H, 2W, Cout) interleaved output."""
    hp, wp = h + 2, w + 2
    npad = b * hp * wp
    y = jnp.pad(y, ((0, npad - y.shape[0]), (0, 0)))
    y = y.reshape(b, hp, wp, 2, 2, cout)[:, :h, :w]
    y = y.transpose(0, 1, 3, 2, 4, 5)
    return y.reshape(b, 2 * h, 2 * w, cout)


# --------------------------------------------------------------------------- #
# Parameters (torch layout -> kernel layout)
# --------------------------------------------------------------------------- #

def _pack_deconv_weight(w):
    """torch ConvTranspose2d weight (Cin, Cout, 4, 4) -> (4, 4, Cin, Cout).

    Parity p = 2*ry + rx (output sub-pixel), tap q = 2*da + db (2x2 window into
    the 1-padded input anchored at the output anchor):
        out[:, 2m+ry, 2n+rx] += pad(in)[:, m+ry+da, n+rx+db] @ w[:, :, 3-ry-2da, 3-rx-2db]
    No all-zero blocks (the previous 9x(4*Cout) packing was ~56% zeros).
    """
    cin, cout = w.shape[0], w.shape[1]
    taps = []
    for ry in range(2):
        for rx in range(2):
            for da in range(2):
                for db in range(2):
                    taps.append(w[:, :, 3 - ry - 2 * da, 3 - rx - 2 * db])
    return jnp.stack(taps).reshape(4, 4, cin, cout)


def init_raw_params(key, nz, nc, input_size, class_num):
    """torch-layout parameters with the module's initialization scheme."""
    s = input_size // 4
    f2 = 128 * s * s
    din = nz + class_num
    k = jax.random.split(key, 4)
    return {
        "w_fc1": 0.02 * jax.random.normal(k[0], (din, 1024), jnp.float32),
        "b_fc1": jnp.zeros((1024,), jnp.float32),
        "g_bn1": jnp.ones((1024,), jnp.float32),
        "be_bn1": jnp.zeros((1024,), jnp.float32),
        "w_fc2": 0.02 * jax.random.normal(k[1], (1024, f2), jnp.float32),
        "b_fc2": jnp.zeros((f2,), jnp.float32),
        "g_bn2": jnp.ones((f2,), jnp.float32),
        "be_bn2": jnp.zeros((f2,), jnp.float32),
        "w_d1": 0.02 * jax.random.normal(k[2], (128, 64, 4, 4), jnp.float32),
        "b_d1": jnp.zeros((64,), jnp.float32),
        "g_bn3": jnp.ones((64,), jnp.float32),
        "be_bn3": jnp.zeros((64,), jnp.float32),
        "w_d2": 0.02 * jax.random.normal(k[3], (64, nc, 4, 4), jnp.float32),
        "b_d2": jnp.zeros((nc,), jnp.float32),
    }


def prepare_params(raw, *, input_size, weight_dtype=jnp.bfloat16):
    """Reorganize torch-layout params for the kernels (semantics preserving).

    * fc2 columns permuted CHW -> HWC so the fc output is NHWC-flat.
    * deconv weights parity-packed to (4, 4, Cin, Cout); bias / BN affine stay
      per-channel (1, Cout) in f32.
    * weight_dtype defaults to bf16 (streamed weights + inter-stage activations
      fed to the MXU in bf16); pass jnp.float32 for the bit-faithful path.
    """
    s = input_size // 4
    f2 = 128 * s * s
    perm = np.arange(f2).reshape(128, s, s).transpose(1, 2, 0).reshape(-1)
    return {
        "w_fc1": raw["w_fc1"].astype(weight_dtype),
        "b_fc1": raw["b_fc1"].reshape(1, -1),
        "g_bn1": raw["g_bn1"].reshape(1, -1),
        "be_bn1": raw["be_bn1"].reshape(1, -1),
        "w_fc2": raw["w_fc2"][:, perm].astype(weight_dtype),
        "b_fc2": raw["b_fc2"][perm].reshape(1, -1),
        "g_bn2": raw["g_bn2"][perm].reshape(1, -1),
        "be_bn2": raw["be_bn2"][perm].reshape(1, -1),
        "w_d1": _pack_deconv_weight(raw["w_d1"]).astype(weight_dtype),
        "b_d1": raw["b_d1"].reshape(1, -1),
        "g_bn3": raw["g_bn3"].reshape(1, -1),
        "be_bn3": raw["be_bn3"].reshape(1, -1),
        "w_d2": _pack_deconv_weight(raw["w_d2"]).astype(weight_dtype),
        "b_d2": raw["b_d2"].reshape(1, -1),
    }


# --------------------------------------------------------------------------- #
# Forward
# --------------------------------------------------------------------------- #

def generator_forward(params, z, label, *, nc, input_size):
    bsz = z.shape[0]
    s = input_size // 4
    f2 = 128 * s * s
    wdt = params["w_fc2"].dtype                       # activation dtype between stages
    vlim = _vmem_limit_bytes()

    x = jnp.concatenate([z, label], axis=1).astype(jnp.float32)
    din = x.shape[1]

    # Stage 1: fused fc1 -> BN1d -> ReLU -> fc2 (column tile) -> BN1d -> ReLU.
    tn = _pick_fc2_tile(f2)
    feat = pl.pallas_call(
        _fc_kernel,
        out_shape=jax.ShapeDtypeStruct((bsz, f2), wdt),
        grid=(f2 // tn,),
        in_specs=[
            pl.BlockSpec((bsz, din), lambda j: (0, 0)),
            pl.BlockSpec((din, 1024), lambda j: (0, 0)),
            pl.BlockSpec((1, 1024), lambda j: (0, 0)),
            pl.BlockSpec((1, 1024), lambda j: (0, 0)),
            pl.BlockSpec((1, 1024), lambda j: (0, 0)),
            pl.BlockSpec((1024, tn), lambda j: (0, j)),
            pl.BlockSpec((1, tn), lambda j: (0, j)),
            pl.BlockSpec((1, tn), lambda j: (0, j)),
            pl.BlockSpec((1, tn), lambda j: (0, j)),
        ],
        out_specs=pl.BlockSpec((bsz, tn), lambda j: (0, j)),
        compiler_params=pltpu.CompilerParams(
            dimension_semantics=("parallel",), vmem_limit_bytes=vlim),
    )(x, params["w_fc1"], params["b_fc1"], params["g_bn1"], params["be_bn1"],
      params["w_fc2"], params["b_fc2"], params["g_bn2"], params["be_bn2"])

    # fc2 columns are already HWC-ordered -> NHWC view with no transpose.
    x4 = feat.reshape(bsz, s, s, 128)

    # Stage 2: ConvT(128->64, k4 s2 p1) -> BN2d -> ReLU (single program).
    hp1 = wp1 = s + 2
    xflat1 = jnp.pad(x4, ((0, 0), (1, 1), (1, 1), (0, 0))).reshape(bsz * hp1 * wp1, 128)
    nrows1 = bsz * hp1 * wp1 - 2 * wp1 - 2
    maskt1 = _valid_row_mask_t(bsz, s, s, nrows1)
    y1 = _vmem_call(
        functools.partial(_deconv1_bn_relu_kernel, wp=wp1, n_valid=bsz * s * s),
        (nrows1, 4 * 64), wdt,
        xflat1, params["w_d1"], params["b_d1"], params["g_bn3"], params["be_bn3"],
        maskt1)
    y1 = _assemble_parity(y1, bsz, s, s, 64)                     # (B, 2s, 2s, 64)

    # Stage 3: ConvT(64->nc, k4 s2 p1) -> Tanh, gridded over batch ("parallel").
    s2 = 2 * s
    hp2 = wp2 = s2 + 2
    rows_img = hp2 * wp2
    rows_pb = ((rows_img + 2 + 7) // 8) * 8                      # 8-aligned, +2 row slack
    nrows_b = (hp2 - 2) * wp2                                    # anchors per image
    xp = jnp.pad(y1, ((0, 0), (1, 1), (1, 1), (0, 0))).reshape(bsz, rows_img, 64)
    xp = jnp.pad(xp, ((0, 0), (0, rows_pb - rows_img), (0, 0)))
    xflat2 = xp.reshape(bsz * rows_pb, 64)
    y2 = pl.pallas_call(
        functools.partial(_deconv2_tanh_kernel, wp=wp2),
        out_shape=jax.ShapeDtypeStruct((bsz * nrows_b, 4 * nc), jnp.float32),
        grid=(bsz,),
        in_specs=[
            pl.BlockSpec((rows_pb, 64), lambda b: (b, 0)),
            pl.BlockSpec((4, 4, 64, nc), lambda b: (0, 0, 0, 0)),
            pl.BlockSpec((1, nc), lambda b: (0, 0)),
        ],
        out_specs=pl.BlockSpec((nrows_b, 4 * nc), lambda b: (b, 0)),
        compiler_params=pltpu.CompilerParams(
            dimension_semantics=("parallel",), vmem_limit_bytes=vlim),
    )(xflat2, params["w_d2"], params["b_d2"])

    # Parity interleave to (B, 4s, 4s, nc), then NCHW to match torch.
    y2 = y2.reshape(bsz, hp2 - 2, wp2, 2, 2, nc)[:, :, :s2]
    y2 = y2.transpose(0, 1, 3, 2, 4, 5).reshape(bsz, 2 * s2, 2 * s2, nc)
    return y2.transpose(0, 3, 1, 2)


# --------------------------------------------------------------------------- #
# Pure-JAX reference (torch semantics) for validation
# --------------------------------------------------------------------------- #

def _bn_train_ref(x, g, be, axes):
    mu = jnp.mean(x, axes, keepdims=True)
    var = jnp.mean((x - mu) ** 2, axes, keepdims=True)
    return (x - mu) * jax.lax.rsqrt(var + EPS) * g + be


def _conv_transpose_ref(x, w, b):
    # torch ConvTranspose2d(k=4, s=2, p=1): dilate the input, pad by k-1-p,
    # correlate with the flipped kernel with (in, out) channel axes swapped.
    k = w.shape[2]
    wf = jnp.flip(w, (2, 3)).transpose(1, 0, 2, 3)
    y = jax.lax.conv_general_dilated(
        x, wf, window_strides=(1, 1),
        padding=((k - 2, k - 2), (k - 2, k - 2)),
        lhs_dilation=(2, 2),
        dimension_numbers=("NCHW", "OIHW", "NCHW"),
        precision=jax.lax.Precision.HIGHEST)
    return y + b.reshape(1, -1, 1, 1)


def reference_forward(raw, z, label, *, nc, input_size):
    del nc
    s = input_size // 4
    hi = jax.lax.Precision.HIGHEST
    x = jnp.concatenate([z, label], axis=1)
    h = jnp.dot(x, raw["w_fc1"], precision=hi) + raw["b_fc1"]
    h = jnp.maximum(_bn_train_ref(h, raw["g_bn1"], raw["be_bn1"], (0,)), 0.0)
    y = jnp.dot(h, raw["w_fc2"], precision=hi) + raw["b_fc2"]
    y = jnp.maximum(_bn_train_ref(y, raw["g_bn2"], raw["be_bn2"], (0,)), 0.0)
    y = y.reshape(-1, 128, s, s)
    y = _conv_transpose_ref(y, raw["w_d1"], raw["b_d1"])
    y = jnp.maximum(_bn_train_ref(y, raw["g_bn3"].reshape(1, -1, 1, 1),
                                  raw["be_bn3"].reshape(1, -1, 1, 1), (0, 2, 3)), 0.0)
    y = _conv_transpose_ref(y, raw["w_d2"], raw["b_d2"])
    return jnp.tanh(y)


# --------------------------------------------------------------------------- #

if __name__ == "__main__":
    # Small, module-consistent shapes.
    nz, nc, input_size, class_num = 16, 1, 16, 8
    batch = 4

    key = jax.random.PRNGKey(0)
    kp, kz = jax.random.split(key)
    raw = init_raw_params(kp, nz, nc, input_size, class_num)

    z = jax.random.normal(kz, (batch, nz), jnp.float32)
    label = jax.nn.one_hot(jnp.arange(batch) % class_num, class_num, dtype=jnp.float32)

    fwd = jax.jit(functools.partial(generator_forward, nc=nc, input_size=input_size))
    ref = reference_forward(raw, z, label, nc=nc, input_size=input_size)

    # Default fast path: bf16 streamed weights / inter-stage activations.
    params_bf16 = prepare_params(raw, input_size=input_size)
    out = fwd(params_bf16, z, label)
    jax.block_until_ready(out)
    assert out.shape == (batch, nc, input_size, input_size), out.shape
    assert bool(jnp.all(jnp.isfinite(out)))
    np.testing.assert_allclose(np.asarray(out), np.asarray(ref), atol=5e-2, rtol=5e-2)

    # fp32 path: tight check against the torch-semantics reference.
    params_f32 = prepare_params(raw, input_size=input_size, weight_dtype=jnp.float32)
    out32 = fwd(params_f32, z, label)
    jax.block_until_ready(out32)
    np.testing.assert_allclose(np.asarray(out32), np.asarray(ref), atol=3e-3, rtol=1e-2)

    print("KERNEL_OK")
</pallas_src>

<mosaic_0001>
module attributes {stable_mosaic.version = 11 : i64} {
  func.func @_fc_kernel(%arg0: i32, %arg1: memref<4x24xf32, #tpu.memory_space<vmem>>, %arg2: memref<24x1024xbf16, #tpu.memory_space<vmem>>, %arg3: memref<1x1024xf32, #tpu.memory_space<vmem>>, %arg4: memref<1x1024xf32, #tpu.memory_space<vmem>>, %arg5: memref<1x1024xf32, #tpu.memory_space<vmem>>, %arg6: memref<1024x512xbf16, #tpu.memory_space<vmem>>, %arg7: memref<1x512xf32, #tpu.memory_space<vmem>>, %arg8: memref<1x512xf32, #tpu.memory_space<vmem>>, %arg9: memref<1x512xf32, #tpu.memory_space<vmem>>, %arg10: memref<4x512xbf16, #tpu.memory_space<vmem>>) attributes {dimension_semantics = [#tpu.dimension_semantics<parallel>], iteration_bounds = array<i64: 4>, scalar_prefetch = 0 : i64, scratch_operands = 0 : i64, tpu.core_type = #tpu.core_type<tc>, window_params = [{pipeline_mode = #tpu.pipeline_mode<synchronous>, transform_indices = @transform_0, window_bounds = array<i64: 4, 24>}, {pipeline_mode = #tpu.pipeline_mode<synchronous>, transform_indices = @transform_1, window_bounds = array<i64: 24, 1024>}, {pipeline_mode = #tpu.pipeline_mode<synchronous>, transform_indices = @transform_2, window_bounds = array<i64: 1, 1024>}, {pipeline_mode = #tpu.pipeline_mode<synchronous>, transform_indices = @transform_3, window_bounds = array<i64: 1, 1024>}, {pipeline_mode = #tpu.pipeline_mode<synchronous>, transform_indices = @transform_4, window_bounds = array<i64: 1, 1024>}, {transform_indices = @transform_5, window_bounds = array<i64: 1024, 512>}, {transform_indices = @transform_6, window_bounds = array<i64: 1, 512>}, {transform_indices = @transform_7, window_bounds = array<i64: 1, 512>}, {transform_indices = @transform_8, window_bounds = array<i64: 1, 512>}, {transform_indices = @transform_9, window_bounds = array<i64: 4, 512>}]} {
    %c0 = arith.constant 0 : index
    %c0_0 = arith.constant 0 : index
    %0 = vector.load %arg2[%c0, %c0_0] : memref<24x1024xbf16, #tpu.memory_space<vmem>>, vector<24x1024xbf16>
    %c0_1 = arith.constant 0 : index
    %c0_2 = arith.constant 0 : index
    %1 = vector.load %arg1[%c0_1, %c0_2] : memref<4x24xf32, #tpu.memory_space<vmem>>, vector<4x24xf32>
    %2 = arith.truncf %1 : vector<4x24xf32> to vector<4x24xbf16>
    %cst = arith.constant dense<0.000000e+00> : vector<4x1024xf32>
    %3 = tpu.matmul %2, %0, %cst {dimension_numbers = #tpu.dot_dimension_numbers<[1], [0], [0], [1], [0, 0, 1, 1], [], []>} : vector<4x24xbf16>, vector<24x1024xbf16>, vector<4x1024xf32> -> vector<4x1024xf32>
    %c0_3 = arith.constant 0 : index
    %c0_4 = arith.constant 0 : index
    %4 = vector.load %arg3[%c0_3, %c0_4] : memref<1x1024xf32, #tpu.memory_space<vmem>>, vector<1x1024xf32>
    %5 = vector.broadcast %4 : vector<1x1024xf32> to vector<4x1024xf32>
    %6 = arith.addf %3, %5 : vector<4x1024xf32>
    %cst_5 = arith.constant dense<0.000000e+00> : vector<1024xf32>
    %7 = vector.multi_reduction <add>, %6, %cst_5 [0] : vector<4x1024xf32> to vector<1024xf32>
    %8 = vector.shape_cast %7 : vector<1024xf32> to vector<1x1024xf32>
    %cst_6 = arith.constant 4.000000e+00 : f32
    %9 = vector.broadcast %cst_6 : f32 to vector<1x1024xf32>
    %10 = arith.divf %8, %9 : vector<1x1024xf32>
    %11 = vector.broadcast %10 : vector<1x1024xf32> to vector<4x1024xf32>
    %12 = arith.subf %6, %11 : vector<4x1024xf32>
    %13 = arith.mulf %12, %12 : vector<4x1024xf32>
    %cst_7 = arith.constant dense<0.000000e+00> : vector<1024xf32>
    %14 = vector.multi_reduction <add>, %13, %cst_7 [0] : vector<4x1024xf32> to vector<1024xf32>
    %15 = vector.shape_cast %14 : vector<1024xf32> to vector<1x1024xf32>
    %cst_8 = arith.constant 4.000000e+00 : f32
    %16 = vector.broadcast %cst_8 : f32 to vector<1x1024xf32>
    %17 = arith.divf %15, %16 : vector<1x1024xf32>
    %18 = vector.broadcast %10 : vector<1x1024xf32> to vector<4x1024xf32>
    %19 = arith.subf %6, %18 : vector<4x1024xf32>
    %cst_9 = arith.constant 9.99999974E-6 : f32
    %20 = vector.broadcast %cst_9 : f32 to vector<1x1024xf32>
    %21 = arith.addf %17, %20 : vector<1x1024xf32>
    %22 = math.rsqrt %21 : vector<1x1024xf32>
    %23 = vector.broadcast %22 : vector<1x1024xf32> to vector<4x1024xf32>
    %24 = arith.mulf %19, %23 : vector<4x1024xf32>
    %c0_10 = arith.constant 0 : index
    %c0_11 = arith.constant 0 : index
    %25 = vector.load %arg4[%c0_10, %c0_11] : memref<1x1024xf32, #tpu.memory_space<vmem>>, vector<1x1024xf32>
    %26 = vector.broadcast %25 : vector<1x1024xf32> to vector<4x1024xf32>
    %27 = arith.mulf %24, %26 : vector<4x1024xf32>
    %c0_12 = arith.constant 0 : index
    %c0_13 = arith.constant 0 : index
    %28 = vector.load %arg5[%c0_12, %c0_13] : memref<1x1024xf32, #tpu.memory_space<vmem>>, vector<1x1024xf32>
    %29 = vector.broadcast %28 : vector<1x1024xf32> to vector<4x1024xf32>
    %30 = arith.addf %27, %29 : vector<4x1024xf32>
    %c0_14 = arith.constant 0 : index
    %c0_15 = arith.constant 0 : index
    %31 = vector.load %arg6[%c0_14, %c0_15] : memref<1024x512xbf16, #tpu.memory_space<vmem>>, vector<1024x512xbf16>
    %cst_16 = arith.constant 0.000000e+00 : f32
    %32 = vector.broadcast %cst_16 : f32 to vector<4x1024xf32>
    %33 = arith.maximumf %30, %32 : vector<4x1024xf32>
    %34 = arith.truncf %33 : vector<4x1024xf32> to vector<4x1024xbf16>
    %cst_17 = arith.constant dense<0.000000e+00> : vector<4x512xf32>
    %35 = tpu.matmul %34, %31, %cst_17 {dimension_numbers = #tpu.dot_dimension_numbers<[1], [0], [0], [1], [0, 0, 1, 1], [], []>} : vector<4x1024xbf16>, vector<1024x512xbf16>, vector<4x512xf32> -> vector<4x512xf32>
    %c0_18 = arith.constant 0 : index
    %c0_19 = arith.constant 0 : index
    %36 = vector.load %arg7[%c0_18, %c0_19] : memref<1x512xf32, #tpu.memory_space<vmem>>, vector<1x512xf32>
    %37 = vector.broadcast %36 : vector<1x512xf32> to vector<4x512xf32>
    %38 = arith.addf %35, %37 : vector<4x512xf32>
    %cst_20 = arith.constant dense<0.000000e+00> : vector<512xf32>
    %39 = vector.multi_reduction <add>, %38, %cst_20 [0] : vector<4x512xf32> to vector<512xf32>
    %40 = vector.shape_cast %39 : vector<512xf32> to vector<1x512xf32>
    %cst_21 = arith.constant 4.000000e+00 : f32
    %41 = vector.broadcast %cst_21 : f32 to vector<1x512xf32>
    %42 = arith.divf %40, %41 : vector<1x512xf32>
    %43 = vector.broadcast %42 : vector<1x512xf32> to vector<4x512xf32>
    %44 = arith.subf %38, %43 : vector<4x512xf32>
    %45 = arith.mulf %44, %44 : vector<4x512xf32>
    %cst_22 = arith.constant dense<0.000000e+00> : vector<512xf32>
    %46 = vector.multi_reduction <add>, %45, %cst_22 [0] : vector<4x512xf32> to vector<512xf32>
    %47 = vector.shape_cast %46 : vector<512xf32> to vector<1x512xf32>
    %cst_23 = arith.constant 4.000000e+00 : f32
    %48 = vector.broadcast %cst_23 : f32 to vector<1x512xf32>
    %49 = arith.divf %47, %48 : vector<1x512xf32>
    %50 = vector.broadcast %42 : vector<1x512xf32> to vector<4x512xf32>
    %51 = arith.subf %38, %50 : vector<4x512xf32>
    %cst_24 = arith.constant 9.99999974E-6 : f32
    %52 = vector.broadcast %cst_24 : f32 to vector<1x512xf32>
    %53 = arith.addf %49, %52 : vector<1x512xf32>
    %54 = math.rsqrt %53 : vector<1x512xf32>
    %55 = vector.broadcast %54 : vector<1x512xf32> to vector<4x512xf32>
    %56 = arith.mulf %51, %55 : vector<4x512xf32>
    %c0_25 = arith.constant 0 : index
    %c0_26 = arith.constant 0 : index
    %57 = vector.load %arg8[%c0_25, %c0_26] : memref<1x512xf32, #tpu.memory_space<vmem>>, vector<1x512xf32>
    %58 = vector.broadcast %57 : vector<1x512xf32> to vector<4x512xf32>
    %59 = arith.mulf %56, %58 : vector<4x512xf32>
    %c0_27 = arith.constant 0 : index
    %c0_28 = arith.constant 0 : index
    %60 = vector.load %arg9[%c0_27, %c0_28] : memref<1x512xf32, #tpu.memory_space<vmem>>, vector<1x512xf32>
    %61 = vector.broadcast %60 : vector<1x512xf32> to vector<4x512xf32>
    %62 = arith.addf %59, %61 : vector<4x512xf32>
    %cst_29 = arith.constant 0.000000e+00 : f32
    %63 = vector.broadcast %cst_29 : f32 to vector<4x512xf32>
    %64 = arith.maximumf %62, %63 : vector<4x512xf32>
    %65 = arith.truncf %64 : vector<4x512xf32> to vector<4x512xbf16>
    %c0_30 = arith.constant 0 : index
    %c0_31 = arith.constant 0 : index
    %66 = vector.load %arg10[%c0_30, %c0_31] : memref<4x512xbf16, #tpu.memory_space<vmem>>, vector<4x512xbf16>
    tpu.vector_store %arg10[%c0_30, %c0_31], %65 {strides = array<i32>} : memref<4x512xbf16, #tpu.memory_space<vmem>>, vector<4x512xbf16>,
    return
  }
  func.func @transform_0(%arg0: i32) -> (i32, i32) {
    %c0_i32 = arith.constant 0 : i32
    %c0_i32_0 = arith.constant 0 : i32
    %c0_i32_1 = arith.constant 0 : i32
    return %c0_i32, %c0_i32_0 : i32, i32
  }
  func.func @transform_1(%arg0: i32) -> (i32, i32) {
    %c0_i32 = arith.constant 0 : i32
    %c0_i32_0 = arith.constant 0 : i32
    %c0_i32_1 = arith.constant 0 : i32
    return %c0_i32, %c0_i32_0 : i32, i32
  }
  func.func @transform_2(%arg0: i32) -> (i32, i32) {
    %c0_i32 = arith.constant 0 : i32
    %c0_i32_0 = arith.constant 0 : i32
    %c0_i32_1 = arith.constant 0 : i32
    return %c0_i32, %c0_i32_0 : i32, i32
  }
  func.func @transform_3(%arg0: i32) -> (i32, i32) {
    %c0_i32 = arith.constant 0 : i32
    %c0_i32_0 = arith.constant 0 : i32
    %c0_i32_1 = arith.constant 0 : i32
    return %c0_i32, %c0_i32_0 : i32, i32
  }
  func.func @transform_4(%arg0: i32) -> (i32, i32) {
    %c0_i32 = arith.constant 0 : i32
    %c0_i32_0 = arith.constant 0 : i32
    %c0_i32_1 = arith.constant 0 : i32
    return %c0_i32, %c0_i32_0 : i32, i32
  }
  func.func @transform_5(%arg0: i32) -> (i32, i32) {
    %c0_i32 = arith.constant 0 : i32
    %c0_i32_0 = arith.constant 0 : i32
    return %c0_i32, %arg0 : i32, i32
  }
  func.func @transform_6(%arg0: i32) -> (i32, i32) {
    %c0_i32 = arith.constant 0 : i32
    %c0_i32_0 = arith.constant 0 : i32
    return %c0_i32, %arg0 : i32, i32
  }
  func.func @transform_7(%arg0: i32) -> (i32, i32) {
    %c0_i32 = arith.constant 0 : i32
    %c0_i32_0 = arith.constant 0 : i32
    return %c0_i32, %arg0 : i32, i32
  }
  func.func @transform_8(%arg0: i32) -> (i32, i32) {
    %c0_i32 = arith.constant 0 : i32
    %c0_i32_0 = arith.constant 0 : i32
    return %c0_i32, %arg0 : i32, i32
  }
  func.func @transform_9(%arg0: i32) -> (i32, i32) {
    %c0_i32 = arith.constant 0 : i32
    %c0_i32_0 = arith.constant 0 : i32
    return %c0_i32, %arg0 : i32, i32
  }
}

module attributes {stable_mosaic.version = 11 : i64} {
  func.func @_deconv1_bn_relu_kernel(%arg0: memref<144x128xbf16, #tpu.memory_space<vmem>>, %arg1: memref<4x4x128x64xbf16, #tpu.memory_space<vmem>>, %arg2: memref<1x64xf32, #tpu.memory_space<vmem>>, %arg3: memref<1x64xf32, #tpu.memory_space<vmem>>, %arg4: memref<1x64xf32, #tpu.memory_space<vmem>>, %arg5: memref<1x130xf32, #tpu.memory_space<vmem>>, %arg6: memref<130x256xbf16, #tpu.memory_space<vmem>>) attributes {dimension_semantics = [], scalar_prefetch = 0 : i64, scratch_operands = 0 : i64, tpu.core_type = #tpu.core_type<tc>} {
    %c0 = arith.constant 0 : index
    %c0_0 = arith.constant 0 : index
    %0 = vector.load %arg5[%c0, %c0_0] : memref<1x130xf32, #tpu.memory_space<vmem>>, vector<1x130xf32>
    %c0_1 = arith.constant 0 : index
    %c0_2 = arith.constant 0 : index
    %1 = vector.load %arg2[%c0_1, %c0_2] : memref<1x64xf32, #tpu.memory_space<vmem>>, vector<1x64xf32>
    %cst = arith.constant 0.000000e+00 : f32
    %2 = vector.broadcast %cst : f32 to vector<1x64xf32>
    %cst_3 = arith.constant 0.000000e+00 : f32
    %3 = vector.broadcast %cst_3 : f32 to vector<1x64xf32>
    %cst_4 = arith.constant 0.000000e+00 : f32
    %4 = vector.broadcast %cst_4 : f32 to vector<130x64xf32>
    %c0_5 = arith.constant 0 : index
    %c0_6 = arith.constant 0 : index
    %5 = vector.load %arg0[%c0_5, %c0_6] : memref<144x128xbf16, #tpu.memory_space<vmem>>, vector<130x128xbf16>
    %c0_7 = arith.constant 0 : index
    %c0_8 = arith.constant 0 : index
    %c0_9 = arith.constant 0 : index
    %c0_10 = arith.constant 0 : index
    %6 = vector.load %arg1[%c0_7, %c0_8, %c0_9, %c0_10] : memref<4x4x128x64xbf16, #tpu.memory_space<vmem>>, vector<1x1x128x64xbf16>
    %7 = vector.shape_cast %6 : vector<1x1x128x64xbf16> to vector<128x64xbf16>
    %cst_11 = arith.constant dense<0.000000e+00> : vector<130x64xf32>
    %8 = tpu.matmul %5, %7, %cst_11 {dimension_numbers = #tpu.dot_dimension_numbers<[1], [0], [0], [1], [0, 0, 1, 1], [], []>} : vector<130x128xbf16>, vector<128x64xbf16>, vector<130x64xf32> -> vector<130x64xf32>
    %9 = arith.addf %4, %8 : vector<130x64xf32>
    %c1 = arith.constant 1 : index
    %c0_12 = arith.constant 0 : index
    %10 = vector.load %arg0[%c1, %c0_12] : memref<144x128xbf16, #tpu.memory_space<vmem>>, vector<130x128xbf16>
    %c0_13 = arith.constant 0 : index
    %c1_14 = arith.constant 1 : index
    %c0_15 = arith.constant 0 : index
    %c0_16 = arith.constant 0 : index
    %11 = vector.load %arg1[%c0_13, %c1_14, %c0_15, %c0_16] : memref<4x4x128x64xbf16, #tpu.memory_space<vmem>>, vector<1x1x128x64xbf16>
    %12 = vector.shape_cast %11 : vector<1x1x128x64xbf16> to vector<128x64xbf16>
    %cst_17 = arith.constant dense<0.000000e+00> : vector<130x64xf32>
    %13 = tpu.matmul %10, %12, %cst_17 {dimension_numbers = #tpu.dot_dimension_numbers<[1], [0], [0], [1], [0, 0, 1, 1], [], []>} : vector<130x128xbf16>, vector<128x64xbf16>, vector<130x64xf32> -> vector<130x64xf32>
    %14 = arith.addf %9, %13 : vector<130x64xf32>
    %c6 = arith.constant 6 : index
    %c0_18 = arith.constant 0 : index
    %15 = vector.load %arg0[%c6, %c0_18] : memref<144x128xbf16, #tpu.memory_space<vmem>>, vector<130x128xbf16>
    %c0_19 = arith.constant 0 : index
    %c2 = arith.constant 2 : index
    %c0_20 = arith.constant 0 : index
    %c0_21 = arith.constant 0 : index
    %16 = vector.load %arg1[%c0_19, %c2, %c0_20, %c0_21] : memref<4x4x128x64xbf16, #tpu.memory_space<vmem>>, vector<1x1x128x64xbf16>
    %17 = vector.shape_cast %16 : vector<1x1x128x64xbf16> to vector<128x64xbf16>
    %cst_22 = arith.constant dense<0.000000e+00> : vector<130x64xf32>
    %18 = tpu.matmul %15, %17, %cst_22 {dimension_numbers = #tpu.dot_dimension_numbers<[1], [0], [0], [1], [0, 0, 1, 1], [], []>} : vector<130x128xbf16>, vector<128x64xbf16>, vector<130x64xf32> -> vector<130x64xf32>
    %19 = arith.addf %14, %18 : vector<130x64xf32>
    %c7 = arith.constant 7 : index
    %c0_23 = arith.constant 0 : index
    %20 = vector.load %arg0[%c7, %c0_23] : memref<144x128xbf16, #tpu.memory_space<vmem>>, vector<130x128xbf16>
    %c0_24 = arith.constant 0 : index
    %c3 = arith.constant 3 : index
    %c0_25 = arith.constant 0 : index
    %c0_26 = arith.constant 0 : index
    %21 = vector.load %arg1[%c0_24, %c3, %c0_25, %c0_26] : memref<4x4x128x64xbf16, #tpu.memory_space<vmem>>, vector<1x1x128x64xbf16>
    %22 = vector.shape_cast %21 : vector<1x1x128x64xbf16> to vector<128x64xbf16>
    %cst_27 = arith.constant dense<0.000000e+00> : vector<130x64xf32>
    %23 = tpu.matmul %20, %22, %cst_27 {dimension_numbers = #tpu.dot_dimension_numbers<[1], [0], [0], [1], [0, 0, 1, 1], [], []>} : vector<130x128xbf16>, vector<128x64xbf16>, vector<130x64xf32> -> vector<130x64xf32>
    %24 = arith.addf %19, %23 : vector<130x64xf32>
    %25 = vector.broadcast %1 : vector<1x64xf32> to vector<130x64xf32>
    %26 = arith.addf %24, %25 : vector<130x64xf32>
    %cst_28 = arith.constant dense<0.000000e+00> : vector<1x64xf32>
    %27 = tpu.matmul %0, %26, %cst_28 {dimension_numbers = #tpu.dot_dimension_numbers<[1], [0], [0], [1], [0, 0, 1, 1], [], []>} : vector<1x130xf32>, vector<130x64xf32>, vector<1x64xf32> -> vector<1x64xf32>
    %28 = arith.addf %2, %27 : vector<1x64xf32>
    %29 = arith.mulf %26, %26 : vector<130x64xf32>
    %cst_29 = arith.constant dense<0.000000e+00> : vector<1x64xf32>
    %30 = tpu.matmul %0, %29, %cst_29 {dimension_numbers = #tpu.dot_dimension_numbers<[1], [0], [0], [1], [0, 0, 1, 1], [], []>} : vector<1x130xf32>, vector<130x64xf32>, vector<1x64xf32> -> vector<1x64xf32>
    %31 = arith.addf %3, %30 : vector<1x64xf32>
    %cst_30 = arith.constant 0.000000e+00 : f32
    %32 = vector.broadcast %cst_30 : f32 to vector<130x64xf32>
    %c1_31 = arith.constant 1 : index
    %c0_32 = arith.constant 0 : index
    %33 = vector.load %arg0[%c1_31, %c0_32] : memref<144x128xbf16, #tpu.memory_space<vmem>>, vector<130x128xbf16>
    %c1_33 = arith.constant 1 : index
    %c0_34 = arith.constant 0 : index
    %c0_35 = arith.constant 0 : index
    %c0_36 = arith.constant 0 : index
    %34 = vector.load %arg1[%c1_33, %c0_34, %c0_35, %c0_36] : memref<4x4x128x64xbf16, #tpu.memory_space<vmem>>, vector<1x1x128x64xbf16>
    %35 = vector.shape_cast %34 : vector<1x1x128x64xbf16> to vector<128x64xbf16>
    %cst_37 = arith.constant dense<0.000000e+00> : vector<130x64xf32>
    %36 = tpu.matmul %33, %35, %cst_37 {dimension_numbers = #tpu.dot_dimension_numbers<[1], [0], [0], [1], [0, 0, 1, 1], [], []>} : vector<130x128xbf16>, vector<128x64xbf16>, vector<130x64xf32> -> vector<130x64xf32>
    %37 = arith.addf %32, %36 : vector<130x64xf32>
    %c2_38 = arith.constant 2 : index
    %c0_39 = arith.constant 0 : index
    %38 = vector.load %arg0[%c2_38, %c0_39] : memref<144x128xbf16, #tpu.memory_space<vmem>>, vector<130x128xbf16>
    %c1_40 = arith.constant 1 : index
    %c1_41 = arith.constant 1 : index
    %c0_42 = arith.constant 0 : index
    %c0_43 = arith.constant 0 : index
    %39 = vector.load %arg1[%c1_40, %c1_41, %c0_42, %c0_43] : memref<4x4x128x64xbf16, #tpu.memory_space<vmem>>, vector<1x1x128x64xbf16>
    %40 = vector.shape_cast %39 : vector<1x1x128x64xbf16> to vector<128x64xbf16>
    %cst_44 = arith.constant dense<0.000000e+00> : vector<130x64xf32>
    %41 = tpu.matmul %38, %40, %cst_44 {dimension_numbers = #tpu.dot_dimension_numbers<[1], [0], [0], [1], [0, 0, 1, 1], [], []>} : vector<130x128xbf16>, vector<128x64xbf16>, vector<130x64xf32> -> vector<130x64xf32>
    %42 = arith.addf %37, %41 : vector<130x64xf32>
    %c7_45 = arith.constant 7 : index
    %c0_46 = arith.constant 0 : index
    %43 = vector.load %arg0[%c7_45, %c0_46] : memref<144x128xbf16, #tpu.memory_space<vmem>>, vector<130x128xbf16>
    %c1_47 = arith.constant 1 : index
    %c2_48 = arith.constant 2 : index
    %c0_49 = arith.constant 0 : index
    %c0_50 = arith.constant 0 : index
    %44 = vector.load %arg1[%c1_47, %c2_48, %c0_49, %c0_50] : memref<4x4x128x64xbf16, #tpu.memory_space<vmem>>, vector<1x1x128x64xbf16>
    %45 = vector.shape_cast %44 : vector<1x1x128x64xbf16> to vector<128x64xbf16>
    %cst_51 = arith.constant dense<0.000000e+00> : vector<130x64xf32>
    %46 = tpu.matmul %43, %45, %cst_51 {dimension_numbers = #tpu.dot_dimension_numbers<[1], [0], [0], [1], [0, 0, 1, 1], [], []>} : vector<130x128xbf16>, vector<128x64xbf16>, vector<130x64xf32> -> vector<130x64xf32>
    %47 = arith.addf %42, %46 : vector<130x64xf32>
    %c8 = arith.constant 8 : index
    %c0_52 = arith.constant 0 : index
    %48 = vector.load %arg0[%c8, %c0_52] : memref<144x128xbf16, #tpu.memory_space<vmem>>, vector<130x128xbf16>
    %c1_53 = arith.constant 1 : index
    %c3_54 = arith.constant 3 : index
    %c0_55 = arith.constant 0 : index
    %c0_56 = arith.constant 0 : index
    %49 = vector.load %arg1[%c1_53, %c3_54, %c0_55, %c0_56] : memref<4x4x128x64xbf16, #tpu.memory_space<vmem>>, vector<1x1x128x64xbf16>
    %50 = vector.shape_cast %49 : vector<1x1x128x64xbf16> to vector<128x64xbf16>
    %cst_57 = arith.constant dense<0.000000e+00> : vector<130x64xf32>
    %51 = tpu.matmul %48, %50, %cst_57 {dimension_numbers = #tpu.dot_dimension_numbers<[1], [0], [0], [1], [0, 0, 1, 1], [], []>} : vector<130x128xbf16>, vector<128x64xbf16>, vector<130x64xf32> -> vector<130x64xf32>
    %52 = arith.addf %47, %51 : vector<130x64xf32>
    %53 = vector.broadcast %1 : vector<1x64xf32> to vector<130x64xf32>
    %54 = arith.addf %52, %53 : vector<130x64xf32>
    %cst_58 = arith.constant dense<0.000000e+00> : vector<1x64xf32>
    %55 = tpu.matmul %0, %54, %cst_58 {dimension_numbers = #tpu.dot_dimension_numbers<[1], [0], [0], [1], [0, 0, 1, 1], [], []>} : vector<1x130xf32>, vector<130x64xf32>, vector<1x64xf32> -> vector<1x64xf32>
    %56 = arith.addf %28, %55 : vector<1x64xf32>
    %57 = arith.mulf %54, %54 : vector<130x64xf32>
    %cst_59 = arith.constant dense<0.000000e+00> : vector<1x64xf32>
    %58 = tpu.matmul %0, %57, %cst_59 {dimension_numbers = #tpu.dot_dimension_numbers<[1], [0], [0], [1], [0, 0, 1, 1], [], []>} : vector<1x130xf32>, vector<130x64xf32>, vector<1x64xf32> -> vector<1x64xf32>
    %59 = arith.addf %31, %58 : vector<1x64xf32>
    %cst_60 = arith.constant 0.000000e+00 : f32
    %60 = vector.broadcast %cst_60 : f32 to vector<130x64xf32>
    %c6_61 = arith.constant 6 : index
    %c0_62 = arith.constant 0 : index
    %61 = vector.load %arg0[%c6_61, %c0_62] : memref<144x128xbf16, #tpu.memory_space<vmem>>, vector<130x128xbf16>
    %c2_63 = arith.constant 2 : index
    %c0_64 = arith.constant 0 : index
    %c0_65 = arith.constant 0 : index
    %c0_66 = arith.constant 0 : index
    %62 = vector.load %arg1[%c2_63, %c0_64, %c0_65, %c0_66] : memref<4x4x128x64xbf16, #tpu.memory_space<vmem>>, vector<1x1x128x64xbf16>
    %63 = vector.shape_cast %62 : vector<1x1x128x64xbf16> to vector<128x64xbf16>
    %cst_67 = arith.constant dense<0.000000e+00> : vector<130x64xf32>
    %64 = tpu.matmul %61, %63, %cst_67 {dimension_numbers = #tpu.dot_dimension_numbers<[1], [0], [0], [1], [0, 0, 1, 1], [], []>} : vector<130x128xbf16>, vector<128x64xbf16>, vector<130x64xf32> -> vector<130x64xf32>
    %65 = arith.addf %60, %64 : vector<130x64xf32>
    %c7_68 = arith.constant 7 : index
    %c0_69 = arith.constant 0 : index
    %66 = vector.load %arg0[%c7_68, %c0_69] : memref<144x128xbf16, #tpu.memory_space<vmem>>, vector<130x128xbf16>
    %c2_70 = arith.constant 2 : index
    %c1_71 = arith.constant 1 : index
    %c0_72 = arith.constant 0 : index
    %c0_73 = arith.constant 0 : index
    %67 = vector.load %arg1[%c2_70, %c1_71, %c0_72, %c0_73] : memref<4x4x128x64xbf16, #tpu.memory_space<vmem>>, vector<1x1x128x64xbf16>
    %68 = vector.shape_cast %67 : vector<1x1x128x64xbf16> to vector<128x64xbf16>
    %cst_74 = arith.constant dense<0.000000e+00> : vector<130x64xf32>
    %69 = tpu.matmul %66, %68, %cst_74 {dimension_numbers = #tpu.dot_dimension_numbers<[1], [0], [0], [1], [0, 0, 1, 1], [], []>} : vector<130x128xbf16>, vector<128x64xbf16>, vector<130x64xf32> -> vector<130x64xf32>
    %70 = arith.addf %65, %69 : vector<130x64xf32>
    %c12 = arith.constant 12 : index
    %c0_75 = arith.constant 0 : index
    %71 = vector.load %arg0[%c12, %c0_75] : memref<144x128xbf16, #tpu.memory_space<vmem>>, vector<130x128xbf16>
    %c2_76 = arith.constant 2 : index
    %c2_77 = arith.constant 2 : index
    %c0_78 = arith.constant 0 : index
    %c0_79 = arith.constant 0 : index
    %72 = vector.load %arg1[%c2_76, %c2_77, %c0_78, %c0_79] : memref<4x4x128x64xbf16, #tpu.memory_space<vmem>>, vector<1x1x128x64xbf16>
    %73 = vector.shape_cast %72 : vector<1x1x128x64xbf16> to vector<128x64xbf16>
    %cst_80 = arith.constant dense<0.000000e+00> : vector<130x64xf32>
    %74 = tpu.matmul %71, %73, %cst_80 {dimension_numbers = #tpu.dot_dimension_numbers<[1], [0], [0], [1], [0, 0, 1, 1], [], []>} : vector<130x128xbf16>, vector<128x64xbf16>, vector<130x64xf32> -> vector<130x64xf32>
    %75 = arith.addf %70, %74 : vector<130x64xf32>
    %c13 = arith.constant 13 : index
    %c0_81 = arith.constant 0 : index
    %76 = vector.load %arg0[%c13, %c0_81] : memref<144x128xbf16, #tpu.memory_space<vmem>>, vector<130x128xbf16>
    %c2_82 = arith.constant 2 : index
    %c3_83 = arith.constant 3 : index
    %c0_84 = arith.constant 0 : index
    %c0_85 = arith.constant 0 : index
    %77 = vector.load %arg1[%c2_82, %c3_83, %c0_84, %c0_85] : memref<4x4x128x64xbf16, #tpu.memory_space<vmem>>, vector<1x1x128x64xbf16>
    %78 = vector.shape_cast %77 : vector<1x1x128x64xbf16> to vector<128x64xbf16>
    %cst_86 = arith.constant dense<0.000000e+00> : vector<130x64xf32>
    %79 = tpu.matmul %76, %78, %cst_86 {dimension_numbers = #tpu.dot_dimension_numbers<[1], [0], [0], [1], [0, 0, 1, 1], [], []>} : vector<130x128xbf16>, vector<128x64xbf16>, vector<130x64xf32> -> vector<130x64xf32>
    %80 = arith.addf %75, %79 : vector<130x64xf32>
    %81 = vector.broadcast %1 : vector<1x64xf32> to vector<130x64xf32>
    %82 = arith.addf %80, %81 : vector<130x64xf32>
    %cst_87 = arith.constant dense<0.000000e+00> : vector<1x64xf32>
    %83 = tpu.matmul %0, %82, %cst_87 {dimension_numbers = #tpu.dot_dimension_numbers<[1], [0], [0], [1], [0, 0, 1, 1], [], []>} : vector<1x130xf32>, vector<130x64xf32>, vector<1x64xf32> -> vector<1x64xf32>
    %84 = arith.addf %56, %83 : vector<1x64xf32>
    %85 = arith.mulf %82, %82 : vector<130x64xf32>
    %cst_88 = arith.constant dense<0.000000e+00> : vector<1x64xf32>
    %86 = tpu.matmul %0, %85, %cst_88 {dimension_numbers = #tpu.dot_dimension_numbers<[1], [0], [0], [1], [0, 0, 1, 1], [], []>} : vector<1x130xf32>, vector<130x64xf32>, vector<1x64xf32> -> vector<1x64xf32>
    %87 = arith.addf %59, %86 : vector<1x64xf32>
    %cst_89 = arith.constant 0.000000e+00 : f32
    %88 = vector.broadcast %cst_89 : f32 to vector<130x64xf32>
    %c7_90 = arith.constant 7 : index
    %c0_91 = arith.constant 0 : index
    %89 = vector.load %arg0[%c7_90, %c0_91] : memref<144x128xbf16, #tpu.memory_space<vmem>>, vector<130x128xbf16>
    %c3_92 = arith.constant 3 : index
    %c0_93 = arith.constant 0 : index
    %c0_94 = arith.constant 0 : index
    %c0_95 = arith.constant 0 : index
    %90 = vector.load %arg1[%c3_92, %c0_93, %c0_94, %c0_95] : memref<4x4x128x64xbf16, #tpu.memory_space<vmem>>, vector<1x1x128x64xbf16>
    %91 = vector.shape_cast %90 : vector<1x1x128x64xbf16> to vector<128x64xbf16>
    %cst_96 = arith.constant dense<0.000000e+00> : vector<130x64xf32>
    %92 = tpu.matmul %89, %91, %cst_96 {dimension_numbers = #tpu.dot_dimension_numbers<[1], [0], [0], [1], [0, 0, 1, 1], [], []>} : vector<130x128xbf16>, vector<128x64xbf16>, vector<130x64xf32> -> vector<130x64xf32>
    %93 = arith.addf %88, %92 : vector<130x64xf32>
    %c8_97 = arith.constant 8 : index
    %c0_98 = arith.constant 0 : index
    %94 = vector.load %arg0[%c8_97, %c0_98] : memref<144x128xbf16, #tpu.memory_space<vmem>>, vector<130x128xbf16>
    %c3_99 = arith.constant 3 : index
    %c1_100 = arith.constant 1 : index
    %c0_101 = arith.constant 0 : index
    %c0_102 = arith.constant 0 : index
    %95 = vector.load %arg1[%c3_99, %c1_100, %c0_101, %c0_102] : memref<4x4x128x64xbf16, #tpu.memory_space<vmem>>, vector<1x1x128x64xbf16>
    %96 = vector.shape_cast %95 : vector<1x1x128x64xbf16> to vector<128x64xbf16>
    %cst_103 = arith.constant dense<0.000000e+00> : vector<130x64xf32>
    %97 = tpu.matmul %94, %96, %cst_103 {dimension_numbers = #tpu.dot_dimension_numbers<[1], [0], [0], [1], [0, 0, 1, 1], [], []>} : vector<130x128xbf16>, vector<128x64xbf16>, vector<130x64xf32> -> vector<130x64xf32>
    %98 = arith.addf %93, %97 : vector<130x64xf32>
    %c13_104 = arith.constant 13 : index
    %c0_105 = arith.constant 0 : index
    %99 = vector.load %arg0[%c13_104, %c0_105] : memref<144x128xbf16, #tpu.memory_space<vmem>>, vector<130x128xbf16>
    %c3_106 = arith.constant 3 : index
    %c2_107 = arith.constant 2 : index
    %c0_108 = arith.constant 0 : index
    %c0_109 = arith.constant 0 : index
    %100 = vector.load %arg1[%c3_106, %c2_107, %c0_108, %c0_109] : memref<4x4x128x64xbf16, #tpu.memory_space<vmem>>, vector<1x1x128x64xbf16>
    %101 = vector.shape_cast %100 : vector<1x1x128x64xbf16> to vector<128x64xbf16>
    %cst_110 = arith.constant dense<0.000000e+00> : vector<130x64xf32>
    %102 = tpu.matmul %99, %101, %cst_110 {dimension_numbers = #tpu.dot_dimension_numbers<[1], [0], [0], [1], [0, 0, 1, 1], [], []>} : vector<130x128xbf16>, vector<128x64xbf16>, vector<130x64xf32> -> vector<130x64xf32>
    %103 = arith.addf %98, %102 : vector<130x64xf32>
    %c14 = arith.constant 14 : index
    %c0_111 = arith.constant 0 : index
    %104 = vector.load %arg0[%c14, %c0_111] : memref<144x128xbf16, #tpu.memory_space<vmem>>, vector<130x128xbf16>
    %c3_112 = arith.constant 3 : index
    %c3_113 = arith.constant 3 : index
    %c0_114 = arith.constant 0 : index
    %c0_115 = arith.constant 0 : index
    %105 = vector.load %arg1[%c3_112, %c3_113, %c0_114, %c0_115] : memref<4x4x128x64xbf16, #tpu.memory_space<vmem>>, vector<1x1x128x64xbf16>
    %106 = vector.shape_cast %105 : vector<1x1x128x64xbf16> to vector<128x64xbf16>
    %cst_116 = arith.constant dense<0.000000e+00> : vector<130x64xf32>
    %107 = tpu.matmul %104, %106, %cst_116 {dimension_numbers = #tpu.dot_dimension_numbers<[1], [0], [0], [1], [0, 0, 1, 1], [], []>} : vector<130x128xbf16>, vector<128x64xbf16>, vector<130x64xf32> -> vector<130x64xf32>
    %108 = arith.addf %103, %107 : vector<130x64xf32>
    %109 = vector.broadcast %1 : vector<1x64xf32> to vector<130x64xf32>
    %110 = arith.addf %108, %109 : vector<130x64xf32>
    %cst_117 = arith.constant dense<0.000000e+00> : vector<1x64xf32>
    %111 = tpu.matmul %0, %110, %cst_117 {dimension_numbers = #tpu.dot_dimension_numbers<[1], [0], [0], [1], [0, 0, 1, 1], [], []>} : vector<1x130xf32>, vector<130x64xf32>, vector<1x64xf32> -> vector<1x64xf32>
    %112 = arith.addf %84, %111 : vector<1x64xf32>
    %113 = arith.mulf %110, %110 : vector<130x64xf32>
    %cst_118 = arith.constant dense<0.000000e+00> : vector<1x64xf32>
    %114 = tpu.matmul %0, %113, %cst_118 {dimension_numbers = #tpu.dot_dimension_numbers<[1], [0], [0], [1], [0, 0, 1, 1], [], []>} : vector<1x130xf32>, vector<130x64xf32>, vector<1x64xf32> -> vector<1x64xf32>
    %115 = arith.addf %87, %114 : vector<1x64xf32>
    %cst_119 = arith.constant 2.560000e+02 : f32
    %116 = vector.broadcast %cst_119 : f32 to vector<1x64xf32>
    %117 = arith.divf %112, %116 : vector<1x64xf32>
    %cst_120 = arith.constant 2.560000e+02 : f32
    %118 = vector.broadcast %cst_120 : f32 to vector<1x64xf32>
    %119 = arith.divf %115, %118 : vector<1x64xf32>
    %120 = arith.mulf %117, %117 : vector<1x64xf32>
    %121 = arith.subf %119, %120 : vector<1x64xf32>
    %cst_121 = arith.constant 0.000000e+00 : f32
    %122 = vector.broadcast %cst_121 : f32 to vector<1x64xf32>
    %123 = arith.maximumf %121, %122 : vector<1x64xf32>
    %cst_122 = arith.constant 9.99999974E-6 : f32
    %124 = vector.broadcast %cst_122 : f32 to vector<1x64xf32>
    %125 = arith.addf %123, %124 : vector<1x64xf32>
    %126 = math.rsqrt %125 : vector<1x64xf32>
    %c0_123 = arith.constant 0 : index
    %c0_124 = arith.constant 0 : index
    %127 = vector.load %arg3[%c0_123, %c0_124] : memref<1x64xf32, #tpu.memory_space<vmem>>, vector<1x64xf32>
    %128 = arith.mulf %126, %127 : vector<1x64xf32>
    %c0_125 = arith.constant 0 : index
    %c0_126 = arith.constant 0 : index
    %129 = vector.load %arg4[%c0_125, %c0_126] : memref<1x64xf32, #tpu.memory_space<vmem>>, vector<1x64xf32>
    %130 = arith.mulf %117, %128 : vector<1x64xf32>
    %131 = arith.subf %129, %130 : vector<1x64xf32>
    %132 = vector.broadcast %128 : vector<1x64xf32> to vector<130x64xf32>
    %133 = arith.mulf %26, %132 : vector<130x64xf32>
    %134 = vector.broadcast %131 : vector<1x64xf32> to vector<130x64xf32>
    %135 = arith.addf %133, %134 : vector<130x64xf32>
    %cst_127 = arith.constant 0.000000e+00 : f32
    %136 = vector.broadcast %cst_127 : f32 to vector<130x64xf32>
    %137 = arith.maximumf %135, %136 : vector<130x64xf32>
    %138 = vector.broadcast %128 : vector<1x64xf32> to vector<130x64xf32>
    %139 = arith.mulf %54, %138 : vector<130x64xf32>
    %140 = vector.broadcast %131 : vector<1x64xf32> to vector<130x64xf32>
    %141 = arith.addf %139, %140 : vector<130x64xf32>
    %cst_128 = arith.constant 0.000000e+00 : f32
    %142 = vector.broadcast %cst_128 : f32 to vector<130x64xf32>
    %143 = arith.maximumf %141, %142 : vector<130x64xf32>
    %144 = vector.broadcast %128 : vector<1x64xf32> to vector<130x64xf32>
    %145 = arith.mulf %82, %144 : vector<130x64xf32>
    %146 = vector.broadcast %131 : vector<1x64xf32> to vector<130x64xf32>
    %147 = arith.addf %145, %146 : vector<130x64xf32>
    %cst_129 = arith.constant 0.000000e+00 : f32
    %148 = vector.broadcast %cst_129 : f32 to vector<130x64xf32>
    %149 = arith.maximumf %147, %148 : vector<130x64xf32>
    %150 = vector.broadcast %128 : vector<1x64xf32> to vector<130x64xf32>
    %151 = arith.mulf %110, %150 : vector<130x64xf32>
    %152 = vector.broadcast %131 : vector<1x64xf32> to vector<130x64xf32>
    %153 = arith.addf %151, %152 : vector<130x64xf32>
    %cst_130 = arith.constant 0.000000e+00 : f32
    %154 = vector.broadcast %cst_130 : f32 to vector<130x64xf32>
    %155 = arith.maximumf %153, %154 : vector<130x64xf32>
    %156 = tpu.concatenate %137, %143, %149, %155 in 1 : vector<130x64xf32>, vector<130x64xf32>, vector<130x64xf32>, vector<130x64xf32> -> vector<130x256xf32>
    %157 = arith.truncf %156 : vector<130x256xf32> to vector<130x256xbf16>
    %c0_131 = arith.constant 0 : index
    %c0_132 = arith.constant 0 : index
    %158 = vector.load %arg6[%c0_131, %c0_132] : memref<130x256xbf16, #tpu.memory_space<vmem>>, vector<130x256xbf16>
    tpu.vector_store %arg6[%c0_131, %c0_132], %157 {strides = array<i32>} : memref<130x256xbf16, #tpu.memory_space<vmem>>, vector<130x256xbf16>,
    return
  }
}

module attributes {stable_mosaic.version = 11 : i64} {
  func.func @_deconv2_tanh_kernel(%arg0: i32, %arg1: memref<104x64xbf16, #tpu.memory_space<vmem>>, %arg2: memref<4x4x64x1xbf16, #tpu.memory_space<vmem>>, %arg3: memref<1x1xf32, #tpu.memory_space<vmem>>, %arg4: memref<80x4xf32, #tpu.memory_space<vmem>>) attributes {dimension_semantics = [#tpu.dimension_semantics<parallel>], iteration_bounds = array<i64: 4>, scalar_prefetch = 0 : i64, scratch_operands = 0 : i64, tpu.core_type = #tpu.core_type<tc>, window_params = [{transform_indices = @transform_0, window_bounds = array<i64: 104, 64>}, {pipeline_mode = #tpu.pipeline_mode<synchronous>, transform_indices = @transform_1, window_bounds = array<i64: 4, 4, 64, 1>}, {pipeline_mode = #tpu.pipeline_mode<synchronous>, transform_indices = @transform_2, window_bounds = array<i64: 1, 1>}, {transform_indices = @transform_3, window_bounds = array<i64: 80, 4>}]} {
    %c0 = arith.constant 0 : index
    %c0_0 = arith.constant 0 : index
    %0 = vector.load %arg3[%c0, %c0_0] : memref<1x1xf32, #tpu.memory_space<vmem>>, vector<1x1xf32>
    %cst = arith.constant 0.000000e+00 : f32
    %1 = vector.broadcast %cst : f32 to vector<80x1xf32>
    %c0_1 = arith.constant 0 : index
    %c0_2 = arith.constant 0 : index
    %2 = vector.load %arg1[%c0_1, %c0_2] : memref<104x64xbf16, #tpu.memory_space<vmem>>, vector<80x64xbf16>
    %c0_3 = arith.constant 0 : index
    %c0_4 = arith.constant 0 : index
    %c0_5 = arith.constant 0 : index
    %c0_6 = arith.constant 0 : index
    %3 = vector.load %arg2[%c0_3, %c0_4, %c0_5, %c0_6] : memref<4x4x64x1xbf16, #tpu.memory_space<vmem>>, vector<1x1x64x1xbf16>
    %4 = vector.shape_cast %3 : vector<1x1x64x1xbf16> to vector<64x1xbf16>
    %cst_7 = arith.constant dense<0.000000e+00> : vector<80x1xf32>
    %5 = tpu.matmul %2, %4, %cst_7 {dimension_numbers = #tpu.dot_dimension_numbers<[1], [0], [0], [1], [0, 0, 1, 1], [], []>} : vector<80x64xbf16>, vector<64x1xbf16>, vector<80x1xf32> -> vector<80x1xf32>
    %6 = arith.addf %1, %5 : vector<80x1xf32>
    %c1 = arith.constant 1 : index
    %c0_8 = arith.constant 0 : index
    %7 = vector.load %arg1[%c1, %c0_8] : memref<104x64xbf16, #tpu.memory_space<vmem>>, vector<80x64xbf16>
    %c0_9 = arith.constant 0 : index
    %c1_10 = arith.constant 1 : index
    %c0_11 = arith.constant 0 : index
    %c0_12 = arith.constant 0 : index
    %8 = vector.load %arg2[%c0_9, %c1_10, %c0_11, %c0_12] : memref<4x4x64x1xbf16, #tpu.memory_space<vmem>>, vector<1x1x64x1xbf16>
    %9 = vector.shape_cast %8 : vector<1x1x64x1xbf16> to vector<64x1xbf16>
    %cst_13 = arith.constant dense<0.000000e+00> : vector<80x1xf32>
    %10 = tpu.matmul %7, %9, %cst_13 {dimension_numbers = #tpu.dot_dimension_numbers<[1], [0], [0], [1], [0, 0, 1, 1], [], []>} : vector<80x64xbf16>, vector<64x1xbf16>, vector<80x1xf32> -> vector<80x1xf32>
    %11 = arith.addf %6, %10 : vector<80x1xf32>
    %c10 = arith.constant 10 : index
    %c0_14 = arith.constant 0 : index
    %12 = vector.load %arg1[%c10, %c0_14] : memref<104x64xbf16, #tpu.memory_space<vmem>>, vector<80x64xbf16>
    %c0_15 = arith.constant 0 : index
    %c2 = arith.constant 2 : index
    %c0_16 = arith.constant 0 : index
    %c0_17 = arith.constant 0 : index
    %13 = vector.load %arg2[%c0_15, %c2, %c0_16, %c0_17] : memref<4x4x64x1xbf16, #tpu.memory_space<vmem>>, vector<1x1x64x1xbf16>
    %14 = vector.shape_cast %13 : vector<1x1x64x1xbf16> to vector<64x1xbf16>
    %cst_18 = arith.constant dense<0.000000e+00> : vector<80x1xf32>
    %15 = tpu.matmul %12, %14, %cst_18 {dimension_numbers = #tpu.dot_dimension_numbers<[1], [0], [0], [1], [0, 0, 1, 1], [], []>} : vector<80x64xbf16>, vector<64x1xbf16>, vector<80x1xf32> -> vector<80x1xf32>
    %16 = arith.addf %11, %15 : vector<80x1xf32>
    %c11 = arith.constant 11 : index
    %c0_19 = arith.constant 0 : index
    %17 = vector.load %arg1[%c11, %c0_19] : memref<104x64xbf16, #tpu.memory_space<vmem>>, vector<80x64xbf16>
    %c0_20 = arith.constant 0 : index
    %c3 = arith.constant 3 : index
    %c0_21 = arith.constant 0 : index
    %c0_22 = arith.constant 0 : index
    %18 = vector.load %arg2[%c0_20, %c3, %c0_21, %c0_22] : memref<4x4x64x1xbf16, #tpu.memory_space<vmem>>, vector<1x1x64x1xbf16>
    %19 = vector.shape_cast %18 : vector<1x1x64x1xbf16> to vector<64x1xbf16>
    %cst_23 = arith.constant dense<0.000000e+00> : vector<80x1xf32>
    %20 = tpu.matmul %17, %19, %cst_23 {dimension_numbers = #tpu.dot_dimension_numbers<[1], [0], [0], [1], [0, 0, 1, 1], [], []>} : vector<80x64xbf16>, vector<64x1xbf16>, vector<80x1xf32> -> vector<80x1xf32>
    %21 = arith.addf %16, %20 : vector<80x1xf32>
    %22 = vector.broadcast %0 : vector<1x1xf32> to vector<80x1xf32>
    %23 = arith.addf %21, %22 : vector<80x1xf32>
    %24 = math.tanh %23 : vector<80x1xf32>
    %cst_24 = arith.constant 0.000000e+00 : f32
    %25 = vector.broadcast %cst_24 : f32 to vector<80x1xf32>
    %c1_25 = arith.constant 1 : index
    %c0_26 = arith.constant 0 : index
    %26 = vector.load %arg1[%c1_25, %c0_26] : memref<104x64xbf16, #tpu.memory_space<vmem>>, vector<80x64xbf16>
    %c1_27 = arith.constant 1 : index
    %c0_28 = arith.constant 0 : index
    %c0_29 = arith.constant 0 : index
    %c0_30 = arith.constant 0 : index
    %27 = vector.load %arg2[%c1_27, %c0_28, %c0_29, %c0_30] : memref<4x4x64x1xbf16, #tpu.memory_space<vmem>>, vector<1x1x64x1xbf16>
    %28 = vector.shape_cast %27 : vector<1x1x64x1xbf16> to vector<64x1xbf16>
    %cst_31 = arith.constant dense<0.000000e+00> : vector<80x1xf32>
    %29 = tpu.matmul %26, %28, %cst_31 {dimension_numbers = #tpu.dot_dimension_numbers<[1], [0], [0], [1], [0, 0, 1, 1], [], []>} : vector<80x64xbf16>, vector<64x1xbf16>, vector<80x1xf32> -> vector<80x1xf32>
    %30 = arith.addf %25, %29 : vector<80x1xf32>
    %c2_32 = arith.constant 2 : index
    %c0_33 = arith.constant 0 : index
    %31 = vector.load %arg1[%c2_32, %c0_33] : memref<104x64xbf16, #tpu.memory_space<vmem>>, vector<80x64xbf16>
    %c1_34 = arith.constant 1 : index
    %c1_35 = arith.constant 1 : index
    %c0_36 = arith.constant 0 : index
    %c0_37 = arith.constant 0 : index
    %32 = vector.load %arg2[%c1_34, %c1_35, %c0_36, %c0_37] : memref<4x4x64x1xbf16, #tpu.memory_space<vmem>>, vector<1x1x64x1xbf16>
    %33 = vector.shape_cast %32 : vector<1x1x64x1xbf16> to vector<64x1xbf16>
    %cst_38 = arith.constant dense<0.000000e+00> : vector<80x1xf32>
    %34 = tpu.matmul %31, %33, %cst_38 {dimension_numbers = #tpu.dot_dimension_numbers<[1], [0], [0], [1], [0, 0, 1, 1], [], []>} : vector<80x64xbf16>, vector<64x1xbf16>, vector<80x1xf32> -> vector<80x1xf32>
    %35 = arith.addf %30, %34 : vector<80x1xf32>
    %c11_39 = arith.constant 11 : index
    %c0_40 = arith.constant 0 : index
    %36 = vector.load %arg1[%c11_39, %c0_40] : memref<104x64xbf16, #tpu.memory_space<vmem>>, vector<80x64xbf16>
    %c1_41 = arith.constant 1 : index
    %c2_42 = arith.constant 2 : index
    %c0_43 = arith.constant 0 : index
    %c0_44 = arith.constant 0 : index
    %37 = vector.load %arg2[%c1_41, %c2_42, %c0_43, %c0_44] : memref<4x4x64x1xbf16, #tpu.memory_space<vmem>>, vector<1x1x64x1xbf16>
    %38 = vector.shape_cast %37 : vector<1x1x64x1xbf16> to vector<64x1xbf16>
    %cst_45 = arith.constant dense<0.000000e+00> : vector<80x1xf32>
    %39 = tpu.matmul %36, %38, %cst_45 {dimension_numbers = #tpu.dot_dimension_numbers<[1], [0], [0], [1], [0, 0, 1, 1], [], []>} : vector<80x64xbf16>, vector<64x1xbf16>, vector<80x1xf32> -> vector<80x1xf32>
    %40 = arith.addf %35, %39 : vector<80x1xf32>
    %c12 = arith.constant 12 : index
    %c0_46 = arith.constant 0 : index
    %41 = vector.load %arg1[%c12, %c0_46] : memref<104x64xbf16, #tpu.memory_space<vmem>>, vector<80x64xbf16>
    %c1_47 = arith.constant 1 : index
    %c3_48 = arith.constant 3 : index
    %c0_49 = arith.constant 0 : index
    %c0_50 = arith.constant 0 : index
    %42 = vector.load %arg2[%c1_47, %c3_48, %c0_49, %c0_50] : memref<4x4x64x1xbf16, #tpu.memory_space<vmem>>, vector<1x1x64x1xbf16>
    %43 = vector.shape_cast %42 : vector<1x1x64x1xbf16> to vector<64x1xbf16>
    %cst_51 = arith.constant dense<0.000000e+00> : vector<80x1xf32>
    %44 = tpu.matmul %41, %43, %cst_51 {dimension_numbers = #tpu.dot_dimension_numbers<[1], [0], [0], [1], [0, 0, 1, 1], [], []>} : vector<80x64xbf16>, vector<64x1xbf16>, vector<80x1xf32> -> vector<80x1xf32>
    %45 = arith.addf %40, %44 : vector<80x1xf32>
    %46 = vector.broadcast %0 : vector<1x1xf32> to vector<80x1xf32>
    %47 = arith.addf %45, %46 : vector<80x1xf32>
    %48 = math.tanh %47 : vector<80x1xf32>
    %cst_52 = arith.constant 0.000000e+00 : f32
    %49 = vector.broadcast %cst_52 : f32 to vector<80x1xf32>
    %c10_53 = arith.constant 10 : index
    %c0_54 = arith.constant 0 : index
    %50 = vector.load %arg1[%c10_53, %c0_54] : memref<104x64xbf16, #tpu.memory_space<vmem>>, vector<80x64xbf16>
    %c2_55 = arith.constant 2 : index
    %c0_56 = arith.constant 0 : index
    %c0_57 = arith.constant 0 : index
    %c0_58 = arith.constant 0 : index
    %51 = vector.load %arg2[%c2_55, %c0_56, %c0_57, %c0_58] : memref<4x4x64x1xbf16, #tpu.memory_space<vmem>>, vector<1x1x64x1xbf16>
    %52 = vector.shape_cast %51 : vector<1x1x64x1xbf16> to vector<64x1xbf16>
    %cst_59 = arith.constant dense<0.000000e+00> : vector<80x1xf32>
    %53 = tpu.matmul %50, %52, %cst_59 {dimension_numbers = #tpu.dot_dimension_numbers<[1], [0], [0], [1], [0, 0, 1, 1], [], []>} : vector<80x64xbf16>, vector<64x1xbf16>, vector<80x1xf32> -> vector<80x1xf32>
    %54 = arith.addf %49, %53 : vector<80x1xf32>
    %c11_60 = arith.constant 11 : index
    %c0_61 = arith.constant 0 : index
    %55 = vector.load %arg1[%c11_60, %c0_61] : memref<104x64xbf16, #tpu.memory_space<vmem>>, vector<80x64xbf16>
    %c2_62 = arith.constant 2 : index
    %c1_63 = arith.constant 1 : index
    %c0_64 = arith.constant 0 : index
    %c0_65 = arith.constant 0 : index
    %56 = vector.load %arg2[%c2_62, %c1_63, %c0_64, %c0_65] : memref<4x4x64x1xbf16, #tpu.memory_space<vmem>>, vector<1x1x64x1xbf16>
    %57 = vector.shape_cast %56 : vector<1x1x64x1xbf16> to vector<64x1xbf16>
    %cst_66 = arith.constant dense<0.000000e+00> : vector<80x1xf32>
    %58 = tpu.matmul %55, %57, %cst_66 {dimension_numbers = #tpu.dot_dimension_numbers<[1], [0], [0], [1], [0, 0, 1, 1], [], []>} : vector<80x64xbf16>, vector<64x1xbf16>, vector<80x1xf32> -> vector<80x1xf32>
    %59 = arith.addf %54, %58 : vector<80x1xf32>
    %c20 = arith.constant 20 : index
    %c0_67 = arith.constant 0 : index
    %60 = vector.load %arg1[%c20, %c0_67] : memref<104x64xbf16, #tpu.memory_space<vmem>>, vector<80x64xbf16>
    %c2_68 = arith.constant 2 : index
    %c2_69 = arith.constant 2 : index
    %c0_70 = arith.constant 0 : index
    %c0_71 = arith.constant 0 : index
    %61 = vector.load %arg2[%c2_68, %c2_69, %c0_70, %c0_71] : memref<4x4x64x1xbf16, #tpu.memory_space<vmem>>, vector<1x1x64x1xbf16>
    %62 = vector.shape_cast %61 : vector<1x1x64x1xbf16> to vector<64x1xbf16>
    %cst_72 = arith.constant dense<0.000000e+00> : vector<80x1xf32>
    %63 = tpu.matmul %60, %62, %cst_72 {dimension_numbers = #tpu.dot_dimension_numbers<[1], [0], [0], [1], [0, 0, 1, 1], [], []>} : vector<80x64xbf16>, vector<64x1xbf16>, vector<80x1xf32> -> vector<80x1xf32>
    %64 = arith.addf %59, %63 : vector<80x1xf32>
    %c21 = arith.constant 21 : index
    %c0_73 = arith.constant 0 : index
    %65 = vector.load %arg1[%c21, %c0_73] : memref<104x64xbf16, #tpu.memory_space<vmem>>, vector<80x64xbf16>
    %c2_74 = arith.constant 2 : index
    %c3_75 = arith.constant 3 : index
    %c0_76 = arith.constant 0 : index
    %c0_77 = arith.constant 0 : index
    %66 = vector.load %arg2[%c2_74, %c3_75, %c0_76, %c0_77] : memref<4x4x64x1xbf16, #tpu.memory_space<vmem>>, vector<1x1x64x1xbf16>
    %67 = vector.shape_cast %66 : vector<1x1x64x1xbf16> to vector<64x1xbf16>
    %cst_78 = arith.constant dense<0.000000e+00> : vector<80x1xf32>
    %68 = tpu.matmul %65, %67, %cst_78 {dimension_numbers = #tpu.dot_dimension_numbers<[1], [0], [0], [1], [0, 0, 1, 1], [], []>} : vector<80x64xbf16>, vector<64x1xbf16>, vector<80x1xf32> -> vector<80x1xf32>
    %69 = arith.addf %64, %68 : vector<80x1xf32>
    %70 = vector.broadcast %0 : vector<1x1xf32> to vector<80x1xf32>
    %71 = arith.addf %69, %70 : vector<80x1xf32>
    %72 = math.tanh %71 : vector<80x1xf32>
    %cst_79 = arith.constant 0.000000e+00 : f32
    %73 = vector.broadcast %cst_79 : f32 to vector<80x1xf32>
    %c11_80 = arith.constant 11 : index
    %c0_81 = arith.constant 0 : index
    %74 = vector.load %arg1[%c11_80, %c0_81] : memref<104x64xbf16, #tpu.memory_space<vmem>>, vector<80x64xbf16>
    %c3_82 = arith.constant 3 : index
    %c0_83 = arith.constant 0 : index
    %c0_84 = arith.constant 0 : index
    %c0_85 = arith.constant 0 : index
    %75 = vector.load %arg2[%c3_82, %c0_83, %c0_84, %c0_85] : memref<4x4x64x1xbf16, #tpu.memory_space<vmem>>, vector<1x1x64x1xbf16>
    %76 = vector.shape_cast %75 : vector<1x1x64x1xbf16> to vector<64x1xbf16>
    %cst_86 = arith.constant dense<0.000000e+00> : vector<80x1xf32>
    %77 = tpu.matmul %74, %76, %cst_86 {dimension_numbers = #tpu.dot_dimension_numbers<[1], [0], [0], [1], [0, 0, 1, 1], [], []>} : vector<80x64xbf16>, vector<64x1xbf16>, vector<80x1xf32> -> vector<80x1xf32>
    %78 = arith.addf %73, %77 : vector<80x1xf32>
    %c12_87 = arith.constant 12 : index
    %c0_88 = arith.constant 0 : index
    %79 = vector.load %arg1[%c12_87, %c0_88] : memref<104x64xbf16, #tpu.memory_space<vmem>>, vector<80x64xbf16>
    %c3_89 = arith.constant 3 : index
    %c1_90 = arith.constant 1 : index
    %c0_91 = arith.constant 0 : index
    %c0_92 = arith.constant 0 : index
    %80 = vector.load %arg2[%c3_89, %c1_90, %c0_91, %c0_92] : memref<4x4x64x1xbf16, #tpu.memory_space<vmem>>, vector<1x1x64x1xbf16>
    %81 = vector.shape_cast %80 : vector<1x1x64x1xbf16> to vector<64x1xbf16>
    %cst_93 = arith.constant dense<0.000000e+00> : vector<80x1xf32>
    %82 = tpu.matmul %79, %81, %cst_93 {dimension_numbers = #tpu.dot_dimension_numbers<[1], [0], [0], [1], [0, 0, 1, 1], [], []>} : vector<80x64xbf16>, vector<64x1xbf16>, vector<80x1xf32> -> vector<80x1xf32>
    %83 = arith.addf %78, %82 : vector<80x1xf32>
    %c21_94 = arith.constant 21 : index
    %c0_95 = arith.constant 0 : index
    %84 = vector.load %arg1[%c21_94, %c0_95] : memref<104x64xbf16, #tpu.memory_space<vmem>>, vector<80x64xbf16>
    %c3_96 = arith.constant 3 : index
    %c2_97 = arith.constant 2 : index
    %c0_98 = arith.constant 0 : index
    %c0_99 = arith.constant 0 : index
    %85 = vector.load %arg2[%c3_96, %c2_97, %c0_98, %c0_99] : memref<4x4x64x1xbf16, #tpu.memory_space<vmem>>, vector<1x1x64x1xbf16>
    %86 = vector.shape_cast %85 : vector<1x1x64x1xbf16> to vector<64x1xbf16>
    %cst_100 = arith.constant dense<0.000000e+00> : vector<80x1xf32>
    %87 = tpu.matmul %84, %86, %cst_100 {dimension_numbers = #tpu.dot_dimension_numbers<[1], [0], [0], [1], [0, 0, 1, 1], [], []>} : vector<80x64xbf16>, vector<64x1xbf16>, vector<80x1xf32> -> vector<80x1xf32>
    %88 = arith.addf %83, %87 : vector<80x1xf32>
    %c22 = arith.constant 22 : index
    %c0_101 = arith.constant 0 : index
    %89 = vector.load %arg1[%c22, %c0_101] : memref<104x64xbf16, #tpu.memory_space<vmem>>, vector<80x64xbf16>
    %c3_102 = arith.constant 3 : index
    %c3_103 = arith.constant 3 : index
    %c0_104 = arith.constant 0 : index
    %c0_105 = arith.constant 0 : index
    %90 = vector.load %arg2[%c3_102, %c3_103, %c0_104, %c0_105] : memref<4x4x64x1xbf16, #tpu.memory_space<vmem>>, vector<1x1x64x1xbf16>
    %91 = vector.shape_cast %90 : vector<1x1x64x1xbf16> to vector<64x1xbf16>
    %cst_106 = arith.constant dense<0.000000e+00> : vector<80x1xf32>
    %92 = tpu.matmul %89, %91, %cst_106 {dimension_numbers = #tpu.dot_dimension_numbers<[1], [0], [0], [1], [0, 0, 1, 1], [], []>} : vector<80x64xbf16>, vector<64x1xbf16>, vector<80x1xf32> -> vector<80x1xf32>
    %93 = arith.addf %88, %92 : vector<80x1xf32>
    %94 = vector.broadcast %0 : vector<1x1xf32> to vector<80x1xf32>
    %95 = arith.addf %93, %94 : vector<80x1xf32>
    %96 = math.tanh %95 : vector<80x1xf32>
    %97 = tpu.concatenate %24, %48, %72, %96 in 1 : vector<80x1xf32>, vector<80x1xf32>, vector<80x1xf32>, vector<80x1xf32> -> vector<80x4xf32>
    %c0_107 = arith.constant 0 : index
    %c0_108 = arith.constant 0 : index
    %98 = vector.load %arg4[%c0_107, %c0_108] : memref<80x4xf32, #tpu.memory_space<vmem>>, vector<80x4xf32>
    tpu.vector_store %arg4[%c0_107, %c0_108], %97 {strides = array<i32>} : memref<80x4xf32, #tpu.memory_space<vmem>>, vector<80x4xf32>,
    return
  }
  func.func @transform_0(%arg0: i32) -> (i32, i32) {
    %c0_i32 = arith.constant 0 : i32
    %c0_i32_0 = arith.constant 0 : i32
    return %arg0, %c0_i32 : i32, i32
  }
  func.func @transform_1(%arg0: i32) -> (i32, i32, i32, i32) {
    %c0_i32 = arith.constant 0 : i32
    %c0_i32_0 = arith.constant 0 : i32
    %c0_i32_1 = arith.constant 0 : i32
    %c0_i32_2 = arith.constant 0 : i32
    %c0_i32_3 = arith.constant 0 : i32
    return %c0_i32, %c0_i32_0, %c0_i32_1, %c0_i32_2 : i32, i32, i32, i32
  }
  func.func @transform_2(%arg0: i32) -> (i32, i32) {
    %c0_i32 = arith.constant 0 : i32
    %c0_i32_0 = arith.constant 0 : i32
    %c0_i32_1 = arith.constant 0 : i32
    return %c0_i32, %c0_i32_0 : i32, i32
  }
  func.func @transform_3(%arg0: i32) -> (i32, i32) {
    %c0_i32 = arith.constant 0 : i32
    %c0_i32_0 = arith.constant 0 : i32
    return %arg0, %c0_i32 : i32, i32
  }
}

</mosaic_0001>

<bundles_post_ra>
// kernel: generator_forward.5
= control target key start
LH: loop header
LB: loop body
LE: loop exit
PB: predicated region body
PF: predicated region fallthrough
CT: control target
= control target key end

     0   :  { %s2833_s14 = smov 0   ;;  %s3601_s0 = inlined_call_operand.vmem [shape: bf16[416,64], index: 0, kind: input, shape index: {}]   ;;  %s3602_s1 = inlined_call_operand.vmem [shape: bf16[4,4,64,1], index: 1, kind: input, shape index: {}]   ;;  %s3603_s2 = inlined_call_operand.<no memory space> [shape: f32[1,1], index: 2, kind: input, shape index: {}]   ;;  %s3604_s3 = inlined_call_operand.vmem [shape: f32[320,4], index: 3, kind: output, shape index: {}]  }
   0x1   :  { %v8_v0 = vstv %s3603_s2 }
   0x2   :  { %9 = vst [vmem:[#allocation2] sm:$0x1] %v8_v0 }
   0x3 LB: > { %s2111_s15 = sadd.s32 4294967295, %s2805_s14   ;;  %p2115_p0 = scmp.ge.s32.totalorder %s2805_s14, 1  ;;  %s2805_s14 = sphi %s2833_s14, %s15_s14  }
   0x4   : > { %p140_p1 = scmp.lt.s32.totalorder %s2805_s14, 5 }
   0x6   : > { %p141_p2 = pnand %p2115_p0, %p140_p1 }
   0x7   : > { %s164_s21 = smul.u32 (!%p141_p2), 13, %s2111_s15  ;;  %s2807_s22 = smov (!%p141_p2), 1  }
   0x8   : > { %144 = sbr.rel (%p141_p2) target bundleno = 597 (0x255), region = 32  ;;  %s2809_s23 = smov (!%p141_p2), 3  }
   0x9   : > { %p165_p3 = scmp.lt.s32.totalorder (!%p141_p2), %s164_s21, 51  ;;  %s170_s24 = smul.u32 (!%p141_p2), 10, %s2111_s15 }
   0xb   : > { %p171_p4 = scmp.lt.s32.totalorder (!%p141_p2), %s170_s24, 39 }
   0xd   : > { %v2635_v1 = vld [vmem:[%s3602_s1 + $0x38] sm:$0xff]  ;;  %v2634_v5 = vld [vmem:[%s3602_s1 + $0x30] sm:$0xff]  ;;  %s3606_s21 = smov (!%p165_p3, %s164_s21), 51  ;;  %v2633_v9 = vld [vmem:[%s3602_s1 + $0x28] sm:$0xff]  ;;  %vm234_vm0 = vsmask.f32 7424 }
   0xe   : > { %v2631_v2 = vld [vmem:[%s3602_s1 + $0x18] sm:$0xff]  ;;  %323 = vmatpush.bf16.msra.mxu0 %v2635_v1  ;;  %v2630_v6 = vld [vmem:[%s3602_s1 + $0x10] sm:$0xff]  ;;  %v2629_v10 = vld [vmem:[%s3602_s1 + $0x8] sm:$0xff]  ;;  %s2116_s9 = sshll.u32 %s3606_s21, 2  ;;  %vm469_vm1 = vcmask 1046528   ;;  %vm303_vm2 = vcmask 523264  }
   0xf   : > { %v2643_v3 = vld [vmem:[%s3602_s1 + $0x58] sm:$0xff]  ;;  %391 = vmatpush.bf16.msra.mxu1 %v2631_v2  ;;  %v2642_v7 = vld [vmem:[%s3602_s1 + $0x50] sm:$0xff]  ;;  %v2641_v11 = vld [vmem:[%s3602_s1 + $0x48] sm:$0xff]  ;;  %s2882_s2 = scalar_lea.vmem %s3601_s0, %s2116_s9  ;;  %vm577_vm3 = vsmask.f32 6400  ;;  %vm991_vm4 = vcmask 1045504  }
  0x10   : > { %v2647_v4 = vld [vmem:[%s3602_s1 + $0x78] sm:$0xff]  ;;  %524 = vmatpush.bf16.msra.mxu2 %v2643_v3  ;;  %v2646_v8 = vld [vmem:[%s3602_s1 + $0x70] sm:$0xff]  ;;  %v2645_v12 = vld [vmem:[%s3602_s1 + $0x68] sm:$0xff]  ;;  %vm1395_vm5 = vsmask.f32 5376  ;;  %vm1776_vm6 = vcmask 1044480  }
  0x11   : > { %674 = vmatpush.bf16.msra.mxu3 %v2647_v4  ;;  %v2701_v13 = vld [vmem:[%s2882_s2] sm:$0xff]   ;;  %v2886_v14 = vld [vmem:[%s2882_s2 + $0x8] sm:$0xff]  ;;  %v2659_v33 = vld [vmem:[%s3602_s1 + $0xd8] sm:$0xff]  ;;  %vm2011_vm7 = vcmask 7168   ;;  %vm2022_vm8 = vcmask 15360   ;;  %s3608_s24 = smov (!%p171_p4, %s170_s24), 39 }
  0x12   : > { %324 = vmatpush.bf16.msra.mxu0 %v2634_v5  ;;  %v421_v15 = vld [vmem:[%s2882_s2 + $0x4] sm:$0xe]  ;;  %v236_v16 = vshrl.u32 %v2701_v13, 16  ;;  %v238_v17 = vshll.u32 %v2701_v13, 16  ;;  %v2890_v18 = vld [vmem:[%s2882_s2 + $0x8] sm:$0xf] }
  0x13   : > { %392 = vmatpush.bf16.msra.mxu1 %v2630_v6  ;;  %v2893_v19 = vld [vmem:[%s2882_s2 + $0xc] sm:$0xff]  ;;  %v452_v20 = vunpack.c.l.b16 %v421_v15  ;;  %v2632_v21 = vld [vmem:[%s3602_s1 + $0x20] sm:$0xff]  ;;  %v243_v23 = vshll.u32 %v2886_v14, 16  ;;  %v453_v24 = vunpack.c.l.b16 %v2890_v18  ;;  %v2663_v34 = vld [vmem:[%s3602_s1 + $0xf8] sm:$0xff]  ;;  %v247_v58 = vshrl.u32 %v2886_v14, 16  ;;  %s2117_s25 = sshll.u32 %s3608_s24, 3 }
  0x14   : > { %525 = vmatpush.bf16.msra.mxu2 %v2642_v7  ;;  %v2628_v22 = vld [vmem:[%s3602_s1] sm:$0xff]  ;;  %v240_v27 = vrot.slane %v238_v17, 1  ;;  %v587_v28 = vshrl.u32 %v2893_v19, 16  ;;  %v590_v29 = vshll.u32 %v2893_v19, 16  ;;  %v471_v32 = vrot.slane %v2893_v19, 1  ;;  %v2655_v41 = vld [vmem:[%s3602_s1 + $0xb8] sm:$0xff]  ;;  %s3536_s28 = scalar_lea.vmem %s3604_s3, %s2117_s25 }
  0x15   : > { %675 = vmatpush.bf16.msra.mxu3 %v2646_v8  ;;  %v2640_v25 = vld [vmem:[%s3602_s1 + $0x40] sm:$0xff]  ;;  %v245_v30 = vrot.slane %v243_v23, 1  ;;  %v463_v31 = vpack.c.b16 %v453_v24, %v452_v20  ;;  %v2651_v43 = vld [vmem:[%s3602_s1 + $0x98] sm:$0xff]  ;;  %v2658_v48 = vld [vmem:[%s3602_s1 + $0xd0] sm:$0xff]  ;;  %vm2033_vm9 = vcmask 23552   ;;  %vm2044_vm10 = vcmask 31744  }
  0x16   : > { %325 = vmatpush.bf16.msra.mxu0 %v2633_v9  ;;  %v2644_v26 = vld [vmem:[%s3602_s1 + $0x60] sm:$0xff]  ;;  %v241_v35 = vor.u32 %v240_v27, %v236_v16  ;;  %v589_v36 = vrot.slane %v587_v28, 1  ;;  %v592_v37 = vrot.slane %v590_v29, 2  ;;  %v2662_v49 = vld [vmem:[%s3602_s1 + $0xf0] sm:$0xff]  ;;  %v2657_v56 = vld [vmem:[%s3602_s1 + $0xc8] sm:$0xff] }
  0x17   : > { %393 = vmatpush.bf16.msra.mxu1 %v2629_v10  ;;  %v470_v38 = vrot.slane %v463_v31, 1  ;;  %v579_v39 = vshrl.u32 %v463_v31, 16  ;;  %v582_v40 = vshll.u32 %v463_v31, 16  ;;  %v2946_v51 = vld [vmem:[%s2882_s2 + $0x10] sm:$0xff]  ;;  %v2661_v57 = vld [vmem:[%s3602_s1 + $0xe8] sm:$0xff]  ;;  %v249_v0 = vor.u32 %v247_v58, %v245_v30  ;;  %v2997_v9 = vld [vmem:[%s2882_s2 + $0x18] sm:$0xff] }
  0x18   : > { %526 = vmatpush.bf16.msra.mxu2 %v2641_v11  ;;  %v2924_v42 = vsel %vm234_vm0, %v241_v35, %v245_v30  ;;  %v593_v47 = vor.u32 %v592_v37, %v589_v36  ;;  %v2949_v52 = vld [vmem:[%s2882_s2 + $0x14] sm:$0xff]  ;;  %v251_v59 = vshll.u32 %v2946_v51, 16  ;;  %v2653_v62 = vld [vmem:[%s3602_s1 + $0xa8] sm:$0xff]  ;;  %v3000_v10 = vld [vmem:[%s2882_s2 + $0x1c] sm:$0xff]  ;;  %v259_v15 = vshll.u32 %v2997_v9, 16 }
  0x19   : > { %676 = vmatpush.bf16.msra.mxu3 %v2645_v12  ;;  %v2932_v44 = vsel %vm469_vm1, %v470_v38, %v471_v32  ;;  %v581_v45 = vrot.slane %v579_v39, 1  ;;  %v584_v46 = vrot.slane %v582_v40, 2  ;;  %v2654_v53 = vld [vmem:[%s3602_s1 + $0xb0] sm:$0xff]  ;;  %v596_v60 = vshrl.u32 %v2949_v52, 16  ;;  %v2649_v63 = vld [vmem:[%s3602_s1 + $0x88] sm:$0xff]  ;;  %v2656_v11 = vld [vmem:[%s3602_s1 + $0xc0] sm:$0xff] }
  0x1a   : > { %326 = vmatpush.bf16.msra.mxu0 %v2632_v21  ;;  %v2650_v54 = vld [vmem:[%s3602_s1 + $0x90] sm:$0xff]  ;;  %v599_v61 = vshll.u32 %v2949_v52, 16  ;;  %v253_v1 = vrot.slane %v251_v59, 1  ;;  %v473_v4 = vrot.slane %v2949_v52, 1  ;;  %v2660_v12 = vld [vmem:[%s3602_s1 + $0xe0] sm:$0xff]  ;;  %v605_v16 = vshrl.u32 %v3000_v10, 16 }
  0x1b   : > { %394 = vmatpush.bf16.msra.mxu1 %v2628_v22  ;;  %v585_v50 = vor.u32 %v584_v46, %v581_v45  ;;  %v598_v2 = vrot.slane %v596_v60, 1  ;;  %v608_v17 = vshll.u32 %v3000_v10, 16  ;;  %v261_v21 = vrot.slane %v259_v15, 1  ;;  %v3026_v29 = vld [vmem:[%s2882_s2 + $0x24] sm:$0xff]  ;;  %v564_v46 = vld [vmem:[%s2882_s2 + $0x2c] sm:$0x3] }
  0x1c   : > { %527 = vmatpush.bf16.msra.mxu2 %v2640_v25  ;;  %v601_v3 = vrot.slane %v599_v61, 2  ;;  %v2980_v5 = vsel %vm234_vm0, %v249_v0, %v253_v1  ;;  %v2985_v7 = vsel %vm469_vm1, %v471_v32, %v473_v4  ;;  %v607_v22 = vrot.slane %v605_v16, 1  ;;  %v3034_v31 = vld [vmem:[%s2882_s2 + $0x20] sm:$0xff]  ;;  %v2679_v18 = vld [vmem:[%s3602_s1 + $0x158] sm:$0xff] }
  0x1d   : > { %677 = vmatpush.bf16.msra.mxu3 %v2644_v26  ;;  %2158 = vmatmul.msk.bf16.vlgmr.msra.gmra.mxu0 %vm303_vm2, %v2924_v42  ;;  %v2958_v55 = vsel %vm577_vm3, %v585_v50, %v593_v47  ;;  %v610_v23 = vrot.slane %v608_v17, 2  ;;  %v475_v25 = vrot.slane %v3000_v10, 1  ;;  %v2652_v32 = vld [vmem:[%s3602_s1 + $0xa0] sm:$0xff]  ;;  %v617_v35 = vshll.u32 %v3026_v29, 16 }
  0x1e   : > { %2179 = vmatmul.msk.bf16.vlgmr.msra.gmra.mxu1 %vm303_vm2, %v2701_v13  ;;  %813 = vmatpush.bf16.msrb.mxu0 %v2655_v41  ;;  %v602_v6 = vor.u32 %v601_v3, %v598_v2  ;;  %v255_v13 = vshrl.u32 %v2946_v51, 16  ;;  %v263_v36 = vshrl.u32 %v2997_v9, 16  ;;  %v267_v37 = vshll.u32 %v3034_v31, 16  ;;  %v2683_v2 = vld [vmem:[%s3602_s1 + $0x178] sm:$0xff] }
  0x1f   : > { %2224 = vmatmul.msk.bf16.vlgmr.msra.gmra.mxu2 %vm303_vm2, %v2932_v44  ;;  %871 = vmatpush.bf16.msrb.mxu1 %v2651_v43  ;;  %v611_v27 = vor.u32 %v610_v23, %v607_v22  ;;  %v3019_v28 = vsel %vm469_vm1, %v473_v4, %v475_v25  ;;  %v619_v39 = vrot.slane %v617_v35, 2  ;;  %v196_v43 = vld [vmem:[%s2882_s2 + $0x28] sm:$0x1]  ;;  %v477_v45 = vrot.slane %v3026_v29, 1  ;;  %v2671_v3 = vld [vmem:[%s3602_s1 + $0x138] sm:$0xff]  ;;  %v2682_v35 = vld [vmem:[%s3602_s1 + $0x170] sm:$0xff] }
  0x20   : > { %938 = vmatpush.bf16.msrb.mxu2 %v2659_v33  ;;  %2253 = vmatmul.msk.bf16.vlgmr.msra.gmra.mxu3 %vm303_vm2, %v2958_v55  ;;  %v2994_v8 = vsel %vm577_vm3, %v593_v47, %v602_v6  ;;  %v257_v20 = vor.u32 %v255_v13, %v253_v1  ;;  %v2648_v33 = vld [vmem:[%s3602_s1 + $0x80] sm:$0xff]  ;;  %v265_v40 = vor.u32 %v263_v36, %v261_v21  ;;  %v269_v41 = vrot.slane %v267_v37, 1  ;;  %v2670_v36 = vld [vmem:[%s3602_s1 + $0x130] sm:$0xff] }
  0x21   : > { %1046 = vmatpush.bf16.msrb.mxu3 %v2663_v34  ;;  %v3031_v30 = vsel %vm577_vm3, %v602_v6, %v611_v27  ;;  %v614_v34 = vshrl.u32 %v3026_v29, 16  ;;  %v760_v1 = vrot.slane %v2886_v14, 1  ;;  %v762_v4 = vrot.slane %v2946_v51, 1 }
  0x22   : > { %814 = vmatpush.bf16.msrb.mxu0 %v2654_v53  ;;  %v3016_v26 = vsel %vm234_vm0, %v257_v20, %v261_v21  ;;  %v3053_v50 = vsel %vm234_vm0, %v265_v40, %v269_v41  ;;  %v575_v53 = vunpack.c.l.b16 %v564_v46  ;;  %v271_v6 = vshrl.u32 %v3034_v31, 16 }
  0x23   : > { %872 = vmatpush.bf16.msrb.mxu1 %v2650_v54  ;;  %v616_v38 = vrot.slane %v614_v34, 1  ;;  %v763_v15 = vsel %vm469_vm1, %v760_v1, %v762_v4  ;;  %v2678_v34 = vld [vmem:[%s3602_s1 + $0x150] sm:$0xff]  ;;  %v995_v46 = vrot.slane %v2949_v52, 2  ;;  %v997_v52 = vrot.slane %v3000_v10, 2  ;;  %v2668_v10 = vld [vmem:[%s3602_s1 + $0x120] sm:$0xff] }
  0x24   : > { %939 = vmatpush.bf16.msrb.mxu2 %v2658_v48  ;;  %v227_v48 = vunpack.c.l.b16 %v196_v43  ;;  %v3072_v61 = vpack.c.b16 %v575_v53, %v575_v53  ;;  %v273_v16 = vor.u32 %v271_v6, %v269_v41  ;;  %v2677_v41 = vld [vmem:[%s3602_s1 + $0x148] sm:$0xff]  ;;  %v2676_v53 = vld [vmem:[%s3602_s1 + $0x140] sm:$0xff] }
  0x25   : > { %1047 = vmatpush.bf16.msrb.mxu3 %v2662_v49  ;;  %v620_v47 = vor.u32 %v619_v39, %v616_v38  ;;  %v978_v49 = vld [vmem:[%s2882_s2 + $0x4] sm:$0xc]  ;;  %v2666_v38 = vld [vmem:[%s3602_s1 + $0x110] sm:$0xff]  ;;  %v2681_v43 = vld [vmem:[%s3602_s1 + $0x168] sm:$0xff] }
  0x26   : > { %815 = vmatpush.bf16.msrb.mxu0 %v2653_v62  ;;  %v989_v54 = vunpack.c.l.b16 %v978_v49  ;;  %v3068_v60 = vpack.c.b16 %v227_v48, %v227_v48  ;;  %v993_v62 = vrot.slane %v2893_v19, 2  ;;  %v2667_v19 = vld [vmem:[%s3602_s1 + $0x118] sm:$0xff]  ;;  %v764_v48 = vrot.slane %v2997_v9, 1 }
  0x27   : > { %873 = vmatpush.bf16.msrb.mxu1 %v2649_v63  ;;  %v3066_v59 = vsel %vm577_vm3, %v611_v27, %v620_v47 }
  0x28   : > { %940 = vmatpush.bf16.msrb.mxu2 %v2657_v56  ;;  %v3056_v56 = vsel %vm469_vm1, %v475_v25, %v477_v45  ;;  %v990_v58 = vpack.c.b16 %v453_v24, %v989_v54  ;;  %v765_v49 = vsel %vm469_vm1, %v762_v4, %v764_v48  ;;  %v766_v54 = vrot.slane %v3034_v31, 1  ;;  %v2687_v4 = vld [vmem:[%s3602_s1 + $0x198] sm:$0xff] }
  0x29   : > { %1048 = vmatpush.bf16.msrb.mxu3 %v2661_v57  ;;  %v431_v57 = vld [vmem:[%s2882_s2 + $0x2c] sm:$0x1] }
  0x2a   : > { %816 = vmatpush.bf16.msrb.mxu0 %v2652_v32  ;;  %v992_v24 = vrot.slane %v990_v58, 2  ;;  %v462_v63 = vunpack.c.l.b16 %v431_v57  ;;  %v2704_v32 = vld [vmem:[%s2882_s2] sm:$0xf0] }
  0x2b   : > { %874 = vmatpush.bf16.msrb.mxu1 %v2648_v33  ;;  %v2705_v33 = vld [vmem:[%s2882_s2] sm:$0xe] }
  0x2c   : > { %941 = vmatpush.bf16.msrb.mxu2 %v2656_v11  ;;  %v3079_v0 = vsel %vm991_vm4, %v992_v24, %v993_v62  ;;  %v275_v11 = vshll.u32 %v3068_v60, 16  ;;  %v468_v13 = vpack.c.b16 %v462_v63, %v462_v63  ;;  %v2706_v37 = vor.u32 %v2705_v33, %v2704_v32 }
  0x2d   : > { %2159 = vmatmul.msk.bf16.gmra.mxu0 %vm303_vm2, %v2980_v5  ;;  %1049 = vmatpush.bf16.msrb.mxu3 %v2660_v12  ;;  %v626_v12 = vshll.u32 %v3072_v61, 16  ;;  %v999_v24 = vrot.slane %v3026_v29, 2  ;;  %v2695_v29 = vld [vmem:[%s3602_s1 + $0x1d8] sm:$0xff]  ;;  %v1001_v33 = vrot.slane %v3072_v61, 2 }
  0x2e   : > { %2180 = vmatmul.msk.bf16.gmra.mxu1 %vm303_vm2, %v2886_v14  ;;  %v623_v14 = vshrl.u32 %v3072_v61, 16  ;;  %1152 = vmatpush.bf16.msra.mxu0 %v2671_v3  ;;  %v277_v17 = vrot.slane %v275_v11, 1  ;;  %v479_v21 = vrot.slane %v468_v13, 1  ;;  %v759_v39 = vrot.slane %v2706_v37, 1  ;;  %v1240_v13 = vld [vmem:[%s2882_s2 + $0x8] sm:$0xc] }
  0x2f   : > { %2225 = vmatmul.msk.bf16.gmra.mxu2 %vm303_vm2, %v2985_v7  ;;  %1210 = vmatpush.bf16.msra.mxu1 %v2667_v19  ;;  %v3195_v63 = vsel %vm991_vm4, %v997_v52, %v999_v24  ;;  %v2691_v19 = vld [vmem:[%s3602_s1 + $0x1b8] sm:$0xff]  ;;  %v3231_v37 = vsel %vm991_vm4, %v999_v24, %v1001_v33  ;;  %v2690_v24 = vld [vmem:[%s3602_s1 + $0x1b0] sm:$0xff] }
  0x30   : > { %2254 = vmatmul.msk.bf16.gmra.mxu3 %vm303_vm2, %v2994_v8  ;;  %1342 = vmatpush.bf16.msra.mxu2 %v2679_v18  ;;  %v625_v20 = vrot.slane %v623_v14, 1  ;;  %v3100_v22 = vsel %vm234_vm0, %v273_v16, %v277_v17  ;;  %v3103_v25 = vsel %vm469_vm1, %v477_v45, %v479_v21  ;;  %v761_v40 = vsel %vm469_vm1, %v759_v39, %v760_v1  ;;  %v2669_v45 = vld [vmem:[%s3602_s1 + $0x128] sm:$0xff] }
  0x31   : > { %1492 = vmatpush.bf16.msra.mxu3 %v2683_v2  ;;  %v767_v18 = vsel %vm469_vm1, %v764_v48, %v766_v54  ;;  %v1271_v17 = vunpack.c.l.b16 %v1240_v13 }
  0x32   : > { %1153 = vmatpush.bf16.msra.mxu0 %v2670_v36 }
  0x33   : > { %1211 = vmatpush.bf16.msra.mxu1 %v2666_v38  ;;  %v3234_v38 = vld [vmem:[%s2882_s2 + $0x10] sm:$0xff] }
  0x34   : > { %1343 = vmatpush.bf16.msra.mxu2 %v2678_v34 }
  0x35   : > { %1493 = vmatpush.bf16.msra.mxu3 %v2682_v35 }
  0x36   : > { %1154 = vmatpush.bf16.msra.mxu0 %v2669_v45  ;;  %v1405_v45 = vshrl.u32 %v3234_v38, 16 }
  0x38   : > { %1344 = vmatpush.bf16.msra.mxu2 %v2677_v41 }
  0x39   : > { %1494 = vmatpush.bf16.msra.mxu3 %v2681_v43 }
  0x3a   : > { %1155 = vmatpush.bf16.msra.mxu0 %v2668_v10  ;;  %v1407_v10 = vrot.slane %v1405_v45, 2 }
  0x3c   : > { %1345 = vmatpush.bf16.msra.mxu2 %v2676_v53 }
  0x3d   : > { %2160 = vmatmul.msk.bf16.gmra.mxu0 %vm303_vm2, %v3016_v26 }
  0x3e   : > { %2181 = vmatmul.msk.bf16.gmra.mxu1 %vm303_vm2, %v2946_v51  ;;  %v628_v51 = vrot.slane %v626_v12, 2  ;;  %v768_v12 = vrot.slane %v3068_v60, 1 }
  0x3f   : > { %2226 = vmatmul.msk.bf16.gmra.mxu2 %vm303_vm2, %v3019_v28 }
  0x40   : > { %2255 = vmatmul.msk.bf16.gmra.mxu3 %vm303_vm2, %v3031_v30  ;;  %v629_v23 = vor.u32 %v628_v51, %v625_v20  ;;  %v769_v32 = vsel %vm469_vm1, %v766_v54, %v768_v12  ;;  %v3267_v12 = vld [vmem:[%s2882_s2 + $0x18] sm:$0xff] }
  0x42   : > { %v3112_v27 = vsel %vm577_vm3, %v620_v47, %v629_v23  ;;  %v3157_v47 = vsel %vm991_vm4, %v993_v62, %v995_v46 }
  0x4d   : > { %2161 = vmatmul.msk.bf16.gmra.mxu0 %vm303_vm2, %v3053_v50 }
  0x4e   : > { %2182 = vmatmul.msk.bf16.gmra.mxu1 %vm303_vm2, %v2997_v9  ;;  %v2680_v9 = vld [vmem:[%s3602_s1 + $0x160] sm:$0xff] }
  0x4f   : > { %2227 = vmatmul.msk.bf16.gmra.mxu2 %vm303_vm2, %v3056_v56  ;;  %1495 = vmatpush.bf16.msra.mxu3 %v2680_v9 }
  0x50   : > { %2256 = vmatmul.msk.bf16.gmra.mxu3 %vm303_vm2, %v3066_v59 }
  0x5d   : > { %2162 = vmatmul.msk.bf16.gmra.mxu0 %vm303_vm2, %v3100_v22 }
  0x5e   : > { %2183 = vmatmul.msk.bf16.gmra.mxu1 %vm303_vm2, %v3034_v31 }
  0x5f   : > { %2228 = vmatmul.msk.bf16.gmra.mxu2 %vm303_vm2, %v3103_v25 }
  0x60   : > { %2257 = vmatmul.msk.bf16.gmra.mxu3 %vm303_vm2, %v3112_v27 }
  0x6d   : > { %2290 = vmatmul.msk.bf16.vlgmr.msrb.gmra.mxu0 %vm303_vm2, %v761_v40 }
  0x6e   : > { %2311 = vmatmul.msk.bf16.vlgmr.msrb.gmra.mxu1 %vm303_vm2, %v2924_v42  ;;  %v2665_v42 = vld [vmem:[%s3602_s1 + $0x108] sm:$0xff]  ;;  %1598 = vmatpush.bf16.msrb.mxu0 %v2691_v19 }
  0x6f   : > { %2340 = vmatmul.msk.bf16.vlgmr.msrb.gmra.mxu2 %vm303_vm2, %v2958_v55  ;;  %1212 = vmatpush.bf16.msra.mxu1 %v2665_v42  ;;  %v1408_v42 = vshll.u32 %v3234_v38, 16 }
  0x70   : > { %2369 = vmatmul.msk.bf16.vlgmr.msrb.gmra.mxu3 %vm303_vm2, %v3079_v0  ;;  %1723 = vmatpush.bf16.msrb.mxu2 %v2695_v29 }
  0x72   : > { %1599 = vmatpush.bf16.msrb.mxu0 %v2690_v24 }
  0x7d   : > { %2291 = vmatmul.msk.bf16.gmra.mxu0 %vm303_vm2, %v763_v15  ;;  %v3216_v15 = vld [vmem:[%s2882_s2 + $0xc] sm:$0xf] }
  0x7e   : > { %2312 = vmatmul.msk.bf16.gmra.mxu1 %vm303_vm2, %v2980_v5  ;;  %v3173_v5 = vsel %vm991_vm4, %v995_v46, %v997_v52  ;;  %v1272_v20 = vunpack.c.l.b16 %v3216_v15  ;;  %v2694_v46 = vld [vmem:[%s3602_s1 + $0x1d0] sm:$0xff] }
  0x7f   : > { %2341 = vmatmul.msk.bf16.gmra.mxu2 %vm303_vm2, %v2994_v8 }
  0x80   : > { %2370 = vmatmul.msk.bf16.gmra.mxu3 %vm303_vm2, %v3157_v47  ;;  %v1282_v60 = vpack.c.b16 %v1272_v20, %v1271_v17  ;;  %1724 = vmatpush.bf16.msrb.mxu2 %v2694_v46  ;;  %v2685_v46 = vld [vmem:[%s3602_s1 + $0x188] sm:$0xff] }
  0x82   : > { %v1397_v39 = vshrl.u32 %v1282_v60, 16  ;;  %v1288_v54 = vrot.slane %v1282_v60, 2 }
  0x84   : > { %v1399_v53 = vrot.slane %v1397_v39, 2  ;;  %v2693_v39 = vld [vmem:[%s3602_s1 + $0x1c8] sm:$0xff] }
  0x85   : > { %1725 = vmatpush.bf16.msrb.mxu2 %v2693_v39 }
  0x8d   : > { %2292 = vmatmul.msk.bf16.gmra.mxu0 %vm303_vm2, %v765_v49 }
  0x8e   : > { %2313 = vmatmul.msk.bf16.gmra.mxu1 %vm303_vm2, %v3016_v26  ;;  %v2664_v26 = vld [vmem:[%s3602_s1 + $0x100] sm:$0xff] }
  0x8f   : > { %2342 = vmatmul.msk.bf16.gmra.mxu2 %vm303_vm2, %v3031_v30  ;;  %1213 = vmatpush.bf16.msra.mxu1 %v2664_v26  ;;  %v1410_v26 = vrot.slane %v1408_v42, 3  ;;  %v2689_v42 = vld [vmem:[%s3602_s1 + $0x1a8] sm:$0xff] }
  0x90   : > { %2371 = vmatmul.msk.bf16.gmra.mxu3 %vm303_vm2, %v3173_v5  ;;  %1600 = vmatpush.bf16.msrb.mxu0 %v2689_v42 }
  0x93   : > { %1656 = vmatpush.bf16.msrb.mxu1 %v2687_v4 }
  0x9a   : > { %v328_v57 = vpop.f32.mrf.mxu0 }
  0x9b   : > { %v396_v58 = vpop.f32.mrf.mxu1 }
  0x9c   : > { %v397_v62 = vadd.f32 %v396_v58, %v328_v57  ;;  %v1289_v57 = vrot.slane %v3234_v38, 2 }
  0x9d   : > { %2293 = vmatmul.msk.bf16.gmra.mxu0 %vm303_vm2, %v767_v18  ;;  %v2698_v18 = vld [vmem:[%s3602_s1 + $0x1f0] sm:$0xff] }
  0x9e   : > { %2314 = vmatmul.msk.bf16.gmra.mxu1 %vm303_vm2, %v3053_v50  ;;  %v2699_v50 = vld [vmem:[%s3602_s1 + $0x1f8] sm:$0xff]  ;;  %v1290_v19 = vsel %vm991_vm4, %v1288_v54, %v1289_v57 }
  0x9f   : > { %2343 = vmatmul.msk.bf16.gmra.mxu2 %vm303_vm2, %v3066_v59  ;;  %1831 = vmatpush.bf16.msrb.mxu3 %v2699_v50 }
  0xa0   : > { %2372 = vmatmul.msk.bf16.gmra.mxu3 %vm303_vm2, %v3195_v63 }
  0xa2   : > { %v529_v31 = vpop.f32.mrf.mxu2  ;;  %v330_v2 = vpop.f32.mrf.mxu0 }
  0xa3   : > { %v554_v1 = vadd.f32 %v529_v31, %v397_v62  ;;  %v398_v3 = vpop.f32.mrf.mxu1  ;;  %v679_v11 = vpop.f32.mrf.mxu3  ;;  %v2686_v62 = vld [vmem:[%s3602_s1 + $0x190] sm:$0xff]  ;;  %1832 = vmatpush.bf16.msrb.mxu3 %v2698_v18 }
  0xa4   : > { %v399_v6 = vadd.f32 %v398_v3, %v330_v2  ;;  %v1411_v2 = vor.u32 %v1410_v26, %v1407_v10  ;;  %1657 = vmatpush.bf16.msrb.mxu1 %v2686_v62  ;;  %v3300_v26 = vld [vmem:[%s2882_s2 + $0x20] sm:$0xff] }
  0xa5   : > { %v3211_v14 = vadd.f32 %v679_v11, %v554_v1  ;;  %v1423_v24 = vshrl.u32 %v3300_v26, 16  ;;  %v1426_v62 = vshll.u32 %v3300_v26, 16 }
  0xa8   : > { %1658 = vmatpush.bf16.msrb.mxu1 %v2685_v46 }
  0xaa   : > { %v531_v16 = vpop.f32.mrf.mxu2  ;;  %v333_v21 = vpop.f32.mrf.mxu0 }
  0xab   : > { %v555_v51 = vadd.f32 %v531_v16, %v399_v6  ;;  %v401_v23 = vpop.f32.mrf.mxu1  ;;  %v681_v35 = vpop.f32.mrf.mxu3 }
  0xac   : > { %v402_v34 = vadd.f32 %v401_v23, %v333_v21  ;;  %v1414_v21 = vshrl.u32 %v3267_v12, 16  ;;  %v1417_v23 = vshll.u32 %v3267_v12, 16 }
  0xad   : > { %v3221_v36 = vadd.f32 %v681_v35, %v555_v51  ;;  %2294 = vmatmul.msk.bf16.gmra.mxu0 %vm303_vm2, %v769_v32 }
  0xae   : > { %2315 = vmatmul.msk.bf16.gmra.mxu1 %vm303_vm2, %v3100_v22  ;;  %v1400_v22 = vshll.u32 %v1282_v60, 16  ;;  %v1419_v35 = vrot.slane %v1417_v23, 3  ;;  %v1291_v60 = vrot.slane %v3267_v12, 2 }
  0xaf   : > { %2344 = vmatmul.msk.bf16.gmra.mxu2 %vm303_vm2, %v3112_v27 }
  0xb0   : > { %2373 = vmatmul.msk.bf16.gmra.mxu3 %vm303_vm2, %v3231_v37  ;;  %v1402_v9 = vrot.slane %v1400_v22, 3 }
  0xb2   : > { %v534_v61 = vpop.f32.mrf.mxu2  ;;  %v335_v41 = vpop.f32.mrf.mxu0  ;;  %v1403_v1 = vor.u32 %v1402_v9, %v1399_v53 }
  0xb3   : > { %v556_v40 = vadd.f32 %v534_v61, %v402_v34  ;;  %v403_v43 = vpop.f32.mrf.mxu1  ;;  %v684_v49 = vpop.f32.mrf.mxu3  ;;  %v1416_v34 = vrot.slane %v1414_v21, 2 }
  0xb4   : > { %v404_v48 = vadd.f32 %v403_v43, %v335_v41  ;;  %v3264_v11 = vsel %vm1395_vm5, %v1403_v1, %v1411_v2  ;;  %v1428_v1 = vrot.slane %v1426_v62, 3 }
  0xb5   : > { %v3243_v52 = vadd.f32 %v684_v49, %v556_v40  ;;  %v2697_v40 = vld [vmem:[%s3602_s1 + $0x1e8] sm:$0xff]  ;;  %v1420_v45 = vor.u32 %v1419_v35, %v1416_v34  ;;  %v1292_v49 = vsel %vm991_vm4, %v1289_v57, %v1291_v60 }
  0xb6   : > { %1833 = vmatpush.bf16.msrb.mxu3 %v2697_v40  ;;  %v3324_v34 = vld [vmem:[%s2882_s2 + $0x28] sm:$0xff] }
  0xb7   : > { %v3297_v10 = vsel %vm1395_vm5, %v1411_v2, %v1420_v45  ;;  %v1293_v2 = vrot.slane %v3300_v26, 2 }
  0xb9   : > { %v1294_v21 = vsel %vm991_vm4, %v1291_v60, %v1293_v2  ;;  %v2696_v60 = vld [vmem:[%s3602_s1 + $0x1e0] sm:$0xff] }
  0xba   : > { %v536_v58 = vpop.f32.mrf.mxu2  ;;  %v338_v29 = vpop.f32.mrf.mxu0  ;;  %1834 = vmatpush.bf16.msrb.mxu3 %v2696_v60 }
  0xbb   : > { %v557_v31 = vadd.f32 %v536_v58, %v404_v48  ;;  %v406_v50 = vpop.f32.mrf.mxu1  ;;  %v686_v4 = vpop.f32.mrf.mxu3 }
  0xbc   : > { %v407_v3 = vadd.f32 %v406_v50, %v338_v29  ;;  %v1425_v50 = vrot.slane %v1423_v24, 2 }
  0xbd   : > { %v3256_v6 = vadd.f32 %v686_v4, %v557_v31  ;;  %2406 = vmatmul.msk.bf16.vlgmr.msra.gmra.mxu0 %vm303_vm2, %v2958_v55 }
  0xbe   : > { %2427 = vmatmul.msk.bf16.vlgmr.msra.gmra.mxu1 %vm303_vm2, %v2932_v44 }
  0xbf   : > { %2472 = vmatmul.msk.bf16.vlgmr.msra.gmra.mxu2 %vm303_vm2, %v1290_v19 }
  0xc0   : > { %2501 = vmatmul.msk.bf16.vlgmr.msra.gmra.mxu3 %vm303_vm2, %v3264_v11 }
  0xc2   : > { %v539_v13 = vpop.f32.mrf.mxu2  ;;  %v340_v17 = vpop.f32.mrf.mxu0 }
  0xc3   : > { %v558_v16 = vadd.f32 %v539_v13, %v407_v3  ;;  %v408_v51 = vpop.f32.mrf.mxu1  ;;  %v689_v44 = vpop.f32.mrf.mxu3 }
  0xc4   : > { %v409_v32 = vadd.f32 %v408_v51, %v340_v17  ;;  %v2692_v17 = vld [vmem:[%s3602_s1 + $0x1c0] sm:$0xff] }
  0xc5   : > { %v3273_v33 = vadd.f32 %v689_v44, %v558_v16  ;;  %v1429_v16 = vor.u32 %v1428_v1, %v1425_v50  ;;  %1726 = vmatpush.bf16.msrb.mxu2 %v2692_v17  ;;  %v1250_v1 = vld [vmem:[%s2882_s2 + $0x30] sm:$0x3] }
  0xc6   : > { %v1281_v17 = vunpack.c.l.b16 %v1250_v1  ;;  %v1763_v1 = vld [vmem:[%s2882_s2 + $0x8] sm:$0x8] }
  0xc7   : > { %v3321_v44 = vsel %vm1395_vm5, %v1420_v45, %v1429_v16 }
  0xc8   : > { %v1287_v60 = vpack.c.b16 %v1281_v17, %v1281_v17 }
  0xca   : > { %v541_v61 = vpop.f32.mrf.mxu2  ;;  %v343_v43 = vpop.f32.mrf.mxu0 }
  0xcb   : > { %v559_v41 = vadd.f32 %v541_v61, %v409_v32  ;;  %v411_v22 = vpop.f32.mrf.mxu1  ;;  %v691_v53 = vpop.f32.mrf.mxu3  ;;  %v2688_v61 = vld [vmem:[%s3602_s1 + $0x1a0] sm:$0xff] }
  0xcc   : > { %v412_v48 = vadd.f32 %v411_v22, %v343_v43  ;;  %v1432_v43 = vshrl.u32 %v3324_v34, 16  ;;  %v1435_v22 = vshll.u32 %v3324_v34, 16  ;;  %1601 = vmatpush.bf16.msrb.mxu0 %v2688_v61 }
  0xcd   : > { %v3289_v9 = vadd.f32 %v691_v53, %v559_v41  ;;  %2407 = vmatmul.msk.bf16.gmra.mxu0 %vm303_vm2, %v2994_v8  ;;  %v1295_v53 = vrot.slane %v3324_v34, 2 }
  0xce   : > { %2428 = vmatmul.msk.bf16.gmra.mxu1 %vm303_vm2, %v2985_v7 }
  0xcf   : > { %2473 = vmatmul.msk.bf16.gmra.mxu2 %vm303_vm2, %v1292_v49  ;;  %v1437_v49 = vrot.slane %v1435_v22, 3 }
  0xd0   : > { %2502 = vmatmul.msk.bf16.gmra.mxu3 %vm303_vm2, %v3297_v10 }
  0xd2   : > { %v544_v54 = vpop.f32.mrf.mxu2  ;;  %v345_v58 = vpop.f32.mrf.mxu0 }
  0xd3   : > { %v560_v57 = vadd.f32 %v544_v54, %v412_v48  ;;  %v413_v18 = vpop.f32.mrf.mxu1  ;;  %v694_v7 = vpop.f32.mrf.mxu3  ;;  %v1434_v48 = vrot.slane %v1432_v43, 2  ;;  %v1382_v54 = vld [vmem:[%s2882_s2 + $0x30] sm:$0x7]  ;;  %v1297_v43 = vrot.slane %v1287_v60, 2  ;;  %s2808_s2 = smov 2  }
  0xd4   : > { %v414_v31 = vadd.f32 %v413_v18, %v345_v58 }
  0xd5   : > { %v3306_v29 = vadd.f32 %v694_v7, %v560_v57  ;;  %v1438_v62 = vor.u32 %v1437_v49, %v1434_v48  ;;  %v1296_v7 = vsel %vm991_vm4, %v1293_v2, %v1295_v53 }
  0xda   : > { %v546_v3 = vpop.f32.mrf.mxu2  ;;  %v348_v4 = vpop.f32.mrf.mxu0 }
  0xdb   : > { %v561_v19 = vadd.f32 %v546_v3, %v414_v31  ;;  %v416_v13 = vpop.f32.mrf.mxu1  ;;  %v696_v23 = vpop.f32.mrf.mxu3  ;;  %v1393_v31 = vunpack.c.l.b16 %v1382_v54 }
  0xdc   : > { %v417_v51 = vadd.f32 %v416_v13, %v348_v4  ;;  %v3353_v4 = vsel %vm1395_vm5, %v1429_v16, %v1438_v62 }
  0xdd   : > { %v3313_v32 = vadd.f32 %v696_v23, %v561_v19  ;;  %2408 = vmatmul.msk.bf16.gmra.mxu0 %vm303_vm2, %v3031_v30  ;;  %v3355_v13 = vpack.c.b16 %v1393_v31, %v1393_v31 }
  0xde   : > { %2429 = vmatmul.msk.bf16.gmra.mxu1 %vm303_vm2, %v3019_v28  ;;  %v2684_v28 = vld [vmem:[%s3602_s1 + $0x180] sm:$0xff] }
  0xdf   : > { %2474 = vmatmul.msk.bf16.gmra.mxu2 %vm303_vm2, %v1294_v21  ;;  %1659 = vmatpush.bf16.msrb.mxu1 %v2684_v28  ;;  %v3361_v28 = vld [vmem:[#allocation2] ss:$0 sm:$0xff] }
  0xe0   : > { %2503 = vmatmul.msk.bf16.gmra.mxu3 %vm303_vm2, %v3321_v44 }
  0xe2   : > { %v549_v35 = vpop.f32.mrf.mxu2  ;;  %v350_v40 = vpop.f32.mrf.mxu0 }
  0xe3   : > { %v562_v39 = vadd.f32 %v549_v35, %v417_v51  ;;  %v418_v41 = vpop.f32.mrf.mxu1  ;;  %v699_v42 = vpop.f32.mrf.mxu3  ;;  %v1441_v35 = vshrl.u32 %v3355_v13, 16 }
  0xe4   : > { %v419_v45 = vadd.f32 %v418_v41, %v350_v40 }
  0xe5   : > { %v3339_v46 = vadd.f32 %v699_v42, %v562_v39  ;;  %v1443_v39 = vrot.slane %v1441_v35, 2 }
  0xea   : > { %v551_v57 = vpop.f32.mrf.mxu2  ;;  %v818_v18 = vpop.f32.mrf.mxu0 }
  0xeb   : > { %v563_v58 = vadd.f32 %v551_v57, %v419_v45  ;;  %v876_v24 = vpop.f32.mrf.mxu1  ;;  %v701_v50 = vpop.f32.mrf.mxu3  ;;  %v1298_v57 = vsel %vm991_vm4, %v1295_v53, %v1297_v43 }
  0xec   : > { %v877_v19 = vadd.f32 %v876_v24, %v818_v18 }
  0xed   : > { %v3345_v3 = vadd.f32 %v701_v50, %v563_v58  ;;  %2409 = vmatmul.msk.bf16.gmra.mxu0 %vm303_vm2, %v3066_v59 }
  0xee   : > { %2430 = vmatmul.msk.bf16.gmra.mxu1 %vm303_vm2, %v3056_v56  ;;  %v1444_v56 = vshll.u32 %v3355_v13, 16 }
  0xef   : > { %2475 = vmatmul.msk.bf16.gmra.mxu2 %vm303_vm2, %v1296_v7 }
  0xf0   : > { %2504 = vmatmul.msk.bf16.gmra.mxu3 %vm303_vm2, %v3353_v4  ;;  %v1446_v40 = vrot.slane %v1444_v56, 3 }
  0xf2   : > { %v943_v2 = vpop.f32.mrf.mxu2  ;;  %v820_v21 = vpop.f32.mrf.mxu0  ;;  %v1447_v54 = vor.u32 %v1446_v40, %v1443_v39 }
  0xf3   : > { %v968_v51 = vadd.f32 %v943_v2, %v877_v19  ;;  %v878_v23 = vpop.f32.mrf.mxu1  ;;  %v1051_v61 = vpop.f32.mrf.mxu3  ;;  %v1774_v2 = vunpack.c.l.b16 %v1763_v1  ;;  %v1780_v1 = vrot.slane %v3267_v12, 3 }
  0xf4   : > { %v879_v22 = vadd.f32 %v878_v23, %v820_v21  ;;  %v3371_v31 = vsel %vm1395_vm5, %v1438_v62, %v1447_v54 }
  0xf5   : > { %v1076_v16 = vadd.f32 %v1051_v61, %v968_v51  ;;  %v1775_v62 = vpack.c.b16 %v1272_v20, %v1774_v2 }
  0xf7   : > { %v1086_v41 = vadd.f32 %v3361_v28, %v1076_v16  ;;  %v1777_v40 = vrot.slane %v1775_v62, 3 }
  0xf9   : > { %2719 = vtanh.f32 %v1086_v41  ;;  %v1778_v41 = vrot.slane %v3234_v38, 3 }
  0xfa   : > { %v945_v45 = vpop.f32.mrf.mxu2  ;;  %v823_v48 = vpop.f32.mrf.mxu0 }
  0xfb   : > { %v969_v42 = vadd.f32 %v945_v45, %v879_v22  ;;  %v881_v49 = vpop.f32.mrf.mxu1  ;;  %v1053_v58 = vpop.f32.mrf.mxu3  ;;  %v1779_v20 = vsel %vm1776_vm6, %v1777_v40, %v1778_v41  ;;  %v1782_v40 = vrot.slane %v3300_v26, 3 }
  0xfc   : > { %v882_v24 = vadd.f32 %v881_v49, %v823_v48 }
  0xfd   : > { %v1077_v18 = vadd.f32 %v1053_v58, %v969_v42  ;;  %2410 = vmatmul.msk.bf16.gmra.mxu0 %vm303_vm2, %v3112_v27 }
  0xfe   : > { %2431 = vmatmul.msk.bf16.gmra.mxu1 %vm303_vm2, %v3103_v25 }
  0xff   : > { %2476 = vmatmul.msk.bf16.gmra.mxu2 %vm303_vm2, %v1298_v57  ;;  %v2720_v7 = vpop.eup %2719  ;;  %v1087_v50 = vadd.f32 %v3361_v28, %v1077_v18 }
 0x100   : > { %1901 = vrot.lane.b32.xlu0 %v2720_v7, %s2807_s22  ;;  %2505 = vmatmul.msk.bf16.gmra.mxu3 %vm303_vm2, %v3371_v31 }
 0x101   : > { %2721 = vtanh.f32 %v1087_v50 }
 0x102   : > { %v948_v53 = vpop.f32.mrf.mxu2  ;;  %v825_v25 = vpop.f32.mrf.mxu0 }
 0x103   : > { %v970_v19 = vadd.f32 %v948_v53, %v882_v24  ;;  %v883_v17 = vpop.f32.mrf.mxu1  ;;  %v1056_v51 = vpop.f32.mrf.mxu3 }
 0x104   : > { %v884_v56 = vadd.f32 %v883_v17, %v825_v25  ;;  %v1781_v17 = vsel %vm1776_vm6, %v1778_v41, %v1780_v1 }
 0x105   : > { %v1078_v21 = vadd.f32 %v1056_v51, %v970_v19 }
 0x107   : > { %v2722_v23 = vpop.eup %2721  ;;  %v1088_v35 = vadd.f32 %v3361_v28, %v1078_v21 }
 0x108   : > { %1903 = vrot.lane.b32.xlu0 %v2722_v23, %s2807_s22 }
 0x109   : > { %2723 = vtanh.f32 %v1088_v35 }
 0x10a   : > { %v950_v60 = vpop.f32.mrf.mxu2  ;;  %v828_v16 = vpop.f32.mrf.mxu0 }
 0x10b   : > { %v971_v61 = vadd.f32 %v950_v60, %v884_v56  ;;  %v886_v39 = vpop.f32.mrf.mxu1  ;;  %v1058_v43 = vpop.f32.mrf.mxu3 }
 0x10c   : > { %v887_v15 = vadd.f32 %v886_v39, %v828_v16 }
 0x10d   : > { %v1079_v22 = vadd.f32 %v1058_v43, %v971_v61  ;;  %2538 = vmatmul.msk.bf16.vlgmr.msrb.gmra.mxu0 %vm303_vm2, %v3079_v0 }
 0x10e   : > { %2559 = vmatmul.msk.bf16.vlgmr.msrb.gmra.mxu1 %vm303_vm2, %v2958_v55 }
 0x10f   : > { %2588 = vmatmul.msk.bf16.vlgmr.msrb.gmra.mxu2 %vm303_vm2, %v3264_v11  ;;  %v2724_v45 = vpop.eup %2723  ;;  %v1089_v42 = vadd.f32 %v3361_v28, %v1079_v22 }
 0x110   : > { %1905 = vrot.lane.b32.xlu1 %v2724_v45, %s2807_s22  ;;  %2617 = vmatmul.msk.bf16.vlgmr.msrb.gmra.mxu3 %vm303_vm2, %v1779_v20 }
 0x111   : > { %2725 = vtanh.f32 %v1089_v42 }
 0x112   : > { %v953_v38 = vpop.f32.mrf.mxu2  ;;  %v830_v0 = vpop.f32.mrf.mxu0 }
 0x113   : > { %v972_v48 = vadd.f32 %v953_v38, %v887_v15  ;;  %v888_v49 = vpop.f32.mrf.mxu1  ;;  %v1061_v54 = vpop.f32.mrf.mxu3  ;;  %v1783_v15 = vsel %vm1776_vm6, %v1780_v1, %v1782_v40 }
 0x114   : > { %v889_v11 = vadd.f32 %v888_v49, %v830_v0 }
 0x115   : > { %v1080_v55 = vadd.f32 %v1061_v54, %v972_v48 }
 0x117   : > { %v2726_v57 = vpop.eup %2725  ;;  %v1090_v58 = vadd.f32 %v3361_v28, %v1080_v55 }
 0x118   : > { %1907 = vrot.lane.b32.xlu1 %v2726_v57, %s2807_s22 }
 0x119   : > { %2727 = vtanh.f32 %v1090_v58 }
 0x11a   : > { %v955_v18 = vpop.f32.mrf.mxu2  ;;  %v833_v7 = vpop.f32.mrf.mxu0 }
 0x11b   : > { %v973_v24 = vadd.f32 %v955_v18, %v889_v11  ;;  %v891_v50 = vpop.f32.mrf.mxu1  ;;  %v1063_v53 = vpop.f32.mrf.mxu3  ;;  %v1784_v11 = vrot.slane %v3324_v34, 3 }
 0x11c   : > { %v892_v25 = vadd.f32 %v891_v50, %v833_v7 }
 0x11d   : > { %v1081_v19 = vadd.f32 %v1063_v53, %v973_v24  ;;  %2539 = vmatmul.msk.bf16.gmra.mxu0 %vm303_vm2, %v3157_v47  ;;  %v1785_v50 = vsel %vm1776_vm6, %v1782_v40, %v1784_v11 }
 0x11e   : > { %2560 = vmatmul.msk.bf16.gmra.mxu1 %vm303_vm2, %v2994_v8 }
 0x11f   : > { %2589 = vmatmul.msk.bf16.gmra.mxu2 %vm303_vm2, %v3297_v10  ;;  %v2728_v2 = vpop.eup %2727  ;;  %v1091_v51 = vadd.f32 %v3361_v28, %v1081_v19 }
 0x120   : > { %1909 = vrot.lane.b32.xlu2 %v2728_v2, %s2807_s22  ;;  %2618 = vmatmul.msk.bf16.gmra.mxu3 %vm303_vm2, %v1781_v17 }
 0x121   : > { %2729 = vtanh.f32 %v1091_v51 }
 0x122   : > { %v958_v12 = vpop.f32.mrf.mxu2  ;;  %v835_v47 = vpop.f32.mrf.mxu0 }
 0x123   : > { %v974_v21 = vadd.f32 %v958_v12, %v892_v25  ;;  %v893_v62 = vpop.f32.mrf.mxu1  ;;  %v1066_v23 = vpop.f32.mrf.mxu3 }
 0x124   : > { %v894_v10 = vadd.f32 %v893_v62, %v835_v47 }
 0x125   : > { %v1082_v8 = vadd.f32 %v1066_v23, %v974_v21  ;;  %v1786_v23 = vrot.slane %v3355_v13, 3 }
 0x127   : > { %v2730_v35 = vpop.eup %2729  ;;  %v1092_v56 = vadd.f32 %v3361_v28, %v1082_v8 }
 0x128   : > { %1911 = vrot.lane.b32.xlu2 %v2730_v35, %s2807_s22 }
 0x129   : > { %2731 = vtanh.f32 %v1092_v56 }
 0x12a   : > { %v960_v60 = vpop.f32.mrf.mxu2  ;;  %v838_v16 = vpop.f32.mrf.mxu0 }
 0x12b   : > { %v975_v61 = vadd.f32 %v960_v60, %v894_v10  ;;  %v896_v39 = vpop.f32.mrf.mxu1  ;;  %v1068_v41 = vpop.f32.mrf.mxu3  ;;  %v1787_v10 = vsel %vm1776_vm6, %v1784_v11, %v1786_v23 }
 0x12c   : > { %v897_v22 = vadd.f32 %v896_v39, %v838_v16 }
 0x12d   : > { %v1083_v43 = vadd.f32 %v1068_v41, %v975_v61  ;;  %2540 = vmatmul.msk.bf16.gmra.mxu0 %vm303_vm2, %v3173_v5 }
 0x12e   : > { %2561 = vmatmul.msk.bf16.gmra.mxu1 %vm303_vm2, %v3031_v30 }
 0x12f   : > { %2590 = vmatmul.msk.bf16.gmra.mxu2 %vm303_vm2, %v3321_v44  ;;  %v2732_v20 = vpop.eup %2731  ;;  %v1093_v45 = vadd.f32 %v3361_v28, %v1083_v43 }
 0x130   : > { %1913 = vrot.lane.b32.xlu0 %v2732_v20, %s2807_s22  ;;  %2619 = vmatmul.msk.bf16.gmra.mxu3 %vm303_vm2, %v1783_v15 }
 0x131   : > { %2733 = vtanh.f32 %v1093_v45 }
 0x132   : > { %v963_v26 = vpop.f32.mrf.mxu2  ;;  %v840_v5 = vpop.f32.mrf.mxu0 }
 0x133   : > { %v976_v42 = vadd.f32 %v963_v26, %v897_v22  ;;  %v898_v38 = vpop.f32.mrf.mxu1  ;;  %v1071_v48 = vpop.f32.mrf.mxu3 }
 0x134   : > { %v899_v44 = vadd.f32 %v898_v38, %v840_v5 }
 0x135   : > { %v1084_v30 = vadd.f32 %v1071_v48, %v976_v42 }
 0x137   : > { %v2734_v0 = vpop.eup %2733  ;;  %v1094_v49 = vadd.f32 %v3361_v28, %v1084_v30 }
 0x138   : > { %1915 = vrot.lane.b32.xlu1 %v2734_v0, %s2807_s22 }
 0x139   : > { %2735 = vtanh.f32 %v1094_v49 }
 0x13a   : > { %v965_v54 = vpop.f32.mrf.mxu2  ;;  %v1157_v57 = vpop.f32.mrf.mxu0 }
 0x13b   : > { %v977_v55 = vadd.f32 %v965_v54, %v899_v44  ;;  %v1215_v58 = vpop.f32.mrf.mxu1  ;;  %v1073_v18 = vpop.f32.mrf.mxu3 }
 0x13c   : > { %v1216_v7 = vadd.f32 %v1215_v58, %v1157_v57 }
 0x13d   : > { %v1085_v24 = vadd.f32 %v1073_v18, %v977_v55  ;;  %2541 = vmatmul.msk.bf16.gmra.mxu0 %vm303_vm2, %v3195_v63 }
 0x13e   : > { %2562 = vmatmul.msk.bf16.gmra.mxu1 %vm303_vm2, %v3066_v59 }
 0x13f   : > { %2591 = vmatmul.msk.bf16.gmra.mxu2 %vm303_vm2, %v3353_v4  ;;  %v2736_v1 = vpop.eup %2735  ;;  %v1095_v53 = vadd.f32 %v3361_v28, %v1085_v24 }
 0x140   : > { %1917 = vrot.lane.b32.xlu2 %v2736_v1, %s2807_s22  ;;  %2620 = vmatmul.msk.bf16.gmra.mxu3 %vm303_vm2, %v1785_v50 }
 0x141   : > { %2737 = vtanh.f32 %v1095_v53 }
 0x142   : > { %v1347_v34 = vpop.f32.mrf.mxu2  ;;  %v1159_v63 = vpop.f32.mrf.mxu0 }
 0x143   : > { %v1372_v19 = vadd.f32 %v1347_v34, %v1216_v7  ;;  %v1217_v25 = vpop.f32.mrf.mxu1  ;;  %v1497_v17 = vpop.f32.mrf.mxu3 }
 0x144   : > { %v1218_v4 = vadd.f32 %v1217_v25, %v1159_v63  ;;  %v721_v25 = vadd.f32 %v3361_v28, %v3273_v33 }
 0x145   : > { %v1522_v59 = vadd.f32 %v1497_v17, %v1372_v19 }
 0x147   : > { %v2738_v2 = vpop.eup %2737  ;;  %v1532_v51 = vadd.f32 %v3361_v28, %v1522_v59 }
 0x148   : > { %1919 = vrot.lane.b32.xlu0 %v2738_v2, %s2807_s22 }
 0x149   : > { %2739 = vtanh.f32 %v1532_v51 }
 0x14a   : > { %v1349_v12 = vpop.f32.mrf.mxu2  ;;  %v1162_v47 = vpop.f32.mrf.mxu0 }
 0x14b   : > { %v1373_v21 = vadd.f32 %v1349_v12, %v1218_v4  ;;  %v1220_v62 = vpop.f32.mrf.mxu1  ;;  %v1499_v8 = vpop.f32.mrf.mxu3 }
 0x14c   : > { %v1221_v56 = vadd.f32 %v1220_v62, %v1162_v47  ;;  %v722_v62 = vadd.f32 %v3361_v28, %v3289_v9 }
 0x14d   : > { %v1523_v35 = vadd.f32 %v1499_v8, %v1373_v21  ;;  %2542 = vmatmul.msk.bf16.gmra.mxu0 %vm303_vm2, %v3231_v37 }
 0x14e   : > { %2563 = vmatmul.msk.bf16.gmra.mxu1 %vm303_vm2, %v3112_v27 }
 0x14f   : > { %2592 = vmatmul.msk.bf16.gmra.mxu2 %vm303_vm2, %v3371_v31  ;;  %v2740_v60 = vpop.eup %2739  ;;  %v1533_v61 = vadd.f32 %v3361_v28, %v1523_v35 }
 0x150   : > { %1941 = vrot.lane.b32.xlu1 %v2740_v60, %s2808_s2  ;;  %2621 = vmatmul.msk.bf16.gmra.mxu3 %vm303_vm2, %v1787_v10 }
 0x151   : > { %2741 = vtanh.f32 %v1533_v61 }
 0x152   : > { %v1352_v13 = vpop.f32.mrf.mxu2  ;;  %v1164_v16 = vpop.f32.mrf.mxu0 }
 0x153   : > { %v1374_v37 = vadd.f32 %v1352_v13, %v1221_v56  ;;  %v1222_v39 = vpop.f32.mrf.mxu1  ;;  %v1502_v27 = vpop.f32.mrf.mxu3 }
 0x154   : > { %v1223_v43 = vadd.f32 %v1222_v39, %v1164_v16 }
 0x155   : > { %v1524_v40 = vadd.f32 %v1502_v27, %v1374_v37 }
 0x157   : > { %v2742_v41 = vpop.eup %2741  ;;  %v1534_v31 = vadd.f32 %v3361_v28, %v1524_v40 }
 0x158   : > { %1943 = vrot.lane.b32.xlu2 %v2742_v41, %s2808_s2 }
 0x159   : > { %2743 = vtanh.f32 %v1534_v31 }
 0x15a   : > { %v1354_v22 = vpop.f32.mrf.mxu2  ;;  %v1167_v20 = vpop.f32.mrf.mxu0 }
 0x15b   : > { %v1375_v15 = vadd.f32 %v1354_v22, %v1223_v43  ;;  %v1225_v45 = vpop.f32.mrf.mxu1  ;;  %v1504_v26 = vpop.f32.mrf.mxu3 }
 0x15c   : > { %v1226_v5 = vadd.f32 %v1225_v45, %v1167_v20 }
 0x15d   : > { %v1525_v42 = vadd.f32 %v1504_v26, %v1375_v15 }
 0x15f   : > { %v2744_v38 = vpop.eup %2743  ;;  %v1535_v48 = vadd.f32 %v3361_v28, %v1525_v42 }
 0x160   : > { %1945 = vrot.lane.b32.xlu0 %v2744_v38, %s2808_s2 }
 0x161   : > { %2745 = vtanh.f32 %v1535_v48 }
 0x162   : > { %v1357_v30 = vpop.f32.mrf.mxu2  ;;  %v1169_v49 = vpop.f32.mrf.mxu0 }
 0x163   : > { %v1376_v0 = vadd.f32 %v1357_v30, %v1226_v5  ;;  %v1227_v44 = vpop.f32.mrf.mxu1  ;;  %v1507_v54 = vpop.f32.mrf.mxu3 }
 0x164   : > { %v1228_v11 = vadd.f32 %v1227_v44, %v1169_v49 }
 0x165   : > { %v1526_v55 = vadd.f32 %v1507_v54, %v1376_v0 }
 0x167   : > { %v2746_v57 = vpop.eup %2745  ;;  %v1536_v58 = vadd.f32 %v3361_v28, %v1526_v55 }
 0x168   : > { %1947 = vrot.lane.b32.xlu1 %v2746_v57, %s2808_s2 }
 0x169   : > { %2747 = vtanh.f32 %v1536_v58  ;;  %v725_v58 = vadd.f32 %v3361_v28, %v3339_v46 }
 0x16a   : > { %v1359_v18 = vpop.f32.mrf.mxu2  ;;  %v1172_v7 = vpop.f32.mrf.mxu0 }
 0x16b   : > { %v1377_v24 = vadd.f32 %v1359_v18, %v1228_v11  ;;  %v1230_v50 = vpop.f32.mrf.mxu1  ;;  %v1509_v1 = vpop.f32.mrf.mxu3 }
 0x16c   : > { %v1231_v34 = vadd.f32 %v1230_v50, %v1172_v7 }
 0x16d   : > { %v1527_v53 = vadd.f32 %v1509_v1, %v1377_v24 }
 0x16f   : > { %v2748_v19 = vpop.eup %2747  ;;  %v1537_v63 = vadd.f32 %v3361_v28, %v1527_v53 }
 0x170   : > { %1949 = vrot.lane.b32.xlu2 %v2748_v19, %s2808_s2 }
 0x171   : > { %2749 = vtanh.f32 %v1537_v63 }
 0x172   : > { %v1362_v17 = vpop.f32.mrf.mxu2  ;;  %v1174_v2 = vpop.f32.mrf.mxu0  ;;  %2751 = vtanh.f32 %v721_v25 }
 0x173   : > { %v1378_v59 = vadd.f32 %v1362_v17, %v1231_v34  ;;  %v1232_v51 = vpop.f32.mrf.mxu1  ;;  %v1512_v4 = vpop.f32.mrf.mxu3 }
 0x174   : > { %v1233_v23 = vadd.f32 %v1232_v51, %v1174_v2 }
 0x175   : > { %v1528_v12 = vadd.f32 %v1512_v4, %v1378_v59 }
 0x177   : > { %v2750_v21 = vpop.eup %2749  ;;  %v1538_v47 = vadd.f32 %v3361_v28, %v1528_v12 }
 0x178   : > { %1951 = vrot.lane.b32.xlu0 %v2750_v21, %s2808_s2  ;;  %v2752_v8 = vpop.eup %2751 }
 0x179   : > { %2753 = vtanh.f32 %v1538_v47 }
 0x17a   : > { %v1364_v33 = vpop.f32.mrf.mxu2  ;;  %v1910_v56 = vpop.permute.xlu2 %1909  ;;  %2755 = vtanh.f32 %v722_v62 }
 0x17b   : > { %v1379_v35 = vadd.f32 %v1364_v33, %v1233_v23  ;;  %v3460_v10 = vsel %vm2011_vm7, %v2752_v8, %v1910_v56  ;;  %v1177_v60 = vpop.f32.mrf.mxu0  ;;  %v1235_v61 = vpop.f32.mrf.mxu1  ;;  %v724_v33 = vadd.f32 %v3361_v28, %v3313_v32 }
 0x17c   : > { %v1514_v13 = vpop.f32.mrf.mxu3  ;;  %v1236_v16 = vadd.f32 %v1235_v61, %v1177_v60  ;;  %v3483_v8 = vpop.permute.xlu0 %1901 }
 0x17d   : > { %v1529_v37 = vadd.f32 %v1514_v13, %v1379_v35 }
 0x17f   : > { %v2754_v39 = vpop.eup %2753  ;;  %v1539_v9 = vadd.f32 %v3361_v28, %v1529_v37 }
 0x180   : > { %1953 = vrot.lane.b32.xlu1 %v2754_v39, %s2808_s2  ;;  %v2756_v40 = vpop.eup %2755 }
 0x181   : > { %2757 = vtanh.f32 %v1539_v9 }
 0x182   : > { %v1367_v27 = vpop.f32.mrf.mxu2  ;;  %v1912_v31 = vpop.permute.xlu2 %1911 }
 0x183   : > { %v1380_v41 = vadd.f32 %v1367_v27, %v1236_v16  ;;  %v3465_v43 = vsel %vm2011_vm7, %v2756_v40, %v1912_v31  ;;  %v1179_v22 = vpop.f32.mrf.mxu0  ;;  %v1237_v15 = vpop.f32.mrf.mxu1 }
 0x184   : > { %v1517_v20 = vpop.f32.mrf.mxu3  ;;  %v1238_v5 = vadd.f32 %v1237_v15, %v1179_v22  ;;  %v3474_v19 = vpop.permute.xlu1 %1905 }
 0x185   : > { %v1530_v45 = vadd.f32 %v1517_v20, %v1380_v41  ;;  %v3490_v41 = vpop.permute.xlu0 %1903 }
 0x187   : > { %v2758_v26 = vpop.eup %2757  ;;  %v1540_v42 = vadd.f32 %v3361_v28, %v1530_v45 }
 0x188   : > { %1955 = vrot.lane.b32.xlu2 %v2758_v26, %s2808_s2 }
 0x189   : > { %2759 = vtanh.f32 %v1540_v42 }
 0x18a   : > { %v1369_v38 = vpop.f32.mrf.mxu2 }
 0x18b   : > { %v1381_v48 = vadd.f32 %v1369_v38, %v1238_v5  ;;  %v1603_v30 = vpop.f32.mrf.mxu0  ;;  %v1661_v0 = vpop.f32.mrf.mxu1 }
 0x18c   : > { %v1519_v49 = vpop.f32.mrf.mxu3  ;;  %v1662_v54 = vadd.f32 %v1661_v0, %v1603_v30  ;;  %v3486_v56 = vpop.permute.xlu1 %1907  ;;  %v726_v30 = vadd.f32 %v3361_v28, %v3345_v3 }
 0x18d   : > { %v1531_v44 = vadd.f32 %v1519_v49, %v1381_v48 }
 0x18f   : > { %v2760_v55 = vpop.eup %2759  ;;  %v1541_v57 = vadd.f32 %v3361_v28, %v1531_v44 }
 0x190   : > { %1957 = vrot.lane.b32.xlu0 %v2760_v55, %s2808_s2 }
 0x191   : > { %2761 = vtanh.f32 %v1541_v57 }
 0x192   : > { %v1728_v11 = vpop.f32.mrf.mxu2  ;;  %2763 = vtanh.f32 %v725_v58 }
 0x193   : > { %v1753_v18 = vadd.f32 %v1728_v11, %v1662_v54  ;;  %v1605_v24 = vpop.f32.mrf.mxu0  ;;  %v1663_v7 = vpop.f32.mrf.mxu1 }
 0x194   : > { %v1836_v50 = vpop.f32.mrf.mxu3  ;;  %v1664_v63 = vadd.f32 %v1663_v7, %v1605_v24 }
 0x195   : > { %v1861_v1 = vadd.f32 %v1836_v50, %v1753_v18 }
 0x197   : > { %v2762_v53 = vpop.eup %2761  ;;  %v1871_v34 = vadd.f32 %v3361_v28, %v1861_v1 }
 0x198   : > { %1959 = vrot.lane.b32.xlu1 %v2762_v53, %s2808_s2  ;;  %v2764_v25 = vpop.eup %2763 }
 0x199   : > { %2765 = vtanh.f32 %v1871_v34 }
 0x19a   : > { %v1730_v46 = vpop.f32.mrf.mxu2  ;;  %v1918_v59 = vpop.permute.xlu2 %1917 }
 0x19b   : > { %v1754_v17 = vadd.f32 %v1730_v46, %v1664_v63  ;;  %v3478_v2 = vsel %vm2011_vm7, %v2764_v25, %v1918_v59  ;;  %v1608_v51 = vpop.f32.mrf.mxu0  ;;  %v1666_v4 = vpop.f32.mrf.mxu1 }
 0x19c   : > { %v1838_v12 = vpop.f32.mrf.mxu3  ;;  %v1667_v47 = vadd.f32 %v1666_v4, %v1608_v51 }
 0x19d   : > { %v1862_v21 = vadd.f32 %v1838_v12, %v1754_v17 }
 0x19f   : > { %v2766_v62 = vpop.eup %2765  ;;  %v1872_v23 = vadd.f32 %v3361_v28, %v1862_v21 }
 0x1a0   : > { %1981 = vrot.lane.b32.xlu2 %v2766_v62, %s2809_s23 }
 0x1a1   : > { %2767 = vtanh.f32 %v1872_v23 }
 0x1a2   : > { %v1733_v35 = vpop.f32.mrf.mxu2  ;;  %2769 = vtanh.f32 %v724_v33  ;;  %v3499_v49 = vpop.permute.xlu0 %1913 }
 0x1a3   : > { %v1755_v60 = vadd.f32 %v1733_v35, %v1667_v47  ;;  %v1610_v61 = vpop.f32.mrf.mxu0  ;;  %v1668_v13 = vpop.f32.mrf.mxu1 }
 0x1a4   : > { %v1841_v37 = vpop.f32.mrf.mxu3  ;;  %v1669_v27 = vadd.f32 %v1668_v13, %v1610_v61 }
 0x1a5   : > { %v1863_v16 = vadd.f32 %v1841_v37, %v1755_v60 }
 0x1a7   : > { %v2768_v39 = vpop.eup %2767  ;;  %v1873_v9 = vadd.f32 %v3361_v28, %v1863_v16 }
 0x1a8   : > { %1983 = vrot.lane.b32.xlu0 %v2768_v39, %s2809_s23  ;;  %v2770_v40 = vpop.eup %2769 }
 0x1a9   : > { %2771 = vtanh.f32 %v1873_v9 }
 0x1aa   : > { %v1735_v32 = vpop.f32.mrf.mxu2  ;;  %v1916_v22 = vpop.permute.xlu1 %1915 }
 0x1ab   : > { %v1756_v31 = vadd.f32 %v1735_v32, %v1669_v27  ;;  %v3493_v15 = vsel %vm2011_vm7, %v2770_v40, %v1916_v22  ;;  %v1613_v20 = vpop.f32.mrf.mxu0  ;;  %v1671_v45 = vpop.f32.mrf.mxu1 }
 0x1ac   : > { %v1843_v26 = vpop.f32.mrf.mxu3  ;;  %v1672_v5 = vadd.f32 %v1671_v45, %v1613_v20 }
 0x1ad   : > { %v1864_v42 = vadd.f32 %v1843_v26, %v1756_v31 }
 0x1af   : > { %v2772_v38 = vpop.eup %2771  ;;  %v1874_v48 = vadd.f32 %v3361_v28, %v1864_v42 }
 0x1b0   : > { %1985 = vrot.lane.b32.xlu1 %v2772_v38, %s2809_s23 }
 0x1b1   : > { %2773 = vtanh.f32 %v1874_v48 }
 0x1b2   : > { %v1738_v0 = vpop.f32.mrf.mxu2  ;;  %2775 = vtanh.f32 %v726_v30  ;;  %v3508_v12 = vpop.permute.xlu2 %1943 }
 0x1b3   : > { %v1757_v44 = vadd.f32 %v1738_v0, %v1672_v5  ;;  %v1615_v54 = vpop.f32.mrf.mxu0  ;;  %v1673_v55 = vpop.f32.mrf.mxu1 }
 0x1b4   : > { %v1846_v57 = vpop.f32.mrf.mxu3  ;;  %v1674_v24 = vadd.f32 %v1673_v55, %v1615_v54 }
 0x1b5   : > { %v1865_v58 = vadd.f32 %v1846_v57, %v1757_v44 }
 0x1b7   : > { %v2774_v11 = vpop.eup %2773  ;;  %v1875_v18 = vadd.f32 %v3361_v28, %v1865_v58 }
 0x1b8   : > { %1987 = vrot.lane.b32.xlu2 %v2774_v11, %s2809_s23  ;;  %v2776_v7 = vpop.eup %2775 }
 0x1b9   : > { %2777 = vtanh.f32 %v1875_v18 }
 0x1ba   : > { %v1740_v3 = vpop.f32.mrf.mxu2  ;;  %v1920_v1 = vpop.permute.xlu0 %1919 }
 0x1bb   : > { %v1758_v50 = vadd.f32 %v1740_v3, %v1674_v24  ;;  %v3504_v53 = vsel %vm2011_vm7, %v2776_v7, %v1920_v1  ;;  %v1618_v34 = vpop.f32.mrf.mxu0  ;;  %v1676_v63 = vpop.f32.mrf.mxu1  ;;  %v717_v7 = vadd.f32 %v3361_v28, %v3211_v14 }
 0x1bc   : > { %v1848_v46 = vpop.f32.mrf.mxu3  ;;  %v1677_v17 = vadd.f32 %v1676_v63, %v1618_v34 }
 0x1bd   : > { %v1866_v25 = vadd.f32 %v1848_v46, %v1758_v50 }
 0x1bf   : > { %v2778_v59 = vpop.eup %2777  ;;  %v1876_v51 = vadd.f32 %v3361_v28, %v1866_v25  ;;  %v720_v25 = vadd.f32 %v3361_v28, %v3256_v6  ;;  %v719_v6 = vadd.f32 %v3361_v28, %v3243_v52 }
 0x1c0   : > { %1989 = vrot.lane.b32.xlu0 %v2778_v59, %s2809_s23  ;;  %v718_v59 = vadd.f32 %v3361_v28, %v3221_v36 }
 0x1c1   : > { %2779 = vtanh.f32 %v1876_v51 }
 0x1c2   : > { %v1743_v4 = vpop.f32.mrf.mxu2  ;;  %v1942_v50 = vpop.permute.xlu1 %1941 }
 0x1c3   : > { %v1759_v21 = vadd.f32 %v1743_v4, %v1677_v17  ;;  %v1620_v47 = vpop.f32.mrf.mxu0  ;;  %v1678_v62 = vpop.f32.mrf.mxu1 }
 0x1c4   : > { %v1851_v23 = vpop.f32.mrf.mxu3  ;;  %v1679_v61 = vadd.f32 %v1678_v62, %v1620_v47 }
 0x1c5   : > { %v1867_v33 = vadd.f32 %v1851_v23, %v1759_v21 }
 0x1c7   : > { %v2780_v35 = vpop.eup %2779  ;;  %v1877_v60 = vadd.f32 %v3361_v28, %v1867_v33 }
 0x1c8   : > { %1991 = vrot.lane.b32.xlu1 %v2780_v35, %s2809_s23 }
 0x1c9   : > { %2781 = vtanh.f32 %v1877_v60 }
 0x1ca   : > { %v1745_v13 = vpop.f32.mrf.mxu2  ;;  %v1950_v16 = vpop.permute.xlu2 %1949 }
 0x1cb   : > { %v1760_v37 = vadd.f32 %v1745_v13, %v1679_v61  ;;  %v3514_v39 = vsel %vm2022_vm8, %v3460_v10, %v1950_v16  ;;  %v1623_v9 = vpop.f32.mrf.mxu0  ;;  %v1681_v27 = vpop.f32.mrf.mxu1 }
 0x1cc   : > { %v1853_v32 = vpop.f32.mrf.mxu3  ;;  %v1682_v31 = vadd.f32 %v1681_v27, %v1623_v9 }
 0x1cd   : > { %v1868_v40 = vadd.f32 %v1853_v32, %v1760_v37  ;;  %v723_v37 = vadd.f32 %v3361_v28, %v3306_v29 }
 0x1cf   : > { %v2782_v22 = vpop.eup %2781  ;;  %v1878_v20 = vadd.f32 %v3361_v28, %v1868_v40 }
 0x1d0   : > { %1993 = vrot.lane.b32.xlu2 %v2782_v22, %s2809_s23 }
 0x1d1   : > { %2783 = vtanh.f32 %v1878_v20 }
 0x1d2   : > { %v1748_v45 = vpop.f32.mrf.mxu2  ;;  %v1946_v46 = vpop.permute.xlu0 %1945 }
 0x1d3   : > { %v1761_v26 = vadd.f32 %v1748_v45, %v1682_v31  ;;  %v1625_v5 = vpop.f32.mrf.mxu0  ;;  %v1683_v38 = vpop.f32.mrf.mxu1 }
 0x1d4   : > { %v1856_v42 = vpop.f32.mrf.mxu3  ;;  %v1684_v0 = vadd.f32 %v1683_v38, %v1625_v5 }
 0x1d5   : > { %v1869_v48 = vadd.f32 %v1856_v42, %v1761_v26 }
 0x1d7   : > { %v2784_v30 = vpop.eup %2783  ;;  %v1879_v10 = vadd.f32 %v3361_v28, %v1869_v48 }
 0x1d8   : > { %1995 = vrot.lane.b32.xlu0 %v2784_v30, %s2809_s23 }
 0x1d9   : > { %2785 = vtanh.f32 %v1879_v10 }
 0x1da   : > { %v1750_v44 = vpop.f32.mrf.mxu2 }
 0x1db   : > { %v1762_v54 = vadd.f32 %v1750_v44, %v1684_v0 }
 0x1dc   : > { %v1858_v55 = vpop.f32.mrf.mxu3 }
 0x1dd   : > { %v1870_v57 = vadd.f32 %v1858_v55, %v1762_v54 }
 0x1df   : > { %v2786_v58 = vpop.eup %2785  ;;  %v1880_v11 = vadd.f32 %v3361_v28, %v1870_v57 }
 0x1e0   : > { %1997 = vrot.lane.b32.xlu1 %v2786_v58, %s2809_s23 }
 0x1e1   : > { %2787 = vtanh.f32 %v1880_v11 }
 0x1e2   : > { %v1956_v18 = vpop.permute.xlu2 %1955  ;;  %2789 = vtanh.f32 %v717_v7 }
 0x1e3   : > { %v3524_v24 = vsel %vm2022_vm8, %v3493_v15, %v1956_v18  ;;  %2791 = vtanh.f32 %v720_v25 }
 0x1e4   : > { %2793 = vtanh.f32 %v718_v59 }
 0x1e5   : > { %2795 = vtanh.f32 %v719_v6 }
 0x1e6   : > { %2797 = vtanh.f32 %v723_v37 }
 0x1e7   : > { %v2788_v3 = vpop.eup %2787 }
 0x1e8   : > { %1999 = vrot.lane.b32.xlu2 %v2788_v3, %s2809_s23  ;;  %v2790_v1 = vpop.eup %2789 }
 0x1e9   : > { %v2012_v34 = vsel %vm2011_vm7, %v2790_v1, %v3483_v8  ;;  %v1948_v8 = vpop.permute.xlu1 %1947  ;;  %v2792_v51 = vpop.eup %2791 }
 0x1ea   : > { %v2023_v15 = vsel %vm2022_vm8, %v2012_v34, %v1942_v50  ;;  %v1952_v17 = vpop.permute.xlu0 %1951  ;;  %v2015_v4 = vsel %vm2011_vm7, %v2792_v51, %v3486_v56  ;;  %v2794_v36 = vpop.eup %2793 }
 0x1eb   : > { %v2026_v47 = vsel %vm2022_vm8, %v2015_v4, %v1948_v8  ;;  %v2013_v35 = vsel %vm2011_vm7, %v2794_v36, %v3490_v41  ;;  %v2796_v52 = vpop.eup %2795  ;;  %v2028_v22 = vsel %vm2022_vm8, %v3465_v43, %v1952_v17 }
 0x1ec   : > { %v2024_v56 = vsel %vm2022_vm8, %v2013_v35, %v3508_v12  ;;  %v2014_v16 = vsel %vm2011_vm7, %v2796_v52, %v3474_v19  ;;  %v2798_v27 = vpop.eup %2797 }
 0x1ed   : > { %v2025_v41 = vsel %vm2022_vm8, %v2014_v16, %v1946_v46  ;;  %v2018_v32 = vsel %vm2011_vm7, %v2798_v27, %v3499_v49 }
 0x1f2   : > { %v1954_v21 = vpop.permute.xlu1 %1953 }
 0x1f3   : > { %v2029_v29 = vsel %vm2022_vm8, %v2018_v32, %v1954_v21 }
 0x1fa   : > { %v1982_v14 = vpop.permute.xlu2 %1981 }
 0x1fb   : > { %v2034_v63 = vsel %vm2033_vm9, %v2023_v15, %v1982_v14 }
 0x1fc   : > { %2045 = vst.msk [vmem:[%s3536_s28] sm:$0xff] %vm2044_vm10, %v2034_v63 }
 0x202   : > { %v1958_v62 = vpop.permute.xlu0 %1957 }
 0x203   : > { %v2031_v43 = vsel %vm2022_vm8, %v3478_v2, %v1958_v62 }
 0x20a   : > { %v1960_v60 = vpop.permute.xlu1 %1959 }
 0x20b   : > { %v2032_v45 = vsel %vm2022_vm8, %v3504_v53, %v1960_v60 }
 0x212   : > { %v1988_v23 = vpop.permute.xlu2 %1987 }
 0x213   : > { %v2037_v33 = vsel %vm2033_vm9, %v2026_v47, %v1988_v23 }
 0x214   : > { %2048 = vst.msk [vmem:[%s3536_s28 + $0x18] sm:$0xff] %vm2044_vm10, %v2037_v33 }
 0x21a   : > { %v1984_v61 = vpop.permute.xlu0 %1983 }
 0x21b   : > { %v2035_v13 = vsel %vm2033_vm9, %v2024_v56, %v1984_v61 }
 0x21c   : > { %2046 = vst.msk [vmem:[%s3536_s28 + $0x8] sm:$0xff] %vm2044_vm10, %v2035_v13 }
 0x222   : > { %v1986_v12 = vpop.permute.xlu1 %1985 }
 0x223   : > { %v2036_v9 = vsel %vm2033_vm9, %v2025_v41, %v1986_v12 }
 0x224   : > { %2047 = vst.msk [vmem:[%s3536_s28 + $0x10] sm:$0xff] %vm2044_vm10, %v2036_v9 }
 0x22a   : > { %v1994_v28 = vpop.permute.xlu2 %1993 }
 0x22b   : > { %v2040_v19 = vsel %vm2033_vm9, %v2029_v29, %v1994_v28 }
 0x22c   : > { %2051 = vst.msk [vmem:[%s3536_s28 + $0x30] sm:$0xff] %vm2044_vm10, %v2040_v19 }
 0x232   : > { %v1990_v40 = vpop.permute.xlu0 %1989 }
 0x233   : > { %v2038_v31 = vsel %vm2033_vm9, %v3514_v39, %v1990_v40 }
 0x234   : > { %2049 = vst.msk [vmem:[%s3536_s28 + $0x20] sm:$0xff] %vm2044_vm10, %v2038_v31 }
 0x23a   : > { %v1992_v20 = vpop.permute.xlu1 %1991 }
 0x23b   : > { %v2039_v49 = vsel %vm2033_vm9, %v2028_v22, %v1992_v20 }
 0x23c   : > { %2050 = vst.msk [vmem:[%s3536_s28 + $0x28] sm:$0xff] %vm2044_vm10, %v2039_v49 }
 0x242   : > { %v2000_v26 = vpop.permute.xlu2 %1999 }
 0x243   : > { %v2043_v42 = vsel %vm2033_vm9, %v2032_v45, %v2000_v26 }
 0x244   : > { %2054 = vst.msk [vmem:[%s3536_s28 + $0x48] sm:$0xff] %vm2044_vm10, %v2043_v42 }
 0x24a   : > { %v1996_v39 = vpop.permute.xlu0 %1995 }
 0x24b   : > { %v2041_v5 = vsel %vm2033_vm9, %v3524_v24, %v1996_v39 }
 0x24c   : > { %2052 = vst.msk [vmem:[%s3536_s28 + $0x38] sm:$0xff] %vm2044_vm10, %v2041_v5 }
 0x252   : > { %v1998_v38 = vpop.permute.xlu1 %1997 }
 0x253   : > { %v2042_v48 = vsel %vm2033_vm9, %v2031_v43, %v1998_v38 }
 0x254   : > { %2053 = vst.msk [vmem:[%s3536_s28 + $0x40] sm:$0xff] %vm2044_vm10, %v2042_v48 }
 0x255 PF: > { %s15_s14 = sadd.s32 1, %s2805_s14  }
 0x256   : > { %p12_p5 = scmp.ge.s32.totalorder %s15_s14, 6  }
 0x258   :  { %14 = sbr.rel (!%p12_p5) target bundleno = 3 (0x3), region = 77 }

// kernel: generator_forward.3
= control target key start
LH: loop header
LB: loop body
LE: loop exit
PB: predicated region body
PF: predicated region fallthrough
CT: control target
= control target key end

     0   :  { %s6420_s0 = inlined_call_operand.vmem [shape: f32[4,24], index: 0, kind: input, shape index: {}]   ;;  %s6421_s1 = inlined_call_operand.hbm [shape: bf16[24,1024], index: 1, kind: input, shape index: {}]   ;;  %s6422_s2 = inlined_call_operand.hbm [shape: f32[1,1024], index: 2, kind: input, shape index: {}]   ;;  %s6423_s3 = inlined_call_operand.hbm [shape: f32[1,1024], index: 3, kind: input, shape index: {}]   ;;  %s6424_s4 = inlined_call_operand.hbm [shape: f32[1,1024], index: 4, kind: input, shape index: {}]   ;;  %s6425_s5 = inlined_call_operand.hbm [shape: bf16[1024,2048], index: 5, kind: input, shape index: {}]   ;;  %s6426_s6 = inlined_call_operand.hbm [shape: f32[1,2048], index: 6, kind: input, shape index: {}]   ;;  %s6427_s7 = inlined_call_operand.hbm [shape: f32[1,2048], index: 7, kind: input, shape index: {}]   ;;  %s6428_s8 = inlined_call_operand.hbm [shape: f32[1,2048], index: 8, kind: input, shape index: {}]   ;;  %s6429_s9 = inlined_call_operand.vmem [shape: bf16[4,2048], index: 9, kind: output, shape index: {}]  }
   0x1   :  { %6435 = sst [smem:[#allocation21_spill]] %s6420_s0 }
   0x2   :  { %6436 = sst [smem:[#allocation22_spill]] %s6421_s1 }
   0x3   :  { %6437 = sst [smem:[#allocation23_spill]] %s6425_s5 }
   0x4   :  { %6438 = sst [smem:[#allocation24_spill]] %s6429_s9 }
   0x5   :  { %14 = vsyncpa [#allocation3], 0 }
   0x6   :  { %15 = vsyncpa [#allocation5], 0 }
   0x7   :  { %16 = vsyncpa [#allocation8], 0  ;;  %s5198_s30 = smov 0   ;;  %s5200_s10 = smov 0  }
   0x8   :  { %s5202_s11 = smov 0   ;;  %s5204_s12 = smov 0  }
   0x9 LB: > { %6439 = sst [smem:[#allocation17_spill]] %s5132_s11  ;;  %s5217_s13 = sadd.s32 4294967295, %s5136_s12   ;;  %s5136_s12 = sphi %s5204_s12, %s6467_s12   ;;  %s5132_s11 = sphi %s5202_s11, %s6469_s11   ;;  %s5128_s10 = sphi %s5200_s10, %s6471_s10   ;;  %s5124_s30 = sphi %s5198_s30, %s6470_s30  }
   0xa   : > { %s5220_s14 = sadd.s32 1, %s5136_s12   ;;  %s134_s16 = sadd.s32 1, %s5132_s11 }
   0xb   : > { %6440 = sst [smem:[#allocation18_spill]] %s5220_s14  ;;  %s131_s15 = ssub.s32 %s5136_s12, %s5220_s14 }
   0xc   : > { %p132_p0 = scmp.eq.s32.totalorder %s131_s15, 0  ;;  %p141_p1 = scmp.ne.s32.totalorder %s5132_s11, %s5128_s10 }
   0xd   : > { %p142_p2 = scmp.eq.s32.totalorder %s5136_s12, 0  ;;  %p147_p3 = scmp.ne.s32.totalorder %s5128_s10, %s5124_s30 }
   0xe   : > { %s5230_s17 = scalar_select %p132_p0, %s5132_s11, %s134_s16  }
   0xf   : > { %p5232_p4 = por %p142_p2, %p141_p1  ;;  %p148_p5 = scmp.eq.s32.totalorder %s5217_s13, 0 }
  0x10   : > { %6441 = sst [smem:[#allocation19_spill]] %s5230_s17  ;;  %p3366_p6 = scmp.ge.s32.totalorder %s5136_s12, 1 }
  0x11   : > { %p262_p7 = scmp.lt.s32.totalorder %s5136_s12, 5  ;;  %p5241_p8 = por %p148_p5, %p147_p3 }
  0x12   : > { %s6446_s1 = sld [smem:[#allocation22_spill]]  ;;  %s5138_s24 = smov [#allocation2]  }
  0x13   : > { %s6443_s19 = scalar_select %p5241_p8, 1, 0 }
  0x14   : > { %p5245_p9 = pnand %p3366_p6, %p262_p7  ;;  %s278_s25 = sshll.u32 %s5138_s24, 4  ;;  %s279_s25 = int_to_ptr.vmem [resolvable:$true] %s278_s25 }
  0x15   : > { %6444 = sst [smem:[#allocation20_spill]] %s6443_s19  ;;  %p4777_p12 = scmp.lt.s32.totalorder %s5136_s12, 4 }
  0x16   : > { %p4747_p10 = pneg %p5245_p9  ;;  %s328_s27 = sand.u32 1, %s5136_s12  }
  0x17   : > { %s5139_s28 = smov 512   ;;  %s5140_s29 = smov 32  }
  0x18   : > { %s276_s23 = sshll.u32 %s6446_s1, 4  ;;  %p5256_p11 = pnand %p4747_p10, %p148_p5  ;;  %s277_s23 = int_to_ptr.hbm [resolvable:$true] %s276_s23 }
  0x19   : > { %p5266_p13 = pnand %p4777_p12, %p5232_p4  ;;  %s330_s15 = sand.u32 1, %s5132_s11  }
  0x1a   : > { %4750 = dma.hbm_to_vmem [thread:$0]  (!%p5256_p11), %s277_s23, 1536, %s279_s25, [#allocation3], %s5139_s28, %s5139_s28, %s5140_s29  }
  0x1b   : > { %s4458_s16 = sshll.u32 %s5136_s12, 4  ;;  %s3372_s21 = sshll.u32 %s330_s15, 11 }
  0x1c   : > { %s6449_s5 = sld [smem:[#allocation23_spill]]  ;;  %s332_s14 = scalar_lea.vmem [#allocation9], %s3372_s21 }
  0x1d   : > { %s340_s9 = sshll.u32 %s332_s14, 4  ;;  %s5275_s23 = sshll.u32 %s330_s15, 2  ;;  %s341_s9 = int_to_ptr.vmem [resolvable:$true] %s340_s9 }
  0x1e   : > { %s5277_s18 = scalar_lea.sflag [#allocation3], %s328_s27  ;;  %p4884_p1 = pneg %p5266_p13 }
  0x22   : > { %s337_s1 = scalar_lea.hbm %s6449_s5, %s4458_s16  ;;  %s4887_s14 = scalar_lea.hbm %s6449_s5, 8192 }
  0x23   : > { %s338_s17 = sshll.u32 %s337_s1, 4  ;;  %s339_s17 = int_to_ptr.hbm [resolvable:$true] %s338_s17 }
  0x24   : > { %s4880_s25 = sshra.s32 %s339_s17, 4  ;;  %s4881_s25 = int_to_ptr.hbm [resolvable:$true] %s4880_s25 }
  0x25   : > { %s4882_s28 = scalar_lea.hbm %s4881_s25, 2048  ;;  %p4888_p4 = scmp.lt.s32.totalorder %s4881_s25, %s6449_s5 }
  0x26   : > { %p4883_p0 = scmp.ne.s32.totalorder %s4881_s25, %s4882_s28  ;;  %p4889_p6 = scmp.lt.s32.totalorder %s4887_s14, %s4882_s28 }
  0x28   : > { %p4885_p2 = pnand %p4884_p1, %p4883_p0  ;;  %p4890_p7 = por %p4889_p6, %p4888_p4 }
  0x2a   : > { %p4886_p3 = pneg %p4885_p2 }
  0x2c   : > { %p4891_p10 = pnand %p4890_p7, %p4886_p3 }
  0x2e   : > { %4894 = shalt.err (!%p4891_p10)
}
  0x2f   : > { %s5141_s27 = smov 1024   ;;  %s5142_s15 = smov 256  }
  0x30   : > { %s5143_s22 = smov 16   ;;  %s5294_s24 = sshll.u32 %s5136_s12, 2 }
  0x31   : > { %4763 = dma.hbm_to_vmem [thread:$0]  (!%p5266_p13), %s339_s17, 32768, %s341_s9, %s5277_s18, %s5141_s27, %s5142_s15, %s5143_s22  }
  0x32   : > { %s358_s25 = scalar_lea.hbm %s6426_s6, %s5294_s24  ;;  %s354_s28 = scalar_lea.vmem [#allocation10], %s5275_s23 }
  0x33   : > { %s362_s14 = sshll.u32 %s354_s28, 4  ;;  %s360_s16 = sshll.u32 %s358_s25, 4  ;;  %s363_s14 = int_to_ptr.vmem [resolvable:$true] %s362_s14  ;;  %s361_s16 = int_to_ptr.hbm [resolvable:$true] %s360_s16 }
  0x34   : > { %s291_s11 = sshll.u32 %s6422_s2, 4  ;;  %s4910_s0 = sshra.s32 %s361_s16, 4  ;;  %s4911_s0 = int_to_ptr.hbm [resolvable:$true] %s4910_s0  ;;  %s292_s11 = int_to_ptr.hbm [resolvable:$true] %s291_s11 }
  0x35   : > { %s4912_s19 = scalar_lea.hbm %s4911_s0, 4  ;;  %s4917_s17 = scalar_lea.hbm %s6426_s6, 16 }
  0x36   : > { %p4913_p12 = scmp.ne.s32.totalorder %s4911_s0, %s4912_s19  ;;  %p4918_p3 = scmp.lt.s32.totalorder %s4911_s0, %s6426_s6 }
  0x37   : > { %p4919_p4 = scmp.lt.s32.totalorder %s4917_s17, %s4912_s19 }
  0x38   : > { %p4915_p0 = pnand %p4913_p12, %p4884_p1 }
  0x39   : > { %p4920_p6 = por %p4919_p4, %p4918_p3 }
  0x3a   : > { %p4916_p2 = pneg %p4915_p0 }
  0x3c   : > { %p4921_p7 = pnand %p4920_p6, %p4916_p2 }
  0x3e   : > { %4924 = shalt.err (!%p4921_p7)
}
  0x3f   : > { %4766 = dma.hbm_to_vmem [thread:$0]  (!%p5266_p13), %s361_s16, 64, %s363_s14, %s5277_s18  }
  0x40   : > { %s5144_s5 = smov [#allocation4]   ;;  %s377_s0 = scalar_lea.hbm %s6427_s7, %s5294_s24 }
  0x41   : > { %s293_s22 = sshll.u32 %s5144_s5, 4  ;;  %s379_s19 = sshll.u32 %s377_s0, 4  ;;  %s294_s22 = int_to_ptr.vmem [resolvable:$true] %s293_s22  ;;  %s380_s19 = int_to_ptr.hbm [resolvable:$true] %s379_s19 }
  0x42   : > { %4753 = dma.hbm_to_vmem [thread:$0]  (!%p5256_p11), %s292_s11, 128, %s294_s22, [#allocation5]  }
  0x43   : > { %s373_s25 = scalar_lea.vmem [#allocation11], %s5275_s23  ;;  %s4970_s21 = sshra.s32 %s380_s19, 4  ;;  %s4971_s21 = int_to_ptr.hbm [resolvable:$true] %s4970_s21 }
  0x44   : > { %s381_s28 = sshll.u32 %s373_s25, 4  ;;  %s4972_s9 = scalar_lea.hbm %s4971_s21, 4  ;;  %s382_s28 = int_to_ptr.vmem [resolvable:$true] %s381_s28 }
  0x45   : > { %p4973_p10 = scmp.ne.s32.totalorder %s4971_s21, %s4972_s9  ;;  %s4977_s12 = scalar_lea.hbm %s6427_s7, 16 }
  0x46   : > { %p4978_p2 = scmp.lt.s32.totalorder %s4971_s21, %s6427_s7  ;;  %p4979_p3 = scmp.lt.s32.totalorder %s4977_s12, %s4972_s9 }
  0x47   : > { %p4975_p12 = pnand %p4973_p10, %p4884_p1 }
  0x48   : > { %p4980_p4 = por %p4979_p3, %p4978_p2 }
  0x49   : > { %p4976_p0 = pneg %p4975_p12 }
  0x4b   : > { %p4981_p6 = pnand %p4980_p4, %p4976_p0 }
  0x4d   : > { %4984 = shalt.err (!%p4981_p6)
}
  0x4e   : > { %4769 = dma.hbm_to_vmem [thread:$0]  (!%p5266_p13), %s380_s19, 64, %s382_s28, %s5277_s18  }
  0x4f   : > { %s303_s5 = sshll.u32 %s6423_s3, 4  ;;  %s5145_s22 = smov [#allocation6]   ;;  %s304_s5 = int_to_ptr.hbm [resolvable:$true] %s303_s5 }
  0x50   : > { %s305_s29 = sshll.u32 %s5145_s22, 4  ;;  %s315_s25 = sshll.u32 %s6424_s4, 4  ;;  %s306_s29 = int_to_ptr.vmem [resolvable:$true] %s305_s29  ;;  %s316_s25 = int_to_ptr.hbm [resolvable:$true] %s315_s25 }
  0x51   : > { %4756 = dma.hbm_to_vmem [thread:$0]  (!%p5256_p11), %s304_s5, 128, %s306_s29, [#allocation5]  }
  0x52   : > { %s5146_s21 = smov [#allocation7]   ;;  %s396_s14 = scalar_lea.hbm %s6428_s8, %s5294_s24 }
  0x53   : > { %s317_s9 = sshll.u32 %s5146_s21, 4  ;;  %s398_s16 = sshll.u32 %s396_s14, 4  ;;  %s318_s9 = int_to_ptr.vmem [resolvable:$true] %s317_s9  ;;  %s399_s16 = int_to_ptr.hbm [resolvable:$true] %s398_s16 }
  0x54   : > { %4759 = dma.hbm_to_vmem [thread:$0]  (!%p5256_p11), %s316_s25, 128, %s318_s9, [#allocation8]  }
  0x55   : > { %s392_s12 = scalar_lea.vmem [#allocation12], %s5275_s23  ;;  %s5060_s27 = sshra.s32 %s399_s16, 4  ;;  %s5061_s27 = int_to_ptr.hbm [resolvable:$true] %s5060_s27 }
  0x56   : > { %s400_s17 = sshll.u32 %s392_s12, 4  ;;  %s5062_s11 = scalar_lea.hbm %s5061_s27, 4  ;;  %s401_s17 = int_to_ptr.vmem [resolvable:$true] %s400_s17 }
  0x57   : > { %p5063_p7 = scmp.ne.s32.totalorder %s5061_s27, %s5062_s11  ;;  %s5067_s22 = scalar_lea.hbm %s6428_s8, 16 }
  0x58   : > { %p5068_p11 = scmp.lt.s32.totalorder %s5061_s27, %s6428_s8  ;;  %p5069_p0 = scmp.lt.s32.totalorder %s5067_s22, %s5062_s11 }
  0x59   : > { %p5065_p10 = pnand %p5063_p7, %p4884_p1 }
  0x5a   : > { %p5070_p2 = por %p5069_p0, %p5068_p11 }
  0x5b   : > { %p5066_p12 = pneg %p5065_p10 }
  0x5d   : > { %p5071_p3 = pnand %p5070_p2, %p5066_p12 }
  0x5f   : > { %5074 = shalt.err (!%p5071_p3)
}
  0x60   : > { %4772 = dma.hbm_to_vmem [thread:$0]  (!%p5266_p13), %s399_s16, 64, %s401_s17, %s5277_s18  }
  0x61   : > { %409 = sbr.rel (%p5245_p9) target bundleno = 745 (0x2e9), region = 56 }
  0x66   : > { %5107 = dma.done.wait (%p148_p5), [#allocation3], 1536  }
  0x67   : > { %5109 = vsyncadd (%p148_p5), [#allocation3], 4294965760 }
  0x68   : > { %5111 = dma.done.wait (%p148_p5), [#allocation5], 256  }
  0x69   : > { %5113 = vsyncadd (%p148_p5), [#allocation5], 4294967040 }
  0x6a   : > { %5115 = dma.done.wait (%p148_p5), [#allocation8], 128  }
  0x6b   : > { %5117 = vsyncadd (%p148_p5), [#allocation8], 4294967168  ;;  %s431_s30 = sand.u32 1, %s5217_s13   ;;  %s433_s23 = sand.u32 1, %s5128_s10  }
  0x6c   : > { %s3386_s18 = sshll.u32 %s433_s23, 11  ;;  %s432_s29 = scalar_lea.sflag [#allocation3], %s431_s30 }
  0x6d   : > { %s5380_s1 = scalar_lea.vmem [#allocation9], %s3386_s18 }
  0x6e   : > { %5119 = dma.done.wait (%p5241_p8), %s432_s29, 32960  }
  0x6f   : > { %5121 = vsyncadd (%p5241_p8), %s432_s29, 4294934336  ;;  %v535_v0 = vld [vmem:[#allocation2 + $0x40] sm:$0xff]  ;;  %v536_v1 = vld [vmem:[#allocation2 + $0x48] sm:$0xff]  ;;  %vm623_vm0 = vcmask 1043456   ;;  %s6451_s21 = sld [smem:[#allocation21_spill]]  ;;  %vm619_vm1 = vcmask 195584  }
  0x70   : > { %v3394_v2 = vld [vmem:[#allocation2] sm:$0xf]  ;;  %v587_v3 = vunpack.c.l.b16 %v535_v0  ;;  %v588_v4 = vunpack.c.h.b16 %v535_v0  ;;  %v589_v5 = vunpack.c.l.b16 %v536_v1  ;;  %v590_v6 = vunpack.c.h.b16 %v536_v1  ;;  %v4459_v8 = vld [vmem:[#allocation2 + $0x4] sm:$0xf]  ;;  %v3402_v14 = vld [vmem:[#allocation2 + $0x8] sm:$0xf] }
  0x71   : > { %v4463_v7 = vld [vmem:[#allocation2 + $0x1c] sm:$0xf0]  ;;  %v3396_v9 = vld [vmem:[#allocation2 + $0x20] sm:$0xf0]  ;;  %v4464_v15 = vld [vmem:[#allocation2 + $0x24] sm:$0xf0] }
  0x72   : > { %v603_v10 = vpack.c.b16 %v587_v3, %v587_v3  ;;  %v604_v11 = vpack.c.b16 %v588_v4, %v588_v4  ;;  %v605_v12 = vpack.c.b16 %v589_v5, %v589_v5  ;;  %v606_v13 = vpack.c.b16 %v590_v6, %v590_v6  ;;  %v537_v16 = vld [vmem:[#allocation2 + $0x50] sm:$0xff]  ;;  %v4460_v19 = vld [vmem:[#allocation2 + $0xc] sm:$0xf]  ;;  %v538_v22 = vld [vmem:[#allocation2 + $0x58] sm:$0xff]  ;;  %s6194_s9 = sshll.u32 %s433_s23, 2  ;;  %s3390_s16 = sshll.u32 %s5217_s13, 2 }
  0x73   : > { %v3395_v17 = vor.u32 %v4463_v7, %v3394_v2  ;;  %v3399_v18 = vor.u32 %v4459_v8, %v3396_v9  ;;  %v3404_v20 = vld [vmem:[#allocation2 + $0x28] sm:$0xf0]  ;;  %v591_v21 = vunpack.c.l.b16 %v537_v16  ;;  %v592_v29 = vunpack.c.h.b16 %v537_v16  ;;  %v3410_v37 = vld [vmem:[#allocation2 + $0x10] sm:$0xf]  ;;  %v4461_v41 = vld [vmem:[#allocation2 + $0x14] sm:$0xf] }
  0x74   : > { %v625_v23 = vsel %vm623_vm0, %v603_v10, 0  ;;  %v628_v24 = vsel %vm623_vm0, %v604_v11, 0  ;;  %v631_v25 = vsel %vm623_vm0, %v605_v12, 0  ;;  %v634_v26 = vsel %vm623_vm0, %v606_v13, 0  ;;  %v4465_v38 = vld [vmem:[#allocation2 + $0x2c] sm:$0xf0] }
  0x75   : > { %654 = vmatpush.bf16.msra.mxu0 %v625_v23  ;;  %667 = vmatpush.bf16.msra.mxu1 %v628_v24  ;;  %v539_v27 = vld [vmem:[%s6451_s21] sm:$0xf]  ;;  %v607_v28 = vpack.c.b16 %v591_v21, %v591_v21  ;;  %v593_v30 = vunpack.c.l.b16 %v538_v22  ;;  %v594_v31 = vunpack.c.h.b16 %v538_v22  ;;  %v3403_v32 = vor.u32 %v4464_v15, %v3402_v14  ;;  %v3412_v42 = vld [vmem:[#allocation2 + $0x30] sm:$0xf0]  ;;  %v3418_v44 = vld [vmem:[#allocation2 + $0x18] sm:$0xf] }
  0x76   : > { %680 = vmatpush.bf16.msra.mxu2 %v631_v25  ;;  %693 = vmatpush.bf16.msra.mxu3 %v634_v26  ;;  %v3407_v33 = vor.u32 %v4460_v19, %v3404_v20  ;;  %v608_v34 = vpack.c.b16 %v592_v29, %v592_v29  ;;  %v540_v39 = vpack.c.bf16 %v539_v27, %v539_v27  ;;  %v4466_v45 = vld [vmem:[#allocation2 + $0x34] sm:$0xf0]  ;;  %v4462_v50 = vld [vmem:[#allocation2 + $0x1c] sm:$0xf]  ;;  %v4497_v55 = vld [vmem:[%s5380_s1 + $0xec] sm:$0xf0] }
  0x77   : > { %v609_v35 = vpack.c.b16 %v593_v30, %v593_v30  ;;  %v610_v36 = vpack.c.b16 %v594_v31, %v594_v31  ;;  %v637_v40 = vsel %vm623_vm0, %v607_v28, 0  ;;  %v3411_v48 = vor.u32 %v4465_v38, %v3410_v37  ;;  %v3420_v51 = vld [vmem:[#allocation2 + $0x38] sm:$0xf0]  ;;  %v3546_v54 = vld [vmem:[%s5380_s1 + $0xe0] sm:$0xf]  ;;  %v5429_v28 = vld [vmem:[#allocation4] sm:$0xff] }
  0x78   : > { %v640_v43 = vsel %vm623_vm0, %v608_v34, 0  ;;  %v3415_v49 = vor.u32 %v4461_v41, %v3412_v42  ;;  %v3419_v52 = vor.u32 %v4466_v45, %v3418_v44  ;;  %v3423_v53 = vor.u32 %v4462_v50, %v3420_v51  ;;  %v3674_v57 = vld [vmem:[%s5380_s1 + $0x1e0] sm:$0xf]  ;;  %v4529_v58 = vld [vmem:[%s5380_s1 + $0x1ec] sm:$0xf0]  ;;  %s445_s19 = scalar_lea.vmem [#allocation10], %s6194_s9 }
  0x79   : > { %655 = vmatpush.bf16.msra.mxu0 %v3395_v17  ;;  %668 = vmatpush.bf16.msra.mxu1 %v3399_v18  ;;  %v643_v46 = vsel %vm623_vm0, %v609_v35, 0  ;;  %v646_v47 = vsel %vm623_vm0, %v610_v36, 0  ;;  %v3547_v56 = vor.u32 %v4497_v55, %v3546_v54  ;;  %v3675_v59 = vor.u32 %v4529_v58, %v3674_v57  ;;  %v3530_v60 = vld [vmem:[%s5380_s1 + $0xc0] sm:$0xf]  ;;  %v4493_v61 = vld [vmem:[%s5380_s1 + $0xcc] sm:$0xf0] }
  0x7a   : > { %681 = vmatpush.bf16.msra.mxu2 %v3403_v32  ;;  %694 = vmatpush.bf16.msra.mxu3 %v3407_v33  ;;  %v3658_v62 = vld [vmem:[%s5380_s1 + $0x1c0] sm:$0xf]  ;;  %v3531_v63 = vor.u32 %v4493_v61, %v3530_v60  ;;  %v4525_v0 = vld [vmem:[%s5380_s1 + $0x1cc] sm:$0xf0]  ;;  %v5147_v8 = vmov 4.0   ;;  %v543_v30 = vperm.slane %v5429_v28, 0 }
  0x7b   : > { %v3659_v1 = vor.u32 %v4525_v0, %v3658_v62  ;;  %v3802_v2 = vld [vmem:[%s5380_s1 + $0x2e0] sm:$0xf]  ;;  %v4561_v3 = vld [vmem:[%s5380_s1 + $0x2ec] sm:$0xf0]  ;;  %4824 = vrcp.f32 %v5147_v8  ;;  %v544_v31 = vperm.slane %v5429_v28, 1  ;;  %v545_v42 = vperm.slane %v5429_v28, 2 }
  0x7c   : > { %3424 = vmatmul.msk.bf16.vlgmr.msra.gmra.mxu0 %vm619_vm1, %v540_v39  ;;  %3425 = vmatmul.msk.bf16.vlgmr.msra.gmra.mxu1 %vm619_vm1, %v540_v39  ;;  %v3930_v4 = vld [vmem:[%s5380_s1 + $0x3e0] sm:$0xf]  ;;  %v3803_v5 = vor.u32 %v4561_v3, %v3802_v2  ;;  %v4593_v6 = vld [vmem:[%s5380_s1 + $0x3ec] sm:$0xf0]  ;;  %v547_v57 = vperm.slane %v5429_v28, 4  ;;  %s455_s28 = scalar_lea.vmem [#allocation11], %s6194_s9 }
  0x7d   : > { %706 = vmatpush.bf16.msrb.mxu0 %v637_v40  ;;  %719 = vmatpush.bf16.msrb.mxu1 %v640_v43  ;;  %v3931_v7 = vor.u32 %v4593_v6, %v3930_v4  ;;  %v3514_v9 = vld [vmem:[%s5380_s1 + $0xa0] sm:$0xf]  ;;  %v4489_v10 = vld [vmem:[%s5380_s1 + $0xac] sm:$0xf0]  ;;  %v546_v43 = vperm.slane %v5429_v28, 3  ;;  %s465_s14 = scalar_lea.vmem [#allocation12], %s6194_s9 }
  0x7e   : > { %3426 = vmatmul.msk.bf16.vlgmr.msra.gmra.mxu2 %vm619_vm1, %v540_v39  ;;  %3427 = vmatmul.msk.bf16.vlgmr.msra.gmra.mxu3 %vm619_vm1, %v540_v39  ;;  %v3642_v11 = vld [vmem:[%s5380_s1 + $0x1a0] sm:$0xf]  ;;  %v3515_v12 = vor.u32 %v4489_v10, %v3514_v9  ;;  %v4521_v13 = vld [vmem:[%s5380_s1 + $0x1ac] sm:$0xf0]  ;;  %p521_p5 = scmp.lt.s32.totalorder %s3390_s16, 15  ;;  %s6466_s27 = sld [smem:[#allocation24_spill]] }
  0x7f   : > { %732 = vmatpush.bf16.msrb.mxu2 %v643_v46  ;;  %745 = vmatpush.bf16.msrb.mxu3 %v646_v47  ;;  %v3643_v14 = vor.u32 %v4521_v13, %v3642_v11  ;;  %v3786_v15 = vld [vmem:[%s5380_s1 + $0x2c0] sm:$0xf]  ;;  %v4557_v16 = vld [vmem:[%s5380_s1 + $0x2cc] sm:$0xf0] }
  0x80   : > { %v3914_v17 = vld [vmem:[%s5380_s1 + $0x3c0] sm:$0xf]  ;;  %v3787_v18 = vor.u32 %v4557_v16, %v3786_v15  ;;  %v4589_v19 = vld [vmem:[%s5380_s1 + $0x3cc] sm:$0xf0]  ;;  %s6473_s16 = smov (!%p521_p5, %s3390_s16), 15 }
  0x81   : > { %707 = vmatpush.bf16.msrb.mxu0 %v3411_v48  ;;  %720 = vmatpush.bf16.msrb.mxu1 %v3415_v49  ;;  %v3915_v20 = vor.u32 %v4589_v19, %v3914_v17  ;;  %v3498_v21 = vld [vmem:[%s5380_s1 + $0x80] sm:$0xf]  ;;  %v4485_v22 = vld [vmem:[%s5380_s1 + $0x8c] sm:$0xf0]  ;;  %v4825_v26 = vpop.eup %4824  ;;  %v548_v17 = vperm.slane %v5429_v28, 5  ;;  %s3391_s12 = sshll.u32 %s6473_s16, 1 }
  0x82   : > { %v3626_v23 = vld [vmem:[%s5380_s1 + $0x180] sm:$0xf]  ;;  %v3499_v24 = vor.u32 %v4485_v22, %v3498_v21  ;;  %v4517_v25 = vld [vmem:[%s5380_s1 + $0x18c] sm:$0xf0]  ;;  %v809_v29 = vmul.f32 4.0, %v4825_v26  ;;  %vm813_vm2 = vweird.f32 %v4825_v26 }
  0x83   : > { %733 = vmatpush.bf16.msrb.mxu2 %v3419_v52  ;;  %746 = vmatpush.bf16.msrb.mxu3 %v3423_v53  ;;  %v3627_v27 = vor.u32 %v4517_v25, %v3626_v23  ;;  %v3770_v55 = vld [vmem:[%s5380_s1 + $0x2a0] sm:$0xf]  ;;  %v4585_v60 = vld [vmem:[%s5380_s1 + $0x3ac] sm:$0xf0] }
  0x84   : > { %v810_v32 = vsub.f32 1.0, %v809_v29  ;;  %v4481_v2 = vld [vmem:[%s5380_s1 + $0x6c] sm:$0xf0]  ;;  %v3754_v13 = vld [vmem:[%s5380_s1 + $0x280] sm:$0xf]  ;;  %s524_s11 = scalar_lea.vmem %s6466_s27, %s3391_s12 }
  0x85   : > { %2613 = vmatpush.bf16.msra.mxu0 %v3547_v56  ;;  %2626 = vmatpush.bf16.msra.mxu1 %v3675_v59  ;;  %v4553_v56 = vld [vmem:[%s5380_s1 + $0x2ac] sm:$0xf0]  ;;  %v3898_v59 = vld [vmem:[%s5380_s1 + $0x3a0] sm:$0xf] }
  0x86   : > { %v811_v38 = vmul.f32 %v4825_v26, %v810_v32  ;;  %v3771_v58 = vor.u32 %v4553_v56, %v3770_v55  ;;  %v4513_v8 = vld [vmem:[%s5380_s1 + $0x16c] sm:$0xf0]  ;;  %v3882_v19 = vld [vmem:[%s5380_s1 + $0x380] sm:$0xf]  ;;  %v549_v32 = vperm.slane %v5429_v28, 6 }
  0x87   : > { %2639 = vmatpush.bf16.msra.mxu2 %v3803_v5  ;;  %2652 = vmatpush.bf16.msra.mxu3 %v3931_v7  ;;  %v3899_v5 = vor.u32 %v4585_v60, %v3898_v59  ;;  %v3610_v7 = vld [vmem:[%s5380_s1 + $0x160] sm:$0xf]  ;;  %v4477_v25 = vld [vmem:[%s5380_s1 + $0x4c] sm:$0xf0] }
  0x88   : > { %v812_v46 = vadd.f32 %v4825_v26, %v811_v38  ;;  %v3450_v55 = vld [vmem:[%s5380_s1 + $0x20] sm:$0xf]  ;;  %v4473_v56 = vld [vmem:[%s5380_s1 + $0x2c] sm:$0xf0] }
  0x89   : > { %2614 = vmatpush.bf16.msra.mxu0 %v3531_v63  ;;  %2627 = vmatpush.bf16.msra.mxu1 %v3659_v1  ;;  %v3482_v1 = vld [vmem:[%s5380_s1 + $0x60] sm:$0xf] }
  0x8a   : > { %v3483_v6 = vor.u32 %v4481_v2, %v3482_v1  ;;  %v5461_v10 = vsel %vm813_vm2, %v4825_v26, %v812_v46  ;;  %v3594_v26 = vld [vmem:[%s5380_s1 + $0x140] sm:$0xf]  ;;  %v3451_v2 = vor.u32 %v4473_v56, %v3450_v55 }
  0x8b   : > { %2640 = vmatpush.bf16.msra.mxu2 %v3787_v18  ;;  %2653 = vmatpush.bf16.msra.mxu3 %v3915_v20  ;;  %v4581_v20 = vld [vmem:[%s5380_s1 + $0x38c] sm:$0xf0] }
  0x8c   : > { %3428 = vmatmul.msk.bf16.vlgmr.msrb.gmra.mxu0 %vm619_vm1, %v540_v39  ;;  %3429 = vmatmul.msk.bf16.vlgmr.msrb.gmra.mxu1 %vm619_vm1, %v540_v39  ;;  %v3883_v23 = vor.u32 %v4581_v20, %v3882_v19 }
  0x8d   : > { %2615 = vmatpush.bf16.msra.mxu0 %v3515_v12  ;;  %2628 = vmatpush.bf16.msra.mxu1 %v3643_v14  ;;  %v3611_v12 = vor.u32 %v4513_v8, %v3610_v7  ;;  %v4549_v14 = vld [vmem:[%s5380_s1 + $0x28c] sm:$0xf0] }
  0x8e   : > { %3430 = vmatmul.msk.bf16.vlgmr.msrb.gmra.mxu2 %vm619_vm1, %v540_v39  ;;  %3431 = vmatmul.msk.bf16.vlgmr.msrb.gmra.mxu3 %vm619_vm1, %v540_v39  ;;  %v3755_v18 = vor.u32 %v4549_v14, %v3754_v13 }
  0x8f   : > { %2641 = vmatpush.bf16.msra.mxu2 %v3771_v58  ;;  %2654 = vmatpush.bf16.msra.mxu3 %v3899_v5 }
  0x91   : > { %2616 = vmatpush.bf16.msra.mxu0 %v3499_v24  ;;  %2629 = vmatpush.bf16.msra.mxu1 %v3627_v27  ;;  %v3466_v24 = vld [vmem:[%s5380_s1 + $0x40] sm:$0xf] }
  0x93   : > { %2642 = vmatpush.bf16.msra.mxu2 %v3755_v18  ;;  %2655 = vmatpush.bf16.msra.mxu3 %v3883_v23 }
  0x95   : > { %2617 = vmatpush.bf16.msra.mxu0 %v3483_v6  ;;  %2630 = vmatpush.bf16.msra.mxu1 %v3611_v12 }
  0xf9   : > { %v657_v33 = vpop.f32.mrf.mxu0  ;;  %v670_v34 = vpop.f32.mrf.mxu1 }
  0xfa   : > { %v5433_v35 = vadd.f32 %v657_v33, %v543_v30  ;;  %v5435_v36 = vadd.f32 %v670_v34, %v544_v31  ;;  %v3467_v33 = vor.u32 %v4477_v25, %v3466_v24  ;;  %v4509_v34 = vld [vmem:[%s5380_s1 + $0x14c] sm:$0xf0] }
  0xfc   : > { %v752_v37 = vsel %vm623_vm0, %v5433_v35, 0.0  ;;  %v759_v39 = vsel %vm623_vm0, %v5435_v36, 0.0  ;;  %2618 = vmatpush.bf16.msra.mxu0 %v3467_v33 }
  0xfd   : > { %v753_v40 = vrot.slane %v752_v37, 4  ;;  %v760_v41 = vrot.slane %v759_v39, 4 }
  0xff   : > { %v754_v44 = vadd.f32 %v753_v40, %v752_v37  ;;  %v761_v45 = vadd.f32 %v760_v41, %v759_v39  ;;  %v550_v41 = vperm.slane %v5429_v28, 7 }
 0x100   : > { %2619 = vmatpush.bf16.msra.mxu0 %v3451_v2 }
 0x101   : > { %v683_v47 = vpop.f32.mrf.mxu2  ;;  %v696_v48 = vpop.f32.mrf.mxu3  ;;  %v755_v49 = vrot.slane %v754_v44, 2  ;;  %v762_v50 = vrot.slane %v761_v45, 2 }
 0x102   : > { %v5443_v51 = vadd.f32 %v683_v47, %v545_v42  ;;  %v5445_v52 = vadd.f32 %v696_v48, %v546_v43  ;;  %v659_v53 = vpop.f32.mrf.mxu0  ;;  %v672_v54 = vpop.f32.mrf.mxu1  ;;  %v3595_v42 = vor.u32 %v4509_v34, %v3594_v26  ;;  %v3738_v43 = vld [vmem:[%s5380_s1 + $0x260] sm:$0xf] }
 0x103   : > { %v756_v61 = vadd.f32 %v755_v49, %v754_v44  ;;  %v763_v62 = vadd.f32 %v762_v50, %v761_v45  ;;  %v4545_v44 = vld [vmem:[%s5380_s1 + $0x26c] sm:$0xf0]  ;;  %v3866_v49 = vld [vmem:[%s5380_s1 + $0x360] sm:$0xf] }
 0x104   : > { %v766_v63 = vsel %vm623_vm0, %v5443_v51, 0.0  ;;  %v773_v0 = vsel %vm623_vm0, %v5445_v52, 0.0  ;;  %2631 = vmatpush.bf16.msra.mxu1 %v3595_v42  ;;  %v3739_v28 = vor.u32 %v4545_v44, %v3738_v43  ;;  %v4577_v54 = vld [vmem:[%s5380_s1 + $0x36c] sm:$0xf0] }
 0x105   : > { %v767_v3 = vrot.slane %v766_v63, 4  ;;  %v774_v4 = vrot.slane %v773_v0, 4  ;;  %v757_v9 = vrot.slane %v756_v61, 1  ;;  %v764_v11 = vrot.slane %v763_v62, 1 }
 0x106   : > { %2643 = vmatpush.bf16.msra.mxu2 %v3739_v28  ;;  %v3867_v1 = vor.u32 %v4577_v54, %v3866_v49 }
 0x107   : > { %v768_v15 = vadd.f32 %v767_v3, %v766_v63  ;;  %v775_v16 = vadd.f32 %v774_v4, %v773_v0  ;;  %v758_v21 = vadd.f32 %v757_v9, %v756_v61  ;;  %v765_v22 = vadd.f32 %v764_v11, %v763_v62 }
 0x108   : > { %2656 = vmatpush.bf16.msra.mxu3 %v3867_v1 }
 0x109   : > { %v769_v27 = vrot.slane %v768_v15, 2  ;;  %v776_v29 = vrot.slane %v775_v16, 2  ;;  %v685_v30 = vpop.f32.mrf.mxu2  ;;  %v698_v31 = vpop.f32.mrf.mxu3  ;;  %v815_v37 = vmul.f32 %v5461_v10, %v758_v21  ;;  %v816_v38 = vmul.f32 %v5461_v10, %v765_v22 }
 0x10a   : > { %v709_v39 = vpop.f32.mrf.mxu0  ;;  %v722_v40 = vpop.f32.mrf.mxu1 }
 0x10b   : > { %v770_v45 = vadd.f32 %v769_v27, %v768_v15  ;;  %v777_v46 = vadd.f32 %v776_v29, %v775_v16  ;;  %v5478_v47 = vadd.f32 %v709_v39, %v547_v57  ;;  %v5480_v48 = vadd.f32 %v722_v40, %v548_v17 }
 0x10c   : > { %v5484_v50 = vsub.f32 %v5433_v35, %v815_v37  ;;  %v5487_v53 = vsub.f32 %v5435_v36, %v816_v38 }
 0x10d   : > { %v771_v58 = vrot.slane %v770_v45, 1  ;;  %v778_v59 = vrot.slane %v777_v46, 1  ;;  %v780_v57 = vsel %vm623_vm0, %v5478_v47, 0.0  ;;  %v787_v60 = vsel %vm623_vm0, %v5480_v48, 0.0 }
 0x10e   : > { %v831_v35 = vmul.f32 %v5484_v50, %v5484_v50  ;;  %v832_v36 = vmul.f32 %v5487_v53, %v5487_v53  ;;  %v781_v61 = vrot.slane %v780_v57, 4  ;;  %v788_v62 = vrot.slane %v787_v60, 4 }
 0x10f   : > { %v772_v63 = vadd.f32 %v771_v58, %v770_v45  ;;  %v779_v0 = vadd.f32 %v778_v59, %v777_v46 }
 0x110   : > { %v839_v3 = vsel %vm623_vm0, %v831_v35, 0.0  ;;  %v846_v4 = vsel %vm623_vm0, %v832_v36, 0.0  ;;  %v782_v5 = vadd.f32 %v781_v61, %v780_v57  ;;  %v789_v6 = vadd.f32 %v788_v62, %v787_v60 }
 0x111   : > { %v840_v7 = vrot.slane %v839_v3, 4  ;;  %v847_v8 = vrot.slane %v846_v4, 4  ;;  %v817_v9 = vmul.f32 %v5461_v10, %v772_v63  ;;  %v818_v11 = vmul.f32 %v5461_v10, %v779_v0  ;;  %v735_v12 = vpop.f32.mrf.mxu2  ;;  %v748_v13 = vpop.f32.mrf.mxu3 }
 0x112   : > { %v783_v14 = vrot.slane %v782_v5, 2  ;;  %v790_v15 = vrot.slane %v789_v6, 2  ;;  %v5504_v16 = vadd.f32 %v735_v12, %v549_v32  ;;  %v5506_v17 = vadd.f32 %v748_v13, %v550_v41  ;;  %v711_v18 = vpop.f32.mrf.mxu0  ;;  %v724_v19 = vpop.f32.mrf.mxu1 }
 0x113   : > { %v841_v20 = vadd.f32 %v840_v7, %v839_v3  ;;  %v848_v21 = vadd.f32 %v847_v8, %v846_v4  ;;  %v5509_v22 = vsub.f32 %v5443_v51, %v817_v9  ;;  %v5512_v23 = vsub.f32 %v5445_v52, %v818_v11 }
 0x114   : > { %v784_v24 = vadd.f32 %v783_v14, %v782_v5  ;;  %v791_v25 = vadd.f32 %v790_v15, %v789_v6  ;;  %v794_v33 = vsel %vm623_vm0, %v5504_v16, 0.0  ;;  %v801_v51 = vsel %vm623_vm0, %v5506_v17, 0.0  ;;  %v3578_v14 = vld [vmem:[%s5380_s1 + $0x120] sm:$0xf]  ;;  %v4505_v15 = vld [vmem:[%s5380_s1 + $0x12c] sm:$0xf0] }
 0x115   : > { %v842_v26 = vrot.slane %v841_v20, 2  ;;  %v849_v27 = vrot.slane %v848_v21, 2  ;;  %v833_v29 = vmul.f32 %v5509_v22, %v5509_v22  ;;  %v834_v30 = vmul.f32 %v5512_v23, %v5512_v23 }
 0x116   : > { %v785_v31 = vrot.slane %v784_v24, 1  ;;  %v792_v32 = vrot.slane %v791_v25, 1  ;;  %v795_v45 = vrot.slane %v794_v33, 4  ;;  %v802_v46 = vrot.slane %v801_v51, 4 }
 0x117   : > { %v843_v52 = vadd.f32 %v842_v26, %v841_v20  ;;  %v850_v34 = vadd.f32 %v849_v27, %v848_v21  ;;  %v853_v37 = vsel %vm623_vm0, %v833_v29, 0.0  ;;  %v860_v38 = vsel %vm623_vm0, %v834_v30, 0.0  ;;  %v3722_v21 = vld [vmem:[%s5380_s1 + $0x240] sm:$0xf]  ;;  %v4573_v30 = vld [vmem:[%s5380_s1 + $0x34c] sm:$0xf0] }
 0x118   : > { %v854_v39 = vrot.slane %v853_v37, 4  ;;  %v861_v40 = vrot.slane %v860_v38, 4  ;;  %v786_v41 = vadd.f32 %v785_v31, %v784_v24  ;;  %v793_v42 = vadd.f32 %v792_v32, %v791_v25  ;;  %v4541_v24 = vld [vmem:[%s5380_s1 + $0x24c] sm:$0xf0]  ;;  %v3850_v29 = vld [vmem:[%s5380_s1 + $0x340] sm:$0xf] }
 0x119   : > { %v844_v43 = vrot.slane %v843_v52, 1  ;;  %v851_v44 = vrot.slane %v850_v34, 1  ;;  %v737_v49 = vpop.f32.mrf.mxu2  ;;  %v750_v28 = vpop.f32.mrf.mxu3  ;;  %v796_v61 = vadd.f32 %v795_v45, %v794_v33  ;;  %v803_v1 = vadd.f32 %v802_v46, %v801_v51  ;;  %v3434_v46 = vld [vmem:[%s5380_s1] sm:$0xf] }
 0x11a   : > { %v855_v54 = vadd.f32 %v854_v39, %v853_v37  ;;  %v862_v55 = vadd.f32 %v861_v40, %v860_v38  ;;  %v819_v56 = vmul.f32 %v5461_v10, %v786_v41  ;;  %v820_v57 = vmul.f32 %v5461_v10, %v793_v42 }
 0x11b   : > { %v845_v58 = vadd.f32 %v844_v43, %v843_v52  ;;  %v852_v59 = vadd.f32 %v851_v44, %v850_v34  ;;  %v797_v5 = vrot.slane %v796_v61, 2  ;;  %v804_v13 = vrot.slane %v803_v1, 2 }
 0x11c   : > { %v856_v60 = vrot.slane %v855_v54, 2  ;;  %v863_v35 = vrot.slane %v862_v55, 2  ;;  %v5527_v36 = vsub.f32 %v5478_v47, %v819_v56  ;;  %v5532_v0 = vsub.f32 %v5480_v48, %v820_v57  ;;  %v4501_v56 = vld [vmem:[%s5380_s1 + $0x10c] sm:$0xf0]  ;;  %v4058_v57 = vld [vmem:[%s5380_s1 + $0x4e0] sm:$0xf] }
 0x11d   : > { %v895_v62 = vmul.f32 %v845_v58, %v5461_v10  ;;  %v896_v63 = vmul.f32 %v852_v59, %v5461_v10  ;;  %v798_v11 = vadd.f32 %v797_v5, %v796_v61  ;;  %v3579_v33 = vor.u32 %v4505_v15, %v3578_v14 }
 0x11e   : > { %v857_v2 = vadd.f32 %v856_v60, %v855_v54  ;;  %v864_v3 = vadd.f32 %v863_v35, %v862_v55  ;;  %v835_v4 = vmul.f32 %v5527_v36, %v5527_v36  ;;  %v836_v7 = vmul.f32 %v5532_v0, %v5532_v0  ;;  %v4469_v54 = vld [vmem:[%s5380_s1 + $0xc] sm:$0xf0]  ;;  %v3562_v55 = vld [vmem:[%s5380_s1 + $0x100] sm:$0xf] }
 0x11f   : > { %v5536_v6 = vadd.f32 1e-05, %v895_v62  ;;  %v5538_v47 = vadd.f32 1e-05, %v896_v63  ;;  %v799_v27 = vrot.slane %v798_v11, 1  ;;  %v805_v37 = vadd.f32 %v804_v13, %v803_v1  ;;  %2632 = vmatpush.bf16.msra.mxu1 %v3579_v33 }
 0x120   : > { %v858_v48 = vrot.slane %v857_v2, 1  ;;  %v865_v8 = vrot.slane %v864_v3, 1  ;;  %v867_v9 = vsel %vm623_vm0, %v835_v4, 0.0  ;;  %v874_v20 = vsel %vm623_vm0, %v836_v7, 0.0  ;;  %v4625_v60 = vld [vmem:[%s5380_s1 + $0x4ec] sm:$0xf0] }
 0x121   : > { %4826 = vrsqrt.f32 %v5536_v6  ;;  %v868_v12 = vrot.slane %v867_v9, 4  ;;  %v875_v26 = vrot.slane %v874_v20, 4  ;;  %v800_v34 = vadd.f32 %v799_v27, %v798_v11  ;;  %v4186_v1 = vld [vmem:[%s5380_s1 + $0x5e0] sm:$0xf] }
 0x122   : > { %4828 = vrsqrt.f32 %v5538_v47  ;;  %v859_v18 = vadd.f32 %v858_v48, %v857_v2  ;;  %v866_v19 = vadd.f32 %v865_v8, %v864_v3  ;;  %v3723_v40 = vor.u32 %v4541_v24, %v3722_v21  ;;  %v4657_v2 = vld [vmem:[%s5380_s1 + $0x5ec] sm:$0xf0] }
 0x123   : > { %v869_v25 = vadd.f32 %v868_v12, %v867_v9  ;;  %v876_v52 = vadd.f32 %v875_v26, %v874_v20  ;;  %v3851_v41 = vor.u32 %v4573_v30, %v3850_v29  ;;  %v821_v45 = vmul.f32 %v5461_v10, %v800_v34  ;;  %v5582_v48 = vld [vmem:[#allocation6] sm:$0xff] }
 0x124   : > { %v897_v31 = vmul.f32 %v859_v18, %v5461_v10  ;;  %v898_v32 = vmul.f32 %v866_v19, %v5461_v10  ;;  %2644 = vmatpush.bf16.msra.mxu2 %v3723_v40  ;;  %v806_v59 = vrot.slane %v805_v37, 1  ;;  %v3435_v4 = vor.u32 %v4469_v54, %v3434_v46  ;;  %v4569_v46 = vld [vmem:[%s5380_s1 + $0x32c] sm:$0xf0] }
 0x125   : > { %v870_v51 = vrot.slane %v869_v25, 2  ;;  %v877_v44 = vrot.slane %v876_v52, 2  ;;  %2657 = vmatpush.bf16.msra.mxu3 %v3851_v41  ;;  %v5577_v63 = vsub.f32 %v5504_v16, %v821_v45  ;;  %v3563_v5 = vor.u32 %v4501_v56, %v3562_v55  ;;  %v3834_v45 = vld [vmem:[%s5380_s1 + $0x320] sm:$0xf] }
 0x126   : > { %v5554_v38 = vadd.f32 1e-05, %v897_v31  ;;  %v5556_v39 = vadd.f32 1e-05, %v898_v32  ;;  %v807_v12 = vadd.f32 %v806_v59, %v805_v37  ;;  %2620 = vmatpush.bf16.msra.mxu0 %v3435_v4  ;;  %v4059_v13 = vor.u32 %v4625_v60, %v4058_v57  ;;  %v4042_v56 = vld [vmem:[%s5380_s1 + $0x4c0] sm:$0xf] }
 0x127   : > { %v5558_v42 = vpop.eup %4826  ;;  %v871_v43 = vadd.f32 %v870_v51, %v869_v25  ;;  %v878_v62 = vadd.f32 %v877_v44, %v876_v52  ;;  %v837_v11 = vmul.f32 %v5577_v63, %v5577_v63  ;;  %2633 = vmatpush.bf16.msra.mxu1 %v3563_v5  ;;  %v4187_v16 = vor.u32 %v4657_v2, %v4186_v1  ;;  %v4537_v44 = vld [vmem:[%s5380_s1 + $0x22c] sm:$0xf0]  ;;  %v4170_v60 = vld [vmem:[%s5380_s1 + $0x5c0] sm:$0xf] }
 0x128   : > { %v5562_v49 = vpop.eup %4828  ;;  %v912_v28 = vmul.f32 %v5558_v42, %v5536_v6  ;;  %4830 = vrsqrt.f32 %v5554_v38  ;;  %v1001_v25 = vperm.slane %v5582_v48, 0  ;;  %v1002_v29 = vperm.slane %v5582_v48, 1  ;;  %v4621_v57 = vld [vmem:[%s5380_s1 + $0x4cc] sm:$0xf0]  ;;  %v3690_v5 = vld [vmem:[%s5380_s1 + $0x200] sm:$0xf] }
 0x129   : > { %v922_v58 = vmul.f32 %v5562_v49, %v5538_v47  ;;  %4832 = vrsqrt.f32 %v5556_v39  ;;  %v872_v61 = vrot.slane %v871_v43, 1  ;;  %v879_v9 = vrot.slane %v878_v62, 1  ;;  %v4653_v1 = vld [vmem:[%s5380_s1 + $0x5cc] sm:$0xf0] }
 0x12a   : > { %v913_v35 = vmul.f32 %v5558_v42, %v912_v28  ;;  %v881_v20 = vsel %vm623_vm0, %v837_v11, 0.0  ;;  %2665 = vmatpush.bf16.msrb.mxu0 %v4059_v13  ;;  %v1003_v30 = vperm.slane %v5582_v48, 2  ;;  %v1004_v51 = vperm.slane %v5582_v48, 3 }
 0x12b   : > { %v923_v3 = vmul.f32 %v5562_v49, %v922_v58  ;;  %v873_v8 = vadd.f32 %v872_v61, %v871_v43  ;;  %v880_v19 = vadd.f32 %v879_v9, %v878_v62  ;;  %v882_v27 = vrot.slane %v881_v20, 4  ;;  %2678 = vmatpush.bf16.msrb.mxu1 %v4187_v16  ;;  %v3706_v43 = vld [vmem:[%s5380_s1 + $0x220] sm:$0xf] }
 0x12c   : > { %v914_v7 = vmul.f32 0.5, %v913_v35  ;;  %v822_v41 = vmul.f32 %v5461_v10, %v807_v12  ;;  %vm918_vm3 = vweird.f32 %v5558_v42  ;;  %vm917_vm4 = vweird.f32 %v5536_v6 }
 0x12d   : > { %v924_v15 = vmul.f32 0.5, %v923_v3  ;;  %v899_v18 = vmul.f32 %v873_v8, %v5461_v10  ;;  %v900_v52 = vmul.f32 %v880_v19, %v5461_v10  ;;  %v883_v34 = vadd.f32 %v882_v27, %v881_v20  ;;  %vm5626_vm6 = vmor %vm917_vm4, %vm918_vm3  ;;  %v3818_v19 = vld [vmem:[%s5380_s1 + $0x300] sm:$0xf]  ;;  %v4565_v20 = vld [vmem:[%s5380_s1 + $0x30c] sm:$0xf0] }
 0x12e   : > { %v5586_v14 = vpop.eup %4830  ;;  %v915_v24 = vsub.f32 1.5, %v914_v7  ;;  %vm927_vm5 = vweird.f32 %v5538_v47  ;;  %v1005_v61 = vperm.slane %v5582_v48, 4  ;;  %v1006_v62 = vperm.slane %v5582_v48, 5  ;;  %v4533_v7 = vld [vmem:[%s5380_s1 + $0x20c] sm:$0xf0] }
 0x12f   : > { %v5590_v21 = vpop.eup %4832  ;;  %v932_v26 = vmul.f32 %v5586_v14, %v5554_v38  ;;  %v5599_v32 = vadd.f32 1e-05, %v899_v18  ;;  %v925_v37 = vsub.f32 1.5, %v924_v15  ;;  %v5613_v55 = vadd.f32 1e-05, %v900_v52 }
 0x130   : > { %v942_v31 = vmul.f32 %v5590_v21, %v5556_v39  ;;  %v916_v28 = vmul.f32 %v5558_v42, %v915_v24  ;;  %v884_v59 = vrot.slane %v883_v34, 2  ;;  %vm928_vm7 = vweird.f32 %v5562_v49  ;;  %v4314_v27 = vld [vmem:[%s5380_s1 + $0x6e0] sm:$0xf]  ;;  %v4721_v52 = vld [vmem:[%s5380_s1 + $0x7ec] sm:$0xf0] }
 0x131   : > { %v933_v33 = vmul.f32 %v5586_v14, %v932_v26  ;;  %4834 = vrsqrt.f32 %v5599_v32  ;;  %v5631_v2 = vmul.f32 %v5562_v49, %v925_v37  ;;  %v5635_v4 = vsub.f32 %v5506_v17, %v822_v41  ;;  %v4617_v41 = vld [vmem:[%s5380_s1 + $0x4ac] sm:$0xf0]  ;;  %vm5670_vm11 = vmor %vm927_vm5, %vm928_vm7  ;;  %v5740_v47 = vld [vmem:[%s5380_s1 + $0x680] sm:$0xf] }
 0x132   : > { %v943_v40 = vmul.f32 %v5590_v21, %v942_v31  ;;  %4836 = vrsqrt.f32 %v5613_v55  ;;  %v885_v3 = vadd.f32 %v884_v59, %v883_v34  ;;  %v920_v8 = vsel %vm5626_vm6, %v5558_v42, %v916_v28  ;;  %v4689_v31 = vld [vmem:[%s5380_s1 + $0x6ec] sm:$0xf0] }
 0x133   : > { %v934_v54 = vmul.f32 0.5, %v933_v33  ;;  %v3707_v9 = vor.u32 %v4537_v44, %v3706_v43  ;;  %v3835_v11 = vor.u32 %v4569_v46, %v3834_v45  ;;  %v4043_v12 = vor.u32 %v4621_v57, %v4042_v56  ;;  %v4442_v33 = vld [vmem:[%s5380_s1 + $0x7e0] sm:$0xf]  ;;  %v4649_v56 = vld [vmem:[%s5380_s1 + $0x5ac] sm:$0xf0] }
 0x134   : > { %v944_v58 = vmul.f32 0.5, %v943_v40  ;;  %v886_v15 = vrot.slane %v885_v3, 1  ;;  %v838_v17 = vmul.f32 %v5635_v4, %v5635_v4  ;;  %v4171_v18 = vor.u32 %v4653_v1, %v4170_v60  ;;  %v4026_v40 = vld [vmem:[%s5380_s1 + $0x4a0] sm:$0xf]  ;;  %v4685_v1 = vld [vmem:[%s5380_s1 + $0x6cc] sm:$0xf0] }
 0x135   : > { %v935_v35 = vsub.f32 1.5, %v934_v54  ;;  %vm938_vm8 = vweird.f32 %v5586_v14  ;;  %2645 = vmatpush.bf16.msra.mxu2 %v3707_v9  ;;  %2658 = vmatpush.bf16.msra.mxu3 %v3835_v11  ;;  %v3691_v26 = vor.u32 %v4533_v7, %v3690_v5  ;;  %vm937_vm9 = vweird.f32 %v5554_v38  ;;  %v4154_v43 = vld [vmem:[%s5380_s1 + $0x5a0] sm:$0xf]  ;;  %v4717_v7 = vld [vmem:[%s5380_s1 + $0x7cc] sm:$0xf0] }
 0x136   : > { %v945_v16 = vsub.f32 1.5, %v944_v58  ;;  %vm947_vm10 = vweird.f32 %v5556_v39  ;;  %v887_v34 = vadd.f32 %v886_v15, %v885_v3  ;;  %v888_v37 = vsel %vm623_vm0, %v838_v17, 0.0  ;;  %2666 = vmatpush.bf16.msrb.mxu0 %v4043_v12  ;;  %2679 = vmatpush.bf16.msrb.mxu1 %v4171_v18  ;;  %v4298_v58 = vld [vmem:[%s5380_s1 + $0x6c0] sm:$0xf]  ;;  %vm5685_vm13 = vmor %vm937_vm9, %vm938_vm8 }
 0x137   : > { %v5642_v13 = vpop.eup %4834  ;;  %v5649_v24 = vmul.f32 %v5586_v14, %v935_v35  ;;  %vm948_vm12 = vweird.f32 %v5590_v21  ;;  %v889_v28 = vrot.slane %v888_v37, 4  ;;  %v3819_v54 = vor.u32 %v4565_v20, %v3818_v19  ;;  %v4645_v20 = vld [vmem:[%s5380_s1 + $0x58c] sm:$0xf0] }
 0x138   : > { %v952_v42 = vmul.f32 %v5642_v13, %v5599_v32  ;;  %v5664_v44 = vpop.eup %4836  ;;  %v5679_v59 = vmul.f32 %v920_v8, %v5484_v50  ;;  %v946_v57 = vmul.f32 %v5590_v21, %v945_v16  ;;  %v901_v35 = vmul.f32 %v887_v34, %v5461_v10  ;;  %v4426_v50 = vld [vmem:[%s5380_s1 + $0x7c0] sm:$0xf]  ;;  %vm5714_vm14 = vmor %vm947_vm10, %vm948_vm12  ;;  %v4713_v34 = vld [vmem:[%s5380_s1 + $0x7ac] sm:$0xf0] }
 0x139   : > { %v962_v60 = vmul.f32 %v5664_v44, %v5613_v55  ;;  %v930_v38 = vsel %vm5670_vm11, %v5562_v49, %v5631_v2  ;;  %v940_v6 = vsel %vm5685_vm13, %v5586_v14, %v5649_v24  ;;  %v890_v5 = vadd.f32 %v889_v28, %v888_v37  ;;  %2646 = vmatpush.bf16.msra.mxu2 %v3691_v26  ;;  %v4010_v8 = vld [vmem:[%s5380_s1 + $0x480] sm:$0xf]  ;;  %v4613_v49 = vld [vmem:[%s5380_s1 + $0x48c] sm:$0xf0] }
 0x13a   : > { %v953_v46 = vmul.f32 %v5642_v13, %v952_v42  ;;  %2659 = vmatpush.bf16.msra.mxu3 %v3819_v54  ;;  %v5706_v11 = vadd.f32 1e-05, %v901_v35  ;;  %v4315_v12 = vor.u32 %v4689_v31, %v4314_v27  ;;  %v4443_v16 = vor.u32 %v4721_v52, %v4442_v33  ;;  %v4138_v2 = vld [vmem:[%s5380_s1 + $0x580] sm:$0xf]  ;;  %v4681_v27 = vld [vmem:[%s5380_s1 + $0x6ac] sm:$0xf0] }
 0x13b   : > { %v963_v9 = vmul.f32 %v5664_v44, %v962_v60  ;;  %v891_v17 = vrot.slane %v890_v5, 2  ;;  %v4027_v18 = vor.u32 %v4617_v41, %v4026_v40  ;;  %v4155_v19 = vor.u32 %v4649_v56, %v4154_v43  ;;  %v5720_v24 = vld [vmem:[%s5380_s1 + $0x6a0] sm:$0xf]  ;;  %v4609_v40 = vld [vmem:[%s5380_s1 + $0x46c] sm:$0xf0] }
 0x13c   : > { %v954_v3 = vmul.f32 0.5, %v953_v46  ;;  %v950_v42 = vsel %vm5714_vm14, %v5590_v21, %v946_v57  ;;  %4838 = vrsqrt.f32 %v5706_v11  ;;  %v4299_v39 = vor.u32 %v4685_v1, %v4298_v58  ;;  %v4410_v31 = vld [vmem:[%s5380_s1 + $0x7a0] sm:$0xf]  ;;  %v5742_v57 = vld [vmem:[#allocation7] sm:$0xff]  ;;  %v4677_v35 = vld [vmem:[%s5380_s1 + $0x68c] sm:$0xf0] }
 0x13d   : > { %v964_v26 = vmul.f32 0.5, %v963_v9  ;;  %2691 = vmatpush.bf16.msrb.mxu2 %v4315_v12  ;;  %v992_v33 = vmul.f32 %v930_v38, %v5487_v53  ;;  %vm958_vm15 = vweird.f32 %v5642_v13  ;;  %v892_v52 = vadd.f32 %v891_v17, %v890_v5  ;;  %2667 = vmatpush.bf16.msrb.mxu0 %v4027_v18  ;;  %v3994_v37 = vld [vmem:[%s5380_s1 + $0x460] sm:$0xf]  ;;  %v4641_v53 = vld [vmem:[%s5380_s1 + $0x56c] sm:$0xf0] }
 0x13e   : > { %v955_v15 = vsub.f32 1.5, %v954_v3  ;;  %2704 = vmatpush.bf16.msrb.mxu3 %v4443_v16  ;;  %2680 = vmatpush.bf16.msrb.mxu1 %v4155_v19  ;;  %v4427_v21 = vor.u32 %v4717_v7, %v4426_v50  ;;  %v993_v41 = vmul.f32 %v940_v6, %v5509_v22  ;;  %v4011_v45 = vor.u32 %v4613_v49, %v4010_v8  ;;  %v4122_v28 = vld [vmem:[%s5380_s1 + $0x560] sm:$0xf]  ;;  %v4709_v50 = vld [vmem:[%s5380_s1 + $0x78c] sm:$0xf0] }
 0x13f   : > { %v965_v43 = vsub.f32 1.5, %v964_v26  ;;  %v4139_v46 = vor.u32 %v4645_v20, %v4138_v2  ;;  %v994_v54 = vmul.f32 %v950_v42, %v5512_v23  ;;  %vm968_vm1 = vweird.f32 %v5664_v44  ;;  %v4394_v1 = vld [vmem:[%s5380_s1 + $0x780] sm:$0xf]  ;;  %v4605_v7 = vld [vmem:[%s5380_s1 + $0x44c] sm:$0xf0] }
 0x140   : > { %v956_v56 = vmul.f32 %v5642_v13, %v955_v15  ;;  %v893_v58 = vrot.slane %v892_v52, 1  ;;  %vm957_vm2 = vweird.f32 %v5599_v32  ;;  %v4283_v60 = vor.u32 %v4681_v27, %v5720_v24  ;;  %v3978_v5 = vld [vmem:[%s5380_s1 + $0x440] sm:$0xf]  ;;  %v4637_v2 = vld [vmem:[%s5380_s1 + $0x54c] sm:$0xf0] }
 0x141   : > { %v966_v22 = vmul.f32 %v5664_v44, %v965_v43  ;;  %2692 = vmatpush.bf16.msrb.mxu2 %v4299_v39  ;;  %v4411_v23 = vor.u32 %v4713_v34, %v4410_v31  ;;  %vm5752_vm3 = vmor %vm957_vm2, %vm958_vm15  ;;  %vm967_vm4 = vweird.f32 %v5613_v55  ;;  %2668 = vmatpush.bf16.msrb.mxu0 %v4011_v45  ;;  %v3995_v6 = vor.u32 %v4609_v40, %v3994_v37  ;;  %v4106_v49 = vld [vmem:[%s5380_s1 + $0x540] sm:$0xf]  ;;  %v5792_v17 = vld [vmem:[%s5380_s1 + $0x66c] sm:$0xf0] }
 0x142   : > { %2705 = vmatpush.bf16.msrb.mxu3 %v4427_v21  ;;  %v894_v32 = vadd.f32 %v893_v58, %v892_v52  ;;  %2681 = vmatpush.bf16.msrb.mxu1 %v4139_v46  ;;  %v4123_v3 = vor.u32 %v4641_v53, %v4122_v28  ;;  %v5759_v8 = vpop.eup %4838  ;;  %v1017_v9 = vmul.f32 %v1001_v25, %v5679_v59  ;;  %vm5772_vm5 = vmor %vm967_vm4, %vm968_vm1  ;;  %v1027_v14 = vperm.slane %v5742_v57, 0  ;;  %v5789_v15 = vld [vmem:[%s5380_s1 + $0x660] sm:$0xf]  ;;  %v4705_v19 = vld [vmem:[%s5380_s1 + $0x76c] sm:$0xf0] }
 0x143   : > { %v1018_v55 = vmul.f32 %v1002_v29, %v992_v33  ;;  %v5768_v12 = vmul.f32 %v1003_v30, %v993_v41  ;;  %v960_v25 = vsel %vm5752_vm3, %v5642_v13, %v956_v56  ;;  %v970_v29 = vsel %vm5772_vm5, %v5664_v44, %v966_v22  ;;  %v5795_v18 = vld [vmem:[%s5380_s1 + $0x760] sm:$0xf]  ;;  %v5807_v42 = vld [vmem:[%s5380_s1 + $0x42c] sm:$0xf0] }
 0x144   : > { %v972_v30 = vmul.f32 %v5759_v8, %v5706_v11  ;;  %v902_v59 = vmul.f32 %v894_v32, %v5461_v10  ;;  %v5800_v13 = vmul.f32 %v1004_v51, %v994_v54  ;;  %v4267_v44 = vor.u32 %v4677_v35, %v5740_v47  ;;  %v5804_v24 = vld [vmem:[%s5380_s1 + $0x420] sm:$0xf]  ;;  %v4633_v52 = vld [vmem:[%s5380_s1 + $0x52c] sm:$0xf0] }
 0x145   : > { %2693 = vmatpush.bf16.msrb.mxu2 %v4283_v60  ;;  %v4395_v20 = vor.u32 %v4709_v50, %v4394_v1  ;;  %v5810_v26 = vld [vmem:[%s5380_s1 + $0x520] sm:$0xf]  ;;  %v1028_v39 = vperm.slane %v5742_v57, 1  ;;  %2669 = vmatpush.bf16.msrb.mxu0 %v3995_v6  ;;  %v3979_v31 = vor.u32 %v4605_v7, %v3978_v5  ;;  %v4107_v33 = vor.u32 %v4637_v2, %v4106_v49  ;;  %v5824_v40 = vld [vmem:[%s5380_s1 + $0x64c] sm:$0xf0] }
 0x146   : > { %2706 = vmatpush.bf16.msrb.mxu3 %v4411_v23  ;;  %v973_v27 = vmul.f32 %v5759_v8, %v972_v30  ;;  %v5814_v51 = vadd.f32 1e-05, %v902_v59  ;;  %2682 = vmatpush.bf16.msrb.mxu1 %v4123_v3  ;;  %v5818_v21 = vld [vmem:[%s5380_s1 + $0x640] sm:$0xf]  ;;  %v995_v34 = vmul.f32 %v960_v25, %v5527_v36  ;;  %v996_v37 = vmul.f32 %v970_v29, %v5532_v0  ;;  %v5833_v46 = vld [vmem:[%s5380_s1 + $0x74c] sm:$0xf0] }
 0x147   : > { %vm977_vm6 = vweird.f32 %v5706_v11  ;;  %v5827_v41 = vld [vmem:[%s5380_s1 + $0x740] sm:$0xf]  ;;  %v1029_v43 = vperm.slane %v5742_v57, 2  ;;  %vm978_vm7 = vweird.f32 %v5759_v8  ;;  %v1043_v0 = vadd.f32 %v1027_v14, %v1017_v9  ;;  %v5842_v54 = vld [vmem:[%s5380_s1 + $0x40c] sm:$0xf0] }
 0x148   : > { %v974_v45 = vmul.f32 0.5, %v973_v27  ;;  %4840 = vrsqrt.f32 %v5814_v51  ;;  %v5836_v36 = vld [vmem:[%s5380_s1 + $0x400] sm:$0xf]  ;;  %v4251_v28 = vor.u32 %v5792_v17, %v5789_v15  ;;  %v4379_v53 = vor.u32 %v4705_v19, %v5795_v18  ;;  %v4629_v35 = vld [vmem:[%s5380_s1 + $0x50c] sm:$0xf0]  ;;  %vm5882_vm8 = vmor %vm977_vm6, %vm978_vm7 }
 0x149   : > { %2694 = vmatpush.bf16.msrb.mxu2 %v4267_v44  ;;  %v5845_v56 = vld [vmem:[%s5380_s1 + $0x500] sm:$0xf]  ;;  %v1044_v58 = vadd.f32 %v1028_v39, %v1018_v55  ;;  %v1030_v47 = vperm.slane %v5742_v57, 3  ;;  %2670 = vmatpush.bf16.msrb.mxu0 %v3979_v31  ;;  %v3963_v60 = vor.u32 %v5807_v42, %v5804_v24  ;;  %v4091_v23 = vor.u32 %v4633_v52, %v5810_v26  ;;  %v4495_v50 = vld [vmem:[%s5380_s1 + $0xe4] sm:$0xf] }
 0x14a   : > { %2707 = vmatpush.bf16.msrb.mxu3 %v4395_v20  ;;  %v975_v22 = vsub.f32 1.5, %v974_v45  ;;  %2683 = vmatpush.bf16.msrb.mxu1 %v4107_v33  ;;  %v1307_v1 = vmax.f32 %v1043_v0, 0.0  ;;  %v5855_v38 = vmul.f32 %v1005_v61, %v995_v34  ;;  %v5859_v32 = vmul.f32 %v1006_v62, %v996_v37  ;;  %v3548_v5 = vld [vmem:[%s5380_s1 + $0xf0] sm:$0xf0]  ;;  %v4527_v7 = vld [vmem:[%s5380_s1 + $0x1e4] sm:$0xf] }
 0x14b   : > { %v4235_v6 = vor.u32 %v5824_v40, %v5818_v21  ;;  %v1308_v3 = vmax.f32 %v1044_v58, 0.0  ;;  %v4363_v55 = vor.u32 %v5833_v46, %v5827_v41  ;;  %v3676_v61 = vld [vmem:[%s5380_s1 + $0x1f0] sm:$0xf0]  ;;  %v5872_v49 = vld [vmem:[%s5380_s1 + $0x620] sm:$0xf]  ;;  %v1045_v2 = vadd.f32 %v1029_v43, %v5768_v12 }
 0x14c   : > { %v976_v9 = vmul.f32 %v5759_v8, %v975_v22  ;;  %v5868_v16 = vpack.c.bf16 %v1307_v1, %v1307_v1  ;;  %v5875_v62 = vld [vmem:[%s5380_s1 + $0x62c] sm:$0xf0]  ;;  %v1007_v25 = vperm.slane %v5582_v48, 6  ;;  %v3947_v29 = vor.u32 %v5842_v54, %v5836_v36  ;;  %v4346_v12 = vld [vmem:[%s5380_s1 + $0x720] sm:$0xf] }
 0x14d   : > { %2695 = vmatpush.bf16.msrb.mxu2 %v4251_v28  ;;  %v5889_v30 = vpack.c.bf16 %v1308_v3, %v1308_v3  ;;  %v4697_v59 = vld [vmem:[%s5380_s1 + $0x72c] sm:$0xf0]  ;;  %v1046_v11 = vadd.f32 %v1030_v47, %v5800_v13  ;;  %2671 = vmatpush.bf16.msrb.mxu0 %v3963_v60  ;;  %v4075_v18 = vor.u32 %v4629_v35, %v5845_v56  ;;  %v4491_v44 = vld [vmem:[%s5380_s1 + $0xc4] sm:$0xf]  ;;  %v3532_v20 = vld [vmem:[%s5380_s1 + $0xd0] sm:$0xf0]  ;;  %vm987_vm10 = vweird.f32 %v5814_v51 }
 0x14e   : > { %2708 = vmatpush.bf16.msrb.mxu3 %v4379_v53  ;;  %v5894_v15 = vpop.eup %4840  ;;  %v980_v17 = vsel %vm5882_vm8, %v5759_v8, %v976_v9  ;;  %2684 = vmatpush.bf16.msrb.mxu1 %v4091_v23  ;;  %v3551_v19 = vor.u32 %v4495_v50, %v3548_v5  ;;  %v1309_v24 = vmax.f32 %v1045_v2, 0.0  ;;  %v3679_v13 = vor.u32 %v4527_v7, %v3676_v61  ;;  %v4523_v8 = vld [vmem:[%s5380_s1 + $0x1c4] sm:$0xf]  ;;  %v3660_v26 = vld [vmem:[%s5380_s1 + $0x1d0] sm:$0xf0] }
 0x14f   : > { %v982_v42 = vmul.f32 %v5894_v15, %v5814_v51  ;;  %2621 = vmatmul.bf16.vlgmr.msra.gmra.mxu0 %v5868_v16  ;;  %2634 = vmatmul.bf16.vlgmr.msra.gmra.mxu1 %v5889_v30  ;;  %v1310_v39 = vmax.f32 %v1046_v11, 0.0  ;;  %v1031_v27 = vperm.slane %v5742_v57, 4  ;;  %v997_v31 = vmul.f32 %v980_v17, %v5577_v63  ;;  %v4202_v52 = vld [vmem:[%s5380_s1 + $0x600] sm:$0xf]  ;;  %v4661_v21 = vld [vmem:[%s5380_s1 + $0x60c] sm:$0xf0] }
 0x150   : > { %v4219_v33 = vor.u32 %v5875_v62, %v5872_v49  ;;  %v5914_v34 = vpack.c.bf16 %v1309_v24, %v1309_v24  ;;  %v1032_v37 = vperm.slane %v5742_v57, 5  ;;  %v4347_v41 = vor.u32 %v4697_v59, %v4346_v12  ;;  %v4330_v43 = vld [vmem:[%s5380_s1 + $0x700] sm:$0xf]  ;;  %v4693_v63 = vld [vmem:[%s5380_s1 + $0x70c] sm:$0xf0] }
 0x151   : > { %v983_v40 = vmul.f32 %v5894_v15, %v982_v42  ;;  %2696 = vmatpush.bf16.msrb.mxu2 %v4235_v6  ;;  %v5920_v45 = vpack.c.bf16 %v1310_v39, %v1310_v39  ;;  %v4559_v46 = vld [vmem:[%s5380_s1 + $0x2e4] sm:$0xf]  ;;  %2672 = vmatpush.bf16.msrb.mxu0 %v3947_v29  ;;  %v3804_v36 = vld [vmem:[%s5380_s1 + $0x2f0] sm:$0xf0]  ;;  %v1008_v54 = vperm.slane %v5582_v48, 7  ;;  %v3535_v56 = vor.u32 %v4491_v44, %v3532_v20 }
 0x152   : > { %2709 = vmatpush.bf16.msrb.mxu3 %v4363_v55  ;;  %2685 = vmatpush.bf16.msrb.mxu1 %v4075_v18  ;;  %v4591_v0 = vld [vmem:[%s5380_s1 + $0x3e4] sm:$0xf]  ;;  %v3932_v28 = vld [vmem:[%s5380_s1 + $0x3f0] sm:$0xf0]  ;;  %v3663_v58 = vor.u32 %v4523_v8, %v3660_v26  ;;  %v1023_v60 = vmul.f32 %v1007_v25, %v997_v31  ;;  %v1047_v1 = vadd.f32 %v1031_v27, %v5855_v38  ;;  %v1033_v50 = vperm.slane %v5742_v57, 6 }
 0x153   : > { %v984_v53 = vmul.f32 0.5, %v983_v40  ;;  %v4487_v47 = vld [vmem:[%s5380_s1 + $0xa4] sm:$0xf]  ;;  %v3516_v22 = vld [vmem:[%s5380_s1 + $0xb0] sm:$0xf0]  ;;  %2647 = vmatmul.bf16.vlgmr.msra.gmra.mxu2 %v5914_v34  ;;  %2660 = vmatmul.bf16.vlgmr.msra.gmra.mxu3 %v5920_v45  ;;  %v1048_v48 = vadd.f32 %v1032_v37, %v5859_v32  ;;  %vm988_vm9 = vweird.f32 %v5894_v15  ;;  %v4203_v3 = vor.u32 %v4661_v21, %v4202_v52 }
 0x154   : > { %v4519_v23 = vld [vmem:[%s5380_s1 + $0x1a4] sm:$0xf]  ;;  %v3644_v35 = vld [vmem:[%s5380_s1 + $0x1b0] sm:$0xf0]  ;;  %v4331_v5 = vor.u32 %v4693_v63, %v4330_v43  ;;  %v3807_v7 = vor.u32 %v4559_v46, %v3804_v36  ;;  %v3935_v9 = vor.u32 %v4591_v0, %v3932_v28  ;;  %v3519_v49 = vor.u32 %v4487_v47, %v3516_v22  ;;  %vm989_vm11 = vmor %vm987_vm10, %vm988_vm9 }
 0x155   : > { %2717 = vmatpush.bf16.msra.mxu0 %v3551_v19  ;;  %v985_v6 = vsub.f32 1.5, %v984_v53  ;;  %2697 = vmatpush.bf16.msrb.mxu2 %v4219_v33  ;;  %v4555_v55 = vld [vmem:[%s5380_s1 + $0x2c4] sm:$0xf]  ;;  %v3788_v38 = vld [vmem:[%s5380_s1 + $0x2d0] sm:$0xf0]  ;;  %v3647_v62 = vor.u32 %v4519_v23, %v3644_v35  ;;  %v1311_v59 = vmax.f32 %v1047_v1, 0.0  ;;  %v1049_v17 = vadd.f32 %v1033_v50, %v1023_v60 }
 0x156   : > { %2730 = vmatpush.bf16.msra.mxu1 %v3679_v13  ;;  %2710 = vmatpush.bf16.msrb.mxu3 %v4347_v41  ;;  %v4587_v61 = vld [vmem:[%s5380_s1 + $0x3c4] sm:$0xf]  ;;  %v3916_v2 = vld [vmem:[%s5380_s1 + $0x3d0] sm:$0xf0]  ;;  %v1312_v11 = vmax.f32 %v1048_v48, 0.0  ;;  %v3791_v44 = vor.u32 %v4555_v55, %v3788_v38  ;;  %v1034_v13 = vperm.slane %v5742_v57, 7 }
 0x157   : > { %v986_v32 = vmul.f32 %v5894_v15, %v985_v6  ;;  %v4483_v14 = vld [vmem:[%s5380_s1 + $0x84] sm:$0xf]  ;;  %v3500_v25 = vld [vmem:[%s5380_s1 + $0x90] sm:$0xf0]  ;;  %v3919_v20 = vor.u32 %v4587_v61, %v3916_v2  ;;  %v5958_v31 = vpack.c.bf16 %v1311_v59, %v1311_v59  ;;  %v1313_v57 = vmax.f32 %v1049_v17, 0.0 }
 0x158   : > { %v4515_v29 = vld [vmem:[%s5380_s1 + $0x184] sm:$0xf]  ;;  %v3628_v12 = vld [vmem:[%s5380_s1 + $0x190] sm:$0xf0]  ;;  %v5960_v33 = vpack.c.bf16 %v1312_v11, %v1312_v11  ;;  %vm3188_vm9 = vcmask 1041408   ;;  %vm3192_vm10 = vcmask 1045508  }
 0x159   : > { %2718 = vmatpush.bf16.msra.mxu0 %v3535_v56  ;;  %v990_v51 = vsel %vm989_vm11, %v5894_v15, %v986_v32  ;;  %2698 = vmatpush.bf16.msrb.mxu2 %v4203_v3  ;;  %v4551_v18 = vld [vmem:[%s5380_s1 + $0x2a4] sm:$0xf]  ;;  %v3772_v24 = vld [vmem:[%s5380_s1 + $0x2b0] sm:$0xf0]  ;;  %v3503_v15 = vor.u32 %v4483_v14, %v3500_v25  ;;  %v3631_v8 = vor.u32 %v4515_v29, %v3628_v12 }
 0x15a   : > { %2731 = vmatpush.bf16.msra.mxu1 %v3663_v58  ;;  %2711 = vmatpush.bf16.msrb.mxu3 %v4331_v5  ;;  %v998_v19 = vmul.f32 %v990_v51, %v5635_v4  ;;  %v4583_v42 = vld [vmem:[%s5380_s1 + $0x3a4] sm:$0xf]  ;;  %v3900_v26 = vld [vmem:[%s5380_s1 + $0x3b0] sm:$0xf0]  ;;  %v3775_v37 = vor.u32 %v4551_v18, %v3772_v24  ;;  %v5974_v47 = vpack.c.bf16 %v1313_v57, %v1313_v57 }
 0x15b   : > { %v4479_v39 = vld [vmem:[%s5380_s1 + $0x64] sm:$0xf]  ;;  %v3484_v4 = vld [vmem:[%s5380_s1 + $0x70] sm:$0xf0]  ;;  %v3903_v40 = vor.u32 %v4583_v42, %v3900_v26 }
 0x15c   : > { %v1024_v27 = vmul.f32 %v1008_v54, %v998_v19  ;;  %v4511_v52 = vld [vmem:[%s5380_s1 + $0x164] sm:$0xf]  ;;  %v3612_v21 = vld [vmem:[%s5380_s1 + $0x170] sm:$0xf0]  ;;  %v3487_v36 = vor.u32 %v4479_v39, %v3484_v4 }
 0x15d   : > { %2743 = vmatpush.bf16.msra.mxu2 %v3807_v7  ;;  %2719 = vmatpush.bf16.msra.mxu0 %v3519_v49  ;;  %v4547_v41 = vld [vmem:[%s5380_s1 + $0x284] sm:$0xf]  ;;  %v3756_v43 = vld [vmem:[%s5380_s1 + $0x290] sm:$0xf0]  ;;  %v3615_v0 = vor.u32 %v4511_v52, %v3612_v21 }
 0x15e   : > { %2756 = vmatpush.bf16.msra.mxu3 %v3935_v9  ;;  %2732 = vmatpush.bf16.msra.mxu1 %v3647_v62  ;;  %v4579_v63 = vld [vmem:[%s5380_s1 + $0x384] sm:$0xf]  ;;  %v1050_v46 = vadd.f32 %v1034_v13, %v1024_v27  ;;  %v3884_v28 = vld [vmem:[%s5380_s1 + $0x390] sm:$0xf0]  ;;  %v3759_v60 = vor.u32 %v4547_v41, %v3756_v43 }
 0x15f   : > { %v4475_v53 = vld [vmem:[%s5380_s1 + $0x44] sm:$0xf]  ;;  %v3468_v54 = vld [vmem:[%s5380_s1 + $0x50] sm:$0xf0]  ;;  %2673 = vmatmul.bf16.vlgmr.msrb.gmra.mxu0 %v5958_v31  ;;  %2686 = vmatmul.bf16.vlgmr.msrb.gmra.mxu1 %v5960_v33  ;;  %v3887_v23 = vor.u32 %v4579_v63, %v3884_v28 }
 0x160   : > { %v4507_v56 = vld [vmem:[%s5380_s1 + $0x144] sm:$0xf]  ;;  %v3596_v58 = vld [vmem:[%s5380_s1 + $0x150] sm:$0xf0]  ;;  %v1314_v22 = vmax.f32 %v1050_v46, 0.0  ;;  %v3471_v50 = vor.u32 %v4475_v53, %v3468_v54 }
 0x161   : > { %2744 = vmatpush.bf16.msra.mxu2 %v3791_v44  ;;  %2720 = vmatpush.bf16.msra.mxu0 %v3503_v15  ;;  %v4543_v1 = vld [vmem:[%s5380_s1 + $0x264] sm:$0xf]  ;;  %v3740_v48 = vld [vmem:[%s5380_s1 + $0x270] sm:$0xf0]  ;;  %v3599_v6 = vor.u32 %v4507_v56, %v3596_v58 }
 0x162   : > { %2757 = vmatpush.bf16.msra.mxu3 %v3919_v20  ;;  %2733 = vmatpush.bf16.msra.mxu1 %v3631_v8  ;;  %v5976_v35 = vpack.c.bf16 %v1314_v22, %v1314_v22  ;;  %v4575_v3 = vld [vmem:[%s5380_s1 + $0x364] sm:$0xf]  ;;  %v3868_v5 = vld [vmem:[%s5380_s1 + $0x370] sm:$0xf0]  ;;  %v3743_v61 = vor.u32 %v4543_v1, %v3740_v48 }
 0x163   : > { %v4471_v7 = vld [vmem:[%s5380_s1 + $0x24] sm:$0xf]  ;;  %2699 = vmatmul.bf16.vlgmr.msrb.gmra.mxu2 %v5974_v47  ;;  %v3452_v9 = vld [vmem:[%s5380_s1 + $0x30] sm:$0xf0]  ;;  %v3871_v32 = vor.u32 %v4575_v3, %v3868_v5 }
 0x164   : > { %2712 = vmatmul.bf16.vlgmr.msrb.gmra.mxu3 %v5976_v35  ;;  %v4503_v55 = vld [vmem:[%s5380_s1 + $0x124] sm:$0xf]  ;;  %v3580_v38 = vld [vmem:[%s5380_s1 + $0x130] sm:$0xf0]  ;;  %v3455_v14 = vor.u32 %v4471_v7, %v3452_v9 }
 0x165   : > { %2745 = vmatpush.bf16.msra.mxu2 %v3775_v37  ;;  %2721 = vmatpush.bf16.msra.mxu0 %v3487_v36  ;;  %v4539_v49 = vld [vmem:[%s5380_s1 + $0x244] sm:$0xf]  ;;  %v3724_v62 = vld [vmem:[%s5380_s1 + $0x250] sm:$0xf0]  ;;  %v3583_v25 = vor.u32 %v4503_v55, %v3580_v38 }
 0x166   : > { %2758 = vmatpush.bf16.msra.mxu3 %v3903_v40  ;;  %2734 = vmatpush.bf16.msra.mxu1 %v3615_v0  ;;  %v4571_v2 = vld [vmem:[%s5380_s1 + $0x344] sm:$0xf]  ;;  %v3852_v29 = vld [vmem:[%s5380_s1 + $0x350] sm:$0xf0]  ;;  %v3727_v20 = vor.u32 %v4539_v49, %v3724_v62 }
 0x167   : > { %v4467_v12 = vld [vmem:[%s5380_s1 + $0x4] sm:$0xf]  ;;  %v3436_v59 = vld [vmem:[%s5380_s1 + $0x10] sm:$0xf0]  ;;  %v3855_v24 = vor.u32 %v4571_v2, %v3852_v29 }
 0x168   : > { %v4499_v11 = vld [vmem:[%s5380_s1 + $0x104] sm:$0xf]  ;;  %v3564_v17 = vld [vmem:[%s5380_s1 + $0x110] sm:$0xf0]  ;;  %v3439_v13 = vor.u32 %v4467_v12, %v3436_v59 }
 0x169   : > { %2746 = vmatpush.bf16.msra.mxu2 %v3759_v60  ;;  %2722 = vmatpush.bf16.msra.mxu0 %v3471_v50  ;;  %v4623_v51 = vld [vmem:[%s5380_s1 + $0x4e4] sm:$0xf]  ;;  %v4060_v18 = vld [vmem:[%s5380_s1 + $0x4f0] sm:$0xf0]  ;;  %v3567_v15 = vor.u32 %v4499_v11, %v3564_v17 }
 0x16a   : > { %2759 = vmatpush.bf16.msra.mxu3 %v3887_v23  ;;  %2735 = vmatpush.bf16.msra.mxu1 %v3599_v6  ;;  %v4655_v19 = vld [vmem:[%s5380_s1 + $0x5e4] sm:$0xf]  ;;  %v4188_v44 = vld [vmem:[%s5380_s1 + $0x5f0] sm:$0xf0]  ;;  %v4063_v4 = vor.u32 %v4623_v51, %v4060_v18 }
 0x16b   : > { %v4535_v42 = vld [vmem:[%s5380_s1 + $0x224] sm:$0xf]  ;;  %v3708_v8 = vld [vmem:[%s5380_s1 + $0x230] sm:$0xf0]  ;;  %v4191_v27 = vor.u32 %v4655_v19, %v4188_v44 }
 0x16c   : > { %v4567_v26 = vld [vmem:[%s5380_s1 + $0x324] sm:$0xf]  ;;  %v3836_v39 = vld [vmem:[%s5380_s1 + $0x330] sm:$0xf0]  ;;  %v3711_v40 = vor.u32 %v4535_v42, %v3708_v8 }
 0x16d   : > { %2747 = vmatpush.bf16.msra.mxu2 %v3743_v61  ;;  %2723 = vmatpush.bf16.msra.mxu0 %v3455_v14  ;;  %v4619_v52 = vld [vmem:[%s5380_s1 + $0x4c4] sm:$0xf]  ;;  %v4044_v21 = vld [vmem:[%s5380_s1 + $0x4d0] sm:$0xf0]  ;;  %v3839_v41 = vor.u32 %v4567_v26, %v3836_v39 }
 0x16e   : > { %2760 = vmatpush.bf16.msra.mxu3 %v3871_v32  ;;  %2736 = vmatpush.bf16.msra.mxu1 %v3583_v25  ;;  %v4651_v57 = vld [vmem:[%s5380_s1 + $0x5c4] sm:$0xf]  ;;  %v4172_v37 = vld [vmem:[%s5380_s1 + $0x5d0] sm:$0xf0]  ;;  %v4047_v53 = vor.u32 %v4619_v52, %v4044_v21 }
 0x16f   : > { %v4531_v43 = vld [vmem:[%s5380_s1 + $0x204] sm:$0xf]  ;;  %v3692_v63 = vld [vmem:[%s5380_s1 + $0x210] sm:$0xf0]  ;;  %v4175_v54 = vor.u32 %v4651_v57, %v4172_v37 }
 0x170   : > { %v4563_v46 = vld [vmem:[%s5380_s1 + $0x304] sm:$0xf]  ;;  %v3820_v36 = vld [vmem:[%s5380_s1 + $0x310] sm:$0xf0]  ;;  %v3695_v48 = vor.u32 %v4531_v43, %v3692_v63 }
 0x171   : > { %2748 = vmatpush.bf16.msra.mxu2 %v3727_v20  ;;  %2724 = vmatpush.bf16.msra.mxu0 %v3439_v13  ;;  %v4687_v0 = vld [vmem:[%s5380_s1 + $0x6e4] sm:$0xf]  ;;  %v4316_v28 = vld [vmem:[%s5380_s1 + $0x6f0] sm:$0xf0]  ;;  %v3823_v50 = vor.u32 %v4563_v46, %v3820_v36 }
 0x172   : > { %2761 = vmatpush.bf16.msra.mxu3 %v3855_v24  ;;  %2737 = vmatpush.bf16.msra.mxu1 %v3567_v15  ;;  %v4719_v56 = vld [vmem:[%s5380_s1 + $0x7e4] sm:$0xf]  ;;  %v4444_v58 = vld [vmem:[%s5380_s1 + $0x7f0] sm:$0xf0]  ;;  %v4319_v6 = vor.u32 %v4687_v0, %v4316_v28 }
 0x173   : > { %v4615_v22 = vld [vmem:[%s5380_s1 + $0x4a4] sm:$0xf]  ;;  %v4028_v60 = vld [vmem:[%s5380_s1 + $0x4b0] sm:$0xf0]  ;;  %v4447_v3 = vor.u32 %v4719_v56, %v4444_v58 }
 0x174   : > { %v4647_v23 = vld [vmem:[%s5380_s1 + $0x5a4] sm:$0xf]  ;;  %v4156_v1 = vld [vmem:[%s5380_s1 + $0x5b0] sm:$0xf0]  ;;  %2725 = vmatmul.bf16.vlgmr.msra.gmra.mxu0 %v5868_v16  ;;  %v4031_v9 = vor.u32 %v4615_v22, %v4028_v60 }
 0x175   : > { %2769 = vmatpush.bf16.msrb.mxu0 %v4063_v4  ;;  %2749 = vmatpush.bf16.msra.mxu2 %v3711_v40  ;;  %v4683_v5 = vld [vmem:[%s5380_s1 + $0x6c4] sm:$0xf]  ;;  %v4300_v7 = vld [vmem:[%s5380_s1 + $0x6d0] sm:$0xf0]  ;;  %v4159_v55 = vor.u32 %v4647_v23, %v4156_v1 }
 0x176   : > { %2782 = vmatpush.bf16.msrb.mxu1 %v4191_v27  ;;  %2762 = vmatpush.bf16.msra.mxu3 %v3839_v41  ;;  %v4715_v38 = vld [vmem:[%s5380_s1 + $0x7c4] sm:$0xf]  ;;  %v4428_v61 = vld [vmem:[%s5380_s1 + $0x7d0] sm:$0xf0]  ;;  %v4303_v14 = vor.u32 %v4683_v5, %v4300_v7 }
 0x177   : > { %2738 = vmatmul.bf16.vlgmr.msra.gmra.mxu1 %v5889_v30  ;;  %v4611_v32 = vld [vmem:[%s5380_s1 + $0x484] sm:$0xf]  ;;  %v4012_v49 = vld [vmem:[%s5380_s1 + $0x490] sm:$0xf0]  ;;  %v4431_v25 = vor.u32 %v4715_v38, %v4428_v61  ;;  %v4498_v38 = vld [vmem:[%s5380_s1 + $0xf4] sm:$0xf0] }
 0x178   : > { %v4643_v62 = vld [vmem:[%s5380_s1 + $0x584] sm:$0xf]  ;;  %v4140_v2 = vld [vmem:[%s5380_s1 + $0x590] sm:$0xf0]  ;;  %v4015_v59 = vor.u32 %v4611_v32, %v4012_v49  ;;  %v3682_v61 = vld [vmem:[%s5380_s1 + $0x1e8] sm:$0xf] }
 0x179   : > { %2770 = vmatpush.bf16.msrb.mxu0 %v4047_v53  ;;  %2750 = vmatpush.bf16.msra.mxu2 %v3695_v48  ;;  %v4679_v29 = vld [vmem:[%s5380_s1 + $0x6a4] sm:$0xf]  ;;  %v4284_v12 = vld [vmem:[%s5380_s1 + $0x6b0] sm:$0xf0]  ;;  %v4143_v11 = vor.u32 %v4643_v62, %v4140_v2  ;;  %v4530_v32 = vld [vmem:[%s5380_s1 + $0x1f4] sm:$0xf0] }
 0x17a   : > { %2783 = vmatpush.bf16.msrb.mxu1 %v4175_v54  ;;  %2763 = vmatpush.bf16.msra.mxu3 %v3823_v50  ;;  %v4711_v17 = vld [vmem:[%s5380_s1 + $0x7a4] sm:$0xf]  ;;  %v4412_v51 = vld [vmem:[%s5380_s1 + $0x7b0] sm:$0xf0]  ;;  %v4287_v24 = vor.u32 %v4679_v29, %v4284_v12 }
 0x17b   : > { %v4607_v18 = vld [vmem:[%s5380_s1 + $0x464] sm:$0xf]  ;;  %v3996_v19 = vld [vmem:[%s5380_s1 + $0x470] sm:$0xf0]  ;;  %v4415_v42 = vor.u32 %v4711_v17, %v4412_v51  ;;  %v3683_v17 = vor.u32 %v4530_v32, %v3682_v61  ;;  %v3538_v51 = vld [vmem:[%s5380_s1 + $0xc8] sm:$0xf] }
 0x17c   : > { %2751 = vmatmul.bf16.vlgmr.msra.gmra.mxu2 %v5914_v34  ;;  %v4639_v44 = vld [vmem:[%s5380_s1 + $0x564] sm:$0xf]  ;;  %v4124_v20 = vld [vmem:[%s5380_s1 + $0x570] sm:$0xf0]  ;;  %v3999_v8 = vor.u32 %v4607_v18, %v3996_v19  ;;  %v4494_v18 = vld [vmem:[%s5380_s1 + $0xd4] sm:$0xf0] }
 0x17d   : > { %2795 = vmatpush.bf16.msrb.mxu2 %v4319_v6  ;;  %2771 = vmatpush.bf16.msrb.mxu0 %v4031_v9  ;;  %v4675_v13 = vld [vmem:[%s5380_s1 + $0x684] sm:$0xf]  ;;  %v4268_v15 = vld [vmem:[%s5380_s1 + $0x690] sm:$0xf0]  ;;  %v4127_v26 = vor.u32 %v4639_v44, %v4124_v20  ;;  %v3666_v19 = vld [vmem:[%s5380_s1 + $0x1c8] sm:$0xf] }
 0x17e   : > { %2808 = vmatpush.bf16.msrb.mxu3 %v4447_v3  ;;  %2784 = vmatpush.bf16.msrb.mxu1 %v4159_v55  ;;  %v4707_v39 = vld [vmem:[%s5380_s1 + $0x784] sm:$0xf]  ;;  %v4396_v4 = vld [vmem:[%s5380_s1 + $0x790] sm:$0xf0]  ;;  %v4271_v37 = vor.u32 %v4675_v13, %v4268_v15  ;;  %v3554_v55 = vld [vmem:[%s5380_s1 + $0xe8] sm:$0xf] }
 0x17f   : > { %2764 = vmatmul.bf16.vlgmr.msra.gmra.mxu3 %v5920_v45  ;;  %v4603_v27 = vld [vmem:[%s5380_s1 + $0x444] sm:$0xf]  ;;  %v3980_v52 = vld [vmem:[%s5380_s1 + $0x450] sm:$0xf0]  ;;  %v4399_v40 = vor.u32 %v4707_v39, %v4396_v4  ;;  %v4526_v44 = vld [vmem:[%s5380_s1 + $0x1d4] sm:$0xf0]  ;;  %v3539_v4 = vor.u32 %v4494_v18, %v3538_v51 }
 0x180   : > { %v4635_v21 = vld [vmem:[%s5380_s1 + $0x544] sm:$0xf]  ;;  %v4108_v57 = vld [vmem:[%s5380_s1 + $0x550] sm:$0xf0]  ;;  %v3983_v63 = vor.u32 %v4603_v27, %v3980_v52  ;;  %v4562_v39 = vld [vmem:[%s5380_s1 + $0x2f4] sm:$0xf0]  ;;  %v3667_v27 = vor.u32 %v4526_v44, %v3666_v19 }
 0x181   : > { %2796 = vmatpush.bf16.msrb.mxu2 %v4303_v14  ;;  %2772 = vmatpush.bf16.msrb.mxu0 %v4015_v59  ;;  %v4671_v41 = vld [vmem:[%s5380_s1 + $0x664] sm:$0xf]  ;;  %v4252_v43 = vld [vmem:[%s5380_s1 + $0x670] sm:$0xf0]  ;;  %v4111_v46 = vor.u32 %v4635_v21, %v4108_v57  ;;  %v3938_v52 = vld [vmem:[%s5380_s1 + $0x3e8] sm:$0xf] }
 0x182   : > { %2809 = vmatpush.bf16.msrb.mxu3 %v4431_v25  ;;  %2785 = vmatpush.bf16.msrb.mxu1 %v4143_v11  ;;  %v4703_v36 = vld [vmem:[%s5380_s1 + $0x764] sm:$0xf]  ;;  %v4380_v0 = vld [vmem:[%s5380_s1 + $0x770] sm:$0xf0]  ;;  %v4255_v58 = vor.u32 %v4671_v41, %v4252_v43  ;;  %v3555_v11 = vor.u32 %v4498_v38, %v3554_v55  ;;  %v4594_v21 = vld [vmem:[%s5380_s1 + $0x3f4] sm:$0xf0] }
 0x183   : > { %v4599_v28 = vld [vmem:[%s5380_s1 + $0x424] sm:$0xf]  ;;  %v3964_v53 = vld [vmem:[%s5380_s1 + $0x430] sm:$0xf0]  ;;  %v4383_v22 = vor.u32 %v4703_v36, %v4380_v0  ;;  %v3522_v57 = vld [vmem:[%s5380_s1 + $0xa8] sm:$0xf]  ;;  %v3939_v36 = vor.u32 %v4594_v21, %v3938_v52 }
 0x184   : > { %v4631_v54 = vld [vmem:[%s5380_s1 + $0x524] sm:$0xf]  ;;  %v4092_v56 = vld [vmem:[%s5380_s1 + $0x530] sm:$0xf0]  ;;  %v3967_v48 = vor.u32 %v4599_v28, %v3964_v53  ;;  %v4522_v41 = vld [vmem:[%s5380_s1 + $0x1b4] sm:$0xf0] }
 0x185   : > { %2797 = vmatpush.bf16.msrb.mxu2 %v4287_v24  ;;  %2773 = vmatpush.bf16.msrb.mxu0 %v3999_v8  ;;  %v4667_v60 = vld [vmem:[%s5380_s1 + $0x644] sm:$0xf]  ;;  %v4236_v23 = vld [vmem:[%s5380_s1 + $0x650] sm:$0xf0]  ;;  %v4095_v50 = vor.u32 %v4631_v54, %v4092_v56  ;;  %v3794_v0 = vld [vmem:[%s5380_s1 + $0x2c8] sm:$0xf] }
 0x186   : > { %2810 = vmatpush.bf16.msrb.mxu3 %v4415_v42  ;;  %2786 = vmatpush.bf16.msrb.mxu1 %v4127_v26  ;;  %v4699_v1 = vld [vmem:[%s5380_s1 + $0x744] sm:$0xf]  ;;  %v4364_v6 = vld [vmem:[%s5380_s1 + $0x750] sm:$0xf0]  ;;  %v4239_v49 = vor.u32 %v4667_v60, %v4236_v23  ;;  %v3810_v26 = vld [vmem:[%s5380_s1 + $0x2e8] sm:$0xf] }
 0x187   : > { %v4595_v3 = vld [vmem:[%s5380_s1 + $0x404] sm:$0xf]  ;;  %v3948_v5 = vld [vmem:[%s5380_s1 + $0x410] sm:$0xf0]  ;;  %v4367_v62 = vor.u32 %v4699_v1, %v4364_v6  ;;  %v4558_v28 = vld [vmem:[%s5380_s1 + $0x2d4] sm:$0xf0] }
 0x188   : > { %v4627_v7 = vld [vmem:[%s5380_s1 + $0x504] sm:$0xf]  ;;  %v4076_v9 = vld [vmem:[%s5380_s1 + $0x510] sm:$0xf0]  ;;  %v3951_v14 = vor.u32 %v4595_v3, %v3948_v5  ;;  %v3922_v56 = vld [vmem:[%s5380_s1 + $0x3c8] sm:$0xf] }
 0x189   : > { %2798 = vmatpush.bf16.msrb.mxu2 %v4271_v37  ;;  %2774 = vmatpush.bf16.msrb.mxu0 %v3983_v63  ;;  %v4663_v2 = vld [vmem:[%s5380_s1 + $0x624] sm:$0xf]  ;;  %v4079_v25 = vor.u32 %v4627_v7, %v4076_v9  ;;  %v4220_v29 = vld [vmem:[%s5380_s1 + $0x630] sm:$0xf0]  ;;  %v4490_v37 = vld [vmem:[%s5380_s1 + $0xb4] sm:$0xf0] }
 0x18a   : > { %2811 = vmatpush.bf16.msrb.mxu3 %v4399_v40  ;;  %2787 = vmatpush.bf16.msrb.mxu1 %v4111_v46  ;;  %v4695_v12 = vld [vmem:[%s5380_s1 + $0x724] sm:$0xf]  ;;  %v4348_v59 = vld [vmem:[%s5380_s1 + $0x730] sm:$0xf0]  ;;  %v4223_v20 = vor.u32 %v4663_v2, %v4220_v29  ;;  %v3650_v40 = vld [vmem:[%s5380_s1 + $0x1a8] sm:$0xf]  ;;  %v3811_v46 = vor.u32 %v4562_v39, %v3810_v26  ;;  %v3523_v53 = vor.u32 %v4490_v37, %v3522_v57 }
 0x18b   : > { %v4351_v24 = vor.u32 %v4695_v12, %v4348_v59  ;;  %v4659_v42 = vld [vmem:[%s5380_s1 + $0x604] sm:$0xf]  ;;  %v4204_v13 = vld [vmem:[%s5380_s1 + $0x610] sm:$0xf0]  ;;  %v3651_v54 = vor.u32 %v4522_v41, %v3650_v40  ;;  %v4486_v60 = vld [vmem:[%s5380_s1 + $0x94] sm:$0xf0] }
 0x18c   : > { %v4691_v15 = vld [vmem:[%s5380_s1 + $0x704] sm:$0xf]  ;;  %v4332_v8 = vld [vmem:[%s5380_s1 + $0x710] sm:$0xf0]  ;;  %v4207_v43 = vor.u32 %v4659_v42, %v4204_v13  ;;  %v3634_v23 = vld [vmem:[%s5380_s1 + $0x188] sm:$0xf] }
 0x18d   : > { %2799 = vmatpush.bf16.msrb.mxu2 %v4255_v58  ;;  %2775 = vmatpush.bf16.msrb.mxu0 %v3967_v48  ;;  %v4335_v63 = vor.u32 %v4691_v15, %v4332_v8  ;;  %v4590_v58 = vld [vmem:[%s5380_s1 + $0x3d4] sm:$0xf0]  ;;  %v3795_v48 = vor.u32 %v4558_v28, %v3794_v0  ;;  %v3778_v6 = vld [vmem:[%s5380_s1 + $0x2a8] sm:$0xf] }
 0x18e   : > { %2812 = vmatpush.bf16.msrb.mxu3 %v4383_v22  ;;  %2788 = vmatpush.bf16.msrb.mxu1 %v4095_v50  ;;  %v3506_v22 = vld [vmem:[%s5380_s1 + $0x88] sm:$0xf]  ;;  %v4518_v1 = vld [vmem:[%s5380_s1 + $0x194] sm:$0xf0]  ;;  %v3923_v50 = vor.u32 %v4590_v58, %v3922_v56 }
 0x18f   : > { %v4554_v3 = vld [vmem:[%s5380_s1 + $0x2b4] sm:$0xf0]  ;;  %v3507_v5 = vor.u32 %v4486_v60, %v3506_v22  ;;  %v3635_v7 = vor.u32 %v4518_v1, %v3634_v23  ;;  %v3906_v9 = vld [vmem:[%s5380_s1 + $0x3a8] sm:$0xf] }
 0x190   : > { %v4586_v55 = vld [vmem:[%s5380_s1 + $0x3b4] sm:$0xf0]  ;;  %v3490_v38 = vld [vmem:[%s5380_s1 + $0x68] sm:$0xf] }
 0x191   : > { %2800 = vmatpush.bf16.msrb.mxu2 %v4239_v49  ;;  %2776 = vmatpush.bf16.msrb.mxu0 %v3951_v14  ;;  %v4482_v61 = vld [vmem:[%s5380_s1 + $0x74] sm:$0xf0]  ;;  %v3618_v32 = vld [vmem:[%s5380_s1 + $0x168] sm:$0xf]  ;;  %v3907_v2 = vor.u32 %v4586_v55, %v3906_v9 }
 0x192   : > { %2813 = vmatpush.bf16.msrb.mxu3 %v4367_v62  ;;  %2789 = vmatpush.bf16.msrb.mxu1 %v4079_v25  ;;  %v4514_v49 = vld [vmem:[%s5380_s1 + $0x174] sm:$0xf0]  ;;  %v3779_v62 = vor.u32 %v4554_v3, %v3778_v6  ;;  %v3762_v14 = vld [vmem:[%s5380_s1 + $0x288] sm:$0xf]  ;;  %v3491_v29 = vor.u32 %v4482_v61, %v3490_v38 }
 0x193   : > { %v4550_v25 = vld [vmem:[%s5380_s1 + $0x294] sm:$0xf0]  ;;  %v3619_v12 = vor.u32 %v4514_v49, %v3618_v32  ;;  %v3890_v59 = vld [vmem:[%s5380_s1 + $0x388] sm:$0xf] }
 0x194   : > { %2777 = vmatmul.bf16.vlgmr.msrb.gmra.mxu0 %v5958_v31  ;;  %v4478_v51 = vld [vmem:[%s5380_s1 + $0x54] sm:$0xf0]  ;;  %v3602_v18 = vld [vmem:[%s5380_s1 + $0x148] sm:$0xf]  ;;  %v3763_v44 = vor.u32 %v4550_v25, %v3762_v14 }
 0x195   : > { %2821 = vmatpush.bf16.msra.mxu0 %v3555_v11  ;;  %2801 = vmatpush.bf16.msrb.mxu2 %v4223_v20  ;;  %v4582_v11 = vld [vmem:[%s5380_s1 + $0x394] sm:$0xf0]  ;;  %v3874_v8 = vld [vmem:[%s5380_s1 + $0x368] sm:$0xf] }
 0x196   : > { %2834 = vmatpush.bf16.msra.mxu1 %v3683_v17  ;;  %2814 = vmatpush.bf16.msrb.mxu3 %v4351_v24  ;;  %v3474_v17 = vld [vmem:[%s5380_s1 + $0x48] sm:$0xf]  ;;  %v4510_v19 = vld [vmem:[%s5380_s1 + $0x154] sm:$0xf0]  ;;  %v3891_v20 = vor.u32 %v4582_v11, %v3890_v59 }
 0x197   : > { %2790 = vmatmul.bf16.vlgmr.msrb.gmra.mxu1 %v5960_v33  ;;  %v3746_v24 = vld [vmem:[%s5380_s1 + $0x268] sm:$0xf]  ;;  %v4546_v42 = vld [vmem:[%s5380_s1 + $0x274] sm:$0xf0]  ;;  %v3475_v13 = vor.u32 %v4478_v51, %v3474_v17  ;;  %v3603_v15 = vor.u32 %v4510_v19, %v3602_v18 }
 0x198   : > { %v4578_v26 = vld [vmem:[%s5380_s1 + $0x374] sm:$0xf0]  ;;  %v3458_v39 = vld [vmem:[%s5380_s1 + $0x28] sm:$0xf]  ;;  %v3747_v21 = vor.u32 %v4546_v42, %v3746_v24 }
 0x199   : > { %2822 = vmatpush.bf16.msra.mxu0 %v3539_v4  ;;  %2802 = vmatpush.bf16.msrb.mxu2 %v4207_v43  ;;  %v4474_v4 = vld [vmem:[%s5380_s1 + $0x34] sm:$0xf0]  ;;  %v3875_v57 = vor.u32 %v4578_v26, %v3874_v8  ;;  %v3730_v37 = vld [vmem:[%s5380_s1 + $0x248] sm:$0xf] }
 0x19a   : > { %2835 = vmatpush.bf16.msra.mxu1 %v3667_v27  ;;  %2815 = vmatpush.bf16.msrb.mxu3 %v4335_v63  ;;  %v3586_v27 = vld [vmem:[%s5380_s1 + $0x128] sm:$0xf]  ;;  %v4506_v52 = vld [vmem:[%s5380_s1 + $0x134] sm:$0xf0]  ;;  %v3459_v43 = vor.u32 %v4474_v4, %v3458_v39 }
 0x19b   : > { %v4542_v40 = vld [vmem:[%s5380_s1 + $0x254] sm:$0xf0]  ;;  %v3858_v41 = vld [vmem:[%s5380_s1 + $0x348] sm:$0xf]  ;;  %v3587_v63 = vor.u32 %v4506_v52, %v3586_v27 }
 0x19c   : > { %2803 = vmatmul.bf16.vlgmr.msrb.gmra.mxu2 %v5974_v47  ;;  %v4470_v0 = vld [vmem:[%s5380_s1 + $0x14] sm:$0xf0]  ;;  %v3570_v28 = vld [vmem:[%s5380_s1 + $0x108] sm:$0xf]  ;;  %v3731_v60 = vor.u32 %v4542_v40, %v3730_v37 }
 0x19d   : > { %2847 = vmatpush.bf16.msra.mxu2 %v3811_v46  ;;  %2823 = vmatpush.bf16.msra.mxu0 %v3523_v53  ;;  %v4574_v46 = vld [vmem:[%s5380_s1 + $0x354] sm:$0xf0]  ;;  %v4194_v58 = vld [vmem:[%s5380_s1 + $0x5e8] sm:$0xf] }
 0x19e   : > { %2860 = vmatpush.bf16.msra.mxu3 %v3939_v36  ;;  %2836 = vmatpush.bf16.msra.mxu1 %v3651_v54  ;;  %v3442_v36 = vld [vmem:[%s5380_s1 + $0x8] sm:$0xf]  ;;  %v4502_v53 = vld [vmem:[%s5380_s1 + $0x114] sm:$0xf0]  ;;  %v3859_v23 = vor.u32 %v4574_v46, %v3858_v41 }
 0x19f   : > { %2816 = vmatmul.bf16.vlgmr.msrb.gmra.mxu3 %v5976_v35  ;;  %v4066_v54 = vld [vmem:[%s5380_s1 + $0x4e8] sm:$0xf]  ;;  %v4626_v56 = vld [vmem:[%s5380_s1 + $0x4f4] sm:$0xf0] }
 0x1a0   : > { %v4658_v22 = vld [vmem:[%s5380_s1 + $0x5f4] sm:$0xf0]  ;;  %v3714_v1 = vld [vmem:[%s5380_s1 + $0x228] sm:$0xf] }
 0x1a1   : > { %2848 = vmatpush.bf16.msra.mxu2 %v3795_v48  ;;  %2824 = vmatpush.bf16.msra.mxu0 %v3507_v5  ;;  %v3443_v48 = vor.u32 %v4470_v0, %v3442_v36  ;;  %v4538_v6 = vld [vmem:[%s5380_s1 + $0x234] sm:$0xf0]  ;;  %v3842_v3 = vld [vmem:[%s5380_s1 + $0x328] sm:$0xf]  ;;  %v4195_v9 = vor.u32 %v4658_v22, %v4194_v58 }
 0x1a2   : > { %2861 = vmatpush.bf16.msra.mxu3 %v3923_v50  ;;  %2837 = vmatpush.bf16.msra.mxu1 %v3635_v7  ;;  %v3571_v50 = vor.u32 %v4502_v53, %v3570_v28  ;;  %v4570_v5 = vld [vmem:[%s5380_s1 + $0x334] sm:$0xf0]  ;;  %v4067_v7 = vor.u32 %v4626_v56, %v4066_v54  ;;  %v4050_v55 = vld [vmem:[%s5380_s1 + $0x4c8] sm:$0xf]  ;;  %v3715_v49 = vor.u32 %v4538_v6, %v3714_v1 }
 0x1a3   : > { %v4622_v38 = vld [vmem:[%s5380_s1 + $0x4d4] sm:$0xf0]  ;;  %v4178_v61 = vld [vmem:[%s5380_s1 + $0x5c8] sm:$0xf] }
 0x1a4   : > { %v4654_v32 = vld [vmem:[%s5380_s1 + $0x5d4] sm:$0xf0]  ;;  %v3826_v25 = vld [vmem:[%s5380_s1 + $0x308] sm:$0xf]  ;;  %v4051_v11 = vor.u32 %v4622_v38, %v4050_v55 }
 0x1a5   : > { %2849 = vmatpush.bf16.msra.mxu2 %v3779_v62  ;;  %2825 = vmatpush.bf16.msra.mxu0 %v3491_v29  ;;  %v3843_v62 = vor.u32 %v4570_v5, %v3842_v3  ;;  %v4534_v14 = vld [vmem:[%s5380_s1 + $0x214] sm:$0xf0]  ;;  %v4179_v17 = vor.u32 %v4654_v32, %v4178_v61  ;;  %v4450_v51 = vld [vmem:[%s5380_s1 + $0x7e8] sm:$0xf] }
 0x1a6   : > { %2862 = vmatpush.bf16.msra.mxu3 %v3907_v2  ;;  %2838 = vmatpush.bf16.msra.mxu1 %v3619_v12  ;;  %v3698_v2 = vld [vmem:[%s5380_s1 + $0x208] sm:$0xf]  ;;  %v4566_v29 = vld [vmem:[%s5380_s1 + $0x314] sm:$0xf0] }
 0x1a7   : > { %v4322_v12 = vld [vmem:[%s5380_s1 + $0x6e8] sm:$0xf]  ;;  %v4690_v59 = vld [vmem:[%s5380_s1 + $0x6f4] sm:$0xf0]  ;;  %v3699_v42 = vor.u32 %v4534_v14, %v3698_v2 }
 0x1a8   : > { %v4722_v18 = vld [vmem:[%s5380_s1 + $0x7f4] sm:$0xf0]  ;;  %v4034_v19 = vld [vmem:[%s5380_s1 + $0x4a8] sm:$0xf] }
 0x1a9   : > { %2850 = vmatpush.bf16.msra.mxu2 %v3763_v44  ;;  %2826 = vmatpush.bf16.msra.mxu0 %v3475_v13  ;;  %v4618_v44 = vld [vmem:[%s5380_s1 + $0x4b4] sm:$0xf0]  ;;  %v3827_v13 = vor.u32 %v4566_v29, %v3826_v25  ;;  %v4451_v8 = vor.u32 %v4722_v18, %v4450_v51  ;;  %v4306_v26 = vld [vmem:[%s5380_s1 + $0x6c8] sm:$0xf] }
 0x1aa   : > { %2863 = vmatpush.bf16.msra.mxu3 %v3891_v20  ;;  %2839 = vmatpush.bf16.msra.mxu1 %v3603_v15  ;;  %v4162_v20 = vld [vmem:[%s5380_s1 + $0x5a8] sm:$0xf]  ;;  %v4650_v24 = vld [vmem:[%s5380_s1 + $0x5b4] sm:$0xf0]  ;;  %v4323_v15 = vor.u32 %v4690_v59, %v4322_v12  ;;  %v4035_v4 = vor.u32 %v4618_v44, %v4034_v19 }
 0x1ab   : > { %v4686_v39 = vld [vmem:[%s5380_s1 + $0x6d4] sm:$0xf0]  ;;  %v4163_v27 = vor.u32 %v4650_v24, %v4162_v20  ;;  %v4434_v52 = vld [vmem:[%s5380_s1 + $0x7c8] sm:$0xf] }
 0x1ac   : > { %v4614_v37 = vld [vmem:[%s5380_s1 + $0x494] sm:$0xf0]  ;;  %v4146_v40 = vld [vmem:[%s5380_s1 + $0x588] sm:$0xf] }
 0x1ad   : > { %2851 = vmatpush.bf16.msra.mxu2 %v3747_v21  ;;  %2827 = vmatpush.bf16.msra.mxu0 %v3459_v43  ;;  %v4718_v21 = vld [vmem:[%s5380_s1 + $0x7d4] sm:$0xf0]  ;;  %v4307_v43 = vor.u32 %v4686_v39, %v4306_v26  ;;  %v4290_v46 = vld [vmem:[%s5380_s1 + $0x6a8] sm:$0xf] }
 0x1ae   : > { %2864 = vmatpush.bf16.msra.mxu3 %v3875_v57  ;;  %2840 = vmatpush.bf16.msra.mxu1 %v3587_v63  ;;  %v4018_v57 = vld [vmem:[%s5380_s1 + $0x488] sm:$0xf]  ;;  %v4646_v41 = vld [vmem:[%s5380_s1 + $0x594] sm:$0xf0]  ;;  %v4435_v63 = vor.u32 %v4718_v21, %v4434_v52  ;;  %v3556_v52 = vld [vmem:[%s5380_s1 + $0xf8] sm:$0xf0] }
 0x1af   : > { %v4682_v36 = vld [vmem:[%s5380_s1 + $0x6b4] sm:$0xf0]  ;;  %v4019_v0 = vor.u32 %v4614_v37, %v4018_v57  ;;  %v4147_v28 = vor.u32 %v4646_v41, %v4146_v40  ;;  %v4418_v53 = vld [vmem:[%s5380_s1 + $0x7a8] sm:$0xf]  ;;  %v4528_v21 = vld [vmem:[%s5380_s1 + $0x1ec] sm:$0xf] }
 0x1b0   : > { %v4714_v54 = vld [vmem:[%s5380_s1 + $0x7b4] sm:$0xf0]  ;;  %v4002_v56 = vld [vmem:[%s5380_s1 + $0x468] sm:$0xf]  ;;  %v3684_v57 = vld [vmem:[%s5380_s1 + $0x1f8] sm:$0xf0] }
 0x1b1   : > { %2852 = vmatpush.bf16.msra.mxu2 %v3731_v60  ;;  %2828 = vmatpush.bf16.msra.mxu0 %v3443_v48  ;;  %v4610_v58 = vld [vmem:[%s5380_s1 + $0x474] sm:$0xf0]  ;;  %v4130_v22 = vld [vmem:[%s5380_s1 + $0x568] sm:$0xf]  ;;  %v4419_v1 = vor.u32 %v4714_v54, %v4418_v53  ;;  %v3687_v53 = vor.u32 %v4528_v21, %v3684_v57  ;;  %v4492_v54 = vld [vmem:[%s5380_s1 + $0xcc] sm:$0xf] }
 0x1b2   : > { %2865 = vmatpush.bf16.msra.mxu3 %v3859_v23  ;;  %2841 = vmatpush.bf16.msra.mxu1 %v3571_v50  ;;  %v4642_v60 = vld [vmem:[%s5380_s1 + $0x574] sm:$0xf0]  ;;  %v4291_v23 = vor.u32 %v4682_v36, %v4290_v46  ;;  %v4274_v48 = vld [vmem:[%s5380_s1 + $0x688] sm:$0xf]  ;;  %v4003_v6 = vor.u32 %v4610_v58, %v4002_v56  ;;  %v3540_v56 = vld [vmem:[%s5380_s1 + $0xd8] sm:$0xf0] }
 0x1b3   : > { %v4678_v50 = vld [vmem:[%s5380_s1 + $0x694] sm:$0xf0]  ;;  %v4131_v3 = vor.u32 %v4642_v60, %v4130_v22  ;;  %v4402_v5 = vld [vmem:[%s5380_s1 + $0x788] sm:$0xf]  ;;  %v4524_v58 = vld [vmem:[%s5380_s1 + $0x1cc] sm:$0xf] }
 0x1b4   : > { %2829 = vmatmul.bf16.vlgmr.msra.gmra.mxu0 %v5868_v16  ;;  %v4606_v55 = vld [vmem:[%s5380_s1 + $0x454] sm:$0xf0]  ;;  %v4114_v38 = vld [vmem:[%s5380_s1 + $0x548] sm:$0xf]  ;;  %v4275_v32 = vor.u32 %v4678_v50, %v4274_v48  ;;  %v3668_v22 = vld [vmem:[%s5380_s1 + $0x1d8] sm:$0xf0] }
 0x1b5   : > { %2873 = vmatpush.bf16.msrb.mxu0 %v4067_v7  ;;  %2853 = vmatpush.bf16.msra.mxu2 %v3715_v49  ;;  %v4710_v7 = vld [vmem:[%s5380_s1 + $0x794] sm:$0xf0]  ;;  %v4386_v29 = vld [vmem:[%s5380_s1 + $0x768] sm:$0xf] }
 0x1b6   : > { %2886 = vmatpush.bf16.msrb.mxu1 %v4195_v9  ;;  %2866 = vmatpush.bf16.msra.mxu3 %v3843_v62  ;;  %v3986_v9 = vld [vmem:[%s5380_s1 + $0x448] sm:$0xf]  ;;  %v4638_v61 = vld [vmem:[%s5380_s1 + $0x554] sm:$0xf0]  ;;  %v4403_v49 = vor.u32 %v4710_v7, %v4402_v5  ;;  %v3812_v5 = vld [vmem:[%s5380_s1 + $0x2f8] sm:$0xf0] }
 0x1b7   : > { %2842 = vmatmul.bf16.vlgmr.msra.gmra.mxu1 %v5889_v30  ;;  %v4258_v62 = vld [vmem:[%s5380_s1 + $0x668] sm:$0xf]  ;;  %v4674_v2 = vld [vmem:[%s5380_s1 + $0x674] sm:$0xf0]  ;;  %v3987_v14 = vor.u32 %v4606_v55, %v3986_v9  ;;  %v4115_v25 = vor.u32 %v4638_v61, %v4114_v38  ;;  %v6223_v7 = vld [vmem:[%s445_s19] sm:$0xf]  ;;  %v3543_v9 = vor.u32 %v4492_v54, %v3540_v56  ;;  %v3671_v55 = vor.u32 %v4524_v58, %v3668_v22 }
 0x1b8   : > { %v4706_v12 = vld [vmem:[%s5380_s1 + $0x774] sm:$0xf0]  ;;  %v3970_v59 = vld [vmem:[%s5380_s1 + $0x428] sm:$0xf]  ;;  %v4259_v18 = vor.u32 %v4674_v2, %v4258_v62  ;;  %v4592_v38 = vld [vmem:[%s5380_s1 + $0x3ec] sm:$0xf] }
 0x1b9   : > { %2874 = vmatpush.bf16.msrb.mxu0 %v4051_v11  ;;  %2854 = vmatpush.bf16.msra.mxu2 %v3699_v42  ;;  %v4602_v11 = vld [vmem:[%s5380_s1 + $0x434] sm:$0xf0]  ;;  %v4387_v19 = vor.u32 %v4706_v12, %v4386_v29  ;;  %v4242_v44 = vld [vmem:[%s5380_s1 + $0x648] sm:$0xf]  ;;  %v3940_v61 = vld [vmem:[%s5380_s1 + $0x3f8] sm:$0xf0] }
 0x1ba   : > { %2887 = vmatpush.bf16.msrb.mxu1 %v4179_v17  ;;  %2867 = vmatpush.bf16.msra.mxu3 %v3827_v13  ;;  %v4098_v17 = vld [vmem:[%s5380_s1 + $0x528] sm:$0xf]  ;;  %v4634_v51 = vld [vmem:[%s5380_s1 + $0x534] sm:$0xf0]  ;;  %v3971_v42 = vor.u32 %v4602_v11, %v3970_v59  ;;  %v4520_v62 = vld [vmem:[%s5380_s1 + $0x1ac] sm:$0xf]  ;;  %v3943_v59 = vor.u32 %v4592_v38, %v3940_v61 }
 0x1bb   : > { %v4670_v20 = vld [vmem:[%s5380_s1 + $0x654] sm:$0xf0]  ;;  %v4370_v24 = vld [vmem:[%s5380_s1 + $0x748] sm:$0xf]  ;;  %v4099_v13 = vor.u32 %v4634_v51, %v4098_v17  ;;  %v3652_v2 = vld [vmem:[%s5380_s1 + $0x1b8] sm:$0xf0] }
 0x1bc   : > { %2855 = vmatmul.bf16.vlgmr.msra.gmra.mxu2 %v5914_v34  ;;  %v4598_v26 = vld [vmem:[%s5380_s1 + $0x414] sm:$0xf0]  ;;  %v4082_v39 = vld [vmem:[%s5380_s1 + $0x508] sm:$0xf]  ;;  %v4243_v37 = vor.u32 %v4670_v20, %v4242_v44  ;;  %v1325_v29 = vperm.slane %v6223_v7, 0 }
 0x1bd   : > { %2899 = vmatpush.bf16.msrb.mxu2 %v4323_v15  ;;  %2875 = vmatpush.bf16.msrb.mxu0 %v4035_v4  ;;  %v4702_v15 = vld [vmem:[%s5380_s1 + $0x754] sm:$0xf0]  ;;  %v4226_v41 = vld [vmem:[%s5380_s1 + $0x628] sm:$0xf]  ;;  %v4556_v11 = vld [vmem:[%s5380_s1 + $0x2cc] sm:$0xf] }
 0x1be   : > { %2912 = vmatpush.bf16.msrb.mxu3 %v4451_v8  ;;  %2888 = vmatpush.bf16.msrb.mxu1 %v4163_v27  ;;  %v3954_v8 = vld [vmem:[%s5380_s1 + $0x408] sm:$0xf]  ;;  %v4630_v4 = vld [vmem:[%s5380_s1 + $0x514] sm:$0xf0]  ;;  %v4496_v27 = vld [vmem:[%s5380_s1 + $0xec] sm:$0xf]  ;;  %v4371_v40 = vor.u32 %v4702_v15, %v4370_v24 }
 0x1bf   : > { %2868 = vmatmul.bf16.vlgmr.msra.gmra.mxu3 %v5920_v45  ;;  %v4666_v46 = vld [vmem:[%s5380_s1 + $0x634] sm:$0xf0]  ;;  %v4354_v36 = vld [vmem:[%s5380_s1 + $0x728] sm:$0xf]  ;;  %v3796_v17 = vld [vmem:[%s5380_s1 + $0x2d8] sm:$0xf0] }
 0x1c0   : > { %v4210_v60 = vld [vmem:[%s5380_s1 + $0x608] sm:$0xf]  ;;  %v4662_v48 = vld [vmem:[%s5380_s1 + $0x614] sm:$0xf0]  ;;  %v3924_v44 = vld [vmem:[%s5380_s1 + $0x3d8] sm:$0xf0] }
 0x1c1   : > { %2900 = vmatpush.bf16.msrb.mxu2 %v4307_v43  ;;  %2876 = vmatpush.bf16.msrb.mxu0 %v4019_v0  ;;  %v3955_v43 = vor.u32 %v4598_v26, %v3954_v8  ;;  %v4698_v0 = vld [vmem:[%s5380_s1 + $0x734] sm:$0xf0]  ;;  %v4338_v50 = vld [vmem:[%s5380_s1 + $0x708] sm:$0xf]  ;;  %v4484_v20 = vld [vmem:[%s5380_s1 + $0x8c] sm:$0xf] }
 0x1c2   : > { %2913 = vmatpush.bf16.msrb.mxu3 %v4435_v63  ;;  %2889 = vmatpush.bf16.msrb.mxu1 %v4147_v28  ;;  %v4083_v63 = vor.u32 %v4630_v4, %v4082_v39  ;;  %v3559_v28 = vor.u32 %v4496_v27, %v3556_v52  ;;  %v4516_v15 = vld [vmem:[%s5380_s1 + $0x18c] sm:$0xf]  ;;  %v3636_v8 = vld [vmem:[%s5380_s1 + $0x198] sm:$0xf0]  ;;  %v3799_v39 = vor.u32 %v4556_v11, %v3796_v17 }
 0x1c3   : > { %v4552_v27 = vld [vmem:[%s5380_s1 + $0x2ac] sm:$0xf]  ;;  %v3780_v52 = vld [vmem:[%s5380_s1 + $0x2b8] sm:$0xf0] }
 0x1c4   : > { %v3764_v54 = vld [vmem:[%s5380_s1 + $0x298] sm:$0xf0]  ;;  %v4580_v22 = vld [vmem:[%s5380_s1 + $0x38c] sm:$0xf] }
 0x1c5   : > { %2901 = vmatpush.bf16.msrb.mxu2 %v4291_v23  ;;  %2877 = vmatpush.bf16.msrb.mxu0 %v4003_v6  ;;  %v4227_v23 = vor.u32 %v4666_v46, %v4226_v41  ;;  %v4694_v6 = vld [vmem:[%s5380_s1 + $0x714] sm:$0xf0]  ;;  %v3908_v41 = vld [vmem:[%s5380_s1 + $0x3b8] sm:$0xf0]  ;;  %v4512_v46 = vld [vmem:[%s5380_s1 + $0x16c] sm:$0xf] }
 0x1c6   : > { %2914 = vmatpush.bf16.msrb.mxu3 %v4419_v1  ;;  %2890 = vmatpush.bf16.msrb.mxu1 %v4131_v3  ;;  %v4355_v1 = vor.u32 %v4698_v0, %v4354_v36  ;;  %v4560_v3 = vld [vmem:[%s5380_s1 + $0x2ec] sm:$0xf]  ;;  %v3620_v36 = vld [vmem:[%s5380_s1 + $0x178] sm:$0xf0]  ;;  %v3783_v0 = vor.u32 %v4552_v27, %v3780_v52 }
 0x1c7   : > { %v3815_v12 = vor.u32 %v4560_v3, %v3812_v5  ;;  %v3623_v58 = vor.u32 %v4512_v46, %v3620_v36  ;;  %v3604_v3 = vld [vmem:[%s5380_s1 + $0x158] sm:$0xf0] }
 0x1c8   : > { %v3748_v38 = vld [vmem:[%s5380_s1 + $0x278] sm:$0xf0] }
 0x1c9   : > { %2902 = vmatpush.bf16.msrb.mxu2 %v4275_v32  ;;  %2878 = vmatpush.bf16.msrb.mxu0 %v3987_v14  ;;  %v4488_v32 = vld [vmem:[%s5380_s1 + $0xac] sm:$0xf]  ;;  %v4211_v14 = vor.u32 %v4662_v48, %v4210_v60  ;;  %v3892_v60 = vld [vmem:[%s5380_s1 + $0x398] sm:$0xf0] }
 0x1ca   : > { %2915 = vmatpush.bf16.msrb.mxu3 %v4403_v49  ;;  %2891 = vmatpush.bf16.msrb.mxu1 %v4115_v25  ;;  %v3524_v49 = vld [vmem:[%s5380_s1 + $0xb8] sm:$0xf0]  ;;  %v4339_v25 = vor.u32 %v4694_v6, %v4338_v50  ;;  %v4508_v6 = vld [vmem:[%s5380_s1 + $0x14c] sm:$0xf] }
 0x1cb   : > { %v3527_v51 = vor.u32 %v4488_v32, %v3524_v49  ;;  %v3476_v50 = vld [vmem:[%s5380_s1 + $0x58] sm:$0xf0]  ;;  %v3607_v32 = vor.u32 %v4508_v6, %v3604_v3 }
 0x1cc   : > { %v2622_v24 = vpop.f32.mrf.mxu0  ;;  %v3588_v11 = vld [vmem:[%s5380_s1 + $0x138] sm:$0xf0] }
 0x1cd   : > { %2903 = vmatpush.bf16.msrb.mxu2 %v4259_v18  ;;  %2879 = vmatpush.bf16.msrb.mxu0 %v3971_v42  ;;  %v3655_v18 = vor.u32 %v4520_v62, %v3652_v2  ;;  %v2635_v42 = vpop.f32.mrf.mxu1  ;;  %v2623_v26 = vadd.f32 %v2622_v24, %v1325_v29  ;;  %v4576_v2 = vld [vmem:[%s5380_s1 + $0x36c] sm:$0xf] }
 0x1ce   : > { %2916 = vmatpush.bf16.msrb.mxu3 %v4387_v19  ;;  %2892 = vmatpush.bf16.msrb.mxu1 %v4099_v13  ;;  %v4588_v19 = vld [vmem:[%s5380_s1 + $0x3cc] sm:$0xf]  ;;  %v3508_v13 = vld [vmem:[%s5380_s1 + $0x98] sm:$0xf0] }
 0x1cf   : > { %v3927_v4 = vor.u32 %v4588_v19, %v3924_v44  ;;  %v2636_v21 = vadd.f32 %v2635_v42, %v2623_v26  ;;  %v3511_v57 = vor.u32 %v4484_v20, %v3508_v13  ;;  %v4540_v19 = vld [vmem:[%s5380_s1 + $0x24c] sm:$0xf]  ;;  %v3732_v44 = vld [vmem:[%s5380_s1 + $0x258] sm:$0xf0] }
 0x1d0   : > { %v4572_v20 = vld [vmem:[%s5380_s1 + $0x34c] sm:$0xf]  ;;  %v3860_v13 = vld [vmem:[%s5380_s1 + $0x358] sm:$0xf0] }
 0x1d1   : > { %2904 = vmatpush.bf16.msrb.mxu2 %v4243_v37  ;;  %2880 = vmatpush.bf16.msrb.mxu0 %v3955_v43  ;;  %v3639_v37 = vor.u32 %v4516_v15, %v3636_v8  ;;  %v4480_v43 = vld [vmem:[%s5380_s1 + $0x6c] sm:$0xf]  ;;  %v3444_v8 = vld [vmem:[%s5380_s1 + $0x18] sm:$0xf0] }
 0x1d2   : > { %2917 = vmatpush.bf16.msrb.mxu3 %v4371_v40  ;;  %2893 = vmatpush.bf16.msrb.mxu1 %v4083_v63  ;;  %v4584_v40 = vld [vmem:[%s5380_s1 + $0x3ac] sm:$0xf]  ;;  %v3492_v63 = vld [vmem:[%s5380_s1 + $0x78] sm:$0xf0] }
 0x1d3   : > { %v3495_v56 = vor.u32 %v4480_v43, %v3492_v63  ;;  %v4468_v15 = vld [vmem:[%s5380_s1 + $0xc] sm:$0xf]  ;;  %v3863_v43 = vor.u32 %v4572_v20, %v3860_v13  ;;  %v4308_v13 = vld [vmem:[%s5380_s1 + $0x6d8] sm:$0xf0] }
 0x1d4   : > { %2881 = vmatmul.bf16.vlgmr.msrb.gmra.mxu0 %v5958_v31  ;;  %v4500_v26 = vld [vmem:[%s5380_s1 + $0x10c] sm:$0xf]  ;;  %v3447_v46 = vor.u32 %v4468_v15, %v3444_v8 }
 0x1d5   : > { %2925 = vmatpush.bf16.msra.mxu0 %v3559_v28  ;;  %2905 = vmatpush.bf16.msrb.mxu2 %v4227_v23  ;;  %v3911_v28 = vor.u32 %v4584_v40, %v3908_v41  ;;  %v4476_v23 = vld [vmem:[%s5380_s1 + $0x4c] sm:$0xf]  ;;  %v2637_v48 = vpop.f32.mrf.mxu1  ;;  %v3735_v41 = vor.u32 %v4540_v19, %v3732_v44 }
 0x1d6   : > { %2938 = vmatpush.bf16.msra.mxu1 %v3687_v53  ;;  %2918 = vmatpush.bf16.msrb.mxu3 %v4355_v1  ;;  %v4548_v53 = vld [vmem:[%s5380_s1 + $0x28c] sm:$0xf]  ;;  %v2624_v1 = vpop.f32.mrf.mxu0  ;;  %v3479_v61 = vor.u32 %v4476_v23, %v3476_v50  ;;  %v2648_v49 = vpop.f32.mrf.mxu2  ;;  %v4180_v50 = vld [vmem:[%s5380_s1 + $0x5d8] sm:$0xf0] }
 0x1d7   : > { %2894 = vmatmul.bf16.vlgmr.msrb.gmra.mxu1 %v5960_v33  ;;  %v3767_v5 = vor.u32 %v4548_v53, %v3764_v54  ;;  %v2661_v62 = vpop.f32.mrf.mxu3  ;;  %v2649_v29 = vadd.f32 %v2648_v49, %v2636_v21  ;;  %v4068_v21 = vld [vmem:[%s5380_s1 + $0x4f8] sm:$0xf0]  ;;  %v4536_v63 = vld [vmem:[%s5380_s1 + $0x22c] sm:$0xf] }
 0x1d8   : > { %v3716_v53 = vld [vmem:[%s5380_s1 + $0x238] sm:$0xf0]  ;;  %v4568_v54 = vld [vmem:[%s5380_s1 + $0x32c] sm:$0xf] }
 0x1d9   : > { %2926 = vmatpush.bf16.msra.mxu0 %v3543_v9  ;;  %2906 = vmatpush.bf16.msrb.mxu2 %v4211_v14  ;;  %v3895_v9 = vor.u32 %v4580_v22, %v3892_v60  ;;  %v3876_v14 = vld [vmem:[%s5380_s1 + $0x378] sm:$0xf0]  ;;  %v2662_v17 = vadd.f32 %v2661_v62, %v2649_v29  ;;  %v4620_v23 = vld [vmem:[%s5380_s1 + $0x4cc] sm:$0xf]  ;;  %v3719_v6 = vor.u32 %v4536_v63, %v3716_v53 }
 0x1da   : > { %2939 = vmatpush.bf16.msra.mxu1 %v3671_v55  ;;  %2919 = vmatpush.bf16.msrb.mxu3 %v4339_v25  ;;  %v4544_v55 = vld [vmem:[%s5380_s1 + $0x26c] sm:$0xf]  ;;  %v4052_v1 = vld [vmem:[%s5380_s1 + $0x4d8] sm:$0xf0] }
 0x1db   : > { %v4472_v25 = vld [vmem:[%s5380_s1 + $0x2c] sm:$0xf]  ;;  %v4055_v49 = vor.u32 %v4620_v23, %v4052_v1  ;;  %v4420_v63 = vld [vmem:[%s5380_s1 + $0x7b8] sm:$0xf0] }
 0x1dc   : > { %2907 = vmatmul.bf16.vlgmr.msrb.gmra.mxu2 %v5974_v47  ;;  %v4652_v48 = vld [vmem:[%s5380_s1 + $0x5cc] sm:$0xf]  ;;  %v4004_v53 = vld [vmem:[%s5380_s1 + $0x478] sm:$0xf0] }
 0x1dd   : > { %2951 = vmatpush.bf16.msra.mxu2 %v3815_v12  ;;  %2927 = vmatpush.bf16.msra.mxu0 %v3527_v51  ;;  %v3460_v12 = vld [vmem:[%s5380_s1 + $0x38] sm:$0xf0]  ;;  %v3751_v51 = vor.u32 %v4544_v55, %v3748_v38  ;;  %v2687_v52 = vpop.f32.mrf.mxu1  ;;  %v4564_v55 = vld [vmem:[%s5380_s1 + $0x30c] sm:$0xf]  ;;  %v4183_v62 = vor.u32 %v4652_v48, %v4180_v50 }
 0x1de   : > { %2964 = vmatpush.bf16.msra.mxu3 %v3943_v59  ;;  %2940 = vmatpush.bf16.msra.mxu1 %v3655_v18  ;;  %v4504_v59 = vld [vmem:[%s5380_s1 + $0x12c] sm:$0xf]  ;;  %v3879_v18 = vor.u32 %v4576_v2, %v3876_v14  ;;  %v3463_v24 = vor.u32 %v4472_v25, %v3460_v12  ;;  %v2674_v27 = vpop.f32.mrf.mxu0  ;;  %v3828_v38 = vld [vmem:[%s5380_s1 + $0x318] sm:$0xf0] }
 0x1df   : > { %2920 = vmatmul.bf16.vlgmr.msrb.gmra.mxu3 %v5976_v35  ;;  %v3591_v42 = vor.u32 %v4504_v59, %v3588_v11  ;;  %v2675_v40 = vadd.f32 %v2674_v27, %v2662_v17  ;;  %v4720_v2 = vld [vmem:[%s5380_s1 + $0x7ec] sm:$0xf]  ;;  %v4452_v14 = vld [vmem:[%s5380_s1 + $0x7f8] sm:$0xf0] }
 0x1e0   : > { %v4616_v25 = vld [vmem:[%s5380_s1 + $0x4ac] sm:$0xf]  ;;  %v4036_v59 = vld [vmem:[%s5380_s1 + $0x4b8] sm:$0xf0]  ;;  %v4455_v44 = vor.u32 %v4720_v2, %v4452_v14 }
 0x1e1   : > { %2952 = vmatpush.bf16.msra.mxu2 %v3799_v39  ;;  %2928 = vmatpush.bf16.msra.mxu0 %v3511_v57  ;;  %v3572_v39 = vld [vmem:[%s5380_s1 + $0x118] sm:$0xf0]  ;;  %v4656_v57 = vld [vmem:[%s5380_s1 + $0x5ec] sm:$0xf]  ;;  %v4039_v8 = vor.u32 %v4616_v25, %v4036_v59 }
 0x1e2   : > { %2965 = vmatpush.bf16.msra.mxu3 %v3927_v4  ;;  %2941 = vmatpush.bf16.msra.mxu1 %v3639_v37  ;;  %v4624_v4 = vld [vmem:[%s5380_s1 + $0x4ec] sm:$0xf]  ;;  %v4196_v37 = vld [vmem:[%s5380_s1 + $0x5f8] sm:$0xf0]  ;;  %v3575_v36 = vor.u32 %v4500_v26, %v3572_v39 }
 0x1e3   : > { %v4071_v22 = vor.u32 %v4624_v4, %v4068_v21  ;;  %v4199_v60 = vor.u32 %v4656_v57, %v4196_v37  ;;  %v4648_v11 = vld [vmem:[%s5380_s1 + $0x5ac] sm:$0xf]  ;;  %v4164_v17 = vld [vmem:[%s5380_s1 + $0x5b8] sm:$0xf0] }
 0x1e4   : > { %v4167_v26 = vor.u32 %v4648_v11, %v4164_v17  ;;  %v4436_v39 = vld [vmem:[%s5380_s1 + $0x7d8] sm:$0xf0]  ;;  %v4644_v27 = vld [vmem:[%s5380_s1 + $0x58c] sm:$0xf] }
 0x1e5   : > { %2953 = vmatpush.bf16.msra.mxu2 %v3783_v0  ;;  %2929 = vmatpush.bf16.msra.mxu0 %v3495_v56  ;;  %v2650_v0 = vpop.f32.mrf.mxu2  ;;  %v3844_v56 = vld [vmem:[%s5380_s1 + $0x338] sm:$0xf0]  ;;  %v2689_v12 = vpop.f32.mrf.mxu1  ;;  %v4680_v57 = vld [vmem:[%s5380_s1 + $0x6ac] sm:$0xf] }
 0x1e6   : > { %2966 = vmatpush.bf16.msra.mxu3 %v3911_v28  ;;  %2942 = vmatpush.bf16.msra.mxu1 %v3623_v58  ;;  %v2663_v28 = vpop.f32.mrf.mxu3  ;;  %v2688_v58 = vadd.f32 %v2687_v52, %v2675_v40  ;;  %v3847_v3 = vor.u32 %v4568_v54, %v3844_v56  ;;  %v2676_v29 = vpop.f32.mrf.mxu0  ;;  %v4020_v4 = vld [vmem:[%s5380_s1 + $0x498] sm:$0xf0]  ;;  %v1326_v56 = vperm.slane %v6223_v7, 1  ;;  %v4636_v2 = vld [vmem:[%s5380_s1 + $0x54c] sm:$0xf] }
 0x1e7   : > { %v4148_v52 = vld [vmem:[%s5380_s1 + $0x598] sm:$0xf0]  ;;  %v4608_v28 = vld [vmem:[%s5380_s1 + $0x46c] sm:$0xf] }
 0x1e8   : > { %v4151_v0 = vor.u32 %v4644_v27, %v4148_v52  ;;  %v4116_v14 = vld [vmem:[%s5380_s1 + $0x558] sm:$0xf0]  ;;  %v4672_v11 = vld [vmem:[%s5380_s1 + $0x66c] sm:$0xf] }
 0x1e9   : > { %2954 = vmatpush.bf16.msra.mxu2 %v3767_v5  ;;  %2930 = vmatpush.bf16.msra.mxu0 %v3479_v61  ;;  %v4532_v5 = vld [vmem:[%s5380_s1 + $0x20c] sm:$0xf]  ;;  %v4260_v17 = vld [vmem:[%s5380_s1 + $0x678] sm:$0xf0] }
 0x1ea   : > { %2967 = vmatpush.bf16.msra.mxu3 %v3895_v9  ;;  %2943 = vmatpush.bf16.msra.mxu1 %v3607_v32  ;;  %v3700_v9 = vld [vmem:[%s5380_s1 + $0x218] sm:$0xf0]  ;;  %v4688_v61 = vld [vmem:[%s5380_s1 + $0x6ec] sm:$0xf] }
 0x1eb   : > { %v4324_v32 = vld [vmem:[%s5380_s1 + $0x6f8] sm:$0xf0] }
 0x1ec   : > { %v4327_v19 = vor.u32 %v4688_v61, %v4324_v32  ;;  %v4604_v61 = vld [vmem:[%s5380_s1 + $0x44c] sm:$0xf]  ;;  %v3988_v32 = vld [vmem:[%s5380_s1 + $0x458] sm:$0xf0] }
 0x1ed   : > { %2955 = vmatpush.bf16.msra.mxu2 %v3751_v51  ;;  %2931 = vmatpush.bf16.msra.mxu0 %v3463_v24  ;;  %v3703_v51 = vor.u32 %v4532_v5, %v3700_v9  ;;  %v2700_v20 = vpop.f32.mrf.mxu2  ;;  %v4007_v9 = vor.u32 %v4608_v28, %v4004_v53 }
 0x1ee   : > { %2968 = vmatpush.bf16.msra.mxu3 %v3879_v18  ;;  %2944 = vmatpush.bf16.msra.mxu1 %v3591_v42  ;;  %v3831_v18 = vor.u32 %v4564_v55, %v3828_v38  ;;  %v2713_v24 = vpop.f32.mrf.mxu3  ;;  %v4684_v42 = vld [vmem:[%s5380_s1 + $0x6cc] sm:$0xf]  ;;  %v2701_v15 = vadd.f32 %v2700_v20, %v2688_v58  ;;  %v4404_v38 = vld [vmem:[%s5380_s1 + $0x798] sm:$0xf0] }
 0x1ef   : > { %v4311_v37 = vor.u32 %v4684_v42, %v4308_v13  ;;  %v4640_v58 = vld [vmem:[%s5380_s1 + $0x56c] sm:$0xf] }
 0x1f0   : > { %v6310_v21 = vadd.f32 %v2713_v24, %v2701_v15  ;;  %v4600_v20 = vld [vmem:[%s5380_s1 + $0x42c] sm:$0xf]  ;;  %v3972_v24 = vld [vmem:[%s5380_s1 + $0x438] sm:$0xf0] }
 0x1f1   : > { %2956 = vmatpush.bf16.msra.mxu2 %v3735_v41  ;;  %2932 = vmatpush.bf16.msra.mxu0 %v3447_v46  ;;  %v4292_v41 = vld [vmem:[%s5380_s1 + $0x6b8] sm:$0xf0]  ;;  %v4632_v13 = vld [vmem:[%s5380_s1 + $0x52c] sm:$0xf]  ;;  %v3975_v52 = vor.u32 %v4600_v20, %v3972_v24 }
 0x1f2   : > { %2969 = vmatpush.bf16.msra.mxu3 %v3863_v43  ;;  %2945 = vmatpush.bf16.msra.mxu1 %v3575_v36  ;;  %v4712_v43 = vld [vmem:[%s5380_s1 + $0x7ac] sm:$0xf]  ;;  %v3029_v46 = vsel %vm623_vm0, %v6310_v21, 0.0  ;;  %v4295_v23 = vor.u32 %v4680_v57, %v4292_v41  ;;  %v4100_v15 = vld [vmem:[%s5380_s1 + $0x538] sm:$0xf0] }
 0x1f3   : > { %v3030_v54 = vrot.slane %v3029_v46, 4  ;;  %v4423_v1 = vor.u32 %v4712_v43, %v4420_v63  ;;  %v4103_v57 = vor.u32 %v4632_v13, %v4100_v15  ;;  %v4596_v41 = vld [vmem:[%s5380_s1 + $0x40c] sm:$0xf]  ;;  %v3956_v63 = vld [vmem:[%s5380_s1 + $0x418] sm:$0xf0] }
 0x1f4   : > { %2933 = vmatmul.bf16.vlgmr.msra.gmra.mxu0 %v5868_v16  ;;  %v4716_v16 = vld [vmem:[%s5380_s1 + $0x7cc] sm:$0xf]  ;;  %v2739_v5 = vpop.f32.mrf.mxu1 }
 0x1f5   : > { %2977 = vmatpush.bf16.msrb.mxu0 %v4071_v22  ;;  %2957 = vmatpush.bf16.msra.mxu2 %v3719_v6  ;;  %v4439_v40 = vor.u32 %v4716_v16, %v4436_v39  ;;  %v4132_v22 = vld [vmem:[%s5380_s1 + $0x578] sm:$0xf0]  ;;  %v2702_v48 = vpop.f32.mrf.mxu2  ;;  %v4676_v6 = vld [vmem:[%s5380_s1 + $0x68c] sm:$0xf] }
 0x1f6   : > { %2990 = vmatpush.bf16.msrb.mxu1 %v4199_v60  ;;  %2970 = vmatpush.bf16.msra.mxu3 %v3847_v3  ;;  %v3031_v60 = vadd.f32 %v3030_v54, %v3029_v46  ;;  %v2715_v50 = vpop.f32.mrf.mxu3  ;;  %v4708_v3 = vld [vmem:[%s5380_s1 + $0x78c] sm:$0xf]  ;;  %v4135_v55 = vor.u32 %v4640_v58, %v4132_v22  ;;  %v3959_v22 = vor.u32 %v4596_v41, %v3956_v63  ;;  %v4356_v48 = vld [vmem:[%s5380_s1 + $0x738] sm:$0xf0] }
 0x1f7   : > { %2946 = vmatmul.bf16.vlgmr.msra.gmra.mxu1 %v5889_v30  ;;  %v4612_v30 = vld [vmem:[%s5380_s1 + $0x48c] sm:$0xf]  ;;  %v4407_v59 = vor.u32 %v4708_v3, %v4404_v38 }
 0x1f8   : > { %v4023_v36 = vor.u32 %v4612_v30, %v4020_v4  ;;  %v4668_v39 = vld [vmem:[%s5380_s1 + $0x64c] sm:$0xf]  ;;  %v4244_v30 = vld [vmem:[%s5380_s1 + $0x658] sm:$0xf0] }
 0x1f9   : > { %2978 = vmatpush.bf16.msrb.mxu0 %v4055_v49  ;;  %2958 = vmatpush.bf16.msra.mxu2 %v3703_v51  ;;  %v3032_v49 = vrot.slane %v3031_v60, 2  ;;  %v4704_v51 = vld [vmem:[%s5380_s1 + $0x76c] sm:$0xf]  ;;  %v4247_v28 = vor.u32 %v4668_v39, %v4244_v30 }
 0x1fa   : > { %2991 = vmatpush.bf16.msrb.mxu1 %v4183_v62  ;;  %2971 = vmatpush.bf16.msra.mxu3 %v3831_v18  ;;  %v3991_v18 = vor.u32 %v4604_v61, %v3988_v32  ;;  %v4628_v46 = vld [vmem:[%s5380_s1 + $0x50c] sm:$0xf]  ;;  %v4340_v61 = vld [vmem:[%s5380_s1 + $0x718] sm:$0xf0] }
 0x1fb   : > { %v3033_v29 = vadd.f32 %v3032_v49, %v3031_v60  ;;  %v4664_v54 = vld [vmem:[%s5380_s1 + $0x62c] sm:$0xf] }
 0x1fc   : > { %2959 = vmatmul.bf16.vlgmr.msra.gmra.mxu2 %v5914_v34  ;;  %v4276_v34 = vld [vmem:[%s5380_s1 + $0x698] sm:$0xf0]  ;;  %v2741_v27 = vpop.f32.mrf.mxu1  ;;  %v4692_v38 = vld [vmem:[%s5380_s1 + $0x70c] sm:$0xf] }
 0x1fd   : > { %3003 = vmatpush.bf16.msrb.mxu2 %v4327_v19  ;;  %2979 = vmatpush.bf16.msrb.mxu0 %v4039_v8  ;;  %v4279_v25 = vor.u32 %v4676_v6, %v4276_v34  ;;  %v4119_v19 = vor.u32 %v4636_v2, %v4116_v14  ;;  %v3034_v42 = vrot.slane %v3033_v29, 1 }
 0x1fe   : > { %3016 = vmatpush.bf16.msrb.mxu3 %v4455_v44  ;;  %2992 = vmatpush.bf16.msrb.mxu1 %v4167_v26  ;;  %v4388_v44 = vld [vmem:[%s5380_s1 + $0x778] sm:$0xf0]  ;;  %v4263_v26 = vor.u32 %v4672_v11, %v4260_v17 }
 0x1ff   : > { %2972 = vmatmul.bf16.vlgmr.msra.gmra.mxu3 %v5920_v45  ;;  %v2726_v45 = vpop.f32.mrf.mxu0  ;;  %v3035_v8 = vadd.f32 %v3034_v42, %v3033_v29  ;;  %v4391_v16 = vor.u32 %v4704_v51, %v4388_v44 }
 0x200   : > { %v2727_v62 = vadd.f32 %v2726_v45, %v1326_v56  ;;  %v2752_v56 = vpop.f32.mrf.mxu2 }
 0x201   : > { %3004 = vmatpush.bf16.msrb.mxu2 %v4311_v37  ;;  %2980 = vmatpush.bf16.msrb.mxu0 %v4023_v36  ;;  %v4700_v37 = vld [vmem:[%s5380_s1 + $0x74c] sm:$0xf]  ;;  %v3057_v43 = vmul.f32 %v3035_v8, %v5461_v10  ;;  %v4084_v36 = vld [vmem:[%s5380_s1 + $0x518] sm:$0xf0] }
 0x202   : > { %3017 = vmatpush.bf16.msrb.mxu3 %v4439_v40  ;;  %2993 = vmatpush.bf16.msrb.mxu1 %v4151_v0  ;;  %v2740_v12 = vadd.f32 %v2739_v5, %v2727_v62  ;;  %v4372_v40 = vld [vmem:[%s5380_s1 + $0x758] sm:$0xf0]  ;;  %v2765_v58 = vpop.f32.mrf.mxu3  ;;  %v4087_v60 = vor.u32 %v4628_v46, %v4084_v36  ;;  %v4660_v5 = vld [vmem:[%s5380_s1 + $0x60c] sm:$0xf]  ;;  %v4343_v62 = vor.u32 %v4692_v38, %v4340_v61 }
 0x203   : > { %v6351_v0 = vsub.f32 %v6310_v21, %v3057_v43  ;;  %v4375_v53 = vor.u32 %v4700_v37, %v4372_v40 }
 0x204   : > { %v2753_v50 = vadd.f32 %v2752_v56, %v2740_v12  ;;  %v1327_v56 = vperm.slane %v6223_v7, 2 }
 0x205   : > { %3005 = vmatpush.bf16.msrb.mxu2 %v4295_v23  ;;  %2981 = vmatpush.bf16.msrb.mxu0 %v4007_v9  ;;  %v4228_v23 = vld [vmem:[%s5380_s1 + $0x638] sm:$0xf0]  ;;  %v3065_v21 = vmul.f32 %v6351_v0, %v6351_v0 }
 0x206   : > { %3018 = vmatpush.bf16.msrb.mxu3 %v4423_v1  ;;  %2994 = vmatpush.bf16.msrb.mxu1 %v4135_v55  ;;  %v4696_v1 = vld [vmem:[%s5380_s1 + $0x72c] sm:$0xf]  ;;  %v2766_v34 = vadd.f32 %v2765_v58, %v2753_v50  ;;  %v4231_v3 = vor.u32 %v4664_v54, %v4228_v23  ;;  %v4212_v9 = vld [vmem:[%s5380_s1 + $0x618] sm:$0xf0] }
 0x207   : > { %v2728_v4 = vpop.f32.mrf.mxu0  ;;  %v3069_v6 = vsel %vm623_vm0, %v3065_v21, 0.0  ;;  %v4359_v45 = vor.u32 %v4696_v1, %v4356_v48  ;;  %v4215_v49 = vor.u32 %v4660_v5, %v4212_v9 }
 0x208   : > { %v3070_v55 = vrot.slane %v3069_v6, 4  ;;  %v2754_v14 = vpop.f32.mrf.mxu2  ;;  %v6374_v4 = vld [vmem:[%s465_s14] sm:$0xf] }
 0x209   : > { %3006 = vmatpush.bf16.msrb.mxu2 %v4279_v25  ;;  %2982 = vmatpush.bf16.msrb.mxu0 %v3991_v18  ;;  %v3165_v63 = vperm.slane %v6374_v4, 0 }
 0x20a   : > { %3019 = vmatpush.bf16.msrb.mxu3 %v4407_v59  ;;  %2995 = vmatpush.bf16.msrb.mxu1 %v4119_v19  ;;  %v3071_v32 = vadd.f32 %v3070_v55, %v3069_v6  ;;  %v2767_v25 = vpop.f32.mrf.mxu3 }
 0x20c   : > { %v3072_v2 = vrot.slane %v3071_v32, 2 }
 0x20d   : > { %3007 = vmatpush.bf16.msrb.mxu2 %v4263_v26  ;;  %2983 = vmatpush.bf16.msrb.mxu0 %v3975_v52 }
 0x20e   : > { %3020 = vmatpush.bf16.msrb.mxu3 %v4391_v16  ;;  %2996 = vmatpush.bf16.msrb.mxu1 %v4103_v57  ;;  %v3073_v29 = vadd.f32 %v3072_v2, %v3071_v32  ;;  %v6370_v16 = vld [vmem:[%s455_s28] sm:$0xf] }
 0x20f   : > { %v3151_v52 = vperm.slane %v6370_v16, 0 }
 0x210   : > { %v3074_v12 = vrot.slane %v3073_v29, 1 }
 0x211   : > { %3008 = vmatpush.bf16.msrb.mxu2 %v4247_v28  ;;  %2984 = vmatpush.bf16.msrb.mxu0 %v3959_v22  ;;  %v2778_v17 = vpop.f32.mrf.mxu0 }
 0x212   : > { %3021 = vmatpush.bf16.msrb.mxu3 %v4375_v53  ;;  %2997 = vmatpush.bf16.msrb.mxu1 %v4087_v60  ;;  %v3075_v59 = vadd.f32 %v3074_v12, %v3073_v29 }
 0x214   : > { %2985 = vmatmul.bf16.vlgmr.msrb.gmra.mxu0 %v5958_v31  ;;  %v3097_v11 = vmul.f32 %v3075_v59, %v5461_v10  ;;  %v2791_v51 = vpop.f32.mrf.mxu1  ;;  %v2779_v31 = vadd.f32 %v2778_v17, %v2766_v34 }
 0x215   : > { %3009 = vmatpush.bf16.msrb.mxu2 %v4231_v3  ;;  %2998 = vmatmul.bf16.vlgmr.msrb.gmra.mxu1 %v5960_v33 }
 0x216   : > { %3022 = vmatpush.bf16.msrb.mxu3 %v4359_v45  ;;  %v3101_v18 = vadd.f32 1e-05, %v3097_v11  ;;  %v2792_v33 = vadd.f32 %v2791_v51, %v2779_v31 }
 0x218   : > { %4842 = vrsqrt.f32 %v3101_v18  ;;  %vm3111_vm13 = vweird.f32 %v3101_v18 }
 0x219   : > { %3010 = vmatpush.bf16.msrb.mxu2 %v4215_v49  ;;  %v2780_v19 = vpop.f32.mrf.mxu0 }
 0x21a   : > { %3023 = vmatpush.bf16.msrb.mxu3 %v4343_v62 }
 0x21c   : > { %3011 = vmatmul.bf16.vlgmr.msrb.gmra.mxu2 %v5974_v47  ;;  %v2793_v44 = vpop.f32.mrf.mxu1 }
 0x21d   : > { %3024 = vmatmul.bf16.vlgmr.msrb.gmra.mxu3 %v5976_v35 }
 0x21e   : > { %v4843_v20 = vpop.eup %4842 }
 0x21f   : > { %v3106_v24 = vmul.f32 %v4843_v20, %v3101_v18  ;;  %v2804_v13 = vpop.f32.mrf.mxu2  ;;  %vm3112_vm12 = vweird.f32 %v4843_v20 }
 0x220   : > { %v2805_v47 = vadd.f32 %v2804_v13, %v2792_v33  ;;  %vm3113_vm14 = vmor %vm3111_vm13, %vm3112_vm12 }
 0x221   : > { %v3107_v42 = vmul.f32 %v4843_v20, %v3106_v24 }
 0x222   : > { %v2817_v15 = vpop.f32.mrf.mxu3 }
 0x223   : > { %v3108_v8 = vmul.f32 0.5, %v3107_v42  ;;  %v2818_v35 = vadd.f32 %v2817_v15, %v2805_v47  ;;  %v3152_v42 = vperm.slane %v6370_v16, 1 }
 0x225   : > { %v3109_v26 = vsub.f32 1.5, %v3108_v8  ;;  %v3036_v39 = vsel %vm623_vm0, %v2818_v35, 0.0 }
 0x226   : > { %v3037_v27 = vrot.slane %v3036_v39, 4 }
 0x227   : > { %v3110_v30 = vmul.f32 %v4843_v20, %v3109_v26  ;;  %v2806_v40 = vpop.f32.mrf.mxu2 }
 0x228   : > { %v3038_v37 = vadd.f32 %v3037_v27, %v3036_v39 }
 0x229   : > { %v3114_v57 = vsel %vm3113_vm14, %v4843_v20, %v3110_v30 }
 0x22a   : > { %v2819_v41 = vpop.f32.mrf.mxu3  ;;  %v3145_v43 = vmul.f32 %v3114_v57, %v6351_v0  ;;  %v3039_v46 = vrot.slane %v3038_v37, 2 }
 0x22c   : > { %v3159_v36 = vmul.f32 %v3151_v52, %v3145_v43  ;;  %v3040_v28 = vadd.f32 %v3039_v46, %v3038_v37 }
 0x22e   : > { %v3173_v53 = vadd.f32 %v3165_v63, %v3159_v36  ;;  %v3041_v54 = vrot.slane %v3040_v28, 1 }
 0x230   : > { %v3042_v58 = vadd.f32 %v3041_v54, %v3040_v28  ;;  %v3177_v37 = vmax.f32 %v3173_v53, 0.0 }
 0x231   : > { %v2830_v22 = vpop.f32.mrf.mxu0 }
 0x232   : > { %v3058_v23 = vmul.f32 %v3042_v58, %v5461_v10  ;;  %v2831_v1 = vadd.f32 %v2830_v22, %v1327_v56 }
 0x234   : > { %v2843_v60 = vpop.f32.mrf.mxu1  ;;  %v3062_v48 = vsub.f32 %v2818_v35, %v3058_v23  ;;  %v3166_v35 = vperm.slane %v6374_v4, 1 }
 0x235   : > { %v2844_v21 = vadd.f32 %v2843_v60, %v2831_v1 }
 0x236   : > { %v3066_v50 = vmul.f32 %v3062_v48, %v3062_v48 }
 0x238   : > { %v3076_v0 = vsel %vm623_vm0, %v3066_v50, 0.0 }
 0x239   : > { %v3077_v6 = vrot.slane %v3076_v0, 4  ;;  %v2832_v34 = vpop.f32.mrf.mxu0 }
 0x23b   : > { %v3078_v45 = vadd.f32 %v3077_v6, %v3076_v0 }
 0x23c   : > { %v2845_v3 = vpop.f32.mrf.mxu1 }
 0x23d   : > { %v3079_v5 = vrot.slane %v3078_v45, 2 }
 0x23f   : > { %v2856_v9 = vpop.f32.mrf.mxu2  ;;  %v3080_v61 = vadd.f32 %v3079_v5, %v3078_v45 }
 0x240   : > { %v2857_v38 = vadd.f32 %v2856_v9, %v2844_v21 }
 0x241   : > { %v3081_v49 = vrot.slane %v3080_v61, 1 }
 0x242   : > { %v2869_v55 = vpop.f32.mrf.mxu3 }
 0x243   : > { %v2870_v32 = vadd.f32 %v2869_v55, %v2857_v38  ;;  %v3082_v62 = vadd.f32 %v3081_v49, %v3080_v61  ;;  %v1328_v38 = vperm.slane %v6223_v7, 3 }
 0x245   : > { %v3098_v2 = vmul.f32 %v3082_v62, %v5461_v10 }
 0x247   : > { %v2858_v14 = vpop.f32.mrf.mxu2  ;;  %v3102_v29 = vadd.f32 1e-05, %v3098_v2 }
 0x249   : > { %4844 = vrsqrt.f32 %v3102_v29  ;;  %vm3121_vm1 = vweird.f32 %v3102_v29 }
 0x24a   : > { %v2871_v25 = vpop.f32.mrf.mxu3 }
 0x24f   : > { %v4845_v11 = vpop.eup %4844 }
 0x250   : > { %v3116_v51 = vmul.f32 %v4845_v11, %v3102_v29  ;;  %vm3122_vm15 = vweird.f32 %v4845_v11 }
 0x251   : > { %v2882_v12 = vpop.f32.mrf.mxu0  ;;  %vm3123_vm2 = vmor %vm3121_vm1, %vm3122_vm15 }
 0x252   : > { %v2883_v17 = vadd.f32 %v2882_v12, %v2870_v32  ;;  %v3117_v31 = vmul.f32 %v4845_v11, %v3116_v51 }
 0x254   : > { %v2895_v59 = vpop.f32.mrf.mxu1  ;;  %v3118_v33 = vmul.f32 0.5, %v3117_v31 }
 0x255   : > { %v2896_v18 = vadd.f32 %v2895_v59, %v2883_v17 }
 0x256   : > { %v3119_v19 = vsub.f32 1.5, %v3118_v33 }
 0x258   : > { %v3120_v24 = vmul.f32 %v4845_v11, %v3119_v19 }
 0x259   : > { %v2884_v44 = vpop.f32.mrf.mxu0 }
 0x25a   : > { %v3124_v13 = vsel %vm3123_vm2, %v4845_v11, %v3120_v24  ;;  %v3153_v44 = vperm.slane %v6370_v16, 2 }
 0x25b   : > { %v3146_v8 = vmul.f32 %v3124_v13, %v3062_v48 }
 0x25c   : > { %v2897_v20 = vpop.f32.mrf.mxu1 }
 0x25d   : > { %v3160_v39 = vmul.f32 %v3152_v42, %v3146_v8 }
 0x25f   : > { %v2908_v15 = vpop.f32.mrf.mxu2  ;;  %v3174_v27 = vadd.f32 %v3166_v35, %v3160_v39 }
 0x260   : > { %v2909_v26 = vadd.f32 %v2908_v15, %v2896_v18 }
 0x261   : > { %v3178_v40 = vmax.f32 %v3174_v27, 0.0 }
 0x262   : > { %v2921_v47 = vpop.f32.mrf.mxu3 }
 0x263   : > { %v2922_v30 = vadd.f32 %v2921_v47, %v2909_v26  ;;  %v6386_v46 = vpack.c.bf16 %v3178_v40, %v3177_v37  ;;  %v3167_v47 = vperm.slane %v6374_v4, 2 }
 0x265   : > { %v3043_v52 = vsel %vm623_vm0, %v2922_v30, 0.0 }
 0x266   : > { %v3044_v57 = vrot.slane %v3043_v52, 4 }
 0x267   : > { %v2910_v43 = vpop.f32.mrf.mxu2 }
 0x268   : > { %v3045_v41 = vadd.f32 %v3044_v57, %v3043_v52 }
 0x26a   : > { %v2923_v63 = vpop.f32.mrf.mxu3  ;;  %v3046_v36 = vrot.slane %v3045_v41, 2 }
 0x26c   : > { %v3047_v28 = vadd.f32 %v3046_v36, %v3045_v41 }
 0x26e   : > { %v3048_v54 = vrot.slane %v3047_v28, 1 }
 0x270   : > { %v3049_v56 = vadd.f32 %v3048_v54, %v3047_v28 }
 0x271   : > { %v2934_v58 = vpop.f32.mrf.mxu0 }
 0x272   : > { %v3059_v60 = vmul.f32 %v3049_v56, %v5461_v10  ;;  %v2935_v62 = vadd.f32 %v2934_v58, %v1328_v38  ;;  %v3168_v38 = vperm.slane %v6374_v4, 3 }
 0x274   : > { %v2947_v22 = vpop.f32.mrf.mxu1  ;;  %v3063_v23 = vsub.f32 %v2922_v30, %v3059_v60 }
 0x275   : > { %v2948_v2 = vadd.f32 %v2947_v22, %v2935_v62  ;;  %v3185_v62 = vrot.slane %v6386_v46, 2 }
 0x276   : > { %v3067_v1 = vmul.f32 %v3063_v23, %v3063_v23 }
 0x278   : > { %v3083_v48 = vsel %vm623_vm0, %v3067_v1, 0.0 }
 0x279   : > { %v3084_v21 = vrot.slane %v3083_v48, 4  ;;  %v2936_v53 = vpop.f32.mrf.mxu0 }
 0x27b   : > { %v3085_v0 = vadd.f32 %v3084_v21, %v3083_v48 }
 0x27c   : > { %v2949_v50 = vpop.f32.mrf.mxu1 }
 0x27d   : > { %v3086_v6 = vrot.slane %v3085_v0, 2 }
 0x27f   : > { %v2960_v34 = vpop.f32.mrf.mxu2  ;;  %v3087_v45 = vadd.f32 %v3086_v6, %v3085_v0 }
 0x280   : > { %v2961_v12 = vadd.f32 %v2960_v34, %v2948_v2 }
 0x281   : > { %v3088_v5 = vrot.slane %v3087_v45, 1 }
 0x282   : > { %v2973_v3 = vpop.f32.mrf.mxu3 }
 0x283   : > { %v3089_v9 = vadd.f32 %v3088_v5, %v3087_v45  ;;  %v2974_v17 = vadd.f32 %v2973_v3, %v2961_v12  ;;  %v3154_v5 = vperm.slane %v6370_v16, 3  ;;  %v3191_v16 = vsel %vm3188_vm9, %v6386_v46, %v3185_v62 }
 0x285   : > { %v3099_v55 = vmul.f32 %v3089_v9, %v5461_v10 }
 0x287   : > { %v2962_v61 = vpop.f32.mrf.mxu2  ;;  %v3103_v49 = vadd.f32 1e-05, %v3099_v55 }
 0x289   : > { %4846 = vrsqrt.f32 %v3103_v49  ;;  %vm3131_vm4 = vweird.f32 %v3103_v49 }
 0x28a   : > { %v2975_v32 = vpop.f32.mrf.mxu3 }
 0x28f   : > { %v4847_v29 = vpop.eup %4846 }
 0x290   : > { %v3126_v59 = vmul.f32 %v4847_v29, %v3103_v49  ;;  %vm3132_vm3 = vweird.f32 %v4847_v29 }
 0x291   : > { %v2986_v14 = vpop.f32.mrf.mxu0  ;;  %vm3133_vm5 = vmor %vm3131_vm4, %vm3132_vm3 }
 0x292   : > { %v2999_v25 = vpop.f32.mrf.mxu1  ;;  %v3127_v11 = vmul.f32 %v4847_v29, %v3126_v59  ;;  %v2987_v18 = vadd.f32 %v2986_v14, %v2974_v17 }
 0x294   : > { %v3128_v51 = vmul.f32 0.5, %v3127_v11  ;;  %v3000_v20 = vadd.f32 %v2999_v25, %v2987_v18 }
 0x296   : > { %v3129_v31 = vsub.f32 1.5, %v3128_v51 }
 0x298   : > { %v3130_v7 = vmul.f32 %v4847_v29, %v3129_v31 }
 0x299   : > { %v2988_v33 = vpop.f32.mrf.mxu0 }
 0x29a   : > { %v3001_v19 = vpop.f32.mrf.mxu1  ;;  %v3134_v24 = vsel %vm3133_vm5, %v4847_v29, %v3130_v7 }
 0x29b   : > { %v3147_v15 = vmul.f32 %v3134_v24, %v3063_v23 }
 0x29d   : > { %v3161_v35 = vmul.f32 %v3153_v44, %v3147_v15 }
 0x29f   : > { %v3012_v42 = vpop.f32.mrf.mxu2  ;;  %v3175_v39 = vadd.f32 %v3167_v47, %v3161_v35 }
 0x2a0   : > { %v3025_v13 = vpop.f32.mrf.mxu3  ;;  %v3013_v8 = vadd.f32 %v3012_v42, %v3000_v20 }
 0x2a1   : > { %v3179_v32 = vmax.f32 %v3175_v39, 0.0 }
 0x2a2   : > { %v3026_v26 = vadd.f32 %v3025_v13, %v3013_v8 }
 0x2a4   : > { %v3050_v30 = vsel %vm623_vm0, %v3026_v26, 0.0 }
 0x2a5   : > { %v3051_v27 = vrot.slane %v3050_v30, 4 }
 0x2a7   : > { %v3052_v52 = vadd.f32 %v3051_v27, %v3050_v30  ;;  %v3014_v57 = vpop.f32.mrf.mxu2 }
 0x2a8   : > { %v3027_v37 = vpop.f32.mrf.mxu3 }
 0x2a9   : > { %v3053_v40 = vrot.slane %v3052_v52, 2 }
 0x2ab   : > { %v3054_v41 = vadd.f32 %v3053_v40, %v3052_v52 }
 0x2ad   : > { %v3055_v43 = vrot.slane %v3054_v41, 1 }
 0x2af   : > { %v3056_v63 = vadd.f32 %v3055_v43, %v3054_v41 }
 0x2b1   : > { %v3060_v36 = vmul.f32 %v3056_v63, %v5461_v10 }
 0x2b3   : > { %v3064_v28 = vsub.f32 %v3026_v26, %v3060_v36 }
 0x2b5   : > { %v3068_v54 = vmul.f32 %v3064_v28, %v3064_v28 }
 0x2b7   : > { %v3090_v56 = vsel %vm623_vm0, %v3068_v54, 0.0 }
 0x2b8   : > { %v3091_v58 = vrot.slane %v3090_v56, 4 }
 0x2ba   : > { %v3092_v22 = vadd.f32 %v3091_v58, %v3090_v56 }
 0x2bc   : > { %v3093_v60 = vrot.slane %v3092_v22, 2 }
 0x2be   : > { %v3094_v23 = vadd.f32 %v3093_v60, %v3092_v22 }
 0x2c0   : > { %v3095_v1 = vrot.slane %v3094_v23, 1 }
 0x2c2   : > { %v3096_v48 = vadd.f32 %v3095_v1, %v3094_v23 }
 0x2c4   : > { %v3100_v21 = vmul.f32 %v3096_v48, %v5461_v10 }
 0x2c6   : > { %v3104_v53 = vadd.f32 1e-05, %v3100_v21 }
 0x2c8   : > { %4848 = vrsqrt.f32 %v3104_v53  ;;  %vm3141_vm7 = vweird.f32 %v3104_v53 }
 0x2ce   : > { %v4849_v50 = vpop.eup %4848 }
 0x2cf   : > { %v3136_v0 = vmul.f32 %v4849_v50, %v3104_v53  ;;  %vm3142_vm6 = vweird.f32 %v4849_v50 }
 0x2d0   : > { %vm3143_vm8 = vmor %vm3141_vm7, %vm3142_vm6 }
 0x2d1   : > { %v3137_v6 = vmul.f32 %v4849_v50, %v3136_v0 }
 0x2d3   : > { %v3138_v34 = vmul.f32 0.5, %v3137_v6 }
 0x2d5   : > { %v3139_v3 = vsub.f32 1.5, %v3138_v34 }
 0x2d7   : > { %v3140_v45 = vmul.f32 %v4849_v50, %v3139_v3 }
 0x2d9   : > { %v3144_v9 = vsel %vm3143_vm8, %v4849_v50, %v3140_v45 }
 0x2da   : > { %v3148_v55 = vmul.f32 %v3144_v9, %v3064_v28 }
 0x2dc   : > { %v3162_v10 = vmul.f32 %v3154_v5, %v3148_v55 }
 0x2de   : > { %v3176_v61 = vadd.f32 %v3168_v38, %v3162_v10 }
 0x2e0   : > { %v3180_v49 = vmax.f32 %v3176_v61, 0.0 }
 0x2e2   : > { %v3182_v2 = vpack.c.bf16 %v3180_v49, %v3179_v32 }
 0x2e4   : > { %v3186_v14 = vrot.slane %v3182_v2, 4  ;;  %v3187_v25 = vrot.slane %v3182_v2, 6 }
 0x2e6   : > { %v3195_v4 = vsel %vm3192_vm10, %v3186_v14, %v3187_v25 }
 0x2e7   : > { %v3196_v29 = vsel %vm623_vm0, %v3191_v16, %v3195_v4 }
 0x2e8   : > { %3198 = vst [vmem:[%s524_s11] sm:$0xff] %v3196_v29 }
 0x2e9 PF: > { %s6467_s12 = sld [smem:[#allocation18_spill]]  ;;  %s6470_s30 = smov %s5128_s10 }
 0x2ea   : > { %s6468_s15 = sld [smem:[#allocation17_spill]] }
 0x2eb   : > { %s6469_s11 = sld [smem:[#allocation19_spill]] }
 0x2ef   : > { %p19_p8 = scmp.ge.s32.totalorder %s6467_s12, 6  }
 0x2f0   : > { %s6471_s10 = smov %s6468_s15 }
 0x2f1   :  { %21 = sbr.rel (!%p19_p8) target bundleno = 9 (0x9), region = 144 }
 0x2f6   :  { %3221 = vsyncpa [#allocation3], 1 }
 0x2f7   :  { %3223 = vsyncpa [#allocation3 + $0x1], 1 }
 0x2f8   :  { %3224 = vsyncpa [#allocation5], 1 }
 0x2f9   :  { %3225 = vsyncpa [#allocation8], 1 }

// kernel: generator_forward.4
= control target key start
LH: loop header
LB: loop body
LE: loop exit
PB: predicated region body
PF: predicated region fallthrough
CT: control target
= control target key end

     0   :  { %11 = vsyncpa [#allocation3], 0  ;;  %s6921_s0 = inlined_call_operand.vmem [shape: bf16[144,128], index: 0, kind: input, shape index: {}]   ;;  %s6922_s1 = inlined_call_operand.vmem [shape: bf16[4,4,128,64], index: 1, kind: input, shape index: {}]   ;;  %s6923_s2 = inlined_call_operand.hbm [shape: f32[1,64], index: 2, kind: input, shape index: {}]   ;;  %s6924_s3 = inlined_call_operand.hbm [shape: f32[1,64], index: 3, kind: input, shape index: {}]   ;;  %s6925_s4 = inlined_call_operand.hbm [shape: f32[1,64], index: 4, kind: input, shape index: {}]   ;;  %s6926_s5 = inlined_call_operand.hbm [shape: f32[1,130], index: 5, kind: input, shape index: {}]   ;;  %s6927_s6 = inlined_call_operand.vmem [shape: bf16[130,256], index: 6, kind: output, shape index: {}]  }
   0x1   :  { %12 = vsyncpa [#allocation5], 0  ;;  %s34_s23 = sshll.u32 %s6924_s3, 4  ;;  %s35_s23 = int_to_ptr.hbm [resolvable:$true] %s34_s23 }
   0x2   :  { %13 = vsyncpa [#allocation8], 0  ;;  %s4813_s24 = smov [#allocation4]   ;;  %s23_s28 = sshll.u32 %s6923_s2, 4  ;;  %s24_s28 = int_to_ptr.hbm [resolvable:$true] %s23_s28 }
   0x3   :  { %s36_s25 = sshll.u32 %s4813_s24, 4  ;;  %s4814_s29 = smov [#allocation2]   ;;  %s37_s25 = int_to_ptr.vmem [resolvable:$true] %s36_s25 }
   0x4   :  { %39 = dma.hbm_to_vmem [thread:$0]  %s35_s23, 16, %s37_s25, [#allocation5]  }
   0x5   :  { %s25_s30 = sshll.u32 %s4814_s29, 4  ;;  %s45_s9 = sshll.u32 %s6925_s4, 4  ;;  %s26_s30 = int_to_ptr.vmem [resolvable:$true] %s25_s30  ;;  %s46_s9 = int_to_ptr.hbm [resolvable:$true] %s45_s9 }
   0x6   :  { %28 = dma.hbm_to_vmem [thread:$0]  %s24_s28, 16, %s26_s30, [#allocation3]  }
   0x7   :  { %s56_s11 = sshll.u32 %s6926_s5, 4  ;;  %s4815_s12 = smov [#allocation6]   ;;  %s57_s11 = int_to_ptr.hbm [resolvable:$true] %s56_s11 }
   0x8   :  { %s47_s13 = sshll.u32 %s4815_s12, 4  ;;  %s4816_s2 = smov [#allocation7]   ;;  %s48_s13 = int_to_ptr.vmem [resolvable:$true] %s47_s13 }
   0x9   :  { %50 = dma.hbm_to_vmem [thread:$0]  %s46_s9, 16, %s48_s13, [#allocation5]  }
   0xa   :  { %s58_s14 = sshll.u32 %s4816_s2, 4  ;;  %s59_s14 = int_to_ptr.vmem [resolvable:$true] %s58_s14 }
   0xb   :  { %61 = dma.hbm_to_vmem [thread:$0]  %s57_s11, 32, %s59_s14, [#allocation8]  }
   0xc   :  { %4807 = dma.done.wait [#allocation3], 16  }
   0xd   :  { %4808 = vsyncadd [#allocation3], 4294967280 }
   0xe   :  { %4809 = dma.done.wait [#allocation5], 32  }
   0xf   :  { %4810 = vsyncadd [#allocation5], 4294967264 }
  0x10   :  { %4811 = dma.done.wait [#allocation8], 32  }
  0x11   :  { %4812 = vsyncadd [#allocation8], 4294967264  ;;  %v4414_v0 = vld [vmem:[%s6922_s1 + $0x78] sm:$0xff]  ;;  %v4413_v4 = vld [vmem:[%s6922_s1 + $0x70] sm:$0xff]  ;;  %vm174_vm0 = vsmask.f32 7424 }
  0x12   :  { %v4406_v1 = vld [vmem:[%s6922_s1 + $0x38] sm:$0xff]  ;;  %303 = vmatpush.bf16.msra.mxu0 %v4414_v0  ;;  %v4405_v5 = vld [vmem:[%s6922_s1 + $0x30] sm:$0xff]  ;;  %v4412_v8 = vld [vmem:[%s6922_s1 + $0x68] sm:$0xff]  ;;  %vm494_vm1 = vcmask 1044480   ;;  %vm719_vm2 = vsmask.f32 4352 }
  0x13   :  { %v4422_v2 = vld [vmem:[%s6922_s1 + $0xb8] sm:$0xff]  ;;  %416 = vmatpush.bf16.msra.mxu1 %v4406_v1  ;;  %v4421_v6 = vld [vmem:[%s6922_s1 + $0xb0] sm:$0xff]  ;;  %v4404_v9 = vld [vmem:[%s6922_s1 + $0x28] sm:$0xff]  ;;  %vm1002_vm3 = vcmask 1046528   ;;  %vm1543_vm4 = vcmask 1041408   ;;  %vm1540_vm5 = vcmask 15360  }
  0x14   :  { %v4430_v3 = vld [vmem:[%s6922_s1 + $0xf8] sm:$0xff]  ;;  %569 = vmatpush.bf16.msra.mxu2 %v4422_v2  ;;  %v4429_v7 = vld [vmem:[%s6922_s1 + $0xf0] sm:$0xff]  ;;  %v4420_v10 = vld [vmem:[%s6922_s1 + $0xa8] sm:$0xff]  ;;  %vm2160_vm6 = vsmask.f32 5376  ;;  %vm1994_vm7 = vcmask 1045504  }
  0x15   :  { %857 = vmatpush.bf16.msra.mxu3 %v4430_v3  ;;  %v4428_v11 = vld [vmem:[%s6922_s1 + $0xe8] sm:$0xff]  ;;  %v4411_v12 = vld [vmem:[%s6922_s1 + $0x60] sm:$0xff]  ;;  %v4410_v18 = vld [vmem:[%s6922_s1 + $0x58] sm:$0xff]  ;;  %vm3520_vm12 = vcmask 523264  }
  0x16   :  { %304 = vmatpush.bf16.msra.mxu0 %v4413_v4  ;;  %v4403_v13 = vld [vmem:[%s6922_s1 + $0x20] sm:$0xff]  ;;  %v4402_v20 = vld [vmem:[%s6922_s1 + $0x18] sm:$0xff]  ;;  %v4946_v26 = vld [vmem:[%s6921_s0 + $0x8] sm:$0xff]  }
  0x17   :  { %417 = vmatpush.bf16.msra.mxu1 %v4405_v5  ;;  %v4419_v14 = vld [vmem:[%s6922_s1 + $0xa0] sm:$0xff]  ;;  %v4418_v21 = vld [vmem:[%s6922_s1 + $0x98] sm:$0xff]  ;;  %v4409_v28 = vld [vmem:[%s6922_s1 + $0x50] sm:$0xff]  ;;  %v729_v38 = vshrl.u32 %v4946_v26, 16  ;;  %v732_v39 = vshll.u32 %v4946_v26, 16 }
  0x18   :  { %570 = vmatpush.bf16.msra.mxu2 %v4421_v6  ;;  %v4427_v15 = vld [vmem:[%s6922_s1 + $0xe0] sm:$0xff]  ;;  %v4426_v23 = vld [vmem:[%s6922_s1 + $0xd8] sm:$0xff]  ;;  %v4401_v29 = vld [vmem:[%s6922_s1 + $0x10] sm:$0xff] }
  0x19   :  { %858 = vmatpush.bf16.msra.mxu3 %v4429_v7  ;;  %v639_v16 = vld [vmem:[%s6921_s0] sm:$0x8]  ;;  %v4920_v17 = vld [vmem:[%s6921_s0 + $0x4] sm:$0xf]  ;;  %v4959_v30 = vld [vmem:[%s6921_s0 + $0x8] sm:$0xff]  ;;  %v731_v50 = vrot.slane %v729_v38, 3 }
  0x1a   :  { %305 = vmatpush.bf16.msra.mxu0 %v4412_v8  ;;  %v692_v19 = vunpack.c.l.b16 %v639_v16  ;;  %v693_v22 = vunpack.c.l.b16 %v4920_v17  ;;  %v4938_v24 = vld [vmem:[%s6921_s0] sm:$0xff]   ;;  %v4417_v34 = vld [vmem:[%s6922_s1 + $0x90] sm:$0xff]  ;;  %v4408_v40 = vld [vmem:[%s6922_s1 + $0x48] sm:$0xff]  ;;  %v183_v44 = vshll.u32 %v4959_v30, 16  ;;  %v734_v51 = vrot.slane %v732_v39, 4 }
  0x1b   :  { %418 = vmatpush.bf16.msra.mxu1 %v4404_v9  ;;  %v469_v25 = vld [vmem:[%s6921_s0] sm:$0x8]  ;;  %v178_v31 = vshll.u32 %v4938_v24, 16  ;;  %v4530_v32 = vunpack.c.h.b16 %v4938_v24  ;;  %v4425_v35 = vld [vmem:[%s6922_s1 + $0xd0] sm:$0xff]  ;;  %v4400_v41 = vld [vmem:[%s6922_s1 + $0x8] sm:$0xff]  ;;  %v176_v42 = vshrl.u32 %v4938_v24, 16 }
  0x1c   :  { %571 = vmatpush.bf16.msra.mxu2 %v4420_v10  ;;  %v710_v27 = vpack.c.b16 %v693_v22, %v692_v19  ;;  %v490_v33 = vunpack.c.l.b16 %v469_v25  ;;  %v4416_v46 = vld [vmem:[%s6922_s1 + $0x88] sm:$0xff]  ;;  %v4407_v52 = vld [vmem:[%s6922_s1 + $0x40] sm:$0xff]  ;;  %v185_v55 = vrot.slane %v183_v44, 1  ;;  %v496_v59 = vrot.slane %v4959_v30, 3  ;;  %v4560_v1 = vld [vmem:[%s6921_s0 + $0x10] sm:$0xff]  }
  0x1d   :  { %859 = vmatpush.bf16.msra.mxu3 %v4428_v11  ;;  %v180_v43 = vrot.slane %v178_v31, 1  ;;  %v4424_v47 = vld [vmem:[%s6922_s1 + $0xc8] sm:$0xff]  ;;  %v4399_v53 = vld [vmem:[%s6922_s1] sm:$0xff]  ;;  %v735_v61 = vor.u32 %v734_v51, %v731_v50  ;;  %v5019_v2 = vld [vmem:[%s6921_s0 + $0x10] sm:$0xff]  ;;  %v738_v3 = vshrl.u32 %v4560_v1, 16  ;;  %v741_v4 = vshll.u32 %v4560_v1, 16 }
  0x1e   :  { %306 = vmatpush.bf16.msra.mxu0 %v4411_v12  ;;  %v721_v36 = vshrl.u32 %v710_v27, 16  ;;  %v724_v37 = vshll.u32 %v710_v27, 16  ;;  %v492_v45 = vpack.c.b16 %v4530_v32, %v490_v33  ;;  %v4415_v56 = vld [vmem:[%s6922_s1 + $0x80] sm:$0xff]  ;;  %v187_v5 = vshrl.u32 %v4959_v30, 16  ;;  %v4561_v16 = vld [vmem:[%s6921_s0 + $0x18] sm:$0xff]  }
  0x1f   :  { %419 = vmatpush.bf16.msra.mxu1 %v4403_v13  ;;  %v181_v54 = vor.u32 %v180_v43, %v176_v42  ;;  %v4423_v57 = vld [vmem:[%s6922_s1 + $0xc0] sm:$0xff]  ;;  %v191_v6 = vshll.u32 %v5019_v2, 16  ;;  %v740_v7 = vrot.slane %v738_v3, 3  ;;  %v743_v8 = vrot.slane %v741_v4, 4 }
  0x20   :  { %572 = vmatpush.bf16.msra.mxu2 %v4419_v14  ;;  %v723_v48 = vrot.slane %v721_v36, 3  ;;  %v726_v49 = vrot.slane %v724_v37, 4  ;;  %v495_v58 = vrot.slane %v492_v45, 3  ;;  %v189_v9 = vor.u32 %v187_v5, %v185_v55  ;;  %v4562_v37 = vld [vmem:[%s6921_s0 + $0x20] sm:$0xff]  }
  0x21   :  { %860 = vmatpush.bf16.msra.mxu3 %v4427_v15  ;;  %v5001_v62 = vsel %vm174_vm0, %v181_v54, %v185_v55  ;;  %v193_v10 = vrot.slane %v191_v6, 1  ;;  %v498_v11 = vrot.slane %v5019_v2, 3  ;;  %v744_v12 = vor.u32 %v743_v8, %v740_v7  ;;  %v5067_v38 = vld [vmem:[%s6921_s0 + $0x20] sm:$0xff]  ;;  %v4564_v7 = vld [vmem:[%s6921_s0 + $0x30] sm:$0xff]   ;;  %v4565_v8 = vld [vmem:[%s6921_s0 + $0x38] sm:$0xff]  }
  0x22   :  { %307 = vmatpush.bf16.msra.mxu0 %v4410_v18  ;;  %v727_v60 = vor.u32 %v726_v49, %v723_v48  ;;  %v5004_v63 = vsel %vm494_vm1, %v495_v58, %v496_v59  ;;  %v5043_v18 = vld [vmem:[%s6921_s0 + $0x18] sm:$0xff]  ;;  %v747_v19 = vshrl.u32 %v4561_v16, 16  ;;  %v756_v39 = vshrl.u32 %v4562_v37, 16 }
  0x23   :  { %420 = vmatpush.bf16.msra.mxu1 %v4402_v20  ;;  %7028 = vst [vmem:[#allocation12_spill] sm:$0xff] %v5004_v63  ;;  %v5025_v13 = vsel %vm174_vm0, %v189_v9, %v193_v10  ;;  %v5028_v14 = vsel %vm494_vm1, %v496_v59, %v498_v11  ;;  %v5031_v15 = vsel %vm719_vm2, %v735_v61, %v744_v12  ;;  %v750_v20 = vshll.u32 %v4561_v16, 16  ;;  %v5118_v9 = vld [vmem:[%s6921_s0 + $0x30] sm:$0xff] }
  0x24   :  { %573 = vmatpush.bf16.msra.mxu2 %v4418_v21  ;;  %v5007_v0 = vsel %vm719_vm2, %v727_v60, %v735_v61  ;;  %7030 = vst [vmem:[#allocation14_spill] sm:$0xff] %v5028_v14  ;;  %v195_v21 = vshrl.u32 %v5019_v2, 16  ;;  %v749_v25 = vrot.slane %v747_v19, 3  ;;  %v500_v31 = vrot.slane %v5043_v18, 3 }
  0x25   :  { %861 = vmatpush.bf16.msra.mxu3 %v4426_v23  ;;  %7029 = vst [vmem:[#allocation13_spill] sm:$0xff] %v5007_v0  ;;  %v199_v23 = vshll.u32 %v5043_v18, 16  ;;  %v752_v27 = vrot.slane %v750_v20, 4  ;;  %v207_v42 = vshll.u32 %v5067_v38, 16  ;;  %v758_v43 = vrot.slane %v756_v39, 3 }
  0x26   :  { %308 = vmatpush.bf16.msra.mxu0 %v4409_v28  ;;  %7031 = vst [vmem:[#allocation15_spill] sm:$0xff] %v5031_v15  ;;  %v197_v28 = vor.u32 %v195_v21, %v193_v10  ;;  %v4558_v10 = vunpack.c.h.b16 %v4565_v8  ;;  %v777_v16 = vshll.u32 %v4564_v7, 16 }
  0x27   :  { %421 = vmatpush.bf16.msra.mxu1 %v4401_v29  ;;  %v201_v29 = vrot.slane %v199_v23, 1  ;;  %v753_v33 = vor.u32 %v752_v27, %v749_v25  ;;  %v223_v23 = vshll.u32 %v5118_v9, 16 }
  0x28   :  { %574 = vmatpush.bf16.msra.mxu2 %v4417_v34  ;;  %v779_v27 = vrot.slane %v777_v16, 4 }
  0x29   :  { %862 = vmatpush.bf16.msra.mxu3 %v4425_v35  ;;  %v5049_v34 = vsel %vm174_vm0, %v197_v28, %v201_v29  ;;  %v5052_v35 = vsel %vm494_vm1, %v498_v11, %v500_v31  ;;  %v5055_v36 = vsel %vm719_vm2, %v744_v12, %v753_v33  ;;  %v5123_v11 = vld [vmem:[%s6921_s0 + $0x40] sm:$0xf]  ;;  %v774_v12 = vshrl.u32 %v4564_v7, 16  ;;  %v4460_v7 = vld [vmem:[%s6922_s1 + $0x1e8] sm:$0xff] }
  0x2a   :  { %309 = vmatpush.bf16.msra.mxu0 %v4408_v40  ;;  %7032 = vst [vmem:[#allocation16_spill] sm:$0xff] %v5052_v35  ;;  %v759_v40 = vshll.u32 %v4562_v37, 16  ;;  %v708_v19 = vunpack.c.l.b16 %v5123_v11  ;;  %v4434_v11 = vld [vmem:[%s6922_s1 + $0x118] sm:$0xff] }
  0x2b   :  { %422 = vmatpush.bf16.msra.mxu1 %v4400_v41  ;;  %7033 = vst [vmem:[#allocation17_spill] sm:$0xff] %v5055_v36  ;;  %v203_v41 = vshrl.u32 %v5043_v18, 16  ;;  %v776_v25 = vrot.slane %v774_v12, 3 }
  0x2c   :  { %575 = vmatpush.bf16.msra.mxu2 %v4416_v46  ;;  %v761_v44 = vrot.slane %v759_v40, 4  ;;  %v209_v46 = vrot.slane %v207_v42, 1  ;;  %v5128_v20 = vpack.c.b16 %v708_v19, %v4558_v10  ;;  %v4438_v42 = vld [vmem:[%s6922_s1 + $0x138] sm:$0xff] }
  0x2d   :  { %863 = vmatpush.bf16.msra.mxu3 %v4424_v47  ;;  %v205_v45 = vor.u32 %v203_v41, %v201_v29  ;;  %v502_v47 = vrot.slane %v5067_v38, 3  ;;  %v225_v29 = vrot.slane %v223_v23, 1  ;;  %v4446_v41 = vld [vmem:[%s6922_s1 + $0x178] sm:$0xff] }
  0x2e   :  { %310 = vmatpush.bf16.msra.mxu0 %v4407_v52  ;;  %v762_v48 = vor.u32 %v761_v44, %v758_v43  ;;  %v4563_v52 = vld [vmem:[%s6921_s0 + $0x28] sm:$0xff]   ;;  %7038 = vst [vmem:[#allocation22_spill] sm:$0xff] %v5128_v20  ;;  %v4454_v43 = vld [vmem:[%s6922_s1 + $0x1b8] sm:$0xff] }
  0x2f   :  { %423 = vmatpush.bf16.msra.mxu1 %v4399_v53  ;;  %v5073_v49 = vsel %vm174_vm0, %v205_v45, %v209_v46  ;;  %v5076_v50 = vsel %vm494_vm1, %v500_v31, %v502_v47  ;;  %v5091_v53 = vld [vmem:[%s6921_s0 + $0x28] sm:$0xff]  ;;  %v765_v54 = vshrl.u32 %v4563_v52, 16  ;;  %v768_v55 = vshll.u32 %v4563_v52, 16  ;;  %v5158_v44 = vld [vmem:[%s6921_s0 + $0x38] sm:$0xff]  ;;  %v4437_v52 = vld [vmem:[%s6922_s1 + $0x130] sm:$0xff] }
  0x30   :  { %576 = vmatpush.bf16.msra.mxu2 %v4415_v56  ;;  %7034 = vst [vmem:[#allocation18_spill] sm:$0xff] %v5076_v50  ;;  %v5079_v51 = vsel %vm719_vm2, %v753_v33, %v762_v48  ;;  %v211_v56 = vshrl.u32 %v5067_v38, 16  ;;  %v504_v1 = vrot.slane %v5091_v53, 3  ;;  %v219_v21 = vshrl.u32 %v5091_v53, 16  ;;  %v4462_v45 = vld [vmem:[%s6922_s1 + $0x1f8] sm:$0xff] }
  0x31   :  { %864 = vmatpush.bf16.msra.mxu3 %v4423_v57  ;;  %311 = vmatmul.bf16.vlgmr.msra.gmra.mxu0 %v5001_v62  ;;  %7035 = vst [vmem:[#allocation19_spill] sm:$0xff] %v5079_v51  ;;  %v215_v57 = vshll.u32 %v5091_v53, 16  ;;  %v767_v58 = vrot.slane %v765_v54, 3  ;;  %v770_v59 = vrot.slane %v768_v55, 4  ;;  %v506_v31 = vrot.slane %v5118_v9, 3  ;;  %v4453_v54 = vld [vmem:[%s6922_s1 + $0x1b0] sm:$0xff] }
  0x32   :  { %424 = vmatmul.bf16.vlgmr.msra.gmra.mxu1 %v4938_v24  ;;  %v213_v60 = vor.u32 %v211_v56, %v209_v46  ;;  %v5100_v5 = vsel %vm494_vm1, %v502_v47, %v504_v1  ;;  %v780_v33 = vor.u32 %v779_v27, %v776_v25  ;;  %v783_v46 = vshrl.u32 %v4565_v8, 16  ;;  %1077 = vmatpush.bf16.msrb.mxu0 %v4446_v41  ;;  %v4461_v55 = vld [vmem:[%s6922_s1 + $0x1f0] sm:$0xff]  ;;  %v4443_v25 = vld [vmem:[%s6922_s1 + $0x160] sm:$0xff] }
  0x33   :  { %577 = vmatmul.bf16.vlgmr.msra.gmra.mxu2 %v5004_v63  ;;  %v217_v61 = vrot.slane %v215_v57, 1  ;;  %v771_v3 = vor.u32 %v770_v59, %v767_v58  ;;  %7036 = vst [vmem:[#allocation20_spill] sm:$0xff] %v5100_v5  ;;  %v5137_v39 = vsel %vm494_vm1, %v504_v1, %v506_v31  ;;  %v786_v47 = vshll.u32 %v4565_v8, 16  ;;  %1178 = vmatpush.bf16.msrb.mxu1 %v4438_v42  ;;  %v656_v1 = vld [vmem:[%s6921_s0 + $0x44] sm:$0x1] }
  0x34   :  { %865 = vmatmul.bf16.vlgmr.msra.gmra.mxu3 %v5007_v0  ;;  %7039 = vst [vmem:[#allocation23_spill] sm:$0xff] %v5137_v39  ;;  %1296 = vmatpush.bf16.msrb.mxu2 %v4454_v43  ;;  %v227_v56 = vshrl.u32 %v5118_v9, 16  ;;  %v231_v57 = vshll.u32 %v5158_v44, 16  ;;  %v785_v58 = vrot.slane %v783_v46, 3  ;;  %v508_v12 = vrot.slane %v5158_v44, 3  ;;  %v4435_v27 = vld [vmem:[%s6922_s1 + $0x120] sm:$0xff] }
  0x35   :  { %v5097_v4 = vsel %vm174_vm0, %v213_v60, %v217_v61  ;;  %v5103_v6 = vsel %vm719_vm2, %v762_v48, %v771_v3  ;;  %v221_v28 = vor.u32 %v219_v21, %v217_v61  ;;  %v5140_v40 = vsel %vm719_vm2, %v771_v3, %v780_v33  ;;  %v4445_v48 = vld [vmem:[%s6922_s1 + $0x170] sm:$0xff]  ;;  %1449 = vmatpush.bf16.msrb.mxu3 %v4462_v45  ;;  %v4444_v60 = vld [vmem:[%s6922_s1 + $0x168] sm:$0xff]  ;;  %v113_v21 = vld [vmem:[%s6921_s0 + $0x40] sm:$0x3] }
  0x36   :  { %7037 = vst [vmem:[#allocation21_spill] sm:$0xff] %v5103_v6  ;;  %v788_v59 = vrot.slane %v786_v47, 4  ;;  %1078 = vmatpush.bf16.msrb.mxu0 %v4445_v48  ;;  %v4436_v61 = vld [vmem:[%s6922_s1 + $0x128] sm:$0xff]  ;;  %v229_v8 = vor.u32 %v227_v56, %v225_v29  ;;  %v233_v10 = vrot.slane %v231_v57, 1  ;;  %v5198_v23 = vunpack.c.l.b16 %v656_v1  ;;  %v4459_v42 = vld [vmem:[%s6922_s1 + $0x1e0] sm:$0xff]  ;;  %v4458_v48 = vld [vmem:[%s6922_s1 + $0x1d8] sm:$0xff] }
  0x37   :  { %v5134_v37 = vsel %vm174_vm0, %v221_v28, %v225_v29  ;;  %7040 = vst [vmem:[#allocation24_spill] sm:$0xff] %v5140_v40  ;;  %1179 = vmatpush.bf16.msrb.mxu1 %v4437_v52  ;;  %v4452_v3 = vld [vmem:[%s6922_s1 + $0x1a8] sm:$0xff]  ;;  %v4451_v28 = vld [vmem:[%s6922_s1 + $0x1a0] sm:$0xff]  ;;  %v164_v41 = vunpack.c.l.b16 %v113_v21  ;;  %v5218_v43 = vsel %vm494_vm1, %v506_v31, %v508_v12  ;;  %v4442_v31 = vld [vmem:[%s6922_s1 + $0x158] sm:$0xff] }
  0x38   :  { %1297 = vmatpush.bf16.msrb.mxu2 %v4453_v54  ;;  %v5193_v16 = vor.u32 %v788_v59, %v785_v58  ;;  %v5210_v29 = vsel %vm174_vm0, %v229_v8, %v233_v10  ;;  %7041 = vst [vmem:[#allocation25_spill] sm:$0xff] %v5218_v43  ;;  %v718_v46 = vpack.c.b16 %v5198_v23, %v708_v19  ;;  %v470_v47 = vld [vmem:[%s6921_s0 + $0x40] sm:$0xf]  ;;  %v4450_v19 = vld [vmem:[%s6922_s1 + $0x198] sm:$0xff]  ;;  %v4441_v56 = vld [vmem:[%s6922_s1 + $0x150] sm:$0xff]  ;;  %v235_v59 = vshrl.u32 %v5158_v44, 16 }
  0x39   :  { %1450 = vmatpush.bf16.msrb.mxu3 %v4461_v55  ;;  %v491_v52 = vunpack.c.l.b16 %v470_v47  ;;  %v4433_v57 = vld [vmem:[%s6922_s1 + $0x110] sm:$0xff]  ;;  %v4440_v8 = vld [vmem:[%s6922_s1 + $0x148] sm:$0xff]  ;;  %v4439_v47 = vld [vmem:[%s6922_s1 + $0x140] sm:$0xff] }
  0x3a   :  { %1079 = vmatpush.bf16.msrb.mxu0 %v4444_v60  ;;  %v5222_v45 = vsel %vm719_vm2, %v780_v33, %v5193_v16  ;;  %v5243_v33 = vpack.c.b16 %v164_v41, %v164_v41  ;;  %v792_v54 = vshrl.u32 %v718_v46, 16  ;;  %v795_v55 = vshll.u32 %v718_v46, 16  ;;  %v4449_v58 = vld [vmem:[%s6922_s1 + $0x190] sm:$0xff]  ;;  %v4432_v21 = vld [vmem:[%s6922_s1 + $0x108] sm:$0xff] }
  0x3b   :  { %1180 = vmatpush.bf16.msrb.mxu1 %v4436_v61  ;;  %7042 = vst [vmem:[#allocation26_spill] sm:$0xff] %v5222_v45  ;;  %v4457_v61 = vld [vmem:[%s6922_s1 + $0x1d0] sm:$0xff]  ;;  %v493_v1 = vpack.c.b16 %v491_v52, %v491_v52  ;;  %v4456_v41 = vld [vmem:[%s6922_s1 + $0x1c8] sm:$0xff] }
  0x3c   :  { %1298 = vmatpush.bf16.msrb.mxu2 %v4452_v3  ;;  %v239_v60 = vshll.u32 %v5243_v33, 16  ;;  %v794_v3 = vrot.slane %v792_v54, 3  ;;  %v243_v54 = vshrl.u32 %v5243_v33, 16 }
  0x3d   :  { %1451 = vmatpush.bf16.msrb.mxu3 %v4460_v7  ;;  %v797_v7 = vrot.slane %v795_v55, 4 }
  0x3e   :  { %1080 = vmatpush.bf16.msrb.mxu0 %v4443_v25  ;;  %v4448_v25 = vld [vmem:[%s6922_s1 + $0x188] sm:$0xff] }
  0x3f   :  { %1181 = vmatpush.bf16.msrb.mxu1 %v4435_v27  ;;  %v237_v27 = vor.u32 %v235_v59, %v233_v10  ;;  %v5276_v46 = vor.u32 %v797_v7, %v794_v3  ;;  %v4431_v10 = vld [vmem:[%s6922_s1 + $0x100] sm:$0xff] }
  0x40   :  { %1299 = vmatpush.bf16.msrb.mxu2 %v4451_v28  ;;  %v241_v28 = vrot.slane %v239_v60, 1  ;;  %v981_v60 = vld [vmem:[%s6921_s0] sm:$0xe] }
  0x41   :  { %316 = vmatmul.bf16.gmra.mxu0 %v5025_v13  ;;  %1452 = vmatpush.bf16.msrb.mxu3 %v4459_v42  ;;  %v5274_v42 = vrot.slane %v493_v1, 3  ;;  %7044 = vst [vmem:[#allocation28_spill] sm:$0xff] %v5276_v46  ;;  %v5302_v52 = vsel %vm719_vm2, %v5193_v16, %v5276_v46 }
  0x42   :  { %429 = vmatmul.bf16.gmra.mxu1 %v4959_v30  ;;  %1081 = vmatpush.bf16.msrb.mxu0 %v4442_v31  ;;  %v4447_v31 = vld [vmem:[%s6922_s1 + $0x180] sm:$0xff]  ;;  %7046 = vst [vmem:[#allocation30_spill] sm:$0xff] %v5302_v52  ;;  %v5312_v55 = vor.u32 %v243_v54, %v241_v28 }
  0x43   :  { %582 = vmatmul.bf16.gmra.mxu2 %v5028_v14  ;;  %1182 = vmatpush.bf16.msrb.mxu1 %v4434_v11  ;;  %7043 = vst [vmem:[#allocation27_spill] sm:$0xff] %v5274_v42  ;;  %v5288_v11 = vsel %vm174_vm0, %v237_v27, %v241_v28 }
  0x44   :  { %870 = vmatmul.bf16.gmra.mxu3 %v5031_v15  ;;  %1300 = vmatpush.bf16.msrb.mxu2 %v4450_v19  ;;  %v4455_v19 = vld [vmem:[%s6922_s1 + $0x1c0] sm:$0xff] }
  0x45   :  { %1453 = vmatpush.bf16.msrb.mxu3 %v4458_v48  ;;  %v5297_v48 = vsel %vm494_vm1, %v508_v12, %v5274_v42  ;;  %v96_v12 = vld [vmem:[%s6921_s0 + $0x40] sm:$0x1] }
  0x46   :  { %1082 = vmatpush.bf16.msrb.mxu0 %v4441_v56  ;;  %7045 = vst [vmem:[#allocation29_spill] sm:$0xff] %v5297_v48  ;;  %v357_v16 = vunpack.c.l.b16 %v96_v12 }
  0x47   :  { %1183 = vmatpush.bf16.msrb.mxu1 %v4433_v57 }
  0x48   :  { %1301 = vmatpush.bf16.msrb.mxu2 %v4449_v58  ;;  %v358_v56 = vpack.c.b16 %v357_v16, %v357_v16 }
  0x49   :  { %1454 = vmatpush.bf16.msrb.mxu3 %v4457_v61  ;;  %v1000_v61 = vunpack.c.l.b16 %v981_v60 }
  0x4a   :  { %1083 = vmatpush.bf16.msrb.mxu0 %v4440_v8 }
  0x4b   :  { %1184 = vmatpush.bf16.msrb.mxu1 %v4432_v21 }
  0x4c   :  { %1302 = vmatpush.bf16.msrb.mxu2 %v4448_v25  ;;  %v1001_v25 = vpack.c.b16 %v4530_v32, %v1000_v61 }
  0x4d   :  { %1455 = vmatpush.bf16.msrb.mxu3 %v4456_v41 }
  0x4e   :  { %1084 = vmatpush.bf16.msrb.mxu0 %v4439_v47  ;;  %v1003_v41 = vrot.slane %v1001_v25, 1  ;;  %v1004_v47 = vrot.slane %v4959_v30, 1  ;;  %v5346_v25 = vld [vmem:[%s6921_s0 + $0xc] sm:$0xff]  }
  0x4f   :  { %1185 = vmatpush.bf16.msrb.mxu1 %v4431_v10  ;;  %v5326_v10 = vunpack.c.l.b16 %v4946_v26  ;;  %7049 = vst [vmem:[#allocation33_spill] sm:$0xff] %v5346_v25 }
  0x50   :  { %1303 = vmatpush.bf16.msrb.mxu2 %v4447_v31 }
  0x51   :  { %321 = vmatmul.bf16.gmra.mxu0 %v5049_v34  ;;  %1456 = vmatpush.bf16.msrb.mxu3 %v4455_v19  ;;  %7047 = vst [vmem:[#allocation31_spill] sm:$0xff] %v5326_v10  ;;  %v5332_v24 = vpack.c.b16 %v5326_v10, %v693_v22  ;;  %v1006_v22 = vrot.slane %v5019_v2, 1 }
  0x52   :  { %434 = vmatmul.bf16.gmra.mxu1 %v5019_v2 }
  0x53   :  { %587 = vmatmul.bf16.gmra.mxu2 %v5052_v35  ;;  %7048 = vst [vmem:[#allocation32_spill] sm:$0xff] %v5332_v24 }
  0x54   :  { %875 = vmatmul.bf16.gmra.mxu3 %v5055_v36 }
  0x61   :  { %326 = vmatmul.bf16.gmra.mxu0 %v5073_v49 }
  0x62   :  { %439 = vmatmul.bf16.gmra.mxu1 %v5043_v18 }
  0x63   :  { %592 = vmatmul.bf16.gmra.mxu2 %v5076_v50 }
  0x64   :  { %880 = vmatmul.bf16.gmra.mxu3 %v5079_v51 }
  0x71   :  { %331 = vmatmul.bf16.gmra.mxu0 %v5097_v4 }
  0x72   :  { %444 = vmatmul.bf16.gmra.mxu1 %v5067_v38 }
  0x73   :  { %597 = vmatmul.bf16.gmra.mxu2 %v5100_v5 }
  0x74   :  { %885 = vmatmul.bf16.gmra.mxu3 %v5103_v6 }
  0x81   :  { %336 = vmatmul.bf16.gmra.mxu0 %v5134_v37 }
  0x82   :  { %449 = vmatmul.bf16.gmra.mxu1 %v5091_v53 }
  0x83   :  { %602 = vmatmul.bf16.gmra.mxu2 %v5137_v39 }
  0x84   :  { %890 = vmatmul.bf16.gmra.mxu3 %v5140_v40 }
  0x91   :  { %341 = vmatmul.bf16.gmra.mxu0 %v5210_v29 }
  0x92   :  { %454 = vmatmul.bf16.gmra.mxu1 %v5118_v9 }
  0x93   :  { %607 = vmatmul.bf16.gmra.mxu2 %v5218_v43 }
  0x94   :  { %895 = vmatmul.bf16.gmra.mxu3 %v5222_v45 }
  0xa1   :  { %346 = vmatmul.bf16.gmra.mxu0 %v5288_v11 }
  0xa2   :  { %459 = vmatmul.bf16.gmra.mxu1 %v5158_v44 }
  0xa3   :  { %612 = vmatmul.bf16.gmra.mxu2 %v5297_v48 }
  0xa4   :  { %900 = vmatmul.bf16.gmra.mxu3 %v5302_v52 }
  0xae   :  { %v312_v57 = vpop.f32.mrf.mxu0 }
  0xaf   :  { %v425_v58 = vpop.f32.mrf.mxu1 }
  0xb0   :  { %v426_v59 = vadd.f32 %v425_v58, %v312_v57 }
  0xb1   :  { %351 = vmatmul.bf16.gmra.mxu0 %v5312_v55 }
  0xb2   :  { %464 = vmatmul.bf16.gmra.mxu1 %v358_v56  ;;  %v1005_v56 = vsel %vm1002_vm3, %v1003_v41, %v1004_v47 }
  0xb3   :  { %617 = vmatmul.bf16.gmra.mxu2 %v5274_v42 }
  0xb4   :  { %905 = vmatmul.bf16.gmra.mxu3 %v5276_v46 }
  0xb6   :  { %v578_v1 = vpop.f32.mrf.mxu2  ;;  %v314_v8 = vpop.f32.mrf.mxu0 }
  0xb7   :  { %v866_v3 = vpop.f32.mrf.mxu3  ;;  %v622_v7 = vadd.f32 %v578_v1, %v426_v59  ;;  %v427_v21 = vpop.f32.mrf.mxu1 }
  0xb8   :  { %v428_v27 = vadd.f32 %v427_v21, %v314_v8 }
  0xb9   :  { %v5322_v28 = vadd.f32 %v866_v3, %v622_v7 }
  0xbe   :  { %v580_v31 = vpop.f32.mrf.mxu2  ;;  %v317_v54 = vpop.f32.mrf.mxu0 }
  0xbf   :  { %v868_v19 = vpop.f32.mrf.mxu3  ;;  %v623_v12 = vadd.f32 %v580_v31, %v428_v27  ;;  %v430_v16 = vpop.f32.mrf.mxu1 }
  0xc0   :  { %v431_v32 = vadd.f32 %v430_v16, %v317_v54 }
  0xc1   :  { %v5334_v57 = vadd.f32 %v868_v19, %v623_v12  ;;  %1085 = vmatmul.bf16.vlgmr.msrb.gmra.mxu0 %v1005_v56  ;;  %v1008_v56 = vrot.slane %v5043_v18, 1 }
  0xc2   :  { %1186 = vmatmul.bf16.vlgmr.msrb.gmra.mxu1 %v5001_v62  ;;  %v1007_v62 = vsel %vm1002_vm3, %v1004_v47, %v1006_v22 }
  0xc3   :  { %1304 = vmatmul.bf16.vlgmr.msrb.gmra.mxu2 %v5007_v0 }
  0xc4   :  { %1457 = vmatmul.bf16.vlgmr.msrb.gmra.mxu3 %v5332_v24 }
  0xc6   :  { %v583_v26 = vpop.f32.mrf.mxu2  ;;  %v319_v59 = vpop.f32.mrf.mxu0 }
  0xc7   :  { %v871_v30 = vpop.f32.mrf.mxu3  ;;  %v624_v58 = vadd.f32 %v583_v26, %v431_v32  ;;  %v432_v60 = vpop.f32.mrf.mxu1 }
  0xc8   :  { %v433_v61 = vadd.f32 %v432_v60, %v319_v59  ;;  %v5360_v60 = vld [vmem:[%s6921_s0 + $0x14] sm:$0xff]  }
  0xc9   :  { %v5339_v17 = vadd.f32 %v871_v30, %v624_v58  ;;  %7050 = vst [vmem:[#allocation34_spill] sm:$0xff] %v5360_v60 }
  0xce   :  { %v585_v1 = vpop.f32.mrf.mxu2  ;;  %v322_v8 = vpop.f32.mrf.mxu0 }
  0xcf   :  { %v873_v3 = vpop.f32.mrf.mxu3  ;;  %v625_v7 = vadd.f32 %v585_v1, %v433_v61  ;;  %v435_v21 = vpop.f32.mrf.mxu1 }
  0xd0   :  { %v436_v27 = vadd.f32 %v435_v21, %v322_v8 }
  0xd1   :  { %v5348_v41 = vadd.f32 %v873_v3, %v625_v7  ;;  %1090 = vmatmul.bf16.gmra.mxu0 %v1007_v62 }
  0xd2   :  { %1191 = vmatmul.bf16.gmra.mxu1 %v5025_v13  ;;  %v1009_v13 = vsel %vm1002_vm3, %v1006_v22, %v1008_v56 }
  0xd3   :  { %1309 = vmatmul.bf16.gmra.mxu2 %v5031_v15 }
  0xd4   :  { %1462 = vmatmul.bf16.gmra.mxu3 %v5346_v25 }
  0xd6   :  { %v588_v2 = vpop.f32.mrf.mxu2  ;;  %v324_v12 = vpop.f32.mrf.mxu0 }
  0xd7   :  { %v876_v31 = vpop.f32.mrf.mxu3  ;;  %v626_v19 = vadd.f32 %v588_v2, %v436_v27  ;;  %v437_v47 = vpop.f32.mrf.mxu1  ;;  %v1010_v27 = vrot.slane %v5067_v38, 1 }
  0xd8   :  { %v438_v54 = vadd.f32 %v437_v47, %v324_v12 }
  0xd9   :  { %v5353_v16 = vadd.f32 %v876_v31, %v626_v19 }
  0xde   :  { %v590_v32 = vpop.f32.mrf.mxu2  ;;  %v327_v58 = vpop.f32.mrf.mxu0 }
  0xdf   :  { %v878_v26 = vpop.f32.mrf.mxu3  ;;  %v627_v30 = vadd.f32 %v590_v32, %v438_v54  ;;  %v440_v59 = vpop.f32.mrf.mxu1  ;;  %v5374_v54 = vld [vmem:[%s6921_s0 + $0x1c] sm:$0xff]  }
  0xe0   :  { %v441_v61 = vadd.f32 %v440_v59, %v327_v58  ;;  %7051 = vst [vmem:[#allocation35_spill] sm:$0xff] %v5374_v54 }
  0xe1   :  { %v5362_v1 = vadd.f32 %v878_v26, %v627_v30  ;;  %1095 = vmatmul.bf16.gmra.mxu0 %v1009_v13 }
  0xe2   :  { %1196 = vmatmul.bf16.gmra.mxu1 %v5049_v34  ;;  %v1011_v34 = vsel %vm1002_vm3, %v1008_v56, %v1010_v27 }
  0xe3   :  { %1314 = vmatmul.bf16.gmra.mxu2 %v5055_v36 }
  0xe4   :  { %1467 = vmatmul.bf16.gmra.mxu3 %v5360_v60 }
  0xe6   :  { %v593_v18 = vpop.f32.mrf.mxu2  ;;  %v329_v8 = vpop.f32.mrf.mxu0 }
  0xe7   :  { %v881_v3 = vpop.f32.mrf.mxu3  ;;  %v628_v7 = vadd.f32 %v593_v18, %v441_v61  ;;  %v442_v22 = vpop.f32.mrf.mxu1  ;;  %v1012_v18 = vrot.slane %v5091_v53, 1 }
  0xe8   :  { %v443_v21 = vadd.f32 %v442_v22, %v329_v8 }
  0xe9   :  { %v5367_v62 = vadd.f32 %v881_v3, %v628_v7  ;;  %v1013_v22 = vsel %vm1002_vm3, %v1010_v27, %v1012_v18 }
  0xee   :  { %v595_v2 = vpop.f32.mrf.mxu2  ;;  %v332_v12 = vpop.f32.mrf.mxu0 }
  0xef   :  { %v883_v31 = vpop.f32.mrf.mxu3  ;;  %v629_v19 = vadd.f32 %v595_v2, %v443_v21  ;;  %v445_v47 = vpop.f32.mrf.mxu1  ;;  %v5394_v21 = vld [vmem:[%s6921_s0 + $0x24] sm:$0xff]  }
  0xf0   :  { %v446_v32 = vadd.f32 %v445_v47, %v332_v12  ;;  %7052 = vst [vmem:[#allocation36_spill] sm:$0xff] %v5394_v21  ;;  %v1014_v12 = vrot.slane %v5118_v9, 1 }
  0xf1   :  { %v5376_v26 = vadd.f32 %v883_v31, %v629_v19  ;;  %1100 = vmatmul.bf16.gmra.mxu0 %v1011_v34 }
  0xf2   :  { %1201 = vmatmul.bf16.gmra.mxu1 %v5073_v49 }
  0xf3   :  { %1319 = vmatmul.bf16.gmra.mxu2 %v5079_v51 }
  0xf4   :  { %1472 = vmatmul.bf16.gmra.mxu3 %v5374_v54  ;;  %v5423_v54 = vld [vmem:[#allocation2] ss:$0 sm:$0xff] }
  0xf6   :  { %v598_v38 = vpop.f32.mrf.mxu2  ;;  %v334_v59 = vpop.f32.mrf.mxu0 }
  0xf7   :  { %v886_v30 = vpop.f32.mrf.mxu3  ;;  %v630_v58 = vadd.f32 %v598_v38, %v446_v32  ;;  %v447_v56 = vpop.f32.mrf.mxu1  ;;  %v1015_v38 = vsel %vm1002_vm3, %v1012_v18, %v1014_v12 }
  0xf8   :  { %v5381_v13 = vadd.f32 %v447_v56, %v334_v59  ;;  %v1016_v56 = vrot.slane %v5158_v44, 1 }
  0xf9   :  { %v5383_v61 = vadd.f32 %v886_v30, %v630_v58 }
  0xfa   :  { %v1017_v48 = vsel %vm1002_vm3, %v1014_v12, %v1016_v56 }
  0xfe   :  { %v5386_v3 = vpop.f32.mrf.mxu2  ;;  %v337_v49 = vpop.f32.mrf.mxu0 }
  0xff   :  { %v5388_v7 = vpop.f32.mrf.mxu3  ;;  %v450_v8 = vpop.f32.mrf.mxu1 }
 0x100   :  { %v451_v15 = vadd.f32 %v450_v8, %v337_v49 }
 0x101   :  { %1105 = vmatmul.bf16.gmra.mxu0 %v1013_v22 }
 0x102   :  { %1206 = vmatmul.bf16.gmra.mxu1 %v5097_v4  ;;  %v5406_v4 = vld [vmem:[%s6921_s0 + $0x2c] sm:$0xff]  }
 0x103   :  { %1324 = vmatmul.bf16.gmra.mxu2 %v5103_v6  ;;  %7053 = vst [vmem:[#allocation37_spill] sm:$0xff] %v5406_v4  ;;  %v1018_v6 = vrot.slane %v5243_v33, 1 }
 0x104   :  { %1477 = vmatmul.bf16.gmra.mxu3 %v5394_v21 }
 0x106   :  { %v603_v53 = vpop.f32.mrf.mxu2  ;;  %v339_v31 = vpop.f32.mrf.mxu0 }
 0x107   :  { %v5399_v2 = vpop.f32.mrf.mxu3  ;;  %v452_v19 = vpop.f32.mrf.mxu1 }
 0x10e   :  { %v605_v27 = vpop.f32.mrf.mxu2  ;;  %v342_v34 = vpop.f32.mrf.mxu0 }
 0x10f   :  { %v893_v47 = vpop.f32.mrf.mxu3  ;;  %v455_v32 = vpop.f32.mrf.mxu1 }
 0x110   :  { %v456_v12 = vadd.f32 %v455_v32, %v342_v34 }
 0x111   :  { %1110 = vmatmul.bf16.gmra.mxu0 %v1015_v38 }
 0x112   :  { %1211 = vmatmul.bf16.gmra.mxu1 %v5134_v37  ;;  %v5416_v37 = vld [vmem:[%s6921_s0 + $0x34] sm:$0xff]  }
 0x113   :  { %1329 = vmatmul.bf16.gmra.mxu2 %v5140_v40  ;;  %7054 = vst [vmem:[#allocation38_spill] sm:$0xff] %v5416_v37 }
 0x114   :  { %1482 = vmatmul.bf16.gmra.mxu3 %v5406_v4 }
 0x116   :  { %v608_v30 = vpop.f32.mrf.mxu2  ;;  %v344_v58 = vpop.f32.mrf.mxu0 }
 0x117   :  { %v896_v9 = vpop.f32.mrf.mxu3  ;;  %v457_v59 = vpop.f32.mrf.mxu1  ;;  %v634_v14 = vadd.f32 %v608_v30, %v456_v12  ;;  %v5469_v30 = vpack.c.b16 %v5198_v23, %v5198_v23  ;;  %v5486_v23 = vadd.f32 %v5423_v54, %v5367_v62 }
 0x118   :  { %v458_v5 = vadd.f32 %v457_v59, %v344_v58  ;;  %v5473_v58 = vadd.f32 %v5423_v54, %v5383_v61  ;;  %v5479_v59 = vadd.f32 %v5423_v54, %v5376_v26 }
 0x119   :  { %7063 = vst [vmem:[#allocation47_spill] sm:$0xff] %v5469_v30 }
 0x11a   :  { %7064 = vst [vmem:[#allocation48_spill] sm:$0xff] %v5473_v58 }
 0x11b   :  { %7065 = vst [vmem:[#allocation49_spill] sm:$0xff] %v5479_v59 }
 0x11c   :  { %7066 = vst [vmem:[#allocation50_spill] sm:$0xff] %v5486_v23 }
 0x11e   :  { %v610_v22 = vpop.f32.mrf.mxu2  ;;  %v347_v24 = vpop.f32.mrf.mxu0 }
 0x11f   :  { %v898_v18 = vpop.f32.mrf.mxu3  ;;  %v460_v42 = vpop.f32.mrf.mxu1 }
 0x120   :  { %v461_v39 = vadd.f32 %v460_v42, %v347_v24 }
 0x121   :  { %1115 = vmatmul.bf16.gmra.mxu0 %v1017_v48  ;;  %v635_v48 = vadd.f32 %v610_v22, %v458_v5  ;;  %v922_v5 = vadd.f32 %v896_v9, %v634_v14 }
 0x122   :  { %1216 = vmatmul.bf16.gmra.mxu1 %v5210_v29 }
 0x123   :  { %1334 = vmatmul.bf16.gmra.mxu2 %v5222_v45  ;;  %v1019_v45 = vsel %vm1002_vm3, %v1016_v56, %v1018_v6 }
 0x124   :  { %1487 = vmatmul.bf16.gmra.mxu3 %v5416_v37  ;;  %v453_v37 = vadd.f32 %v452_v19, %v339_v31 }
 0x126   :  { %v613_v38 = vpop.f32.mrf.mxu2  ;;  %v349_v43 = vpop.f32.mrf.mxu0  ;;  %v633_v33 = vadd.f32 %v605_v27, %v453_v37  ;;  %v5507_v37 = vadd.f32 %v5423_v54, %v5348_v41 }
 0x127   :  { %v901_v44 = vpop.f32.mrf.mxu3  ;;  %v462_v40 = vpop.f32.mrf.mxu1  ;;  %v636_v4 = vadd.f32 %v613_v38, %v461_v39  ;;  %v923_v39 = vadd.f32 %v898_v18, %v635_v48  ;;  %v5500_v18 = vadd.f32 %v5423_v54, %v5353_v16 }
 0x128   :  { %v463_v51 = vadd.f32 %v462_v40, %v349_v43  ;;  %v921_v49 = vadd.f32 %v893_v47, %v633_v33  ;;  %7070 = vst [vmem:[#allocation54_spill] sm:$0xff] %v5507_v37 }
 0x129   :  { %v924_v42 = vadd.f32 %v901_v44, %v636_v4  ;;  %v5438_v8 = vadd.f32 %v5423_v54, %v923_v39  ;;  %7068 = vst [vmem:[#allocation52_spill] sm:$0xff] %v5500_v18  ;;  %v5521_v44 = vadd.f32 %v5423_v54, %v5334_v57 }
 0x12b   :  { %v5432_v43 = vadd.f32 %v5423_v54, %v924_v42  ;;  %7057 = vst [vmem:[#allocation41_spill] sm:$0xff] %v5438_v8  ;;  %v960_v33 = vmul.f32 %v5438_v8, %v5438_v8 }
 0x12c   :  { %7073 = vst [vmem:[#allocation57_spill] sm:$0xff] %v5521_v44 }
 0x12d   :  { %7056 = vst [vmem:[#allocation40_spill] sm:$0xff] %v5432_v43  ;;  %v961_v57 = vmul.f32 %v5432_v43, %v5432_v43 }
 0x12e   :  { %v615_v50 = vpop.f32.mrf.mxu2  ;;  %v352_v29 = vpop.f32.mrf.mxu0 }
 0x12f   :  { %v903_v21 = vpop.f32.mrf.mxu3  ;;  %v637_v36 = vadd.f32 %v615_v50, %v463_v51  ;;  %v465_v35 = vpop.f32.mrf.mxu1  ;;  %v632_v51 = vadd.f32 %v603_v53, %v451_v15  ;;  %v5443_v53 = vadd.f32 %v5423_v54, %v922_v5 }
 0x130   :  { %v466_v50 = vadd.f32 %v465_v35, %v352_v29  ;;  %v5526_v29 = vadd.f32 %v5423_v54, %v5322_v28 }
 0x131   :  { %v925_v24 = vadd.f32 %v903_v21, %v637_v36  ;;  %1120 = vmatmul.bf16.gmra.mxu0 %v1019_v45  ;;  %v920_v14 = vadd.f32 %v5399_v2, %v632_v51  ;;  %7058 = vst [vmem:[#allocation42_spill] sm:$0xff] %v5443_v53  ;;  %v959_v51 = vmul.f32 %v5443_v53, %v5443_v53 }
 0x132   :  { %1221 = vmatmul.bf16.gmra.mxu1 %v5288_v11  ;;  %v631_v11 = vadd.f32 %v5386_v3, %v5381_v13  ;;  %v5448_v3 = vadd.f32 %v5423_v54, %v921_v49  ;;  %7074 = vst [vmem:[#allocation58_spill] sm:$0xff] %v5526_v29 }
 0x133   :  { %v5427_v40 = vadd.f32 %v5423_v54, %v925_v24  ;;  %1339 = vmatmul.bf16.gmra.mxu2 %v5302_v52  ;;  %v5455_v27 = vadd.f32 %v5423_v54, %v920_v14 }
 0x134   :  { %1492 = vmatmul.bf16.gmra.mxu3 %v5128_v20  ;;  %v919_v13 = vadd.f32 %v5388_v7, %v631_v11  ;;  %7059 = vst [vmem:[#allocation43_spill] sm:$0xff] %v5448_v3 }
 0x135   :  { %7055 = vst [vmem:[#allocation39_spill] sm:$0xff] %v5427_v40  ;;  %1590 = vmatpush.msra.mxu2 %v5427_v40 }
 0x136   :  { %v618_v36 = vpop.f32.mrf.mxu2  ;;  %v354_v21 = vpop.f32.mrf.mxu0  ;;  %7061 = vst [vmem:[#allocation45_spill] sm:$0xff] %v5455_v27  ;;  %v5463_v34 = vadd.f32 %v5423_v54, %v919_v13  ;;  %v954_v13 = vmul.f32 %v5479_v59, %v5479_v59 }
 0x137   :  { %v906_v45 = vpop.f32.mrf.mxu3  ;;  %v638_v35 = vadd.f32 %v618_v36, %v466_v50  ;;  %1591 = vmatpush.msra.mxu2 %v5432_v43  ;;  %v467_v15 = vpop.f32.mrf.mxu1  ;;  %v958_v36 = vmul.f32 %v5448_v3, %v5448_v3 }
 0x138   :  { %7062 = vst [vmem:[#allocation46_spill] sm:$0xff] %v5463_v34 }
 0x139   :  { %v926_v31 = vadd.f32 %v906_v45, %v638_v35  ;;  %1592 = vmatpush.msra.mxu2 %v5438_v8  ;;  %v957_v45 = vmul.f32 %v5455_v27, %v5455_v27  ;;  %v956_v35 = vmul.f32 %v5463_v34, %v5463_v34 }
 0x13b   :  { %v5451_v19 = vadd.f32 %v5423_v54, %v926_v31  ;;  %1593 = vmatpush.msra.mxu2 %v5443_v53  ;;  %v955_v31 = vmul.f32 %v5473_v58, %v5473_v58 }
 0x13d   :  { %7060 = vst [vmem:[#allocation44_spill] sm:$0xff] %v5451_v19  ;;  %v963_v2 = vmul.f32 %v5451_v19, %v5451_v19  ;;  %1594 = vmatpush.msra.mxu2 %v5448_v3  ;;  %3994 = vmatpush.msk.msra.mxu3 %vm1543_vm4, %v5451_v19 }
 0x13e   :  { %v620_v7 = vpop.f32.mrf.mxu2  ;;  %v1086_v32 = vpop.f32.mrf.mxu0 }
 0x13f   :  { %v908_v47 = vpop.f32.mrf.mxu3  ;;  %1595 = vmatpush.msra.mxu2 %v5455_v27  ;;  %3998 = vmatpush.msk.msrb.mxu3 %vm1543_vm4, %v963_v2  ;;  %v1187_v4 = vpop.f32.mrf.mxu1  ;;  %v953_v2 = vmul.f32 %v5486_v23, %v5486_v23 }
 0x140   :  { %v1188_v9 = vadd.f32 %v1187_v4, %v1086_v32 }
 0x141   :  { %1596 = vmatpush.msra.mxu2 %v5463_v34  ;;  %1125 = vmatmul.bf16.gmra.mxu0 %v1018_v6 }
 0x142   :  { %1226 = vmatmul.bf16.gmra.mxu1 %v5312_v55  ;;  %v5491_v55 = vadd.f32 %v5423_v54, %v5362_v1  ;;  %v5512_v1 = vadd.f32 %v5423_v54, %v5339_v17  ;;  %v962_v17 = vmul.f32 %v5427_v40, %v5427_v40 }
 0x143   :  { %1597 = vmatpush.msra.mxu2 %v5473_v58 }
 0x144   :  { %1497 = vmatmul.bf16.gmra.mxu3 %v5469_v30  ;;  %1344 = vmatmul.bf16.gmra.mxu2 %v5276_v46  ;;  %7067 = vst [vmem:[#allocation51_spill] sm:$0xff] %v5491_v55  ;;  %v952_v32 = vmul.f32 %v5491_v55, %v5491_v55 }
 0x145   :  { %1598 = vmatpush.msra.mxu2 %v5479_v59  ;;  %7071 = vst [vmem:[#allocation55_spill] sm:$0xff] %v5512_v1 }
 0x146   :  { %v1305_v61 = vpop.f32.mrf.mxu2  ;;  %v5494_v56 = vpop.f32.mrf.mxu0 }
 0x147   :  { %v1458_v6 = vpop.f32.mrf.mxu3  ;;  %v1349_v26 = vadd.f32 %v1305_v61, %v1188_v9  ;;  %1599 = vmatpush.msra.mxu2 %v5486_v23  ;;  %v5496_v22 = vpop.f32.mrf.mxu1 }
 0x149   :  { %v5502_v62 = vadd.f32 %v1458_v6, %v1349_v26  ;;  %1600 = vmatpush.msra.mxu2 %v5491_v55  ;;  %v951_v6 = vmul.f32 %v5500_v18, %v5500_v18 }
 0x14b   :  { %7069 = vst [vmem:[#allocation53_spill] sm:$0xff] %v5502_v62  ;;  %1601 = vmatpush.msra.mxu2 %v5500_v18 }
 0x14d   :  { %1602 = vmatpush.msra.mxu2 %v5507_v37 }
 0x14e   :  { %v5515_v38 = vpop.f32.mrf.mxu2  ;;  %v1091_v41 = vpop.f32.mrf.mxu0 }
 0x14f   :  { %v5517_v16 = vpop.f32.mrf.mxu3  ;;  %1603 = vmatpush.msra.mxu2 %v5512_v1  ;;  %v1192_v12 = vpop.f32.mrf.mxu1 }
 0x150   :  { %7072 = vst [vmem:[#allocation56_spill] sm:$0xff] %v5517_v16  ;;  %v1193_v48 = vadd.f32 %v1192_v12, %v1091_v41  ;;  %v950_v41 = vmul.f32 %v5507_v37, %v5507_v37  ;;  %v949_v12 = vmul.f32 %v5512_v1, %v5512_v1 }
 0x151   :  { %1604 = vmatpush.msra.mxu2 %v5521_v44 }
 0x153   :  { %1605 = vmatpush.msra.mxu2 %v5526_v29 }
 0x155   :  { %1693 = vmatpush.msrb.mxu2 %v962_v17 }
 0x156   :  { %v1310_v42 = vpop.f32.mrf.mxu2  ;;  %v5536_v28 = vpop.f32.mrf.mxu0 }
 0x157   :  { %v1463_v24 = vpop.f32.mrf.mxu3  ;;  %1694 = vmatpush.msrb.mxu2 %v961_v57  ;;  %v1351_v39 = vadd.f32 %v1310_v42, %v1193_v48  ;;  %v5538_v50 = vpop.f32.mrf.mxu1  ;;  %v948_v57 = vmul.f32 %v5521_v44, %v5521_v44 }
 0x159   :  { %1695 = vmatpush.msrb.mxu2 %v960_v33  ;;  %v5542_v5 = vadd.f32 %v1463_v24, %v1351_v39  ;;  %v947_v39 = vmul.f32 %v5526_v29, %v5526_v29 }
 0x15b   :  { %7075 = vst [vmem:[#allocation59_spill] sm:$0xff] %v5542_v5  ;;  %1696 = vmatpush.msrb.mxu2 %v959_v51 }
 0x15d   :  { %1697 = vmatpush.msrb.mxu2 %v958_v36 }
 0x15e   :  { %v5548_v11 = vpop.f32.mrf.mxu2  ;;  %v1096_v21 = vpop.f32.mrf.mxu0 }
 0x15f   :  { %v5550_v49 = vpop.f32.mrf.mxu3  ;;  %1698 = vmatpush.msrb.mxu2 %v957_v45  ;;  %v1197_v15 = vpop.f32.mrf.mxu1 }
 0x160   :  { %v1198_v14 = vadd.f32 %v1197_v15, %v1096_v21 }
 0x161   :  { %1699 = vmatpush.msrb.mxu2 %v956_v35 }
 0x163   :  { %1700 = vmatpush.msrb.mxu2 %v955_v31 }
 0x165   :  { %1701 = vmatpush.msrb.mxu2 %v954_v13 }
 0x166   :  { %v1315_v7 = vpop.f32.mrf.mxu2  ;;  %v5562_v9 = vpop.f32.mrf.mxu0 }
 0x167   :  { %v1468_v47 = vpop.f32.mrf.mxu3  ;;  %1702 = vmatpush.msrb.mxu2 %v953_v2  ;;  %v1353_v4 = vadd.f32 %v1315_v7, %v1198_v14  ;;  %v5564_v61 = vpop.f32.mrf.mxu1 }
 0x169   :  { %1703 = vmatpush.msrb.mxu2 %v952_v32  ;;  %v5568_v26 = vadd.f32 %v1468_v47, %v1353_v4 }
 0x16b   :  { %1704 = vmatpush.msrb.mxu2 %v951_v6 }
 0x16d   :  { %1705 = vmatpush.msrb.mxu2 %v950_v41 }
 0x16e   :  { %v5574_v48 = vpop.f32.mrf.mxu2  ;;  %v1101_v42 = vpop.f32.mrf.mxu0 }
 0x16f   :  { %v5576_v17 = vpop.f32.mrf.mxu3  ;;  %1706 = vmatpush.msrb.mxu2 %v949_v12  ;;  %v1202_v24 = vpop.f32.mrf.mxu1 }
 0x170   :  { %v1203_v33 = vadd.f32 %v1202_v24, %v1101_v42 }
 0x171   :  { %1707 = vmatpush.msrb.mxu2 %v948_v57 }
 0x173   :  { %1708 = vmatpush.msrb.mxu2 %v947_v39 }
 0x176   :  { %v1320_v51 = vpop.f32.mrf.mxu2  ;;  %v5582_v35 = vpop.f32.mrf.mxu0 }
 0x177   :  { %v1473_v36 = vpop.f32.mrf.mxu3  ;;  %v1355_v45 = vadd.f32 %v1320_v51, %v1203_v33  ;;  %v5584_v21 = vpop.f32.mrf.mxu1 }
 0x179   :  { %v5586_v15 = vadd.f32 %v1473_v36, %v1355_v45 }
 0x17e   :  { %v5588_v14 = vpop.f32.mrf.mxu2  ;;  %v1106_v13 = vpop.f32.mrf.mxu0 }
 0x17f   :  { %v5590_v31 = vpop.f32.mrf.mxu3  ;;  %v1207_v2 = vpop.f32.mrf.mxu1 }
 0x180   :  { %v1208_v7 = vadd.f32 %v1207_v2, %v1106_v13 }
 0x186   :  { %v1325_v47 = vpop.f32.mrf.mxu2  ;;  %v1108_v6 = vpop.f32.mrf.mxu0 }
 0x187   :  { %v1478_v32 = vpop.f32.mrf.mxu3  ;;  %v1357_v4 = vadd.f32 %v1325_v47, %v1208_v7  ;;  %v1209_v41 = vpop.f32.mrf.mxu1 }
 0x189   :  { %v5592_v12 = vadd.f32 %v1478_v32, %v1357_v4 }
 0x18e   :  { %v1327_v57 = vpop.f32.mrf.mxu2  ;;  %v1111_v24 = vpop.f32.mrf.mxu0 }
 0x18f   :  { %v5594_v42 = vpop.f32.mrf.mxu3  ;;  %v1212_v33 = vpop.f32.mrf.mxu1 }
 0x190   :  { %v1213_v60 = vadd.f32 %v1212_v33, %v1111_v24  ;;  %v7089_v24 = vld [vmem:[#allocation56_spill] sm:$0xff] }
 0x196   :  { %v1330_v39 = vpop.f32.mrf.mxu2  ;;  %v1113_v36 = vpop.f32.mrf.mxu0 }
 0x197   :  { %v1483_v51 = vpop.f32.mrf.mxu3  ;;  %v1214_v45 = vpop.f32.mrf.mxu1 }
 0x198   :  { %v1215_v0 = vadd.f32 %v1214_v45, %v1113_v36  ;;  %v4467_v45 = vld [vmem:[%s6922_s1 + $0x220] sm:$0xff] }
 0x19e   :  { %v1332_v19 = vpop.f32.mrf.mxu2  ;;  %v1116_v43 = vpop.f32.mrf.mxu0 }
 0x19f   :  { %v1485_v40 = vpop.f32.mrf.mxu3  ;;  %v1217_v13 = vpop.f32.mrf.mxu1  ;;  %v1360_v62 = vadd.f32 %v1332_v19, %v1215_v0 }
 0x1a0   :  { %v1218_v55 = vadd.f32 %v1217_v13, %v1116_v43  ;;  %v4492_v13 = vld [vmem:[%s6922_s1 + $0x2e8] sm:$0xff] }
 0x1a6   :  { %v1335_v2 = vpop.f32.mrf.mxu2  ;;  %v1118_v7 = vpop.f32.mrf.mxu0 }
 0x1a7   :  { %v1488_v8 = vpop.f32.mrf.mxu3  ;;  %v1219_v47 = vpop.f32.mrf.mxu1  ;;  %v1361_v63 = vadd.f32 %v1335_v2, %v1218_v55  ;;  %v1200_v55 = vadd.f32 %v5564_v61, %v5562_v9  ;;  %v78_v61 = vld [vmem:[#allocation7] sm:$0x3] }
 0x1a8   :  { %v1220_v18 = vadd.f32 %v1219_v47, %v1118_v7  ;;  %v4476_v7 = vld [vmem:[%s6922_s1 + $0x268] sm:$0xff]  ;;  %v7094_v47 = vld [vmem:[#allocation53_spill] sm:$0xff] }
 0x1ae   :  { %v1337_v53 = vpop.f32.mrf.mxu2  ;;  %v1121_v4 = vpop.f32.mrf.mxu0 }
 0x1af   :  { %v1490_v32 = vpop.f32.mrf.mxu3  ;;  %v1222_v3 = vpop.f32.mrf.mxu1  ;;  %v1362_v30 = vadd.f32 %v1337_v53, %v1220_v18  ;;  %v1513_v18 = vadd.f32 %v1485_v40, %v1360_v62 }
 0x1b0   :  { %v1223_v23 = vadd.f32 %v1222_v3, %v1121_v4  ;;  %v1210_v3 = vadd.f32 %v1209_v41, %v1108_v6  ;;  %v4466_v4 = vld [vmem:[%s6922_s1 + $0x218] sm:$0xff] }
 0x1b1   :  { %v1515_v5 = vadd.f32 %v1490_v32, %v1362_v30  ;;  %v5616_v19 = vadd.f32 %v5423_v54, %v1513_v18  ;;  %v5730_v32 = vadd.f32 %v5423_v54, %v7094_v47 }
 0x1b3   :  { %7080 = vst [vmem:[#allocation64_spill] sm:$0xff] %v5616_v19 }
 0x1b4   :  { %7095 = vst [vmem:[#allocation53_spill] sm:$0xff] %v5730_v32 }
 0x1b6   :  { %v1340_v27 = vpop.f32.mrf.mxu2  ;;  %v1123_v58 = vpop.f32.mrf.mxu0 }
 0x1b7   :  { %v1493_v34 = vpop.f32.mrf.mxu3  ;;  %v1224_v59 = vpop.f32.mrf.mxu1  ;;  %v1363_v37 = vadd.f32 %v1340_v27, %v1223_v23  ;;  %v1359_v27 = vadd.f32 %v1330_v39, %v1213_v60  ;;  %v1358_v23 = vadd.f32 %v1327_v57, %v1210_v3 }
 0x1b8   :  { %v1225_v1 = vadd.f32 %v1224_v59, %v1123_v58  ;;  %v1514_v58 = vadd.f32 %v1488_v8, %v1361_v63  ;;  %v1205_v63 = vadd.f32 %v5584_v21, %v5582_v35  ;;  %v1195_v35 = vadd.f32 %v5538_v50, %v5536_v28 }
 0x1b9   :  { %v1516_v25 = vadd.f32 %v1493_v34, %v1363_v37  ;;  %v5604_v34 = vadd.f32 %v5423_v54, %v1515_v5  ;;  %v1511_v8 = vadd.f32 %v5594_v42, %v1358_v23  ;;  %v5643_v21 = vadd.f32 %v5423_v54, %v5592_v12  ;;  %v4494_v12 = vld [vmem:[%s6922_s1 + $0x2f8] sm:$0xff] }
 0x1ba   :  { %v1356_v40 = vadd.f32 %v5588_v14, %v1205_v63  ;;  %v4470_v14 = vld [vmem:[%s6922_s1 + $0x238] sm:$0xff]  ;;  %v1190_v28 = vadd.f32 %v5496_v22, %v5494_v56  ;;  %v5665_v50 = vadd.f32 %v5423_v54, %v5586_v15  ;;  %v5688_v42 = vadd.f32 %v5423_v54, %v5568_v26  ;;  %v4477_v26 = vld [vmem:[%s6922_s1 + $0x270] sm:$0xff] }
 0x1bb   :  { %v5600_v59 = vadd.f32 %v5423_v54, %v1516_v25  ;;  %7078 = vst [vmem:[#allocation62_spill] sm:$0xff] %v5604_v34  ;;  %v5610_v25 = vadd.f32 %v5423_v54, %v1514_v58  ;;  %v5635_v5 = vadd.f32 %v5423_v54, %v1511_v8  ;;  %v4478_v15 = vld [vmem:[%s6922_s1 + $0x278] sm:$0xff]  ;;  %v1643_v18 = vmul.f32 %v5604_v34, %v5604_v34  ;;  %v4489_v63 = vld [vmem:[%s6922_s1 + $0x2d0] sm:$0xff] }
 0x1bc   :  { %7084 = vst [vmem:[#allocation68_spill] sm:$0xff] %v5643_v21  ;;  %v1350_v57 = vadd.f32 %v5515_v38, %v1190_v28  ;;  %v4468_v38 = vld [vmem:[%s6922_s1 + $0x228] sm:$0xff]  ;;  %v4490_v23 = vld [vmem:[%s6922_s1 + $0x2d8] sm:$0xff]  ;;  %v4473_v8 = vld [vmem:[%s6922_s1 + $0x250] sm:$0xff] }
 0x1bd   :  { %7077 = vst [vmem:[#allocation61_spill] sm:$0xff] %v5600_v59  ;;  %v1644_v58 = vmul.f32 %v5600_v59, %v5600_v59  ;;  %v4487_v28 = vld [vmem:[%s6922_s1 + $0x2c0] sm:$0xff] }
 0x1be   :  { %v1342_v44 = vpop.f32.mrf.mxu2  ;;  %v1126_v52 = vpop.f32.mrf.mxu0  ;;  %7079 = vst [vmem:[#allocation63_spill] sm:$0xff] %v5610_v25  ;;  %v1503_v33 = vadd.f32 %v7089_v24, %v1350_v57 }
 0x1bf   :  { %v1495_v29 = vpop.f32.mrf.mxu3  ;;  %v1364_v46 = vadd.f32 %v1342_v44, %v1225_v1  ;;  %v1227_v20 = vpop.f32.mrf.mxu1  ;;  %v1354_v44 = vadd.f32 %v5574_v48, %v1200_v55  ;;  %7083 = vst [vmem:[#allocation67_spill] sm:$0xff] %v5635_v5  ;;  %v5646_v48 = vperm.slane %v78_v61, 1 }
 0x1c0   :  { %v1228_v43 = vadd.f32 %v1227_v20, %v1126_v52  ;;  %v1512_v52 = vadd.f32 %v1483_v51, %v1359_v27  ;;  %7086 = vst [vmem:[#allocation70_spill] sm:$0xff] %v5665_v50  ;;  %v7091_v51 = vld [vmem:[#allocation59_spill] sm:$0xff]  ;;  %v5721_v2 = vadd.f32 %v5423_v54, %v1503_v33 }
 0x1c1   :  { %v1517_v10 = vadd.f32 %v1495_v29, %v1364_v46  ;;  %v1509_v29 = vadd.f32 %v5590_v31, %v1356_v40  ;;  %v1352_v31 = vadd.f32 %v5548_v11, %v1195_v35  ;;  %v1507_v6 = vadd.f32 %v5576_v17, %v1354_v44  ;;  %3995 = vmatmul.msk.f32.vlgmr.msra.gmra.mxu3 %vm1540_vm5, %v5646_v48  ;;  %v4469_v17 = vld [vmem:[%s6922_s1 + $0x230] sm:$0xff]  ;;  %v1969_v27 = vld [vmem:[%s6921_s0 + $0x4] sm:$0xc] }
 0x1c2   :  { %v5625_v62 = vadd.f32 %v5423_v54, %v1512_v52  ;;  %1916 = vmatpush.bf16.msra.mxu3 %v4470_v14  ;;  %v5668_v11 = vperm.slane %v78_v61, 0  ;;  %7088 = vst [vmem:[#allocation72_spill] sm:$0xff] %v5688_v42  ;;  %v5709_v36 = vadd.f32 %v5423_v54, %v7091_v51  ;;  %v1641_v52 = vmul.f32 %v5616_v19, %v5616_v19  ;;  %v7097_v35 = vld [vmem:[#allocation33_spill] sm:$0xff] }
 0x1c3   :  { %v5597_v16 = vadd.f32 %v5423_v54, %v1517_v10  ;;  %v5654_v41 = vadd.f32 %v5423_v54, %v1509_v29  ;;  %v1505_v56 = vadd.f32 %v5550_v49, %v1352_v31  ;;  %v5679_v22 = vadd.f32 %v5423_v54, %v1507_v6  ;;  %v4493_v49 = vld [vmem:[%s6922_s1 + $0x2f0] sm:$0xff]  ;;  %7093 = vst [vmem:[#allocation73_spill] sm:$0xff] %v5721_v2  ;;  %v4472_v29 = vld [vmem:[%s6922_s1 + $0x248] sm:$0xff] }
 0x1c4   :  { %7082 = vst [vmem:[#allocation66_spill] sm:$0xff] %v5625_v62  ;;  %1606 = vmatmul.f32.vlgmr.msra.gmra.mxu2 %v5668_v11  ;;  %v1640_v55 = vmul.f32 %v5625_v62, %v5625_v62  ;;  %v1639_v44 = vmul.f32 %v5635_v5, %v5635_v5  ;;  %v2170_v14 = vshrl.u32 %v7097_v35, 16  ;;  %v2173_v31 = vshll.u32 %v7097_v35, 16  ;;  %v7104_v35 = vld [vmem:[#allocation16_spill] sm:$0xff] }
 0x1c5   :  { %7076 = vst [vmem:[#allocation60_spill] sm:$0xff] %v5597_v16  ;;  %1547 = vmatpush.msra.mxu0 %v5597_v16  ;;  %2298 = vmatpush.bf16.msra.mxu2 %v4494_v12  ;;  %v5699_v39 = vadd.f32 %v5423_v54, %v1505_v56  ;;  %v1645_v3 = vmul.f32 %v5597_v16, %v5597_v16 }
 0x1c6   :  { %v1128_v46 = vpop.f32.mrf.mxu0  ;;  %7085 = vst [vmem:[#allocation69_spill] sm:$0xff] %v5654_v41  ;;  %1917 = vmatpush.bf16.msra.mxu3 %v4469_v17  ;;  %v1638_v6 = vmul.f32 %v5643_v21, %v5643_v21  ;;  %v2172_v57 = vrot.slane %v2170_v14, 2  ;;  %v2175_v56 = vrot.slane %v2173_v31, 3 }
 0x1c7   :  { %v1498_v53 = vpop.f32.mrf.mxu3  ;;  %1548 = vmatpush.msra.mxu0 %v5600_v59  ;;  %v1345_v0 = vpop.f32.mrf.mxu2  ;;  %7087 = vst [vmem:[#allocation71_spill] sm:$0xff] %v5679_v22  ;;  %v4474_v46 = vld [vmem:[%s6922_s1 + $0x258] sm:$0xff]  ;;  %v1633_v47 = vmul.f32 %v5699_v39, %v5699_v39 }
 0x1c8   :  { %v1365_v10 = vadd.f32 %v1345_v0, %v1228_v43  ;;  %v1229_v20 = vpop.f32.mrf.mxu1  ;;  %7090 = vst [vmem:[#allocation56_spill] sm:$0xff] %v5699_v39  ;;  %v4491_v43 = vld [vmem:[%s6922_s1 + $0x2e0] sm:$0xff]  ;;  %v1990_v0 = vunpack.c.l.b16 %v1969_v27  ;;  %v2176_v33 = vor.u32 %v2175_v56, %v2172_v57  ;;  %v5870_v57 = vld [vmem:[%s6921_s0 + $0xc] sm:$0xff]  }
 0x1c9   :  { %1549 = vmatpush.msra.mxu0 %v5604_v34  ;;  %3999 = vmatmul.msk.f32.vlgmr.msrb.gmra.mxu3 %vm1540_vm5, %v5646_v48  ;;  %7092 = vst [vmem:[#allocation59_spill] sm:$0xff] %v5709_v36  ;;  %v4464_v20 = vld [vmem:[%s6922_s1 + $0x208] sm:$0xff]  ;;  %v1996_v56 = vrot.slane %v5870_v57, 2 }
 0x1ca   :  { %v1518_v60 = vadd.f32 %v1498_v53, %v1365_v10  ;;  %1918 = vmatpush.bf16.msra.mxu3 %v4468_v38  ;;  %2299 = vmatpush.bf16.msra.mxu2 %v4493_v49  ;;  %v4465_v53 = vld [vmem:[%s6922_s1 + $0x210] sm:$0xff]  ;;  %v1642_v10 = vmul.f32 %v5610_v25, %v5610_v25  ;;  %v7098_v38 = vld [vmem:[#allocation12_spill] sm:$0xff]  ;;  %v4471_v49 = vld [vmem:[%s6922_s1 + $0x240] sm:$0xff] }
 0x1cb   :  { %1550 = vmatpush.msra.mxu0 %v5610_v25 }
 0x1cc   :  { %v5620_v30 = vadd.f32 %v5423_v54, %v1518_v60  ;;  %1709 = vmatmul.f32.vlgmr.msrb.gmra.mxu2 %v5668_v11  ;;  %v4475_v54 = vld [vmem:[%s6922_s1 + $0x260] sm:$0xff] }
 0x1cd   :  { %1551 = vmatpush.msra.mxu0 %v5616_v19  ;;  %v7096_v60 = vld [vmem:[#allocation31_spill] sm:$0xff] }
 0x1ce   :  { %7081 = vst [vmem:[#allocation65_spill] sm:$0xff] %v5620_v30  ;;  %v1646_v37 = vmul.f32 %v5620_v30, %v5620_v30  ;;  %3992 = vmatpush.msk.msra.mxu1 %vm1543_vm4, %v5620_v30  ;;  %1919 = vmatpush.bf16.msra.mxu3 %v4467_v45  ;;  %v5773_v40 = vpack.c.b16 %v7096_v60, %v1990_v0  ;;  %v4485_v0 = vld [vmem:[%s6922_s1 + $0x2b0] sm:$0xff] }
 0x1cf   :  { %v1500_v1 = vpop.f32.mrf.mxu3  ;;  %1552 = vmatpush.msra.mxu0 %v5625_v62  ;;  %v1347_v9 = vpop.f32.mrf.mxu2  ;;  %3993 = vmatmul.msk.f32.vlgmr.msra.gmra.mxu1 %vm1540_vm5, %v5646_v48  ;;  %v1635_v45 = vmul.f32 %v5679_v22, %v5679_v22 }
 0x1d0   :  { %3996 = vmatpush.msk.msrb.mxu1 %vm1543_vm4, %v1646_v37  ;;  %2300 = vmatpush.bf16.msra.mxu2 %v4492_v13  ;;  %v4463_v37 = vld [vmem:[%s6922_s1 + $0x200] sm:$0xff]  ;;  %v4488_v1 = vld [vmem:[%s6922_s1 + $0x2c8] sm:$0xff]  ;;  %v2162_v9 = vshrl.u32 %v5773_v40, 16  ;;  %v2165_v61 = vshll.u32 %v5773_v40, 16  ;;  %v1634_v13 = vmul.f32 %v5688_v42, %v5688_v42 }
 0x1d1   :  { %1553 = vmatpush.msra.mxu0 %v5635_v5 }
 0x1d2   :  { %1815 = vmatpush.bf16.msra.mxu1 %v4478_v15  ;;  %1920 = vmatpush.bf16.msra.mxu3 %v4466_v4  ;;  %v2164_v17 = vrot.slane %v2162_v9, 2  ;;  %v2167_v12 = vrot.slane %v2165_v61, 3  ;;  %v1637_v15 = vmul.f32 %v5654_v41, %v5654_v41  ;;  %v1632_v4 = vmul.f32 %v5709_v36, %v5709_v36  ;;  %v4481_v61 = vld [vmem:[%s6922_s1 + $0x290] sm:$0xff] }
 0x1d3   :  { %1554 = vmatpush.msra.mxu0 %v5643_v21 }
 0x1d4   :  { %2301 = vmatpush.bf16.msra.mxu2 %v4491_v43  ;;  %v2168_v24 = vor.u32 %v2167_v12, %v2164_v17  ;;  %v1631_v43 = vmul.f32 %v5721_v2, %v5721_v2  ;;  %v4479_v17 = vld [vmem:[%s6922_s1 + $0x280] sm:$0xff]  ;;  %v1995_v12 = vrot.slane %v5773_v40, 2 }
 0x1d5   :  { %1555 = vmatpush.msra.mxu0 %v5654_v41 }
 0x1d6   :  { %1816 = vmatpush.bf16.msra.mxu1 %v4477_v26  ;;  %1921 = vmatpush.bf16.msra.mxu3 %v4465_v53  ;;  %v1636_v26 = vmul.f32 %v5665_v50, %v5665_v50  ;;  %v5809_v51 = vsel %vm2160_vm6, %v2168_v24, %v2176_v33 }
 0x1d7   :  { %1556 = vmatpush.msra.mxu0 %v5665_v50  ;;  %3997 = vmatmul.msk.f32.vlgmr.msrb.gmra.mxu1 %vm1540_vm5, %v5646_v48 }
 0x1d8   :  { %2302 = vmatpush.bf16.msra.mxu2 %v4490_v23 }
 0x1d9   :  { %1557 = vmatpush.msra.mxu0 %v5679_v22 }
 0x1da   :  { %1817 = vmatpush.bf16.msra.mxu1 %v4476_v7  ;;  %1922 = vmatpush.bf16.msra.mxu3 %v4464_v20  ;;  %v7099_v7 = vld [vmem:[#allocation13_spill] sm:$0xff] }
 0x1db   :  { %1558 = vmatpush.msra.mxu0 %v5688_v42 }
 0x1dc   :  { %2303 = vmatpush.bf16.msra.mxu2 %v4489_v63  ;;  %v4484_v63 = vld [vmem:[%s6922_s1 + $0x2a8] sm:$0xff] }
 0x1dd   :  { %1559 = vmatpush.msra.mxu0 %v5699_v39 }
 0x1de   :  { %1818 = vmatpush.bf16.msra.mxu1 %v4475_v54  ;;  %1923 = vmatpush.bf16.msra.mxu3 %v4463_v37  ;;  %v7100_v54 = vld [vmem:[#allocation34_spill] sm:$0xff]  ;;  %v7103_v37 = vld [vmem:[#allocation35_spill] sm:$0xff] }
 0x1df   :  { %1560 = vmatpush.msra.mxu0 %v5709_v36  ;;  %v2179_v27 = vshrl.u32 %v7100_v54, 16  ;;  %v2182_v53 = vshll.u32 %v7100_v54, 16 }
 0x1e0   :  { %2304 = vmatpush.bf16.msra.mxu2 %v4488_v1  ;;  %v2188_v1 = vshrl.u32 %v7103_v37, 16 }
 0x1e1   :  { %1561 = vmatpush.msra.mxu0 %v5721_v2  ;;  %1924 = vmatmul.bf16.vlgmr.msra.gmra.mxu3 %v7098_v38  ;;  %v2181_v23 = vrot.slane %v2179_v27, 2  ;;  %v7106_v38 = vld [vmem:[#allocation36_spill] sm:$0xff] }
 0x1e2   :  { %1819 = vmatpush.bf16.msra.mxu1 %v4474_v46  ;;  %v7101_v46 = vld [vmem:[#allocation14_spill] sm:$0xff]  ;;  %v2200_v24 = vshll.u32 %v7106_v38, 16 }
 0x1e3   :  { %1562 = vmatpush.msra.mxu0 %v5730_v32 }
 0x1e4   :  { %1563 = vmatmul.f32.vlgmr.msra.gmra.mxu0 %v5668_v11  ;;  %2305 = vmatpush.bf16.msra.mxu2 %v4487_v28  ;;  %v7105_v28 = vld [vmem:[#allocation17_spill] sm:$0xff] }
 0x1e5   :  { %1650 = vmatpush.msrb.mxu0 %v1645_v3  ;;  %v4486_v3 = vld [vmem:[%s6922_s1 + $0x2b8] sm:$0xff] }
 0x1e6   :  { %1820 = vmatpush.bf16.msra.mxu1 %v4473_v8  ;;  %v4483_v8 = vld [vmem:[%s6922_s1 + $0x2a0] sm:$0xff] }
 0x1e7   :  { %1651 = vmatpush.msrb.mxu0 %v1644_v58  ;;  %2306 = vmatmul.bf16.vlgmr.msra.gmra.mxu2 %v5809_v51  ;;  %v1630_v58 = vmul.f32 %v5730_v32, %v5730_v32 }
 0x1e9   :  { %1652 = vmatpush.msrb.mxu0 %v1643_v18  ;;  %v2184_v18 = vrot.slane %v2182_v53, 3 }
 0x1ea   :  { %1821 = vmatpush.bf16.msra.mxu1 %v4472_v29  ;;  %v2190_v29 = vrot.slane %v2188_v1, 2 }
 0x1eb   :  { %1653 = vmatpush.msrb.mxu0 %v1642_v10  ;;  %v2185_v10 = vor.u32 %v2184_v18, %v2181_v23  ;;  %v7111_v18 = vld [vmem:[#allocation20_spill] sm:$0xff] }
 0x1ed   :  { %1654 = vmatpush.msrb.mxu0 %v1641_v52  ;;  %v5836_v20 = vsel %vm2160_vm6, %v2176_v33, %v2185_v10  ;;  %v7102_v52 = vld [vmem:[#allocation15_spill] sm:$0xff] }
 0x1ee   :  { %1822 = vmatpush.bf16.msra.mxu1 %v4471_v49  ;;  %v2197_v49 = vshrl.u32 %v7106_v38, 16 }
 0x1ef   :  { %1655 = vmatpush.msrb.mxu0 %v1640_v55  ;;  %v4482_v55 = vld [vmem:[%s6922_s1 + $0x298] sm:$0xff] }
 0x1f0   :  { %v2199_v33 = vrot.slane %v2197_v49, 2 }
 0x1f1   :  { %1656 = vmatpush.msrb.mxu0 %v1639_v44  ;;  %1823 = vmatmul.bf16.vlgmr.msra.gmra.mxu1 %v7099_v7  ;;  %v2191_v44 = vshll.u32 %v7103_v37, 16 }
 0x1f2   :  { %1929 = vmatmul.bf16.gmra.mxu3 %v7101_v46 }
 0x1f3   :  { %1657 = vmatpush.msrb.mxu0 %v1638_v6  ;;  %v2193_v9 = vrot.slane %v2191_v44, 3  ;;  %v4480_v6 = vld [vmem:[%s6922_s1 + $0x288] sm:$0xff] }
 0x1f5   :  { %1658 = vmatpush.msrb.mxu0 %v1637_v15  ;;  %v2194_v14 = vor.u32 %v2193_v9, %v2190_v29  ;;  %v1997_v15 = vsel %vm1994_vm7, %v1995_v12, %v1996_v56  ;;  %v7115_v9 = vld [vmem:[#allocation23_spill] sm:$0xff] }
 0x1f7   :  { %1659 = vmatpush.msrb.mxu0 %v1636_v26  ;;  %2311 = vmatmul.bf16.gmra.mxu2 %v5836_v20  ;;  %v5856_v31 = vsel %vm2160_vm6, %v2185_v10, %v2194_v14  ;;  %v2202_v26 = vrot.slane %v2200_v24, 3  ;;  %v7113_v10 = vld [vmem:[#allocation21_spill] sm:$0xff] }
 0x1f8   :  { %v7119_v24 = vld [vmem:[#allocation25_spill] sm:$0xff] }
 0x1f9   :  { %1660 = vmatpush.msrb.mxu0 %v1635_v45  ;;  %v7107_v45 = vld [vmem:[#allocation18_spill] sm:$0xff]  ;;  %v2203_v40 = vor.u32 %v2202_v26, %v2199_v33 }
 0x1fb   :  { %1661 = vmatpush.msrb.mxu0 %v1634_v13  ;;  %v5878_v13 = vsel %vm2160_vm6, %v2194_v14, %v2203_v40  ;;  %v7117_v14 = vld [vmem:[#allocation24_spill] sm:$0xff] }
 0x1fc   :  { %7108 = vst [vmem:[#allocation31_spill] sm:$0xff] %v5878_v13 }
 0x1fd   :  { %1662 = vmatpush.msrb.mxu0 %v1633_v47  ;;  %v7109_v47 = vld [vmem:[#allocation19_spill] sm:$0xff] }
 0x1ff   :  { %1663 = vmatpush.msrb.mxu0 %v1632_v4  ;;  %v1998_v4 = vrot.slane %v7100_v54, 2  ;;  %v2000_v54 = vrot.slane %v7103_v37, 2  ;;  %v2002_v37 = vrot.slane %v7106_v38, 2  ;;  %v2139_v38 = vld [vmem:[%s6921_s0 + $0x44] sm:$0xf] }
 0x201   :  { %1664 = vmatpush.msrb.mxu0 %v1631_v43  ;;  %1828 = vmatmul.bf16.gmra.mxu1 %v7102_v52  ;;  %v1999_v43 = vsel %vm1994_vm7, %v1996_v56, %v1998_v4 }
 0x202   :  { %1934 = vmatmul.bf16.gmra.mxu3 %v7104_v35 }
 0x203   :  { %1665 = vmatpush.msrb.mxu0 %v1630_v58 }
 0x204   :  { %1666 = vmatmul.f32.vlgmr.msrb.gmra.mxu0 %v5668_v11 }
 0x205   :  { %2069 = vmatpush.bf16.msra.mxu0 %v4486_v3  ;;  %v7110_v3 = vld [vmem:[#allocation37_spill] sm:$0xff] }
 0x206   :  { %v2206_v27 = vshrl.u32 %v7110_v3, 16  ;;  %v2209_v58 = vshll.u32 %v7110_v3, 16 }
 0x207   :  { %2316 = vmatmul.bf16.gmra.mxu2 %v5856_v31 }
 0x208   :  { %v2208_v53 = vrot.slane %v2206_v27, 2  ;;  %v2211_v23 = vrot.slane %v2209_v58, 3 }
 0x209   :  { %2070 = vmatpush.bf16.msra.mxu0 %v4485_v0 }
 0x20a   :  { %v2212_v0 = vor.u32 %v2211_v23, %v2208_v53 }
 0x20c   :  { %v5888_v46 = vsel %vm2160_vm6, %v2203_v40, %v2212_v0  ;;  %v2004_v40 = vrot.slane %v7110_v3, 2 }
 0x20d   :  { %2071 = vmatpush.bf16.msra.mxu0 %v4484_v63  ;;  %7112 = vst [vmem:[#allocation33_spill] sm:$0xff] %v5888_v46  ;;  %v2001_v63 = vsel %vm1994_vm7, %v1998_v4, %v2000_v54  ;;  %v2158_v4 = vunpack.c.l.b16 %v2139_v38 }
 0x20e   :  { %v2005_v27 = vsel %vm1994_vm7, %v2002_v37, %v2004_v40 }
 0x211   :  { %2072 = vmatpush.bf16.msra.mxu0 %v4483_v8  ;;  %1833 = vmatmul.bf16.gmra.mxu1 %v7105_v28  ;;  %v7114_v8 = vld [vmem:[#allocation38_spill] sm:$0xff] }
 0x212   :  { %1939 = vmatmul.bf16.gmra.mxu3 %v7107_v45  ;;  %v2218_v1 = vshll.u32 %v7114_v8, 16  ;;  %v7121_v45 = vld [vmem:[#allocation26_spill] sm:$0xff] }
 0x214   :  { %v2220_v29 = vrot.slane %v2218_v1, 3  ;;  %v7123_v1 = vld [vmem:[#allocation29_spill] sm:$0xff] }
 0x215   :  { %2073 = vmatpush.bf16.msra.mxu0 %v4482_v55  ;;  %v2215_v55 = vshrl.u32 %v7114_v8, 16 }
 0x217   :  { %2321 = vmatmul.bf16.gmra.mxu2 %v5878_v13  ;;  %v2217_v44 = vrot.slane %v2215_v55, 2 }
 0x219   :  { %2074 = vmatpush.bf16.msra.mxu0 %v4481_v61  ;;  %v2221_v61 = vor.u32 %v2220_v29, %v2217_v44 }
 0x21b   :  { %v5898_v35 = vsel %vm2160_vm6, %v2212_v0, %v2221_v61 }
 0x21c   :  { %7116 = vst [vmem:[#allocation12_spill] sm:$0xff] %v5898_v35 }
 0x21d   :  { %2075 = vmatpush.bf16.msra.mxu0 %v4480_v6  ;;  %v2003_v6 = vsel %vm1994_vm7, %v2000_v54, %v2002_v37  ;;  %v2006_v37 = vrot.slane %v7114_v8, 2 }
 0x221   :  { %2076 = vmatpush.bf16.msra.mxu0 %v4479_v17  ;;  %1838 = vmatmul.bf16.gmra.mxu1 %v7109_v47  ;;  %v7118_v17 = vld [vmem:[#allocation22_spill] sm:$0xff] }
 0x222   :  { %1944 = vmatmul.bf16.gmra.mxu3 %v7111_v18  ;;  %v2224_v12 = vshrl.u32 %v7118_v17, 16  ;;  %v2227_v56 = vshll.u32 %v7118_v17, 16 }
 0x224   :  { %2077 = vmatmul.bf16.vlgmr.msra.gmra.mxu0 %v1997_v15  ;;  %v2226_v15 = vrot.slane %v2224_v12, 2  ;;  %v2229_v49 = vrot.slane %v2227_v56, 3  ;;  %v2007_v56 = vsel %vm1994_vm7, %v2004_v40, %v2006_v37  ;;  %v1970_v40 = vld [vmem:[%s6921_s0 + $0x44] sm:$0x7] }
 0x226   :  { %v2230_v33 = vor.u32 %v2229_v49, %v2226_v15  ;;  %v7129_v49 = vld [vmem:[#allocation27_spill] sm:$0xff] }
 0x227   :  { %2326 = vmatmul.bf16.gmra.mxu2 %v5888_v46 }
 0x228   :  { %v5908_v26 = vsel %vm2160_vm6, %v2221_v61, %v2230_v33  ;;  %v7128_v61 = vld [vmem:[#allocation30_spill] sm:$0xff] }
 0x229   :  { %7120 = vst [vmem:[#allocation13_spill] sm:$0xff] %v5908_v26 }
 0x231   :  { %1843 = vmatmul.bf16.gmra.mxu1 %v7113_v10 }
 0x232   :  { %1949 = vmatmul.bf16.gmra.mxu3 %v7115_v9 }
 0x234   :  { %2082 = vmatmul.bf16.gmra.mxu0 %v1999_v43  ;;  %v5916_v43 = vpack.c.b16 %v2158_v4, %v2158_v4  ;;  %v2008_v4 = vrot.slane %v7118_v17, 2 }
 0x236   :  { %7122 = vst [vmem:[#allocation34_spill] sm:$0xff] %v5916_v43  ;;  %v2233_v58 = vshrl.u32 %v5916_v43, 16  ;;  %v2236_v53 = vshll.u32 %v5916_v43, 16  ;;  %v2009_v8 = vsel %vm1994_vm7, %v2006_v37, %v2008_v4 }
 0x237   :  { %2331 = vmatmul.bf16.gmra.mxu2 %v5898_v35 }
 0x238   :  { %v2235_v18 = vrot.slane %v2233_v58, 2  ;;  %v2238_v0 = vrot.slane %v2236_v53, 3 }
 0x23a   :  { %v5922_v44 = vor.u32 %v2238_v0, %v2235_v18  ;;  %v1991_v0 = vunpack.c.l.b16 %v1970_v40 }
 0x23c   :  { %7124 = vst [vmem:[#allocation14_spill] sm:$0xff] %v5922_v44  ;;  %v5930_v9 = vsel %vm2160_vm6, %v2230_v33, %v5922_v44  ;;  %v7130_v33 = vld [vmem:[#allocation28_spill] sm:$0xff] }
 0x23d   :  { %7127 = vst [vmem:[#allocation16_spill] sm:$0xff] %v5930_v9 }
 0x241   :  { %1848 = vmatmul.bf16.gmra.mxu1 %v7117_v14 }
 0x242   :  { %1954 = vmatmul.bf16.gmra.mxu3 %v7119_v24 }
 0x244   :  { %2087 = vmatmul.bf16.gmra.mxu0 %v2001_v63  ;;  %v5924_v3 = vpop.f32.mrf.mxu3 }
 0x245   :  { %7125 = vst [vmem:[#allocation15_spill] sm:$0xff] %v5924_v3 }
 0x247   :  { %2336 = vmatmul.bf16.gmra.mxu2 %v5908_v26  ;;  %v1607_v63 = vpop.f32.mrf.mxu2 }
 0x24c   :  { %v1584_v23 = vpop.f32.mrf.mxu1  ;;  %v1730_v12 = vpop.f32.mrf.mxu3 }
 0x24f   :  { %v1710_v15 = vpop.f32.mrf.mxu2 }
 0x251   :  { %1853 = vmatmul.bf16.gmra.mxu1 %v7121_v45 }
 0x252   :  { %1959 = vmatmul.bf16.gmra.mxu3 %v7123_v1 }
 0x254   :  { %2092 = vmatmul.bf16.gmra.mxu0 %v2003_v6  ;;  %v1687_v6 = vpop.f32.mrf.mxu1 }
 0x257   :  { %2341 = vmatmul.bf16.gmra.mxu2 %v5930_v9 }
 0x261   :  { %v1564_v54 = vpop.f32.mrf.mxu0  ;;  %1858 = vmatmul.bf16.gmra.mxu1 %v7128_v61 }
 0x262   :  { %v1585_v55 = vadd.f32 %v1584_v23, %v1564_v54  ;;  %1964 = vmatmul.bf16.gmra.mxu3 %v7129_v49  ;;  %v1993_v49 = vpack.c.b16 %v1991_v0, %v1991_v0 }
 0x264   :  { %2097 = vmatmul.bf16.gmra.mxu0 %v2005_v27  ;;  %v5926_v29 = vadd.f32 %v1607_v63, %v1585_v55  ;;  %v1925_v38 = vpop.f32.mrf.mxu3  ;;  %v2010_v2 = vrot.slane %v1993_v49, 2 }
 0x266   :  { %7126 = vst [vmem:[#allocation35_spill] sm:$0xff] %v5926_v29  ;;  %v2011_v42 = vsel %vm1994_vm7, %v2008_v4, %v2010_v2 }
 0x267   :  { %2346 = vmatmul.bf16.gmra.mxu2 %v5922_v44 }
 0x26a   :  { %v2307_v27 = vpop.f32.mrf.mxu2 }
 0x26c   :  { %v1927_v53 = vpop.f32.mrf.mxu3 }
 0x26e   :  { %v1824_v24 = vpop.f32.mrf.mxu1 }
 0x271   :  { %1863 = vmatmul.bf16.gmra.mxu1 %v7130_v33 }
 0x272   :  { %v5944_v54 = vpop.f32.mrf.mxu2 }
 0x274   :  { %2102 = vmatmul.bf16.gmra.mxu0 %v2007_v56 }
 0x275   :  { %v1930_v56 = vpop.f32.mrf.mxu3 }
 0x276   :  { %v1826_v58 = vpop.f32.mrf.mxu1 }
 0x277   :  { %v1928_v49 = vadd.f32 %v1927_v53, %v1826_v58 }
 0x27a   :  { %v2312_v32 = vpop.f32.mrf.mxu2 }
 0x27d   :  { %v1932_v37 = vpop.f32.mrf.mxu3 }
 0x27e   :  { %v1829_v1 = vpop.f32.mrf.mxu1 }
 0x27f   :  { %v1931_v34 = vadd.f32 %v1930_v56, %v1829_v1 }
 0x281   :  { %v1667_v23 = vpop.f32.mrf.mxu0 }
 0x282   :  { %v1688_v18 = vadd.f32 %v1687_v6, %v1667_v23  ;;  %v5949_v5 = vpop.f32.mrf.mxu2  ;;  %v1926_v23 = vadd.f32 %v1925_v38, %v1824_v24 }
 0x284   :  { %2107 = vmatmul.bf16.gmra.mxu0 %v2009_v8  ;;  %v1711_v63 = vadd.f32 %v1710_v15, %v1688_v18 }
 0x285   :  { %v1935_v6 = vpop.f32.mrf.mxu3 }
 0x286   :  { %v5946_v55 = vadd.f32 %v1730_v12, %v1711_v63  ;;  %v1831_v22 = vpop.f32.mrf.mxu1 }
 0x288   :  { %7131 = vst [vmem:[#allocation17_spill] sm:$0xff] %v5946_v55 }
 0x28a   :  { %v2317_v40 = vpop.f32.mrf.mxu2 }
 0x28d   :  { %v1937_v15 = vpop.f32.mrf.mxu3 }
 0x28e   :  { %v1834_v8 = vpop.f32.mrf.mxu1 }
 0x28f   :  { %v1936_v41 = vadd.f32 %v1935_v6, %v1834_v8 }
 0x292   :  { %v5953_v0 = vpop.f32.mrf.mxu2 }
 0x294   :  { %2112 = vmatmul.bf16.gmra.mxu0 %v2011_v42 }
 0x295   :  { %v1940_v16 = vpop.f32.mrf.mxu3 }
 0x296   :  { %v1836_v21 = vpop.f32.mrf.mxu1 }
 0x29a   :  { %v2322_v59 = vpop.f32.mrf.mxu2 }
 0x29d   :  { %v1942_v19 = vpop.f32.mrf.mxu3 }
 0x29e   :  { %v1839_v30 = vpop.f32.mrf.mxu1 }
 0x2a1   :  { %v2078_v12 = vpop.f32.mrf.mxu0 }
 0x2a2   :  { %v2122_v18 = vadd.f32 %v2078_v12, %v1926_v23  ;;  %v5959_v23 = vpop.f32.mrf.mxu2 }
 0x2a4   :  { %v5951_v63 = vadd.f32 %v2307_v27, %v2122_v18  ;;  %2117 = vmatmul.bf16.gmra.mxu0 %v2010_v2  ;;  %v1933_v27 = vadd.f32 %v1932_v37, %v1831_v22 }
 0x2a5   :  { %v1945_v12 = vpop.f32.mrf.mxu3 }
 0x2a6   :  { %v1841_v25 = vpop.f32.mrf.mxu1 }
 0x2a9   :  { %v2080_v4 = vpop.f32.mrf.mxu0 }
 0x2aa   :  { %v5955_v42 = vadd.f32 %v2080_v4, %v1928_v49  ;;  %v2327_v53 = vpop.f32.mrf.mxu2 }
 0x2ad   :  { %v5965_v4 = vpop.f32.mrf.mxu3 }
 0x2ae   :  { %v1844_v2 = vpop.f32.mrf.mxu1 }
 0x2af   :  { %v1946_v33 = vadd.f32 %v1945_v12, %v1844_v2 }
 0x2b1   :  { %v2083_v24 = vpop.f32.mrf.mxu0 }
 0x2b2   :  { %v2124_v38 = vadd.f32 %v2083_v24, %v1931_v34  ;;  %v5969_v34 = vpop.f32.mrf.mxu2 }
 0x2b4   :  { %v5957_v62 = vadd.f32 %v2312_v32, %v2124_v38  ;;  %v1938_v32 = vadd.f32 %v1937_v15, %v1836_v21 }
 0x2b5   :  { %v1950_v22 = vpop.f32.mrf.mxu3 }
 0x2b6   :  { %v5963_v49 = vpop.f32.mrf.mxu1 }
 0x2b9   :  { %v2085_v18 = vpop.f32.mrf.mxu0 }
 0x2ba   :  { %v5961_v58 = vadd.f32 %v2085_v18, %v1933_v27  ;;  %v2332_v27 = vpop.f32.mrf.mxu2  ;;  %v1941_v18 = vadd.f32 %v1940_v16, %v1839_v30 }
 0x2bd   :  { %v1952_v8 = vpop.f32.mrf.mxu3 }
 0x2be   :  { %v1849_v24 = vpop.f32.mrf.mxu1 }
 0x2c1   :  { %v2088_v1 = vpop.f32.mrf.mxu0 }
 0x2c2   :  { %v2126_v56 = vadd.f32 %v2088_v1, %v1936_v41  ;;  %v5975_v9 = vpop.f32.mrf.mxu2  ;;  %v1943_v41 = vadd.f32 %v1942_v19, %v1841_v25 }
 0x2c4   :  { %v5967_v50 = vadd.f32 %v2317_v40, %v2126_v56 }
 0x2c5   :  { %v1955_v1 = vpop.f32.mrf.mxu3 }
 0x2c6   :  { %v1851_v39 = vpop.f32.mrf.mxu1 }
 0x2c7   :  { %v1953_v14 = vadd.f32 %v1952_v8, %v1851_v39 }
 0x2c9   :  { %v2090_v37 = vpop.f32.mrf.mxu0 }
 0x2ca   :  { %v5971_v38 = vadd.f32 %v2090_v37, %v1938_v32  ;;  %v2337_v15 = vpop.f32.mrf.mxu2 }
 0x2cd   :  { %v1957_v16 = vpop.f32.mrf.mxu3 }
 0x2ce   :  { %v1854_v40 = vpop.f32.mrf.mxu1 }
 0x2d1   :  { %v2093_v6 = vpop.f32.mrf.mxu0 }
 0x2d2   :  { %v2128_v36 = vadd.f32 %v2093_v6, %v1941_v18  ;;  %v2339_v55 = vpop.f32.mrf.mxu2  ;;  %v1951_v6 = vadd.f32 %v1950_v22, %v1849_v24  ;;  %v4510_v24 = vld [vmem:[%s6922_s1 + $0x378] sm:$0xff] }
 0x2d3   :  { %2572 = vmatpush.bf16.msrb.mxu2 %v4510_v24 }
 0x2d4   :  { %v5973_v44 = vadd.f32 %v2322_v59, %v2128_v36 }
 0x2d5   :  { %v1960_v36 = vpop.f32.mrf.mxu3 }
 0x2d6   :  { %v1856_v43 = vpop.f32.mrf.mxu1 }
 0x2d9   :  { %v2095_v56 = vpop.f32.mrf.mxu0 }
 0x2da   :  { %v5977_v21 = vadd.f32 %v2095_v56, %v1943_v41  ;;  %v2342_v26 = vpop.f32.mrf.mxu2 }
 0x2dd   :  { %v1962_v56 = vpop.f32.mrf.mxu3 }
 0x2de   :  { %v1859_v59 = vpop.f32.mrf.mxu1 }
 0x2e1   :  { %v2098_v32 = vpop.f32.mrf.mxu0 }
 0x2e2   :  { %v2130_v37 = vadd.f32 %v2098_v32, %v1946_v33  ;;  %v2344_v2 = vpop.f32.mrf.mxu2 }
 0x2e4   :  { %v5979_v30 = vadd.f32 %v2327_v53, %v2130_v37 }
 0x2e5   :  { %v1965_v33 = vpop.f32.mrf.mxu3 }
 0x2e6   :  { %v1861_v41 = vpop.f32.mrf.mxu1 }
 0x2e9   :  { %v2100_v18 = vpop.f32.mrf.mxu0 }
 0x2ea   :  { %v2347_v61 = vpop.f32.mrf.mxu2 }
 0x2ed   :  { %v1967_v37 = vpop.f32.mrf.mxu3 }
 0x2ee   :  { %v1864_v12 = vpop.f32.mrf.mxu1  ;;  %v1963_v37 = vadd.f32 %v1962_v56, %v1861_v41 }
 0x2ef   :  { %v1966_v39 = vadd.f32 %v1965_v33, %v1864_v12  ;;  %v4502_v33 = vld [vmem:[%s6922_s1 + $0x338] sm:$0xff] }
 0x2f1   :  { %v2103_v25 = vpop.f32.mrf.mxu0 }
 0x2f2   :  { %v2132_v19 = vadd.f32 %v2103_v25, %v1951_v6  ;;  %v2349_v45 = vpop.f32.mrf.mxu2  ;;  %v4509_v6 = vld [vmem:[%s6922_s1 + $0x370] sm:$0xff]  ;;  %v1956_v25 = vadd.f32 %v1955_v1, %v1854_v40  ;;  %v1948_v1 = vadd.f32 %v5965_v4, %v5963_v49 }
 0x2f3   :  { %2573 = vmatpush.bf16.msrb.mxu2 %v4509_v6 }
 0x2f4   :  { %v5981_v3 = vadd.f32 %v2332_v27, %v2132_v19  ;;  %v1961_v27 = vadd.f32 %v1960_v36, %v1859_v59  ;;  %v1958_v19 = vadd.f32 %v1957_v16, %v1856_v43  ;;  %v4507_v36 = vld [vmem:[%s6922_s1 + $0x360] sm:$0xff] }
 0x2f6   :  { %v1866_v53 = vpop.f32.mrf.mxu1 }
 0x2f7   :  { %v4508_v53 = vld [vmem:[%s6922_s1 + $0x368] sm:$0xff] }
 0x2f8   :  { %2574 = vmatpush.bf16.msrb.mxu2 %v4508_v53  ;;  %v4501_v53 = vld [vmem:[%s6922_s1 + $0x330] sm:$0xff] }
 0x2f9   :  { %v2105_v29 = vpop.f32.mrf.mxu0 }
 0x2fa   :  { %v2133_v6 = vadd.f32 %v2105_v29, %v1953_v14  ;;  %v4506_v14 = vld [vmem:[%s6922_s1 + $0x358] sm:$0xff] }
 0x2fc   :  { %2575 = vmatpush.bf16.msrb.mxu2 %v4507_v36 }
 0x300   :  { %2576 = vmatpush.bf16.msrb.mxu2 %v4506_v14 }
 0x301   :  { %v2108_v32 = vpop.f32.mrf.mxu0 }
 0x302   :  { %v2134_v24 = vadd.f32 %v2108_v32, %v1956_v25  ;;  %v4504_v32 = vld [vmem:[%s6922_s1 + $0x348] sm:$0xff] }
 0x304   :  { %v2363_v16 = vadd.f32 %v2337_v15, %v2134_v24 }
 0x309   :  { %v2110_v35 = vpop.f32.mrf.mxu0 }
 0x30a   :  { %v2135_v45 = vadd.f32 %v2110_v35, %v1958_v19  ;;  %v5997_v35 = vld [vmem:[#allocation2] ss:$0 sm:$0xff] }
 0x30b   :  { %v6022_v8 = vadd.f32 %v5997_v35, %v2363_v16  ;;  %v4503_v19 = vld [vmem:[%s6922_s1 + $0x340] sm:$0xff]  ;;  %v6138_v14 = vadd.f32 %v5997_v35, %v5951_v63  ;;  %v4526_v63 = vld [vmem:[%s6922_s1 + $0x3f8] sm:$0xff] }
 0x30c   :  { %v2364_v40 = vadd.f32 %v2339_v55, %v2135_v45  ;;  %v2356_v45 = vadd.f32 %v5953_v0, %v5971_v38  ;;  %v6085_v0 = vadd.f32 %v5997_v35, %v5973_v44  ;;  %v4500_v38 = vld [vmem:[%s6922_s1 + $0x328] sm:$0xff] }
 0x30d   :  { %7135 = vst [vmem:[#allocation37_spill] sm:$0xff] %v6022_v8 }
 0x30e   :  { %v6013_v55 = vadd.f32 %v5997_v35, %v2364_v40  ;;  %7142 = vst [vmem:[#allocation27_spill] sm:$0xff] %v6085_v0  ;;  %v7144_v40 = vld [vmem:[#allocation32_spill] sm:$0xff]  ;;  %v2435_v44 = vmul.f32 %v6085_v0, %v6085_v0 }
 0x310   :  { %7134 = vst [vmem:[#allocation19_spill] sm:$0xff] %v6013_v55  ;;  %v2442_v56 = vmul.f32 %v6013_v55, %v6013_v55 }
 0x311   :  { %v2113_v22 = vpop.f32.mrf.mxu0 }
 0x312   :  { %v2136_v17 = vadd.f32 %v2113_v22, %v1961_v27  ;;  %v2358_v22 = vadd.f32 %v5959_v23, %v5977_v21  ;;  %v6065_v21 = vadd.f32 %v5997_v35, %v5979_v30 }
 0x314   :  { %v2365_v13 = vadd.f32 %v2342_v26, %v2136_v17  ;;  %v2131_v17 = vadd.f32 %v2100_v18, %v1948_v1  ;;  %v2362_v26 = vadd.f32 %v5975_v9, %v2133_v6  ;;  %7140 = vst [vmem:[#allocation25_spill] sm:$0xff] %v6065_v21  ;;  %v6076_v24 = vadd.f32 %v5997_v35, %v2358_v22  ;;  %v4523_v22 = vld [vmem:[%s6922_s1 + $0x3e0] sm:$0xff] }
 0x315   :  { %v2437_v30 = vmul.f32 %v6065_v21, %v6065_v21  ;;  %v6096_v6 = vadd.f32 %v5997_v35, %v2356_v45  ;;  %v4706_v45 = vld [vmem:[%s6921_s0 + $0x14] sm:$0xff]  }
 0x316   :  { %v2360_v15 = vadd.f32 %v5969_v34, %v2131_v17  ;;  %v2441_v34 = vmul.f32 %v6022_v8, %v6022_v8  ;;  %7141 = vst [vmem:[#allocation29_spill] sm:$0xff] %v6076_v24  ;;  %v2436_v36 = vmul.f32 %v6076_v24, %v6076_v24 }
 0x317   :  { %7143 = vst [vmem:[#allocation74_spill] sm:$0xff] %v6096_v6  ;;  %v2434_v1 = vmul.f32 %v6096_v6, %v6096_v6 }
 0x319   :  { %v2115_v46 = vpop.f32.mrf.mxu0 }
 0x31a   :  { %v2137_v59 = vadd.f32 %v2115_v46, %v1963_v37  ;;  %v6003_v46 = vadd.f32 %v5997_v35, %v2365_v13  ;;  %v4505_v13 = vld [vmem:[%s6922_s1 + $0x350] sm:$0xff] }
 0x31b   :  { %2577 = vmatpush.bf16.msrb.mxu2 %v4505_v13 }
 0x31c   :  { %v2366_v43 = vadd.f32 %v2344_v2, %v2137_v59  ;;  %7133 = vst [vmem:[#allocation18_spill] sm:$0xff] %v6003_v46  ;;  %v2443_v9 = vmul.f32 %v6003_v46, %v6003_v46  ;;  %v6029_v2 = vadd.f32 %v5997_v35, %v2362_v26  ;;  %v2354_v59 = vadd.f32 %v5949_v5, %v5961_v58  ;;  %v4499_v58 = vld [vmem:[%s6922_s1 + $0x320] sm:$0xff]  ;;  %v4497_v26 = vld [vmem:[%s6922_s1 + $0x310] sm:$0xff] }
 0x31d   :  { %v6104_v5 = vadd.f32 %v5997_v35, %v5967_v50 }
 0x31e   :  { %v6000_v41 = vadd.f32 %v5997_v35, %v2366_v43  ;;  %7136 = vst [vmem:[#allocation20_spill] sm:$0xff] %v6029_v2  ;;  %v2440_v27 = vmul.f32 %v6029_v2, %v6029_v2  ;;  %v2352_v43 = vadd.f32 %v5944_v54, %v5955_v42  ;;  %v6115_v16 = vadd.f32 %v5997_v35, %v2354_v59  ;;  %v4498_v54 = vld [vmem:[%s6922_s1 + $0x318] sm:$0xff]  ;;  %v4511_v59 = vld [vmem:[%s6922_s1 + $0x380] sm:$0xff] }
 0x31f   :  { %2578 = vmatpush.bf16.msrb.mxu2 %v4504_v32  ;;  %7145 = vst [vmem:[#allocation32_spill] sm:$0xff] %v6104_v5  ;;  %v2433_v50 = vmul.f32 %v6104_v5, %v6104_v5  ;;  %v4515_v32 = vld [vmem:[%s6922_s1 + $0x3a0] sm:$0xff] }
 0x320   :  { %7132 = vst [vmem:[#allocation36_spill] sm:$0xff] %v6000_v41  ;;  %2388 = vmatpush.msrb.mxu1 %v6000_v41  ;;  %v2444_v29 = vmul.f32 %v6000_v41, %v6000_v41  ;;  %v2432_v42 = vmul.f32 %v6115_v16, %v6115_v16  ;;  %v6131_v17 = vadd.f32 %v5997_v35, %v2352_v43  ;;  %v2885_v43 = vrot.slane %v4706_v45, 3 }
 0x321   :  { %v2118_v49 = vpop.f32.mrf.mxu0 }
 0x322   :  { %v2138_v4 = vadd.f32 %v2118_v49, %v1966_v39  ;;  %2389 = vmatpush.msrb.mxu1 %v6003_v46  ;;  %2449 = vmatpush.msrb.mxu0 %v2444_v29  ;;  %v6122_v39 = vadd.f32 %v5997_v35, %v5957_v62  ;;  %v2430_v29 = vmul.f32 %v6131_v17, %v6131_v17  ;;  %v4518_v49 = vld [vmem:[%s6922_s1 + $0x3b8] sm:$0xff] }
 0x323   :  { %2579 = vmatpush.bf16.msrb.mxu2 %v4503_v19  ;;  %v2861_v19 = vld [vmem:[%s6921_s0 + $0x4] sm:$0x8] }
 0x324   :  { %v2367_v18 = vadd.f32 %v2347_v61, %v2138_v4  ;;  %2390 = vmatpush.msrb.mxu1 %v6013_v55  ;;  %2450 = vmatpush.msrb.mxu0 %v2443_v9  ;;  %v6039_v61 = vadd.f32 %v5997_v35, %v5981_v3  ;;  %v6053_v3 = vadd.f32 %v5997_v35, %v2360_v15  ;;  %v4496_v9 = vld [vmem:[%s6922_s1 + $0x308] sm:$0xff]  ;;  %v4517_v15 = vld [vmem:[%s6922_s1 + $0x3b0] sm:$0xff] }
 0x325   :  { %v2431_v62 = vmul.f32 %v6122_v39, %v6122_v39  ;;  %v2429_v4 = vmul.f32 %v6138_v14, %v6138_v14 }
 0x326   :  { %v6032_v12 = vadd.f32 %v5997_v35, %v2367_v18  ;;  %2391 = vmatpush.msrb.mxu1 %v6022_v8  ;;  %2451 = vmatpush.msrb.mxu0 %v2442_v56  ;;  %7138 = vst [vmem:[#allocation38_spill] sm:$0xff] %v6039_v61  ;;  %v2439_v23 = vmul.f32 %v6039_v61, %v6039_v61  ;;  %v4525_v18 = vld [vmem:[%s6922_s1 + $0x3f0] sm:$0xff]  ;;  %v4495_v56 = vld [vmem:[%s6922_s1 + $0x300] sm:$0xff] }
 0x327   :  { %7139 = vst [vmem:[#allocation23_spill] sm:$0xff] %v6053_v3  ;;  %v2438_v37 = vmul.f32 %v6053_v3, %v6053_v3  ;;  %2580 = vmatmul.bf16.vlgmr.msrb.gmra.mxu2 %v7144_v40 }
 0x328   :  { %7137 = vst [vmem:[#allocation21_spill] sm:$0xff] %v6032_v12  ;;  %2392 = vmatpush.msrb.mxu1 %v6029_v2  ;;  %2452 = vmatpush.msrb.mxu0 %v2441_v34  ;;  %v2445_v13 = vmul.f32 %v6032_v12, %v6032_v12  ;;  %v4516_v34 = vld [vmem:[%s6922_s1 + $0x3a8] sm:$0xff] }
 0x329   :  { %v2120_v25 = vpop.f32.mrf.mxu0  ;;  %4192 = vmatpush.msk.msrb.mxu3 %vm1543_vm4, %v6032_v12 }
 0x32a   :  { %2393 = vmatpush.msrb.mxu1 %v6039_v61  ;;  %2453 = vmatpush.msrb.mxu0 %v2440_v27  ;;  %v4514_v27 = vld [vmem:[%s6922_s1 + $0x398] sm:$0xff] }
 0x32b   :  { %2673 = vmatpush.bf16.msra.mxu3 %v4502_v33  ;;  %v4524_v33 = vld [vmem:[%s6922_s1 + $0x3e8] sm:$0xff]  ;;  %v4522_v25 = vld [vmem:[%s6922_s1 + $0x3d8] sm:$0xff] }
 0x32c   :  { %2394 = vmatpush.msrb.mxu1 %v6053_v3  ;;  %2454 = vmatpush.msrb.mxu0 %v2439_v23  ;;  %v4521_v23 = vld [vmem:[%s6922_s1 + $0x3d0] sm:$0xff] }
 0x32d   :  { %4193 = vmatmul.msk.f32.vlgmr.msrb.gmra.mxu3 %vm1540_vm5, %v5646_v48 }
 0x32e   :  { %2395 = vmatpush.msrb.mxu1 %v6065_v21  ;;  %2455 = vmatpush.msrb.mxu0 %v2438_v37  ;;  %v4512_v37 = vld [vmem:[%s6922_s1 + $0x388] sm:$0xff] }
 0x32f   :  { %2674 = vmatpush.bf16.msra.mxu3 %v4501_v53  ;;  %v2880_v53 = vunpack.c.l.b16 %v2861_v19 }
 0x330   :  { %2396 = vmatpush.msrb.mxu1 %v6076_v24  ;;  %2456 = vmatpush.msrb.mxu0 %v2437_v30  ;;  %v4520_v30 = vld [vmem:[%s6922_s1 + $0x3c8] sm:$0xff] }
 0x332   :  { %2397 = vmatpush.msrb.mxu1 %v6085_v0  ;;  %2457 = vmatpush.msrb.mxu0 %v2436_v36  ;;  %v4519_v36 = vld [vmem:[%s6922_s1 + $0x3c0] sm:$0xff] }
 0x333   :  { %2675 = vmatpush.bf16.msra.mxu3 %v4500_v38  ;;  %v2881_v38 = vpack.c.b16 %v7096_v60, %v2880_v53  ;;  %v4707_v60 = vld [vmem:[%s6921_s0 + $0x1c] sm:$0xff]  }
 0x334   :  { %2398 = vmatpush.msrb.mxu1 %v6096_v6  ;;  %2458 = vmatpush.msrb.mxu0 %v2435_v44  ;;  %v2883_v44 = vrot.slane %v5870_v57, 3 }
 0x335   :  { %v2882_v40 = vrot.slane %v2881_v38, 3  ;;  %v7157_v38 = vld [vmem:[#allocation17_spill] sm:$0xff] }
 0x336   :  { %2399 = vmatpush.msrb.mxu1 %v6104_v5  ;;  %2459 = vmatpush.msrb.mxu0 %v2434_v1  ;;  %v2886_v1 = vsel %vm494_vm1, %v2883_v44, %v2885_v43 }
 0x337   :  { %2676 = vmatpush.bf16.msra.mxu3 %v4499_v58  ;;  %2585 = vmatmul.bf16.gmra.mxu2 %v5870_v57  ;;  %v2884_v58 = vsel %vm494_vm1, %v2882_v40, %v2883_v44  ;;  %v7159_v44 = vld [vmem:[#allocation28_spill] sm:$0xff] }
 0x338   :  { %2400 = vmatpush.msrb.mxu1 %v6115_v16  ;;  %2460 = vmatpush.msrb.mxu0 %v2433_v50 }
 0x33a   :  { %2401 = vmatpush.msrb.mxu1 %v6122_v39  ;;  %2461 = vmatpush.msrb.mxu0 %v2432_v42  ;;  %v7147_v42 = vld [vmem:[#allocation24_spill] sm:$0xff] }
 0x33b   :  { %2677 = vmatpush.bf16.msra.mxu3 %v4498_v54  ;;  %v7146_v54 = vld [vmem:[#allocation31_spill] sm:$0xff] }
 0x33c   :  { %2402 = vmatpush.msrb.mxu1 %v6131_v17  ;;  %2462 = vmatpush.msrb.mxu0 %v2431_v62 }
 0x33e   :  { %2403 = vmatpush.msrb.mxu1 %v6138_v14  ;;  %2463 = vmatpush.msrb.mxu0 %v2430_v29  ;;  %v7149_v29 = vld [vmem:[#allocation22_spill] sm:$0xff] }
 0x33f   :  { %2404 = vmatmul.f32.vlgmr.msrb.gmra.mxu1 %v5668_v11  ;;  %2678 = vmatpush.bf16.msra.mxu3 %v4497_v26  ;;  %v7148_v26 = vld [vmem:[#allocation33_spill] sm:$0xff] }
 0x340   :  { %4194 = vmatpush.msk.msra.mxu1 %vm1543_vm4, %v2445_v13  ;;  %2464 = vmatpush.msrb.mxu0 %v2429_v4  ;;  %v7151_v13 = vld [vmem:[#allocation12_spill] sm:$0xff]  ;;  %v7152_v4 = vld [vmem:[#allocation47_spill] sm:$0xff] }
 0x341   :  { %2465 = vmatmul.f32.vlgmr.msrb.gmra.mxu0 %v5668_v11 }
 0x342   :  { %2791 = vmatpush.bf16.msrb.mxu1 %v4518_v49  ;;  %2956 = vmatpush.bf16.msra.mxu0 %v4526_v63  ;;  %v7150_v49 = vld [vmem:[#allocation26_spill] sm:$0xff] }
 0x343   :  { %2679 = vmatpush.bf16.msra.mxu3 %v4496_v9 }
 0x346   :  { %2792 = vmatpush.bf16.msrb.mxu1 %v4517_v15  ;;  %2957 = vmatpush.bf16.msra.mxu0 %v4525_v18  ;;  %v2895_v15 = vrot.slane %v7149_v29, 3 }
 0x347   :  { %4195 = vmatmul.msk.f32.vlgmr.msra.gmra.mxu1 %vm1540_vm5, %v5646_v48  ;;  %2680 = vmatpush.bf16.msra.mxu3 %v4495_v56  ;;  %v7153_v56 = vld [vmem:[#allocation30_spill] sm:$0xff] }
 0x348   :  { %2590 = vmatmul.bf16.gmra.mxu2 %v4706_v45 }
 0x34a   :  { %2793 = vmatpush.bf16.msrb.mxu1 %v4516_v34  ;;  %2958 = vmatpush.bf16.msra.mxu0 %v4524_v33 }
 0x34b   :  { %2681 = vmatmul.bf16.vlgmr.msra.gmra.mxu3 %v7099_v7  ;;  %v4513_v7 = vld [vmem:[%s6922_s1 + $0x390] sm:$0xff] }
 0x34e   :  { %2794 = vmatpush.bf16.msrb.mxu1 %v4515_v32  ;;  %2959 = vmatpush.bf16.msra.mxu0 %v4523_v22  ;;  %v7154_v32 = vld [vmem:[#allocation35_spill] sm:$0xff] }
 0x34f   :  { %v7155_v22 = vld [vmem:[#allocation15_spill] sm:$0xff] }
 0x352   :  { %2795 = vmatpush.bf16.msrb.mxu1 %v4514_v27  ;;  %2960 = vmatpush.bf16.msra.mxu0 %v4522_v25  ;;  %v1628_v27 = vadd.f32 %v7155_v22, %v7154_v32 }
 0x356   :  { %2796 = vmatpush.bf16.msrb.mxu1 %v4513_v7  ;;  %2961 = vmatpush.bf16.msra.mxu0 %v4521_v23  ;;  %v7156_v23 = vld [vmem:[#allocation13_spill] sm:$0xff] }
 0x358   :  { %2595 = vmatmul.bf16.gmra.mxu2 %v4707_v60 }
 0x35a   :  { %2797 = vmatpush.bf16.msrb.mxu1 %v4512_v37  ;;  %2962 = vmatpush.bf16.msra.mxu0 %v4520_v30 }
 0x35b   :  { %2686 = vmatmul.bf16.gmra.mxu3 %v7102_v52  ;;  %v4708_v52 = vld [vmem:[%s6921_s0 + $0x24] sm:$0xff]  }
 0x35e   :  { %2798 = vmatpush.bf16.msrb.mxu1 %v4511_v59  ;;  %2963 = vmatpush.bf16.msra.mxu0 %v4519_v36  ;;  %v7158_v36 = vld [vmem:[#allocation34_spill] sm:$0xff] }
 0x35f   :  { %v2897_v40 = vrot.slane %v7158_v36, 3 }
 0x361   :  { %2799 = vmatmul.bf16.vlgmr.msrb.gmra.mxu1 %v5809_v51  ;;  %2964 = vmatmul.bf16.vlgmr.msra.gmra.mxu0 %v2884_v58  ;;  %v2887_v51 = vrot.slane %v4707_v60, 3  ;;  %v2898_v58 = vsel %vm494_vm1, %v2895_v15, %v2897_v40 }
 0x363   :  { %v2888_v57 = vsel %vm494_vm1, %v2885_v43, %v2887_v51 }
 0x368   :  { %2600 = vmatmul.bf16.gmra.mxu2 %v4708_v52 }
 0x36b   :  { %2691 = vmatmul.bf16.gmra.mxu3 %v7105_v28  ;;  %v4709_v28 = vld [vmem:[%s6921_s0 + $0x2c] sm:$0xff]  }
 0x371   :  { %2804 = vmatmul.bf16.gmra.mxu1 %v5836_v20  ;;  %2969 = vmatmul.bf16.gmra.mxu0 %v2886_v1  ;;  %v2889_v20 = vrot.slane %v4708_v52, 3  ;;  %v7160_v52 = vld [vmem:[#allocation16_spill] sm:$0xff] }
 0x373   :  { %v2890_v50 = vsel %vm494_vm1, %v2887_v51, %v2889_v20 }
 0x378   :  { %2605 = vmatmul.bf16.gmra.mxu2 %v4709_v28 }
 0x37b   :  { %2696 = vmatmul.bf16.gmra.mxu3 %v7109_v47  ;;  %v4710_v47 = vld [vmem:[%s6921_s0 + $0x34] sm:$0xff]   ;;  %s4818_s0 = smov 64  }
 0x381   :  { %2809 = vmatmul.bf16.gmra.mxu1 %v5856_v31  ;;  %2974 = vmatmul.bf16.gmra.mxu0 %v2888_v57  ;;  %v2891_v31 = vrot.slane %v4709_v28, 3 }
 0x383   :  { %v2892_v62 = vsel %vm494_vm1, %v2889_v20, %v2891_v31 }
 0x388   :  { %2610 = vmatmul.bf16.gmra.mxu2 %v4710_v47 }
 0x38b   :  { %2701 = vmatmul.bf16.gmra.mxu3 %v7113_v10  ;;  %v2893_v10 = vrot.slane %v4710_v47, 3 }
 0x38d   :  { %v2894_v63 = vsel %vm494_vm1, %v2891_v31, %v2893_v10  ;;  %v2896_v19 = vsel %vm494_vm1, %v2893_v10, %v2895_v15 }
 0x391   :  { %2814 = vmatmul.bf16.gmra.mxu1 %v7146_v54  ;;  %2979 = vmatmul.bf16.gmra.mxu0 %v2890_v50 }
 0x398   :  { %2615 = vmatmul.bf16.gmra.mxu2 %v7149_v29 }
 0x39b   :  { %2706 = vmatmul.bf16.gmra.mxu3 %v7147_v42 }
 0x3a1   :  { %2819 = vmatmul.bf16.gmra.mxu1 %v7148_v26  ;;  %2984 = vmatmul.bf16.gmra.mxu0 %v2892_v62  ;;  %v7161_v26 = vld [vmem:[#allocation14_spill] sm:$0xff] }
 0x3a8   :  { %2620 = vmatmul.bf16.gmra.mxu2 %v7152_v4 }
 0x3aa   :  { %v2581_v9 = vpop.f32.mrf.mxu2 }
 0x3ab   :  { %2711 = vmatmul.bf16.gmra.mxu3 %v7150_v49 }
 0x3b0   :  { %v2425_v18 = vpop.f32.mrf.mxu3 }
 0x3b1   :  { %2824 = vmatmul.bf16.gmra.mxu1 %v7151_v13  ;;  %2989 = vmatmul.bf16.gmra.mxu0 %v2894_v63 }
 0x3b2   :  { %v2583_v33 = vpop.f32.mrf.mxu2 }
 0x3ba   :  { %v2586_v30 = vpop.f32.mrf.mxu2 }
 0x3bb   :  { %2716 = vmatmul.bf16.gmra.mxu3 %v7153_v56 }
 0x3bc   :  { %v2405_v34 = vpop.f32.mrf.mxu1 }
 0x3bd   :  { %v2426_v25 = vadd.f32 %v2425_v18, %v2405_v34 }
 0x3be   :  { %v2466_v53 = vpop.f32.mrf.mxu0 }
 0x3bf   :  { %v6257_v7 = vadd.f32 %v2426_v25, %v1628_v27 }
 0x3c1   :  { %2829 = vmatmul.bf16.gmra.mxu1 %v7156_v23  ;;  %2994 = vmatmul.bf16.gmra.mxu0 %v2896_v19 }
 0x3c2   :  { %v2588_v43 = vpop.f32.mrf.mxu2 }
 0x3c4   :  { %v2486_v45 = vpop.f32.mrf.mxu1 }
 0x3c5   :  { %v2487_v37 = vadd.f32 %v2486_v45, %v2466_v53 }
 0x3c7   :  { %v6261_v59 = vadd.f32 %v2487_v37, %v7157_v38 }
 0x3cb   :  { %2721 = vmatmul.bf16.gmra.mxu3 %v7159_v44  ;;  %v2591_v57 = vpop.f32.mrf.mxu2 }
 0x3ce   :  { %v2682_v60 = vpop.f32.mrf.mxu3 }
 0x3cf   :  { %v2683_v1 = vadd.f32 %v2682_v60, %v2581_v9 }
 0x3d1   :  { %2834 = vmatmul.bf16.gmra.mxu1 %v7160_v52  ;;  %2999 = vmatmul.bf16.gmra.mxu0 %v2898_v58 }
 0x3d3   :  { %v2593_v31 = vpop.f32.mrf.mxu2 }
 0x3d6   :  { %v2684_v51 = vpop.f32.mrf.mxu3 }
 0x3d7   :  { %v2685_v28 = vadd.f32 %v2684_v51, %v2583_v33 }
 0x3db   :  { %v2596_v13 = vpop.f32.mrf.mxu2 }
 0x3de   :  { %v2800_v20 = vpop.f32.mrf.mxu1  ;;  %v2965_v50 = vpop.f32.mrf.mxu0 }
 0x3df   :  { %v2844_v54 = vadd.f32 %v2800_v20, %v2683_v1  ;;  %v2687_v47 = vpop.f32.mrf.mxu3 }
 0x3e0   :  { %v2688_v42 = vadd.f32 %v2687_v47, %v2586_v30 }
 0x3e1   :  { %v6267_v62 = vadd.f32 %v2965_v50, %v2844_v54  ;;  %2839 = vmatmul.bf16.gmra.mxu1 %v7161_v26  ;;  %3004 = vmatmul.bf16.gmra.mxu0 %v2897_v40 }
 0x3e3   :  { %v2598_v33 = vpop.f32.mrf.mxu2 }
 0x3e6   :  { %v2802_v29 = vpop.f32.mrf.mxu1  ;;  %v2967_v10 = vpop.f32.mrf.mxu0 }
 0x3e7   :  { %v2845_v49 = vadd.f32 %v2802_v29, %v2685_v28  ;;  %v2689_v63 = vpop.f32.mrf.mxu3 }
 0x3e8   :  { %v2690_v4 = vadd.f32 %v2689_v63, %v2588_v43 }
 0x3e9   :  { %v6270_v9 = vadd.f32 %v2967_v10, %v2845_v49 }
 0x3eb   :  { %v2601_v53 = vpop.f32.mrf.mxu2 }
 0x3ee   :  { %v2805_v15 = vpop.f32.mrf.mxu1  ;;  %v2970_v18 = vpop.f32.mrf.mxu0 }
 0x3ef   :  { %v2846_v56 = vadd.f32 %v2805_v15, %v2688_v42  ;;  %v2692_v34 = vpop.f32.mrf.mxu3 }
 0x3f0   :  { %v2693_v32 = vadd.f32 %v2692_v34, %v2591_v57 }
 0x3f1   :  { %v6272_v22 = vadd.f32 %v2970_v18, %v2846_v56 }
 0x3f3   :  { %v2603_v44 = vpop.f32.mrf.mxu2 }
 0x3f6   :  { %v2807_v27 = vpop.f32.mrf.mxu1  ;;  %v2972_v25 = vpop.f32.mrf.mxu0 }
 0x3f7   :  { %v2847_v19 = vadd.f32 %v2807_v27, %v2690_v4  ;;  %v2694_v23 = vpop.f32.mrf.mxu3 }
 0x3f8   :  { %v2695_v45 = vadd.f32 %v2694_v23, %v2593_v31 }
 0x3f9   :  { %v6274_v37 = vadd.f32 %v2972_v25, %v2847_v19 }
 0x3fb   :  { %v2606_v57 = vpop.f32.mrf.mxu2 }
 0x3fe   :  { %v2810_v30 = vpop.f32.mrf.mxu1  ;;  %v2975_v38 = vpop.f32.mrf.mxu0 }
 0x3ff   :  { %v2848_v36 = vadd.f32 %v2810_v30, %v2693_v32  ;;  %v2697_v40 = vpop.f32.mrf.mxu3 }
 0x400   :  { %v2698_v58 = vadd.f32 %v2697_v40, %v2596_v13 }
 0x401   :  { %v6276_v60 = vadd.f32 %v2975_v38, %v2848_v36 }
 0x403   :  { %v2608_v42 = vpop.f32.mrf.mxu2 }
 0x406   :  { %v2812_v43 = vpop.f32.mrf.mxu1  ;;  %v2977_v1 = vpop.f32.mrf.mxu0 }
 0x407   :  { %v2849_v52 = vadd.f32 %v2812_v43, %v2695_v45  ;;  %v2699_v51 = vpop.f32.mrf.mxu3 }
 0x408   :  { %v2700_v28 = vadd.f32 %v2699_v51, %v2598_v33 }
 0x409   :  { %v6278_v20 = vadd.f32 %v2977_v1, %v2849_v52 }
 0x40b   :  { %v2611_v4 = vpop.f32.mrf.mxu2 }
 0x40e   :  { %v2815_v50 = vpop.f32.mrf.mxu1  ;;  %v2980_v54 = vpop.f32.mrf.mxu0 }
 0x40f   :  { %v2850_v47 = vadd.f32 %v2815_v50, %v2698_v58  ;;  %v2702_v31 = vpop.f32.mrf.mxu3 }
 0x410   :  { %v2703_v26 = vadd.f32 %v2702_v31, %v2601_v53 }
 0x411   :  { %v6280_v29 = vadd.f32 %v2980_v54, %v2850_v47 }
 0x413   :  { %v2613_v25 = vpop.f32.mrf.mxu2 }
 0x416   :  { %v2817_v10 = vpop.f32.mrf.mxu1  ;;  %v2982_v49 = vpop.f32.mrf.mxu0 }
 0x417   :  { %v2851_v63 = vadd.f32 %v2817_v10, %v2700_v28  ;;  %v2704_v13 = vpop.f32.mrf.mxu3 }
 0x418   :  { %v2705_v15 = vadd.f32 %v2704_v13, %v2603_v44 }
 0x419   :  { %v6282_v18 = vadd.f32 %v2982_v49, %v2851_v63 }
 0x41b   :  { %v2616_v45 = vpop.f32.mrf.mxu2 }
 0x41e   :  { %v2820_v56 = vpop.f32.mrf.mxu1  ;;  %v2985_v34 = vpop.f32.mrf.mxu0 }
 0x41f   :  { %v2852_v33 = vadd.f32 %v2820_v56, %v2703_v26  ;;  %v2707_v32 = vpop.f32.mrf.mxu3 }
 0x420   :  { %v2708_v41 = vadd.f32 %v2707_v32, %v2606_v57 }
 0x421   :  { %v6284_v27 = vadd.f32 %v2985_v34, %v2852_v33 }
 0x423   :  { %v2618_v40 = vpop.f32.mrf.mxu2 }
 0x426   :  { %v2822_v19 = vpop.f32.mrf.mxu1  ;;  %v2987_v23 = vpop.f32.mrf.mxu0 }
 0x427   :  { %v2709_v53 = vpop.f32.mrf.mxu3  ;;  %v2853_v57 = vadd.f32 %v2822_v19, %v2705_v15 }
 0x428   :  { %v2710_v2 = vadd.f32 %v2709_v53, %v2608_v42 }
 0x42b   :  { %v2621_v1 = vpop.f32.mrf.mxu2 }
 0x42e   :  { %v2825_v30 = vpop.f32.mrf.mxu1  ;;  %v2990_v38 = vpop.f32.mrf.mxu0 }
 0x42f   :  { %v2712_v36 = vpop.f32.mrf.mxu3  ;;  %v2854_v6 = vadd.f32 %v2825_v30, %v2708_v41 }
 0x430   :  { %v2713_v13 = vadd.f32 %v2712_v36, %v2611_v4  ;;  %v6329_v36 = vadd.f32 %v5997_v35, %v6284_v27  ;;  %v6346_v27 = vadd.f32 %v5997_v35, %v6280_v29  ;;  %v6360_v29 = vadd.f32 %v5997_v35, %v6276_v60 }
 0x431   :  { %v6374_v60 = vadd.f32 %v5997_v35, %v6272_v22  ;;  %v6388_v22 = vadd.f32 %v5997_v35, %v6267_v62 }
 0x433   :  { %v2623_v50 = vpop.f32.mrf.mxu2 }
 0x436   :  { %v2827_v58 = vpop.f32.mrf.mxu1  ;;  %v2992_v43 = vpop.f32.mrf.mxu0 }
 0x437   :  { %v2714_v44 = vpop.f32.mrf.mxu3  ;;  %v2855_v21 = vadd.f32 %v2827_v58, %v2710_v2  ;;  %v6337_v58 = vadd.f32 %v5997_v35, %v6282_v18  ;;  %v3095_v18 = vmul.f32 %v6329_v36, %v6329_v36 }
 0x438   :  { %v2715_v56 = vadd.f32 %v2714_v44, %v2613_v25  ;;  %v6353_v44 = vadd.f32 %v5997_v35, %v6278_v20  ;;  %v6367_v20 = vadd.f32 %v5997_v35, %v6274_v37  ;;  %v6381_v37 = vadd.f32 %v5997_v35, %v6270_v9 }
 0x439   :  { %v3020_v32 = vadd.f32 %v2992_v43, %v2855_v21 }
 0x43a   :  { %v3088_v9 = vmul.f32 %v6381_v37, %v6381_v37 }
 0x43b   :  { %v6305_v21 = vadd.f32 %v5997_v35, %v3020_v32 }
 0x43d   :  { %v3098_v53 = vmul.f32 %v6305_v21, %v6305_v21 }
 0x43e   :  { %v2830_v52 = vpop.f32.mrf.mxu1  ;;  %v2995_v51 = vpop.f32.mrf.mxu0 }
 0x43f   :  { %v2717_v28 = vpop.f32.mrf.mxu3  ;;  %v2856_v12 = vadd.f32 %v2830_v52, %v2713_v13  ;;  %v3093_v52 = vmul.f32 %v6346_v27, %v6346_v27 }
 0x440   :  { %v2718_v49 = vadd.f32 %v2717_v28, %v2616_v45  ;;  %v3091_v28 = vmul.f32 %v6360_v29, %v6360_v29 }
 0x441   :  { %v3021_v5 = vadd.f32 %v2995_v51, %v2856_v12  ;;  %v3092_v51 = vmul.f32 %v6353_v44, %v6353_v44 }
 0x443   :  { %v6299_v2 = vadd.f32 %v5997_v35, %v3021_v5 }
 0x445   :  { %v3099_v15 = vmul.f32 %v6299_v2, %v6299_v2 }
 0x446   :  { %v2832_v54 = vpop.f32.mrf.mxu1  ;;  %v2997_v47 = vpop.f32.mrf.mxu0 }
 0x447   :  { %v2719_v31 = vpop.f32.mrf.mxu3  ;;  %v2857_v33 = vadd.f32 %v2832_v54, %v2715_v56  ;;  %v3090_v54 = vmul.f32 %v6367_v20, %v6367_v20 }
 0x448   :  { %v2720_v46 = vadd.f32 %v2719_v31, %v2618_v40  ;;  %v3087_v31 = vmul.f32 %v6388_v22, %v6388_v22 }
 0x449   :  { %v3022_v24 = vadd.f32 %v2997_v47, %v2857_v33  ;;  %v3089_v47 = vmul.f32 %v6374_v60, %v6374_v60 }
 0x44b   :  { %v6293_v42 = vadd.f32 %v5997_v35, %v3022_v24 }
 0x44e   :  { %v2835_v26 = vpop.f32.mrf.mxu1  ;;  %v3000_v10 = vpop.f32.mrf.mxu0 }
 0x44f   :  { %v2722_v63 = vpop.f32.mrf.mxu3  ;;  %v2858_v34 = vadd.f32 %v2835_v26, %v2718_v49 }
 0x450   :  { %v2723_v25 = vadd.f32 %v2722_v63, %v2621_v1  ;;  %v3094_v1 = vmul.f32 %v6337_v58, %v6337_v58 }
 0x451   :  { %v3023_v61 = vadd.f32 %v3000_v10, %v2858_v34 }
 0x453   :  { %v6287_v45 = vadd.f32 %v5997_v35, %v3023_v61 }
 0x455   :  { %v3101_v61 = vmul.f32 %v6287_v45, %v6287_v45 }
 0x456   :  { %v2837_v55 = vpop.f32.mrf.mxu1  ;;  %v3002_v8 = vpop.f32.mrf.mxu0 }
 0x457   :  { %v2859_v3 = vadd.f32 %v2837_v55, %v2720_v46  ;;  %v2724_v50 = vpop.f32.mrf.mxu3  ;;  %v3019_v55 = vadd.f32 %v2990_v38, %v2854_v6 }
 0x459   :  { %v3024_v0 = vadd.f32 %v3002_v8, %v2859_v3  ;;  %v3018_v3 = vadd.f32 %v2987_v23, %v2853_v57  ;;  %v6311_v6 = vadd.f32 %v5997_v35, %v3019_v55 }
 0x45b   :  { %v6290_v4 = vadd.f32 %v5997_v35, %v3024_v0  ;;  %v3100_v0 = vmul.f32 %v6293_v42, %v6293_v42  ;;  %v6320_v19 = vadd.f32 %v5997_v35, %v3018_v3  ;;  %v3097_v40 = vmul.f32 %v6311_v6, %v6311_v6 }
 0x45d   :  { %v3102_v46 = vmul.f32 %v6290_v4, %v6290_v4  ;;  %3046 = vmatpush.msra.mxu2 %v6290_v4  ;;  %v3096_v43 = vmul.f32 %v6320_v19, %v6320_v19 }
 0x45e   :  { %v2840_v41 = vpop.f32.mrf.mxu1  ;;  %v3005_v8 = vpop.f32.mrf.mxu0 }
 0x45f   :  { %v2860_v12 = vadd.f32 %v2840_v41, %v2723_v25  ;;  %3047 = vmatpush.msra.mxu2 %v6287_v45  ;;  %3107 = vmatpush.msrb.mxu3 %v3102_v46 }
 0x461   :  { %v3025_v24 = vadd.f32 %v3005_v8, %v2860_v12  ;;  %3048 = vmatpush.msra.mxu2 %v6293_v42  ;;  %3108 = vmatpush.msrb.mxu3 %v3101_v61 }
 0x463   :  { %v6314_v5 = vadd.f32 %v5997_v35, %v3025_v24  ;;  %3049 = vmatpush.msra.mxu2 %v6299_v2  ;;  %3109 = vmatpush.msrb.mxu3 %v3100_v0  ;;  %v4817_v35 = vmov 256.0  }
 0x464   :  { %4700 = vrcp.f32 %v4817_v35 }
 0x465   :  { %v3103_v23 = vmul.f32 %v6314_v5, %v6314_v5  ;;  %3050 = vmatpush.msra.mxu2 %v6305_v21  ;;  %3110 = vmatpush.msrb.mxu3 %v3099_v15 }
 0x466   :  { %v2842_v30 = vpop.f32.mrf.mxu1  ;;  %v3007_v38 = vpop.f32.mrf.mxu0 }
 0x467   :  { %3051 = vmatpush.msra.mxu2 %v6311_v6  ;;  %3111 = vmatpush.msrb.mxu3 %v3098_v53  ;;  %v3171_v53 = vld [vmem:[#allocation4] sm:$0x1]  ;;  %v3173_v30 = vld [vmem:[#allocation6] sm:$0x1] }
 0x468   :  { %4390 = vmatpush.msk.msra.mxu1 %vm1543_vm4, %v3103_v23 }
 0x469   :  { %3052 = vmatpush.msra.mxu2 %v6320_v19  ;;  %3112 = vmatpush.msrb.mxu3 %v3097_v40 }
 0x46a   :  { %4391 = vmatmul.msk.f32.vlgmr.msra.gmra.mxu1 %vm1540_vm5, %v5646_v48  ;;  %v4701_v62 = vpop.eup %4700 }
 0x46b   :  { %3053 = vmatpush.msra.mxu2 %v6329_v36  ;;  %3113 = vmatpush.msrb.mxu3 %v3096_v43  ;;  %v3149_v26 = vmul.f32 256.0, %v4701_v62  ;;  %vm3153_vm8 = vweird.f32 %v4701_v62 }
 0x46d   :  { %3054 = vmatpush.msra.mxu2 %v6337_v58  ;;  %3114 = vmatpush.msrb.mxu3 %v3095_v18  ;;  %v3150_v49 = vsub.f32 1.0, %v3149_v26  ;;  %v7162_v18 = vld [vmem:[#allocation58_spill] sm:$0xff] }
 0x46f   :  { %3055 = vmatpush.msra.mxu2 %v6346_v27  ;;  %3115 = vmatpush.msrb.mxu3 %v3094_v1  ;;  %v3151_v56 = vmul.f32 %v4701_v62, %v3150_v49  ;;  %v7168_v49 = vld [vmem:[#allocation50_spill] sm:$0xff] }
 0x471   :  { %3056 = vmatpush.msra.mxu2 %v6353_v44  ;;  %3116 = vmatpush.msrb.mxu3 %v3093_v52  ;;  %v3152_v33 = vadd.f32 %v4701_v62, %v3151_v56  ;;  %v7163_v52 = vld [vmem:[#allocation57_spill] sm:$0xff] }
 0x473   :  { %3057 = vmatpush.msra.mxu2 %v6360_v29  ;;  %3117 = vmatpush.msrb.mxu3 %v3092_v51  ;;  %v3154_v32 = vsel %vm3153_vm8, %v4701_v62, %v3152_v33  ;;  %v7167_v62 = vld [vmem:[#allocation51_spill] sm:$0xff] }
 0x475   :  { %3058 = vmatpush.msra.mxu2 %v6367_v20  ;;  %3118 = vmatpush.msrb.mxu3 %v3091_v28  ;;  %v7164_v28 = vld [vmem:[#allocation55_spill] sm:$0xff] }
 0x477   :  { %3059 = vmatpush.msra.mxu2 %v6374_v60  ;;  %3119 = vmatpush.msrb.mxu3 %v3090_v54 }
 0x479   :  { %3060 = vmatpush.msra.mxu2 %v6381_v37  ;;  %3120 = vmatpush.msrb.mxu3 %v3089_v47  ;;  %v7165_v47 = vld [vmem:[#allocation54_spill] sm:$0xff] }
 0x47b   :  { %3061 = vmatpush.msra.mxu2 %v6388_v22  ;;  %3121 = vmatpush.msrb.mxu3 %v3088_v9 }
 0x47c   :  { %3062 = vmatmul.f32.vlgmr.msra.gmra.mxu2 %v5668_v11 }
 0x47d   :  { %4388 = vmatpush.msk.msrb.mxu2 %vm1543_vm4, %v6314_v5  ;;  %3122 = vmatpush.msrb.mxu3 %v3087_v31  ;;  %v7166_v31 = vld [vmem:[#allocation52_spill] sm:$0xff] }
 0x47e   :  { %3123 = vmatmul.f32.vlgmr.msrb.gmra.mxu3 %v5668_v11 }
 0x484   :  { %4389 = vmatmul.msk.f32.vlgmr.msrb.gmra.mxu2 %vm1540_vm5, %v5646_v48 }
 0x4e7   :  { %v3144_v13 = vpop.f32.mrf.mxu1 }
 0x4ff   :  { %v3063_v10 = vpop.f32.mrf.mxu2 }
 0x501   :  { %v3124_v63 = vpop.f32.mrf.mxu3 }
 0x502   :  { %v3145_v34 = vadd.f32 %v3144_v13, %v3124_v63  ;;  %v7169_v13 = vld [vmem:[#allocation49_spill] sm:$0xff] }
 0x504   :  { %v3147_v57 = vadd.f32 %v3145_v34, %v6261_v59  ;;  %v7170_v34 = vld [vmem:[#allocation48_spill] sm:$0xff] }
 0x506   :  { %v3156_v46 = vmul.f32 %v3154_v32, %v3147_v57  ;;  %v7172_v57 = vld [vmem:[#allocation45_spill] sm:$0xff] }
 0x507   :  { %v3083_v50 = vpop.f32.mrf.mxu2 }
 0x508   :  { %v3084_v25 = vadd.f32 %v3083_v50, %v3063_v10  ;;  %v7171_v50 = vld [vmem:[#allocation46_spill] sm:$0xff] }
 0x50a   :  { %v3086_v11 = vadd.f32 %v3084_v25, %v6257_v7 }
 0x50c   :  { %v3155_v48 = vmul.f32 %v3154_v32, %v3086_v11  ;;  %v7173_v32 = vld [vmem:[#allocation43_spill] sm:$0xff] }
 0x50e   :  { %v3157_v55 = vmul.f32 %v3155_v48, %v3155_v48 }
 0x510   :  { %v3158_v41 = vsub.f32 %v3156_v46, %v3157_v55  ;;  %v7174_v46 = vld [vmem:[#allocation42_spill] sm:$0xff] }
 0x512   :  { %v3159_v8 = vmax.f32 %v3158_v41, 0.0  ;;  %v7175_v41 = vld [vmem:[#allocation41_spill] sm:$0xff] }
 0x514   :  { %v3160_v12 = vadd.f32 1e-05, %v3159_v8 }
 0x516   :  { %4702 = vrsqrt.f32 %v3160_v12  ;;  %vm3167_vm10 = vweird.f32 %v3160_v12 }
 0x51c   :  { %v4703_v61 = vpop.eup %4702 }
 0x51d   :  { %v3162_v3 = vmul.f32 %v4703_v61, %v3160_v12  ;;  %vm3168_vm9 = vweird.f32 %v4703_v61  ;;  %v7176_v12 = vld [vmem:[#allocation40_spill] sm:$0xff] }
 0x51e   :  { %vm3169_vm11 = vmor %vm3167_vm10, %vm3168_vm9 }
 0x51f   :  { %v3163_v24 = vmul.f32 %v4703_v61, %v3162_v3  ;;  %v7177_v3 = vld [vmem:[#allocation39_spill] sm:$0xff] }
 0x521   :  { %v3164_v0 = vmul.f32 0.5, %v3163_v24 }
 0x523   :  { %v3165_v15 = vsub.f32 1.5, %v3164_v0  ;;  %v7178_v0 = vld [vmem:[#allocation44_spill] sm:$0xff] }
 0x525   :  { %v3166_v23 = vmul.f32 %v4703_v61, %v3165_v15 }
 0x527   :  { %v3170_v59 = vsel %vm3169_vm11, %v4703_v61, %v3166_v23  ;;  %v7179_v23 = vld [vmem:[#allocation59_spill] sm:$0xff] }
 0x528   :  { %v3172_v7 = vmul.f32 %v3171_v53, %v3170_v59  ;;  %v7180_v59 = vld [vmem:[#allocation56_spill] sm:$0xff] }
 0x52a   :  { %v3174_v38 = vmul.f32 %v3172_v7, %v3155_v48  ;;  %v6407_v40 = vperm.slane %v3172_v7, 0 }
 0x52c   :  { %v3175_v43 = vsub.f32 %v3173_v30, %v3174_v38  ;;  %v3177_v1 = vmul.f32 %v6407_v40, %v7162_v18  ;;  %v3178_v51 = vmul.f32 %v6407_v40, %v7163_v52  ;;  %v3179_v54 = vmul.f32 %v6407_v40, %v7164_v28  ;;  %v7181_v30 = vld [vmem:[#allocation70_spill] sm:$0xff] }
 0x52d   :  { %v3180_v9 = vmul.f32 %v6407_v40, %v7165_v47  ;;  %v3181_v35 = vmul.f32 %v6407_v40, %v7166_v31  ;;  %v3182_v26 = vmul.f32 %v6407_v40, %v7167_v62  ;;  %v3183_v63 = vmul.f32 %v6407_v40, %v7168_v49  ;;  %v7183_v52 = vld [vmem:[#allocation66_spill] sm:$0xff]  ;;  %v7184_v47 = vld [vmem:[#allocation64_spill] sm:$0xff]  ;;  %v7185_v62 = vld [vmem:[#allocation63_spill] sm:$0xff] }
 0x52e   :  { %v6421_v10 = vperm.slane %v3175_v43, 0  ;;  %v3184_v56 = vmul.f32 %v6407_v40, %v7169_v13  ;;  %v3185_v33 = vmul.f32 %v6407_v40, %v7170_v34  ;;  %v3186_v25 = vmul.f32 %v6407_v40, %v7171_v50  ;;  %v7182_v43 = vld [vmem:[#allocation69_spill] sm:$0xff]  ;;  %v7187_v13 = vld [vmem:[#allocation62_spill] sm:$0xff] }
 0x52f   :  { %v3187_v11 = vmul.f32 %v6407_v40, %v7172_v57  ;;  %v3188_v48 = vmul.f32 %v6407_v40, %v7173_v32  ;;  %v3189_v55 = vmul.f32 %v6407_v40, %v7174_v46  ;;  %v3190_v8 = vmul.f32 %v6407_v40, %v7175_v41  ;;  %v7189_v50 = vld [vmem:[#allocation61_spill] sm:$0xff]  ;;  %v7190_v32 = vld [vmem:[#allocation60_spill] sm:$0xff] }
 0x530   :  { %v3191_v61 = vmul.f32 %v6407_v40, %v7176_v12  ;;  %v3192_v24 = vmul.f32 %v6407_v40, %v7177_v3  ;;  %v3193_v15 = vmul.f32 %v6407_v40, %v7178_v0  ;;  %v6447_v53 = vmul.f32 %v6407_v40, %v7179_v23  ;;  %v7191_v41 = vld [vmem:[#allocation65_spill] sm:$0xff] }
 0x531   :  { %v6451_v7 = vmul.f32 %v6407_v40, %v7180_v59  ;;  %v6455_v38 = vmul.f32 %v6407_v40, %v7181_v30  ;;  %v6459_v18 = vmul.f32 %v6407_v40, %v7182_v43  ;;  %v6463_v28 = vmul.f32 %v6407_v40, %v7183_v52  ;;  %v7192_v30 = vld [vmem:[#allocation32_spill] sm:$0xff]  ;;  %v7193_v52 = vld [vmem:[#allocation74_spill] sm:$0xff] }
 0x532   :  { %v6467_v31 = vmul.f32 %v6407_v40, %v7184_v47  ;;  %v6471_v49 = vmul.f32 %v6407_v40, %v7185_v62  ;;  %v6475_v34 = vmul.f32 %v6407_v40, %v7187_v13  ;;  %v6479_v57 = vmul.f32 %v6407_v40, %v7189_v50  ;;  %v7194_v62 = vld [vmem:[#allocation27_spill] sm:$0xff]  ;;  %v7195_v50 = vld [vmem:[#allocation29_spill] sm:$0xff] }
 0x533   :  { %v6483_v46 = vmul.f32 %v6407_v40, %v7190_v32  ;;  %v6487_v12 = vmul.f32 %v6407_v40, %v7191_v41  ;;  %v3282_v3 = vmul.f32 %v6407_v40, %v6138_v14  ;;  %v3283_v0 = vmul.f32 %v6407_v40, %v6131_v17  ;;  %v7196_v32 = vld [vmem:[#allocation25_spill] sm:$0xff]  ;;  %v7197_v41 = vld [vmem:[#allocation23_spill] sm:$0xff] }
 0x534   :  { %7186 = vst [vmem:[#allocation31_spill] sm:$0xff] %v6471_v49  ;;  %v3284_v23 = vmul.f32 %v6407_v40, %v6122_v39  ;;  %v3285_v59 = vmul.f32 %v6407_v40, %v6115_v16  ;;  %v3286_v43 = vmul.f32 %v6407_v40, %v7192_v30  ;;  %v3287_v47 = vmul.f32 %v6407_v40, %v7193_v52  ;;  %v7199_v49 = vld [vmem:[#allocation21_spill] sm:$0xff] }
 0x535   :  { %7188 = vst [vmem:[#allocation24_spill] sm:$0xff] %v6475_v34  ;;  %v3288_v13 = vmul.f32 %v6407_v40, %v7194_v62  ;;  %v3289_v14 = vmul.f32 %v6407_v40, %v7195_v50  ;;  %v3290_v17 = vmul.f32 %v6407_v40, %v7196_v32  ;;  %v3291_v39 = vmul.f32 %v6407_v40, %v7197_v41  ;;  %v7198_v34 = vld [vmem:[#allocation38_spill] sm:$0xff]  ;;  %v7203_v41 = vld [vmem:[#allocation67_spill] sm:$0xff] }
 0x536   :  { %v3292_v16 = vmul.f32 %v6407_v40, %v7198_v34  ;;  %v3298_v30 = vmul.f32 %v6407_v40, %v7199_v49  ;;  %v6515_v52 = vmul.f32 %v6407_v40, %v6388_v22  ;;  %v6519_v62 = vmul.f32 %v6407_v40, %v6381_v37  ;;  %v7202_v49 = vld [vmem:[#allocation68_spill] sm:$0xff] }
 0x537   :  { %v6523_v50 = vmul.f32 %v6407_v40, %v6374_v60  ;;  %v6527_v32 = vmul.f32 %v6407_v40, %v6367_v20  ;;  %v6531_v34 = vmul.f32 %v6407_v40, %v6360_v29  ;;  %v6535_v22 = vmul.f32 %v6407_v40, %v6353_v44 }
 0x538   :  { %7200 = vst [vmem:[#allocation33_spill] sm:$0xff] %v6519_v62  ;;  %v6539_v37 = vmul.f32 %v6407_v40, %v6346_v27  ;;  %v6543_v60 = vmul.f32 %v6407_v40, %v6337_v58  ;;  %v6547_v20 = vmul.f32 %v6407_v40, %v6329_v36  ;;  %v3239_v29 = vmul.f32 %v6407_v40, %v7202_v49 }
 0x539   :  { %7201 = vst [vmem:[#allocation22_spill] sm:$0xff] %v6523_v50  ;;  %v3240_v50 = vmul.f32 %v6407_v40, %v7203_v41  ;;  %v6554_v44 = vadd.f32 %v6421_v10, %v3177_v1  ;;  %v6557_v27 = vadd.f32 %v6421_v10, %v3178_v51  ;;  %v6560_v62 = vadd.f32 %v6421_v10, %v3179_v54 }
 0x53a   :  { %v6563_v58 = vadd.f32 %v6421_v10, %v3180_v9  ;;  %v6566_v36 = vadd.f32 %v6421_v10, %v3181_v35  ;;  %v6569_v49 = vadd.f32 %v6421_v10, %v3182_v26  ;;  %v3256_v41 = vadd.f32 %v3239_v29, %v6421_v10 }
 0x53b   :  { %7204 = vst [vmem:[#allocation26_spill] sm:$0xff] %v6554_v44  ;;  %v3257_v1 = vadd.f32 %v3240_v50, %v6421_v10  ;;  %v6574_v44 = vadd.f32 %v6421_v10, %v3183_v63  ;;  %v6577_v51 = vadd.f32 %v6421_v10, %v3184_v56  ;;  %v6580_v54 = vadd.f32 %v6421_v10, %v3185_v33 }
 0x53c   :  { %v6583_v9 = vadd.f32 %v6421_v10, %v3186_v25  ;;  %v6586_v35 = vadd.f32 %v6421_v10, %v3187_v11  ;;  %v6589_v26 = vadd.f32 %v6421_v10, %v3188_v48  ;;  %v3273_v29 = vmax.f32 %v3256_v41, 0.0 }
 0x53d   :  { %v3274_v50 = vmax.f32 %v3257_v1, 0.0  ;;  %v6592_v63 = vadd.f32 %v6421_v10, %v3189_v55  ;;  %v6595_v56 = vadd.f32 %v6421_v10, %v3190_v8  ;;  %v6598_v33 = vadd.f32 %v6421_v10, %v3191_v61 }
 0x53e   :  { %v6601_v25 = vadd.f32 %v6421_v10, %v3192_v24  ;;  %v6604_v11 = vadd.f32 %v6421_v10, %v3193_v15  ;;  %v6607_v48 = vadd.f32 %v3282_v3, %v6421_v10  ;;  %v6610_v1 = vadd.f32 %v3283_v0, %v6421_v10 }
 0x53f   :  { %7205 = vst [vmem:[#allocation12_spill] sm:$0xff] %v6595_v56  ;;  %v4634_v41 = vpack.i.bf16 %v3274_v50, %v3273_v29  ;;  %v6613_v55 = vadd.f32 %v3284_v23, %v6421_v10  ;;  %v6616_v8 = vadd.f32 %v3285_v59, %v6421_v10  ;;  %v6619_v61 = vadd.f32 %v3286_v43, %v6421_v10  ;;  %v7213_v29 = vld [vmem:[#allocation71_spill] sm:$0xff] }
 0x540   :  { %7206 = vst [vmem:[#allocation47_spill] sm:$0xff] %v6598_v33  ;;  %v6622_v24 = vadd.f32 %v3287_v47, %v6421_v10  ;;  %v6625_v15 = vadd.f32 %v3288_v13, %v6421_v10  ;;  %v6628_v3 = vadd.f32 %v3289_v14, %v6421_v10  ;;  %v6632_v0 = vadd.f32 %v3290_v17, %v6421_v10  ;;  %v7212_v14 = vld [vmem:[#allocation72_spill] sm:$0xff] }
 0x541   :  { %7207 = vst [vmem:[#allocation30_spill] sm:$0xff] %v6601_v25  ;;  %4635 = vrot.lane.b32.xlu2 %v4634_v41, %s4818_s0  ;;  %v6635_v23 = vadd.f32 %v3291_v39, %v6421_v10  ;;  %v6638_v59 = vadd.f32 %v3292_v16, %v6421_v10  ;;  %v6641_v43 = vadd.f32 %v3298_v30, %v6421_v10 }
 0x542   :  { %7208 = vst [vmem:[#allocation35_spill] sm:$0xff] %v6604_v11  ;;  %v6645_v47 = vmul.f32 %v6407_v40, %v6320_v19  ;;  %v6649_v13 = vmul.f32 %v6407_v40, %v6311_v6  ;;  %v3235_v17 = vmul.f32 %v6407_v40, %v7212_v14  ;;  %v3236_v39 = vmul.f32 %v6407_v40, %v7213_v29  ;;  %v7214_v14 = vld [vmem:[#allocation53_spill] sm:$0xff] }
 0x543   :  { %7209 = vst [vmem:[#allocation15_spill] sm:$0xff] %v6628_v3  ;;  %v3344_v16 = vmul.f32 %v6407_v40, %v6305_v21  ;;  %v3345_v30 = vmul.f32 %v6407_v40, %v6299_v2  ;;  %v6661_v19 = vmul.f32 %v6407_v40, %v6293_v42  ;;  %v6665_v6 = vmul.f32 %v6407_v40, %v6287_v45  ;;  %v7215_v29 = vld [vmem:[#allocation73_spill] sm:$0xff] }
 0x544   :  { %7210 = vst [vmem:[#allocation13_spill] sm:$0xff] %v6632_v0  ;;  %v6669_v50 = vmul.f32 %v6407_v40, %v6290_v4  ;;  %v6673_v41 = vmul.f32 %v6407_v40, %v6314_v5  ;;  %v3252_v21 = vadd.f32 %v3235_v17, %v6421_v10  ;;  %v3253_v2 = vadd.f32 %v3236_v39, %v6421_v10 }
 0x545   :  { %7211 = vst [vmem:[#allocation17_spill] sm:$0xff] %v6641_v43  ;;  %v3231_v42 = vmul.f32 %v6407_v40, %v7214_v14  ;;  %v3232_v43 = vmul.f32 %v6407_v40, %v7215_v29  ;;  %v3258_v45 = vadd.f32 %v6463_v28, %v6421_v10  ;;  %v3259_v4 = vadd.f32 %v6467_v31, %v6421_v10 }
 0x546   :  { %v3269_v56 = vmax.f32 %v3252_v21, 0.0  ;;  %v3270_v25 = vmax.f32 %v3253_v2, 0.0  ;;  %v3254_v5 = vadd.f32 %v6455_v38, %v6421_v10  ;;  %v3255_v17 = vadd.f32 %v6459_v18, %v6421_v10 }
 0x547   :  { %v3248_v39 = vadd.f32 %v3231_v42, %v6421_v10  ;;  %v3249_v14 = vadd.f32 %v3232_v43, %v6421_v10  ;;  %v3275_v11 = vmax.f32 %v3258_v45, 0.0  ;;  %v3276_v29 = vmax.f32 %v3259_v4, 0.0 }
 0x548   :  { %v4624_v33 = vpack.i.bf16 %v3270_v25, %v3269_v56  ;;  %v3271_v0 = vmax.f32 %v3254_v5, 0.0  ;;  %v3272_v28 = vmax.f32 %v3255_v17, 0.0  ;;  %v3250_v31 = vadd.f32 %v6447_v53, %v6421_v10 }
 0x549   :  { %v3265_v21 = vmax.f32 %v3248_v39, 0.0  ;;  %v3266_v2 = vmax.f32 %v3249_v14, 0.0  ;;  %v4639_v3 = vpack.i.bf16 %v3276_v29, %v3275_v11  ;;  %v3251_v38 = vadd.f32 %v6451_v7, %v6421_v10 }
 0x54a   :  { %4625 = vrot.lane.b32.xlu1 %v4624_v33, %s4818_s0  ;;  %v4629_v18 = vpack.i.bf16 %v3272_v28, %v3271_v0  ;;  %v3267_v42 = vmax.f32 %v3250_v31, 0.0  ;;  %v3264_v43 = vadd.f32 %v6487_v12, %v6421_v10  ;;  %v3350_v56 = vadd.f32 %v6515_v52, %v6421_v10  ;;  %v7216_v0 = vld [vmem:[#allocation31_spill] sm:$0xff]  ;;  %v7217_v12 = vld [vmem:[#allocation24_spill] sm:$0xff] }
 0x54b   :  { %v4614_v25 = vpack.i.bf16 %v3266_v2, %v3265_v21  ;;  %4640 = vrot.lane.b32.xlu2 %v4639_v3, %s4818_s0  ;;  %v3268_v53 = vmax.f32 %v3251_v38, 0.0  ;;  %v3262_v11 = vadd.f32 %v6479_v57, %v6421_v10  ;;  %v3263_v7 = vadd.f32 %v6483_v46, %v6421_v10 }
 0x54c   :  { %v3281_v45 = vmax.f32 %v3264_v43, 0.0  ;;  %v3367_v33 = vmax.f32 %v3350_v56, 0.0  ;;  %v3260_v4 = vadd.f32 %v7216_v0, %v6421_v10  ;;  %v3261_v5 = vadd.f32 %v7217_v12, %v6421_v10  ;;  %v7218_v43 = vld [vmem:[#allocation33_spill] sm:$0xff] }
 0x54d   :  { %4615 = vrot.lane.b32.xlu0 %v4614_v25, %s4818_s0  ;;  %v4619_v52 = vpack.i.bf16 %v3268_v53, %v3267_v42  ;;  %v3279_v17 = vmax.f32 %v3262_v11, 0.0  ;;  %v3280_v3 = vmax.f32 %v3263_v7, 0.0  ;;  %v3355_v39 = vadd.f32 %v6535_v22, %v6421_v10  ;;  %v7219_v22 = vld [vmem:[#allocation22_spill] sm:$0xff] }
 0x54e   :  { %v4654_v57 = vpack.i.bf16 %v3367_v33, %v3281_v45  ;;  %v3277_v14 = vmax.f32 %v3260_v4, 0.0  ;;  %v3278_v29 = vmax.f32 %v3261_v5, 0.0  ;;  %v3356_v46 = vadd.f32 %v6539_v37, %v6421_v10 }
 0x54f   :  { %v4649_v28 = vpack.i.bf16 %v3280_v3, %v3279_v17  ;;  %v3372_v31 = vmax.f32 %v3355_v39, 0.0  ;;  %v3353_v21 = vadd.f32 %v6527_v32, %v6421_v10  ;;  %v3354_v2 = vadd.f32 %v6531_v34, %v6421_v10 }
 0x550   :  { %v4644_v38 = vpack.i.bf16 %v3278_v29, %v3277_v14  ;;  %v3373_v42 = vmax.f32 %v3356_v46, 0.0  ;;  %v3351_v56 = vadd.f32 %v7218_v43, %v6421_v10  ;;  %v3352_v25 = vadd.f32 %v7219_v22, %v6421_v10  ;;  %v7221_v43 = vld [vmem:[#allocation37_spill] sm:$0xff] }
 0x551   :  { %v3370_v53 = vmax.f32 %v3353_v21, 0.0  ;;  %v3371_v11 = vmax.f32 %v3354_v2, 0.0  ;;  %v3361_v37 = vadd.f32 %v3344_v16, %v6421_v10  ;;  %v3362_v7 = vadd.f32 %v3345_v30, %v6421_v10 }
 0x552   :  { %4630 = vrot.lane.b32.xlu1 %v4629_v18, %s4818_s0  ;;  %v4669_v32 = vpack.i.bf16 %v3373_v42, %v3372_v31  ;;  %v3368_v45 = vmax.f32 %v3351_v56, 0.0  ;;  %v3369_v33 = vmax.f32 %v3352_v25, 0.0  ;;  %v3359_v34 = vadd.f32 %v6645_v47, %v6421_v10  ;;  %v7220_v42 = vld [vmem:[#allocation20_spill] sm:$0xff]  ;;  %v7222_v25 = vld [vmem:[#allocation19_spill] sm:$0xff] }
 0x553   :  { %4655 = vrot.lane.b32.xlu2 %v4654_v57, %s4818_s0  ;;  %v4664_v0 = vpack.i.bf16 %v3371_v11, %v3370_v53  ;;  %v3378_v4 = vmax.f32 %v3361_v37, 0.0  ;;  %v3379_v12 = vmax.f32 %v3362_v7, 0.0  ;;  %v3360_v5 = vadd.f32 %v6649_v13, %v6421_v10  ;;  %v7223_v11 = vld [vmem:[#allocation36_spill] sm:$0xff]  ;;  %v7224_v7 = vld [vmem:[#allocation18_spill] sm:$0xff] }
 0x554   :  { %v4659_v17 = vpack.i.bf16 %v3369_v33, %v3368_v45  ;;  %v3376_v16 = vmax.f32 %v3359_v34, 0.0  ;;  %v3357_v30 = vadd.f32 %v6543_v60, %v6421_v10  ;;  %v3358_v18 = vadd.f32 %v6547_v20, %v6421_v10 }
 0x555   :  { %4620 = vrot.lane.b32.xlu0 %v4619_v52, %s4818_s0  ;;  %v4684_v3 = vpack.i.bf16 %v3379_v12, %v3378_v4  ;;  %v3377_v47 = vmax.f32 %v3360_v5, 0.0  ;;  %v3365_v39 = vadd.f32 %v6669_v50, %v6421_v10  ;;  %v3366_v57 = vadd.f32 %v6673_v41, %v6421_v10 }
 0x556   :  { %v3374_v14 = vmax.f32 %v3357_v30, 0.0  ;;  %v3375_v13 = vmax.f32 %v3358_v18, 0.0  ;;  %v3363_v29 = vadd.f32 %v6661_v19, %v6421_v10  ;;  %v3364_v60 = vadd.f32 %v6665_v6, %v6421_v10 }
 0x557   :  { %v4679_v46 = vpack.i.bf16 %v3377_v47, %v3376_v16  ;;  %v3382_v20 = vmax.f32 %v3365_v39, 0.0  ;;  %v3383_v31 = vmax.f32 %v3366_v57, 0.0  ;;  %v3293_v50 = vmul.f32 %v6407_v40, %v7220_v42 }
 0x558   :  { %v4674_v52 = vpack.i.bf16 %v3375_v13, %v3374_v14  ;;  %v3380_v21 = vmax.f32 %v3363_v29, 0.0  ;;  %v3381_v2 = vmax.f32 %v3364_v60, 0.0  ;;  %v3294_v41 = vmul.f32 %v6407_v40, %v7221_v43 }
 0x559   :  { %v4694_v56 = vpack.i.bf16 %v3383_v31, %v3382_v20  ;;  %v3310_v19 = vadd.f32 %v3293_v50, %v6421_v10  ;;  %v3295_v53 = vmul.f32 %v6407_v40, %v7222_v25  ;;  %v3297_v37 = vmul.f32 %v6407_v40, %v7223_v11 }
 0x55a   :  { %4650 = vrot.lane.b32.xlu1 %v4649_v28, %s4818_s0  ;;  %v4689_v22 = vpack.i.bf16 %v3381_v2, %v3380_v21  ;;  %v6751_v6 = vadd.f32 %v3294_v41, %v6421_v10  ;;  %v3296_v45 = vmul.f32 %v6407_v40, %v7224_v7  ;;  %v3225_v14 = vmax.f32 %v6589_v26, 0.0 }
 0x55b   :  { %4670 = vrot.lane.b32.xlu2 %v4669_v32, %s4818_s0  ;;  %v6761_v28 = vadd.f32 %v3297_v37, %v6421_v10  ;;  %v6764_v32 = vadd.f32 %v3295_v53, %v6421_v10  ;;  %v3327_v60 = vmax.f32 %v3310_v19, 0.0  ;;  %v3316_v20 = vmax.f32 %v6607_v48, 0.0 }
 0x55c   :  { %v6767_v33 = vadd.f32 %v3296_v45, %v6421_v10  ;;  %v3222_v10 = vmax.f32 %v6580_v54, 0.0  ;;  %v3219_v54 = vmax.f32 %v6569_v49, 0.0  ;;  %v3220_v41 = vmax.f32 %v6574_v44, 0.0 }
 0x55d   :  { %4645 = vrot.lane.b32.xlu0 %v4644_v38, %s4818_s0  ;;  %v3328_v7 = vmax.f32 %v6751_v6, 0.0 }
 0x562   :  { %4665 = vrot.lane.b32.xlu1 %v4664_v0, %s4818_s0 }
 0x563   :  { %4685 = vrot.lane.b32.xlu2 %v4684_v3, %s4818_s0 }
 0x565   :  { %4660 = vrot.lane.b32.xlu0 %v4659_v17, %s4818_s0  ;;  %v3321_v17 = vmax.f32 %v6622_v24, 0.0 }
 0x56a   :  { %4680 = vrot.lane.b32.xlu1 %v4679_v46, %s4818_s0  ;;  %v7225_v46 = vld [vmem:[#allocation26_spill] sm:$0xff] }
 0x56b   :  { %v3214_v24 = vmax.f32 %v7225_v46, 0.0 }
 0x56d   :  { %4675 = vrot.lane.b32.xlu0 %v4674_v52, %s4818_s0 }
 0x572   :  { %4695 = vrot.lane.b32.xlu1 %v4694_v56, %s4818_s0  ;;  %v3322_v56 = vmax.f32 %v6625_v15, 0.0 }
 0x575   :  { %4690 = vrot.lane.b32.xlu0 %v4689_v22, %s4818_s0 }
 0x59b   :  { %v6776_v40 = vpop.permute.xlu2 %4635 }
 0x59c   :  { %v4637_v38 = vunpack.i.l.bf16 %v6776_v40 }
 0x59e   :  { %v6781_v34 = vsel %vm3520_vm12, %v3222_v10, %v4637_v38  ;;  %v3226_v10 = vmax.f32 %v6592_v63, 0.0  ;;  %v3319_v63 = vmax.f32 %v6616_v8, 0.0 }
 0x5a5   :  { %v6783_v0 = vpop.permute.xlu2 %4640 }
 0x5a6   :  { %v4643_v30 = vunpack.i.h.bf16 %v6783_v0 }
 0x5a8   :  { %v3532_v21 = vsel %vm3520_vm12, %v3225_v14, %v4643_v30 }
 0x5ad   :  { %v6785_v4 = vpop.permute.xlu2 %4655 }
 0x5ae   :  { %v4658_v39 = vunpack.i.h.bf16 %v6785_v4 }
 0x5b0   :  { %v3538_v2 = vsel %vm3520_vm12, %v3316_v20, %v4658_v39  ;;  %v3320_v39 = vmax.f32 %v6619_v61, 0.0 }
 0x5b5   :  { %v4671_v12 = vpop.permute.xlu2 %4670 }
 0x5b6   :  { %v4672_v5 = vunpack.i.l.bf16 %v4671_v12  ;;  %v4673_v50 = vunpack.i.h.bf16 %v4671_v12 }
 0x5b8   :  { %v3543_v18 = vsel %vm3520_vm12, %v3321_v17, %v4672_v5  ;;  %v3544_v19 = vsel %vm3520_vm12, %v3322_v56, %v4673_v50  ;;  %v3223_v50 = vmax.f32 %v6583_v9, 0.0  ;;  %v7226_v9 = vld [vmem:[#allocation15_spill] sm:$0xff] }
 0x5bc   :  { %v4626_v16 = vpop.permute.xlu1 %4625 }
 0x5bd   :  { %v4628_v3 = vunpack.i.h.bf16 %v4626_v16  ;;  %v4686_v47 = vpop.permute.xlu2 %4685  ;;  %v4627_v5 = vunpack.i.l.bf16 %v4626_v16 }
 0x5be   :  { %v4687_v57 = vunpack.i.l.bf16 %v4686_v47  ;;  %v4688_v44 = vunpack.i.h.bf16 %v4686_v47  ;;  %v3217_v47 = vmax.f32 %v6563_v58, 0.0 }
 0x5bf   :  { %v3526_v13 = vsel %vm3520_vm12, %v3219_v54, %v4628_v3  ;;  %v4616_v29 = vpop.permute.xlu0 %4615  ;;  %v3218_v3 = vmax.f32 %v6566_v36, 0.0  ;;  %v3215_v54 = vmax.f32 %v6557_v27, 0.0  ;;  %v3318_v36 = vmax.f32 %v6613_v55, 0.0 }
 0x5c0   :  { %v3560_v31 = vpack.c.bf16 %v3543_v18, %v3526_v13  ;;  %v4617_v52 = vunpack.i.l.bf16 %v4616_v29  ;;  %v3549_v49 = vsel %vm3520_vm12, %v3327_v60, %v4687_v57  ;;  %v3550_v38 = vsel %vm3520_vm12, %v3328_v7, %v4688_v44 }
 0x5c1   :  { %v3566_v42 = vpack.c.bf16 %v3549_v49, %v3532_v21  ;;  %v3216_v18 = vmax.f32 %v6560_v62, 0.0  ;;  %v4618_v14 = vunpack.i.h.bf16 %v4616_v29  ;;  %v3317_v62 = vmax.f32 %v6610_v1, 0.0 }
 0x5c2   :  { %3577 = vst [vmem:[%s6927_s6 + $0x28] sm:$0xff] %v3560_v31  ;;  %v3521_v26 = vsel %vm3520_vm12, %v3214_v24, %v4617_v52  ;;  %v3525_v27 = vsel %vm3520_vm12, %v3218_v3, %v4627_v5  ;;  %v4638_v21 = vunpack.i.h.bf16 %v6776_v40  ;;  %v4642_v49 = vunpack.i.l.bf16 %v6783_v0 }
 0x5c3   :  { %v3555_v43 = vpack.c.bf16 %v3538_v2, %v3521_v26  ;;  %3583 = vst [vmem:[%s6927_s6 + $0x58] sm:$0xff] %v3566_v42  ;;  %v3522_v29 = vsel %vm3520_vm12, %v3215_v54, %v4618_v14  ;;  %v3224_v42 = vmax.f32 %v6586_v35, 0.0  ;;  %v3326_v40 = vmax.f32 %v6638_v59, 0.0  ;;  %v7228_v54 = vld [vmem:[#allocation47_spill] sm:$0xff] }
 0x5c4   :  { %v6806_v48 = vpop.permute.xlu1 %4630  ;;  %v3323_v35 = vmax.f32 %v7226_v9, 0.0 }
 0x5c5   :  { %3572 = vst [vmem:[%s6927_s6] sm:$0xff] %v3555_v43  ;;  %v4632_v22 = vunpack.i.l.bf16 %v6806_v48 }
 0x5c7   :  { %v3527_v25 = vsel %vm3520_vm12, %v3220_v41, %v4632_v22  ;;  %v4621_v53 = vpop.permute.xlu0 %4620  ;;  %v3325_v41 = vmax.f32 %v6635_v23, 0.0  ;;  %v4633_v22 = vunpack.i.h.bf16 %v6806_v48  ;;  %v3531_v23 = vsel %vm3520_vm12, %v3224_v42, %v4642_v49 }
 0x5c8   :  { %v3561_v11 = vpack.c.bf16 %v3544_v19, %v3527_v25  ;;  %v4623_v17 = vunpack.i.h.bf16 %v4621_v53  ;;  %v4622_v13 = vunpack.i.l.bf16 %v4621_v53  ;;  %v3221_v19 = vmax.f32 %v6577_v51, 0.0  ;;  %v7227_v25 = vld [vmem:[#allocation13_spill] sm:$0xff] }
 0x5c9   :  { %v3324_v53 = vmax.f32 %v7227_v25, 0.0 }
 0x5ca   :  { %3578 = vst [vmem:[%s6927_s6 + $0x30] sm:$0xff] %v3561_v11  ;;  %v3524_v58 = vsel %vm3520_vm12, %v3217_v47, %v4623_v17  ;;  %v3523_v52 = vsel %vm3520_vm12, %v3216_v18, %v4622_v13  ;;  %v3530_v11 = vsel %vm3520_vm12, %v3223_v50, %v4638_v21  ;;  %v4657_v17 = vunpack.i.l.bf16 %v6785_v4 }
 0x5cb   :  { %v3228_v47 = vmax.f32 %v7228_v54, 0.0  ;;  %v3331_v4 = vmax.f32 %v6761_v28, 0.0 }
 0x5cc   :  { %v6819_v37 = vpop.permute.xlu1 %4650 }
 0x5cf   :  { %v6821_v15 = vpop.permute.xlu0 %4645 }
 0x5d0   :  { %v4647_v45 = vunpack.i.l.bf16 %v6821_v15 }
 0x5d2   :  { %v3533_v12 = vsel %vm3520_vm12, %v3226_v10, %v4647_v45 }
 0x5d3   :  { %v3567_v30 = vpack.c.bf16 %v3550_v38, %v3533_v12  ;;  %v3528_v38 = vsel %vm3520_vm12, %v3221_v19, %v4633_v22 }
 0x5d4   :  { %v4666_v6 = vpop.permute.xlu1 %4665 }
 0x5d5   :  { %3584 = vst [vmem:[%s6927_s6 + $0x60] sm:$0xff] %v3567_v30  ;;  %v4668_v16 = vunpack.i.h.bf16 %v4666_v6  ;;  %v4667_v57 = vunpack.i.l.bf16 %v4666_v6  ;;  %v4653_v30 = vunpack.i.h.bf16 %v6819_v37  ;;  %v7229_v6 = vld [vmem:[#allocation35_spill] sm:$0xff] }
 0x5d7   :  { %v3542_v60 = vsel %vm3520_vm12, %v3320_v39, %v4668_v16  ;;  %v3541_v46 = vsel %vm3520_vm12, %v3319_v63, %v4667_v57  ;;  %v4661_v24 = vpop.permute.xlu0 %4660  ;;  %v3230_v63 = vmax.f32 %v7229_v6, 0.0  ;;  %v7230_v39 = vld [vmem:[#allocation30_spill] sm:$0xff]  ;;  %v7231_v57 = vld [vmem:[#allocation12_spill] sm:$0xff] }
 0x5d8   :  { %v3558_v8 = vpack.c.bf16 %v3541_v46, %v3524_v58  ;;  %v3559_v20 = vpack.c.bf16 %v3542_v60, %v3525_v27  ;;  %v4663_v61 = vunpack.i.h.bf16 %v4661_v24  ;;  %v4662_v31 = vunpack.i.l.bf16 %v4661_v24 }
 0x5d9   :  { %v3229_v16 = vmax.f32 %v7230_v39, 0.0  ;;  %v3227_v14 = vmax.f32 %v7231_v57, 0.0  ;;  %v4648_v60 = vunpack.i.h.bf16 %v6821_v15  ;;  %v3329_v46 = vmax.f32 %v6764_v32, 0.0 }
 0x5da   :  { %3575 = vst [vmem:[%s6927_s6 + $0x18] sm:$0xff] %v3558_v8  ;;  %v3540_v1 = vsel %vm3520_vm12, %v3318_v36, %v4663_v61  ;;  %v3539_v55 = vsel %vm3520_vm12, %v3317_v62, %v4662_v31  ;;  %v7232_v62 = vld [vmem:[#allocation17_spill] sm:$0xff]  ;;  %v3330_v24 = vmax.f32 %v6767_v33, 0.0  ;;  %v3537_v8 = vsel %vm3520_vm12, %v3230_v63, %v4657_v17 }
 0x5db   :  { %3576 = vst [vmem:[%s6927_s6 + $0x20] sm:$0xff] %v3559_v20  ;;  %v3556_v2 = vpack.c.bf16 %v3539_v55, %v3522_v29  ;;  %v3557_v26 = vpack.c.bf16 %v3540_v1, %v3523_v52  ;;  %v3332_v36 = vmax.f32 %v7232_v62, 0.0  ;;  %v3536_v28 = vsel %vm3520_vm12, %v3229_v16, %v4653_v30 }
 0x5dc   :  { %v4681_v43 = vpop.permute.xlu1 %4680  ;;  %v3534_v55 = vsel %vm3520_vm12, %v3227_v14, %v4648_v60 }
 0x5dd   :  { %3573 = vst [vmem:[%s6927_s6 + $0x8] sm:$0xff] %v3556_v2  ;;  %v4683_v0 = vunpack.i.h.bf16 %v4681_v43  ;;  %v4682_v56 = vunpack.i.l.bf16 %v4681_v43 }
 0x5de   :  { %3574 = vst [vmem:[%s6927_s6 + $0x10] sm:$0xff] %v3557_v26 }
 0x5df   :  { %v3548_v59 = vsel %vm3520_vm12, %v3326_v40, %v4683_v0  ;;  %v3547_v44 = vsel %vm3520_vm12, %v3325_v41, %v4682_v56  ;;  %v4676_v7 = vpop.permute.xlu0 %4675 }
 0x5e0   :  { %v3564_v48 = vpack.c.bf16 %v3547_v44, %v3530_v11  ;;  %v3565_v45 = vpack.c.bf16 %v3548_v59, %v3531_v23  ;;  %v4678_v51 = vunpack.i.h.bf16 %v4676_v7  ;;  %v4677_v10 = vunpack.i.l.bf16 %v4676_v7 }
 0x5e2   :  { %3581 = vst [vmem:[%s6927_s6 + $0x48] sm:$0xff] %v3564_v48  ;;  %v3546_v12 = vsel %vm3520_vm12, %v3324_v53, %v4678_v51  ;;  %v3545_v5 = vsel %vm3520_vm12, %v3323_v35, %v4677_v10 }
 0x5e3   :  { %3582 = vst [vmem:[%s6927_s6 + $0x50] sm:$0xff] %v3565_v45  ;;  %v3562_v18 = vpack.c.bf16 %v3545_v5, %v3528_v38  ;;  %v3563_v3 = vpack.c.bf16 %v3546_v12, %v6781_v34  ;;  %v4652_v34 = vunpack.i.l.bf16 %v6819_v37 }
 0x5e4   :  { %v4696_v13 = vpop.permute.xlu1 %4695 }
 0x5e5   :  { %3579 = vst [vmem:[%s6927_s6 + $0x38] sm:$0xff] %v3562_v18  ;;  %v4698_v27 = vunpack.i.h.bf16 %v4696_v13  ;;  %v4697_v58 = vunpack.i.l.bf16 %v4696_v13  ;;  %v3535_v1 = vsel %vm3520_vm12, %v3228_v47, %v4652_v34 }
 0x5e6   :  { %3580 = vst [vmem:[%s6927_s6 + $0x40] sm:$0xff] %v3563_v3 }
 0x5e7   :  { %v3554_v20 = vsel %vm3520_vm12, %v3332_v36, %v4698_v27  ;;  %v3553_v61 = vsel %vm3520_vm12, %v3331_v4, %v4697_v58  ;;  %v4691_v31 = vpop.permute.xlu0 %4690 }
 0x5e8   :  { %v3570_v37 = vpack.c.bf16 %v3553_v61, %v3536_v28  ;;  %v3571_v29 = vpack.c.bf16 %v3554_v20, %v3537_v8  ;;  %v4693_v15 = vunpack.i.h.bf16 %v4691_v31  ;;  %v4692_v52 = vunpack.i.l.bf16 %v4691_v31 }
 0x5ea   :  { %3587 = vst [vmem:[%s6927_s6 + $0x78] sm:$0xff] %v3570_v37  ;;  %v3552_v32 = vsel %vm3520_vm12, %v3330_v24, %v4693_v15  ;;  %v3551_v33 = vsel %vm3520_vm12, %v3329_v46, %v4692_v52 }
 0x5eb   :  { %3588 = vst [vmem:[%s6927_s6 + $0x80] sm:$0x11] %v3571_v29  ;;  %v3568_v21 = vpack.c.bf16 %v3551_v33, %v3534_v55  ;;  %v3569_v49 = vpack.c.bf16 %v3552_v32, %v3535_v1 }
 0x5ed   :  { %3585 = vst [vmem:[%s6927_s6 + $0x68] sm:$0xff] %v3568_v21 }
 0x5ee   :  { %3586 = vst [vmem:[%s6927_s6 + $0x70] sm:$0xff] %v3569_v49 }
 0x5ef   :  { %3593 = vsyncpa [#allocation3], 1 }
 0x5f0   :  { %3594 = vsyncpa [#allocation5], 1 }
 0x5f1   :  { %3595 = vsyncpa [#allocation8], 1 }

</bundles_post_ra>
